<compile_context>
chip_gen: v7x
topology: tpu7x:2x2x1
jax: 0.10.0
libtpu: 0.0.40
codegen_flags: <defaults>
</compile_context>

<pallas_src>
import functools
import math

import jax
import jax.numpy as jnp
from jax.experimental import pallas as pl
from jax.experimental.pallas import tpu as pltpu


def _round_up(x, m):
    return (x + m - 1) // m * m


def _pick_tile(dim, cap, align):
    """Largest tile <= cap (multiple of align) dividing dim; full dim if small."""
    if dim <= cap:
        return dim
    t = (cap // align) * align
    while t >= align:
        if dim % t == 0:
            return t
        t -= align
    return dim


# --------------------------------------------------------------------------
# Masked LayerNorm helper (normalizes over the first e_real lanes only;
# padded lanes carry zeros and gamma/beta pads are zero so they stay zero).
# --------------------------------------------------------------------------
def _masked_layernorm(y, g, b, e_real, eps):
    col = jax.lax.broadcasted_iota(jnp.int32, y.shape, 1)
    mask = (col < e_real).astype(jnp.float32)
    mu = jnp.sum(y * mask, axis=-1, keepdims=True) * (1.0 / e_real)
    d = (y - mu) * mask
    var = jnp.sum(d * d, axis=-1, keepdims=True) * (1.0 / e_real)
    return d * jax.lax.rsqrt(var + eps) * g + b


# --------------------------------------------------------------------------
# Tiled linear:  out = act(x @ w + b)       (weights pre-padded bf16 at init)
# --------------------------------------------------------------------------
def _linear_kernel(x_ref, w_ref, b_ref, o_ref, acc_ref, *, k_steps, activation):
    @pl.when(pl.program_id(2) == 0)
    def _():
        acc_ref[...] = jnp.zeros_like(acc_ref)

    acc_ref[...] += jnp.dot(x_ref[...].astype(jnp.bfloat16), w_ref[...],
                            preferred_element_type=jnp.float32)

    @pl.when(pl.program_id(2) == k_steps - 1)
    def _():
        out = acc_ref[...] + b_ref[...]
        if activation == "relu":
            out = jnp.maximum(out, 0.0)
        o_ref[...] = out.astype(o_ref.dtype)


def linear(x, w, b, activation=None, tm_max=256, tn_max=512, tk_max=512):
    """x: (M, K) f32;  w: (K, N) bf16 pre-padded;  b: (1, N) f32 -> (M, N) f32."""
    M, K = x.shape
    N = w.shape[1]
    Mp = _round_up(M, 8)
    tm = _pick_tile(Mp, tm_max, 8)
    tn = _pick_tile(N, tn_max, 128)
    tk = _pick_tile(K, tk_max, 128)
    xp = jnp.pad(x, ((0, Mp - M), (0, 0)))
    k_steps = K // tk

    out = pl.pallas_call(
        functools.partial(_linear_kernel, k_steps=k_steps, activation=activation),
        out_shape=jax.ShapeDtypeStruct((Mp, N), jnp.float32),
        grid_spec=pltpu.PrefetchScalarGridSpec(
            num_scalar_prefetch=0,
            grid=(Mp // tm, N // tn, k_steps),
            in_specs=[
                pl.BlockSpec((tm, tk), lambda i, j, k: (i, k)),
                pl.BlockSpec((tk, tn), lambda i, j, k: (k, j)),
                pl.BlockSpec((1, tn), lambda i, j, k: (0, j)),
            ],
            out_specs=pl.BlockSpec((tm, tn), lambda i, j, k: (i, j)),
            scratch_shapes=[pltpu.VMEM((tm, tn), jnp.float32)],
        ),
        compiler_params=pltpu.CompilerParams(
            dimension_semantics=("parallel", "parallel", "arbitrary")),
    )(xp, w, b)
    return out[:M]


# --------------------------------------------------------------------------
# Linear with fused residual-add + LayerNorm in the finalize epilogue.
# --------------------------------------------------------------------------
def _linear_add_ln_kernel(x_ref, w_ref, b_ref, res_ref, g_ref, beta_ref,
                          o_ref, acc_ref, *, k_steps, e_real, eps):
    @pl.when(pl.program_id(1) == 0)
    def _():
        acc_ref[...] = jnp.zeros_like(acc_ref)

    acc_ref[...] += jnp.dot(x_ref[...].astype(jnp.bfloat16), w_ref[...],
                            preferred_element_type=jnp.float32)

    @pl.when(pl.program_id(1) == k_steps - 1)
    def _():
        y = acc_ref[...] + b_ref[...] + res_ref[...]
        o_ref[...] = _masked_layernorm(y, g_ref[...], beta_ref[...], e_real,
                                       eps).astype(o_ref.dtype)


def linear_add_ln(x, w, b, residual, gamma, beta, *, e_real, eps=1e-5,
                  tm_max=256, tk_max=512):
    M, K = x.shape
    N = w.shape[1]
    Mp = _round_up(M, 8)
    tm = _pick_tile(Mp, tm_max, 8)
    tk = _pick_tile(K, tk_max, 128)
    xp = jnp.pad(x, ((0, Mp - M), (0, 0)))
    rp = jnp.pad(residual, ((0, Mp - M), (0, 0)))
    k_steps = K // tk

    out = pl.pallas_call(
        functools.partial(_linear_add_ln_kernel, k_steps=k_steps,
                          e_real=e_real, eps=eps),
        out_shape=jax.ShapeDtypeStruct((Mp, N), jnp.float32),
        grid_spec=pltpu.PrefetchScalarGridSpec(
            num_scalar_prefetch=0,
            grid=(Mp // tm, k_steps),
            in_specs=[
                pl.BlockSpec((tm, tk), lambda i, k: (i, k)),
                pl.BlockSpec((tk, N), lambda i, k: (k, 0)),
                pl.BlockSpec((1, N), lambda i, k: (0, 0)),
                pl.BlockSpec((tm, N), lambda i, k: (i, 0)),
                pl.BlockSpec((1, N), lambda i, k: (0, 0)),
                pl.BlockSpec((1, N), lambda i, k: (0, 0)),
            ],
            out_specs=pl.BlockSpec((tm, N), lambda i, k: (i, 0)),
            scratch_shapes=[pltpu.VMEM((tm, N), jnp.float32)],
        ),
        compiler_params=pltpu.CompilerParams(
            dimension_semantics=("parallel", "arbitrary")),
    )(xp, w, b, rp, gamma, beta)
    return out[:M]


# --------------------------------------------------------------------------
# FFN tiled over the hidden dim (grid axis + f32 accumulator) with fused
# residual-add + LayerNorm epilogue:
#   out = LN( relu(x@w1+b1)@w2 + b2 + residual )
# --------------------------------------------------------------------------
def _ffn_add_ln_kernel(x_ref, w1_ref, b1_ref, w2_ref, b2_ref, res_ref,
                       g_ref, beta_ref, o_ref, acc_ref, *, h_steps, e_real, eps):
    @pl.when(pl.program_id(1) == 0)
    def _():
        acc_ref[...] = jnp.zeros_like(acc_ref)

    h = jnp.dot(x_ref[...].astype(jnp.bfloat16), w1_ref[...],
                preferred_element_type=jnp.float32) + b1_ref[...]
    h = jnp.maximum(h, 0.0)
    acc_ref[...] += jnp.dot(h.astype(jnp.bfloat16), w2_ref[...],
                            preferred_element_type=jnp.float32)

    @pl.when(pl.program_id(1) == h_steps - 1)
    def _():
        y = acc_ref[...] + b2_ref[...] + res_ref[...]
        o_ref[...] = _masked_layernorm(y, g_ref[...], beta_ref[...], e_real,
                                       eps).astype(o_ref.dtype)


def ffn_add_ln(x, w1, b1, w2, b2, residual, gamma, beta, *, e_real, eps=1e-5,
               tm_max=256, th_max=512):
    M, E = x.shape
    Hf = w1.shape[1]
    N = w2.shape[1]
    Mp = _round_up(M, 8)
    tm = _pick_tile(Mp, tm_max, 8)
    th = _pick_tile(Hf, th_max, 128)
    xp = jnp.pad(x, ((0, Mp - M), (0, 0)))
    rp = jnp.pad(residual, ((0, Mp - M), (0, 0)))
    h_steps = Hf // th

    out = pl.pallas_call(
        functools.partial(_ffn_add_ln_kernel, h_steps=h_steps,
                          e_real=e_real, eps=eps),
        out_shape=jax.ShapeDtypeStruct((Mp, N), jnp.float32),
        grid_spec=pltpu.PrefetchScalarGridSpec(
            num_scalar_prefetch=0,
            grid=(Mp // tm, h_steps),
            in_specs=[
                pl.BlockSpec((tm, E), lambda i, j: (i, 0)),
                pl.BlockSpec((E, th), lambda i, j: (0, j)),
                pl.BlockSpec((1, th), lambda i, j: (0, j)),
                pl.BlockSpec((th, N), lambda i, j: (j, 0)),
                pl.BlockSpec((1, N), lambda i, j: (0, 0)),
                pl.BlockSpec((tm, N), lambda i, j: (i, 0)),
                pl.BlockSpec((1, N), lambda i, j: (0, 0)),
                pl.BlockSpec((1, N), lambda i, j: (0, 0)),
            ],
            out_specs=pl.BlockSpec((tm, N), lambda i, j: (i, 0)),
            scratch_shapes=[pltpu.VMEM((tm, N), jnp.float32)],
        ),
        compiler_params=pltpu.CompilerParams(
            dimension_semantics=("parallel", "arbitrary")),
    )(xp, w1, b1, w2, b2, rp, gamma, beta)
    return out[:M]


# --------------------------------------------------------------------------
# Attention, grid=(B,).  All heads of one batch element are computed from
# lane slices of the fused QKV / KV projection block — no head_dim padding,
# no HBM slices of the fused projections, no head transposes in glue.
# --------------------------------------------------------------------------
def _softmax_rows(s):
    m = jnp.max(s, axis=-1, keepdims=True)
    p = jnp.exp(s - m)
    return p * pl.reciprocal(jnp.sum(p, axis=-1, keepdims=True), approx=True)


def _self_attn_kernel(qkv_ref, o_ref, *, heads, dh, e, ep, scale):
    blk = qkv_ref[0].astype(jnp.bfloat16)               # (T, >=3E)
    T = blk.shape[0]
    row = jax.lax.broadcasted_iota(jnp.int32, (T, T), 0)
    col = jax.lax.broadcasted_iota(jnp.int32, (T, T), 1)
    causal = col <= row
    outs = []
    for h in range(heads):
        q = blk[:, h * dh:(h + 1) * dh]
        k = blk[:, e + h * dh:e + (h + 1) * dh]
        v = blk[:, 2 * e + h * dh:2 * e + (h + 1) * dh]
        s = jax.lax.dot_general(q, k, (((1,), (1,)), ((), ())),
                                preferred_element_type=jnp.float32) * scale
        s = jnp.where(causal, s, -1e30)
        p = _softmax_rows(s)
        outs.append(jnp.dot(p.astype(jnp.bfloat16), v,
                            preferred_element_type=jnp.float32))
    if ep > e:
        outs.append(jnp.zeros((T, ep - e), jnp.float32))
    o_ref[0] = jnp.concatenate(outs, axis=-1).astype(o_ref.dtype)


def self_attention(qkv, *, heads, dh, e, ep):
    """qkv: (B, T, 3E padded) -> (B, T, Ep), causal."""
    B, T, W3 = qkv.shape
    kernel = functools.partial(_self_attn_kernel, heads=heads, dh=dh, e=e,
                               ep=ep, scale=1.0 / math.sqrt(dh))
    return pl.pallas_call(
        kernel,
        out_shape=jax.ShapeDtypeStruct((B, T, ep), jnp.float32),
        grid_spec=pltpu.PrefetchScalarGridSpec(
            num_scalar_prefetch=0,
            grid=(B,),
            in_specs=[pl.BlockSpec((1, T, W3), lambda b: (b, 0, 0))],
            out_specs=pl.BlockSpec((1, T, ep), lambda b: (b, 0, 0)),
        ),
        compiler_params=pltpu.CompilerParams(
            dimension_semantics=("parallel",)),
    )(qkv)


def _cross_attn_kernel(q_ref, kv_ref, o_ref, *, heads, dh, e, ep, scale):
    qb = q_ref[0].astype(jnp.bfloat16)                  # (T, >=E)
    kvb = kv_ref[0].astype(jnp.bfloat16)                # (S, >=2E)
    T = qb.shape[0]
    outs = []
    for h in range(heads):
        q = qb[:, h * dh:(h + 1) * dh]
        k = kvb[:, h * dh:(h + 1) * dh]
        v = kvb[:, e + h * dh:e + (h + 1) * dh]
        s = jax.lax.dot_general(q, k, (((1,), (1,)), ((), ())),
                                preferred_element_type=jnp.float32) * scale
        p = _softmax_rows(s)
        outs.append(jnp.dot(p.astype(jnp.bfloat16), v,
                            preferred_element_type=jnp.float32))
    if ep > e:
        outs.append(jnp.zeros((T, ep - e), jnp.float32))
    o_ref[0] = jnp.concatenate(outs, axis=-1).astype(o_ref.dtype)


def cross_attention(q, kv, *, heads, dh, e, ep):
    """q: (B, T, Ep), kv: (B, S, 2E padded) -> (B, T, Ep)."""
    B, T, Wq = q.shape
    S, Wkv = kv.shape[1], kv.shape[2]
    kernel = functools.partial(_cross_attn_kernel, heads=heads, dh=dh, e=e,
                               ep=ep, scale=1.0 / math.sqrt(dh))
    return pl.pallas_call(
        kernel,
        out_shape=jax.ShapeDtypeStruct((B, T, ep), jnp.float32),
        grid_spec=pltpu.PrefetchScalarGridSpec(
            num_scalar_prefetch=0,
            grid=(B,),
            in_specs=[pl.BlockSpec((1, T, Wq), lambda b: (b, 0, 0)),
                      pl.BlockSpec((1, S, Wkv), lambda b: (b, 0, 0))],
            out_specs=pl.BlockSpec((1, T, ep), lambda b: (b, 0, 0)),
        ),
        compiler_params=pltpu.CompilerParams(
            dimension_semantics=("parallel",)),
    )(q, kv)


# --------------------------------------------------------------------------
# 3x3 'same' conv + ReLU: im2col patch built in VMEM, ONE matmul (K = 9*Cin)
# per band of 8 output rows (matmul M = 8*W).
# --------------------------------------------------------------------------
def _conv3x3_kernel(x_ref, w_ref, b_ref, o_ref, *, rows, W, Cin, Cout):
    band = pl.program_id(1)
    blk = x_ref[0, pl.ds(band * rows, rows + 2)]        # (rows+2, W+2, Cin)
    taps = []
    for dh in range(3):
        for dw in range(3):
            t = blk[dh:dh + rows, dw:dw + W, :]         # (rows, W, Cin)
            taps.append(t.reshape(rows * W, Cin))
    patch = jnp.concatenate(taps, axis=-1).astype(jnp.bfloat16)  # (rows*W, 9*Cin)
    acc = jnp.dot(patch, w_ref[...], preferred_element_type=jnp.float32)
    acc = jnp.maximum(acc + b_ref[...], 0.0)
    # TODO(synk): a (rows, W*Cout) lane-dense store would avoid the masked
    # sub-128-lane store here but requires a lane-merging in-kernel reshape.
    o_ref[0] = acc.reshape(rows, W, Cout).astype(o_ref.dtype)


def conv3x3_relu(x, w, b):
    """x: (B, H, W, Cin) NHWC f32;  w: (9*Cin, Cout) bf16;  b: (1, Cout) f32."""
    B, H, W, Cin = x.shape
    Cout = w.shape[1]
    rows = 8 if H % 8 == 0 else H
    xp = jnp.pad(x, ((0, 0), (1, 1), (1, 1), (0, 0)))
    kernel = functools.partial(_conv3x3_kernel, rows=rows, W=W, Cin=Cin, Cout=Cout)
    return pl.pallas_call(
        kernel,
        out_shape=jax.ShapeDtypeStruct((B, H, W, Cout), jnp.float32),
        grid_spec=pltpu.PrefetchScalarGridSpec(
            num_scalar_prefetch=0,
            grid=(B, H // rows),
            in_specs=[
                # TODO(synk): for large images tile H into halo'd row bands via
                # manual DMA instead of keeping the padded image resident (v7x VMEM).
                pl.BlockSpec((1, H + 2, W + 2, Cin), lambda bb, r: (bb, 0, 0, 0)),
                pl.BlockSpec((9 * Cin, Cout), lambda bb, r: (0, 0)),
                pl.BlockSpec((1, Cout), lambda bb, r: (0, 0)),
            ],
            out_specs=pl.BlockSpec((1, rows, W, Cout),
                                   lambda bb, r: (bb, r, 0, 0)),
        ),
        compiler_params=pltpu.CompilerParams(
            dimension_semantics=("parallel", "arbitrary")),
    )(xp, w, b)


def maxpool2x2(x):
    # TODO(synk): cheap reduction kept in XLA glue.
    B, H, W, C = x.shape
    return jnp.max(x.reshape(B, H // 2, 2, W // 2, 2, C), axis=(2, 4))


def encoder_vgg16(p, images_nhwc):
    # TODO(synk): pretrained torchvision VGG16 weights are not loadable here; a
    # deterministic randomly-initialized 2-block VGG-style stack stands in.
    x = conv3x3_relu(images_nhwc, p["c1a_w"], p["c1a_b"])
    x = conv3x3_relu(x, p["c1b_w"], p["c1b_b"])
    x = maxpool2x2(x)
    x = conv3x3_relu(x, p["c2a_w"], p["c2a_b"])
    x = conv3x3_relu(x, p["c2b_w"], p["c2b_b"])
    x = maxpool2x2(x)
    B, Hs, Ws, C = x.shape
    return x.reshape(B, Hs * Ws, C)       # (B, num_pixels, image_features_dim)


# --------------------------------------------------------------------------
# Transformer decoder (operates on the padded embedding width Ep throughout)
# --------------------------------------------------------------------------
def sinusoidal_pos(T, E):
    pos = jnp.arange(T, dtype=jnp.float32)[:, None]
    i = jnp.arange(E // 2, dtype=jnp.float32)[None, :]
    angle = pos / jnp.power(10000.0, 2.0 * i / E)
    return jnp.concatenate([jnp.sin(angle), jnp.cos(angle)], axis=-1)


def transformer_decoder(p, feats, captions, *, heads, num_layers, vocab_size,
                        embed):
    B, S, F = feats.shape
    _, T = captions.shape
    E = embed
    Ep = p["embed_w"].shape[1]
    dh = E // heads

    # token embedding: gather (matches nn.Embedding, no bias / one-hot matmul)
    tok = jnp.take(p["embed_w"], captions.reshape(-1), axis=0)       # (B*T, Ep)
    pos = jnp.pad(sinusoidal_pos(T, E), ((0, 0), (0, Ep - E)))
    x = (tok.reshape(B, T, Ep) + pos[None]).reshape(B * T, Ep)

    # project image features into the embedding space
    mem2d = linear(feats.reshape(B * S, F), p["mem_w"], p["mem_b"])  # (B*S, Ep)

    for l in range(num_layers):
        pre = f"l{l}"
        # masked self-attention: fused QKV projection, attention reads it directly
        qkv = linear(x, p[pre + "_sa_wqkv"], p[pre + "_sa_bqkv"])
        a = self_attention(qkv.reshape(B, T, -1), heads=heads, dh=dh, e=E, ep=Ep)
        x = linear_add_ln(a.reshape(B * T, Ep), p[pre + "_sa_wo"],
                          p[pre + "_sa_bo"], x,
                          p[pre + "_ln1_g"], p[pre + "_ln1_b"], e_real=E)

        # cross-attention over image features: fused KV projection
        q = linear(x, p[pre + "_ca_wq"], p[pre + "_ca_bq"])
        kv = linear(mem2d, p[pre + "_ca_wkv"], p[pre + "_ca_bkv"])
        c = cross_attention(q.reshape(B, T, Ep), kv.reshape(B, S, -1),
                            heads=heads, dh=dh, e=E, ep=Ep)
        x = linear_add_ln(c.reshape(B * T, Ep), p[pre + "_ca_wo"],
                          p[pre + "_ca_bo"], x,
                          p[pre + "_ln2_g"], p[pre + "_ln2_b"], e_real=E)

        # feed-forward, hidden-dim tiled, with fused residual + LN
        x = ffn_add_ln(x, p[pre + "_ff1_w"], p[pre + "_ff1_b"],
                       p[pre + "_ff2_w"], p[pre + "_ff2_b"],
                       x, p[pre + "_ln3_g"], p[pre + "_ln3_b"], e_real=E)

    logits = linear(x, p["out_w"], p["out_b"])        # (B*T, vocab padded)
    return logits[:, :vocab_size].reshape(B, T, vocab_size)


# --------------------------------------------------------------------------
# Full model forward  (== ImageCaptioningModel.forward)
# --------------------------------------------------------------------------
def image_captioning_forward(params, images_nchw, captions, *, heads,
                             num_layers, vocab_size, embed):
    images_nhwc = jnp.transpose(images_nchw, (0, 2, 3, 1))      # NCHW -> NHWC
    feats = encoder_vgg16(params, images_nhwc)
    return transformer_decoder(params, feats, captions, heads=heads,
                               num_layers=num_layers, vocab_size=vocab_size,
                               embed=embed)


# --------------------------------------------------------------------------
# Deterministic init: every matmul weight is pre-padded to its lane-dense
# tiled layout and pre-cast to bf16 ONCE here (no per-forward pad/cast).
# Pads are exact zeros, so padded lanes stay zero through the whole network.
# --------------------------------------------------------------------------
def init_params(key, *, in_ch, feat_dim, embed, vocab_size, num_layers, heads,
                ffn_mult=4):
    E = embed
    Ep = _round_up(E, 128)
    Np3 = _round_up(3 * E, 128)
    Np2 = _round_up(2 * E, 128)
    Hf = ffn_mult * E
    Hfp = _round_up(Hf, 128)
    Vp = _round_up(vocab_size, 128)

    keys = iter(jax.random.split(key, 512))

    def wmat(k_real, n_real, k_pad, n_pad, scale=0.02):
        w = scale * jax.random.normal(next(keys), (k_real, n_real), jnp.float32)
        return jnp.pad(w, ((0, k_pad - k_real), (0, n_pad - n_real))
                       ).astype(jnp.bfloat16)

    def bvec(n_pad):
        return jnp.zeros((1, n_pad), jnp.float32)

    def gvec(n_real, n_pad):
        return jnp.pad(jnp.ones((1, n_real), jnp.float32),
                       ((0, 0), (0, n_pad - n_real)))

    p = {}
    # encoder (VGG-style, 2 blocks); conv weights stored as (9*Cin, Cout) bf16
    c1 = feat_dim // 2
    p["c1a_w"], p["c1a_b"] = wmat(9 * in_ch, c1, 9 * in_ch, c1), bvec(c1)
    p["c1b_w"], p["c1b_b"] = wmat(9 * c1, c1, 9 * c1, c1), bvec(c1)
    p["c2a_w"], p["c2a_b"] = wmat(9 * c1, feat_dim, 9 * c1, feat_dim), bvec(feat_dim)
    p["c2b_w"], p["c2b_b"] = (wmat(9 * feat_dim, feat_dim, 9 * feat_dim, feat_dim),
                              bvec(feat_dim))

    # decoder
    emb = 0.02 * jax.random.normal(next(keys), (vocab_size, E), jnp.float32)
    p["embed_w"] = jnp.pad(emb, ((0, 0), (0, Ep - E)))          # f32 gather table
    p["mem_w"], p["mem_b"] = wmat(feat_dim, E, feat_dim, Ep), bvec(Ep)
    for l in range(num_layers):
        pre = f"l{l}"
        p[pre + "_sa_wqkv"], p[pre + "_sa_bqkv"] = wmat(E, 3 * E, Ep, Np3), bvec(Np3)
        p[pre + "_sa_wo"], p[pre + "_sa_bo"] = wmat(E, E, Ep, Ep), bvec(Ep)
        p[pre + "_ca_wq"], p[pre + "_ca_bq"] = wmat(E, E, Ep, Ep), bvec(Ep)
        p[pre + "_ca_wkv"], p[pre + "_ca_bkv"] = wmat(E, 2 * E, Ep, Np2), bvec(Np2)
        p[pre + "_ca_wo"], p[pre + "_ca_bo"] = wmat(E, E, Ep, Ep), bvec(Ep)
        p[pre + "_ff1_w"], p[pre + "_ff1_b"] = wmat(E, Hf, Ep, Hfp), bvec(Hfp)
        p[pre + "_ff2_w"], p[pre + "_ff2_b"] = wmat(Hf, E, Hfp, Ep), bvec(Ep)
        for ln in ("_ln1", "_ln2", "_ln3"):
            p[pre + ln + "_g"] = gvec(E, Ep)
            p[pre + ln + "_b"] = jnp.zeros((1, Ep), jnp.float32)
    p["out_w"], p["out_b"] = wmat(E, vocab_size, Ep, Vp), bvec(Vp)
    return p


# --------------------------------------------------------------------------
if __name__ == "__main__":
    B, C, H, W = 2, 3, 16, 16        # images (batch, channels, W, H)
    T = 8                            # caption length
    VOCAB = 50
    EMBED = 32
    FEAT_DIM = 32                    # image_features_dim
    HEADS = 4
    LAYERS = 2                       # decoder_num_layers (kept small)

    key = jax.random.PRNGKey(0)
    kp, kimg, kcap = jax.random.split(key, 3)

    params = init_params(kp, in_ch=C, feat_dim=FEAT_DIM, embed=EMBED,
                         vocab_size=VOCAB, num_layers=LAYERS, heads=HEADS)
    images = jax.random.normal(kimg, (B, C, H, W), jnp.float32)
    captions = jax.random.randint(kcap, (B, T), 0, VOCAB)

    fwd = jax.jit(functools.partial(image_captioning_forward,
                                    heads=HEADS, num_layers=LAYERS,
                                    vocab_size=VOCAB, embed=EMBED))
    logits = fwd(params, images, captions)
    jax.block_until_ready(logits)
    assert logits.shape == (B, T, VOCAB), logits.shape
    assert bool(jnp.all(jnp.isfinite(logits)))
    print("KERNEL_OK")
</pallas_src>

<mosaic_0001>
module attributes {stable_mosaic.version = 11 : i64} {
  func.func @_linear_kernel(%arg0: i32, %arg1: i32, %arg2: i32, %arg3: memref<16x128xf32, #tpu.memory_space<vmem>>, %arg4: memref<128x128xbf16, #tpu.memory_space<vmem>>, %arg5: memref<1x128xf32, #tpu.memory_space<vmem>>, %arg6: memref<16x128xf32, #tpu.memory_space<vmem>>, %arg7: memref<16x128xf32, #tpu.memory_space<vmem>>) attributes {dimension_semantics = [#tpu.dimension_semantics<parallel>, #tpu.dimension_semantics<parallel>, #tpu.dimension_semantics<arbitrary>], iteration_bounds = array<i64: 1, 1, 1>, scalar_prefetch = 0 : i64, scratch_operands = 1 : i64, tpu.core_type = #tpu.core_type<tc>, window_params = [{transform_indices = @transform_0, window_bounds = array<i64: 16, 128>}, {transform_indices = @transform_1, window_bounds = array<i64: 128, 128>}, {transform_indices = @transform_2, window_bounds = array<i64: 1, 128>}, {transform_indices = @transform_3, window_bounds = array<i64: 16, 128>}]} {
    %c0_i32 = arith.constant 0 : i32
    %0 = arith.cmpi eq, %arg2, %c0_i32 : i32
    %1 = arith.extui %0 : i1 to i32
    %c0_i32_0 = arith.constant 0 : i32
    %2 = arith.cmpi ne, %1, %c0_i32_0 : i32
    scf.if %2 {
      %cst_10 = arith.constant 0.000000e+00 : f32
      %13 = vector.broadcast %cst_10 : f32 to vector<16x128xf32>
      %c0_11 = arith.constant 0 : index
      %c0_12 = arith.constant 0 : index
      %14 = vector.load %arg7[%c0_11, %c0_12] : memref<16x128xf32, #tpu.memory_space<vmem>>, vector<16x128xf32>
      tpu.vector_store %arg7[%c0_11, %c0_12], %13 {strides = array<i32>} : memref<16x128xf32, #tpu.memory_space<vmem>>, vector<16x128xf32>,
    } else {
    }
    %c0 = arith.constant 0 : index
    %c0_1 = arith.constant 0 : index
    %3 = vector.load %arg7[%c0, %c0_1] : memref<16x128xf32, #tpu.memory_space<vmem>>, vector<16x128xf32>
    %c0_2 = arith.constant 0 : index
    %c0_3 = arith.constant 0 : index
    %4 = vector.load %arg3[%c0_2, %c0_3] : memref<16x128xf32, #tpu.memory_space<vmem>>, vector<16x128xf32>
    %5 = arith.truncf %4 : vector<16x128xf32> to vector<16x128xbf16>
    %c0_4 = arith.constant 0 : index
    %c0_5 = arith.constant 0 : index
    %6 = vector.load %arg4[%c0_4, %c0_5] : memref<128x128xbf16, #tpu.memory_space<vmem>>, vector<128x128xbf16>
    %cst = arith.constant dense<0.000000e+00> : vector<16x128xf32>
    %7 = tpu.matmul %5, %6, %cst {dimension_numbers = #tpu.dot_dimension_numbers<[1], [0], [0], [1], [0, 0, 1, 1], [], []>} : vector<16x128xbf16>, vector<128x128xbf16>, vector<16x128xf32> -> vector<16x128xf32>
    %8 = arith.addf %3, %7 : vector<16x128xf32>
    %c0_6 = arith.constant 0 : index
    %c0_7 = arith.constant 0 : index
    %9 = vector.load %arg7[%c0_6, %c0_7] : memref<16x128xf32, #tpu.memory_space<vmem>>, vector<16x128xf32>
    tpu.vector_store %arg7[%c0_6, %c0_7], %8 {strides = array<i32>} : memref<16x128xf32, #tpu.memory_space<vmem>>, vector<16x128xf32>,
    %c0_i32_8 = arith.constant 0 : i32
    %10 = arith.cmpi eq, %arg2, %c0_i32_8 : i32
    %11 = arith.extui %10 : i1 to i32
    %c0_i32_9 = arith.constant 0 : i32
    %12 = arith.cmpi ne, %11, %c0_i32_9 : i32
    scf.if %12 {
      %c0_10 = arith.constant 0 : index
      %c0_11 = arith.constant 0 : index
      %13 = vector.load %arg7[%c0_10, %c0_11] : memref<16x128xf32, #tpu.memory_space<vmem>>, vector<16x128xf32>
      %c0_12 = arith.constant 0 : index
      %c0_13 = arith.constant 0 : index
      %14 = vector.load %arg5[%c0_12, %c0_13] : memref<1x128xf32, #tpu.memory_space<vmem>>, vector<1x128xf32>
      %15 = vector.broadcast %14 : vector<1x128xf32> to vector<16x128xf32>
      %16 = arith.addf %13, %15 : vector<16x128xf32>
      %c0_14 = arith.constant 0 : index
      %c0_15 = arith.constant 0 : index
      %17 = vector.load %arg6[%c0_14, %c0_15] : memref<16x128xf32, #tpu.memory_space<vmem>>, vector<16x128xf32>
      tpu.vector_store %arg6[%c0_14, %c0_15], %16 {strides = array<i32>} : memref<16x128xf32, #tpu.memory_space<vmem>>, vector<16x128xf32>,
    } else {
    }
    return
  }
  func.func @transform_0(%arg0: i32, %arg1: i32, %arg2: i32) -> (i32, i32) {
    %c0_i32 = arith.constant 0 : i32
    return %arg0, %arg2 : i32, i32
  }
  func.func @transform_1(%arg0: i32, %arg1: i32, %arg2: i32) -> (i32, i32) {
    %c0_i32 = arith.constant 0 : i32
    return %arg2, %arg1 : i32, i32
  }
  func.func @transform_2(%arg0: i32, %arg1: i32, %arg2: i32) -> (i32, i32) {
    %c0_i32 = arith.constant 0 : i32
    %c0_i32_0 = arith.constant 0 : i32
    return %c0_i32, %arg1 : i32, i32
  }
  func.func @transform_3(%arg0: i32, %arg1: i32, %arg2: i32) -> (i32, i32) {
    %c0_i32 = arith.constant 0 : i32
    return %arg0, %arg1 : i32, i32
  }
}

module attributes {stable_mosaic.version = 11 : i64} {
  func.func @_self_attn_kernel(%arg0: i32, %arg1: memref<1x8x128xf32, #tpu.memory_space<vmem>>, %arg2: memref<1x8x128xf32, #tpu.memory_space<vmem>>) attributes {dimension_semantics = [#tpu.dimension_semantics<parallel>], iteration_bounds = array<i64: 2>, scalar_prefetch = 0 : i64, scratch_operands = 0 : i64, tpu.core_type = #tpu.core_type<tc>, window_params = [{transform_indices = @transform_0, window_bounds = array<i64: 1, 8, 128>}, {transform_indices = @transform_1, window_bounds = array<i64: 1, 8, 128>}]} {
    %c0 = arith.constant 0 : index
    %c0_0 = arith.constant 0 : index
    %c0_1 = arith.constant 0 : index
    %0 = vector.load %arg1[%c0, %c0_0, %c0_1] : memref<1x8x128xf32, #tpu.memory_space<vmem>>, vector<1x8x128xf32>
    %1 = vector.shape_cast %0 : vector<1x8x128xf32> to vector<8x128xf32>
    %2 = arith.truncf %1 : vector<8x128xf32> to vector<8x128xbf16>
    %3 = tpu.iota {dimensions = array<i32: 0>} : vector<8x8xi32>
    %4 = tpu.iota {dimensions = array<i32: 1>} : vector<8x8xi32>
    %5 = arith.cmpi sle, %4, %3 : vector<8x8xi32>
    %6 = vector.extract_strided_slice %2 {offsets = [0, 0], sizes = [8, 8], strides = [1, 1]} : vector<8x128xbf16> to vector<8x8xbf16>
    %7 = vector.extract_strided_slice %2 {offsets = [0, 32], sizes = [8, 8], strides = [1, 1]} : vector<8x128xbf16> to vector<8x8xbf16>
    %8 = vector.extract_strided_slice %2 {offsets = [0, 64], sizes = [8, 8], strides = [1, 1]} : vector<8x128xbf16> to vector<8x8xbf16>
    %cst = arith.constant dense<0.000000e+00> : vector<8x8xf32>
    %9 = tpu.matmul %6, %7, %cst {dimension_numbers = #tpu.dot_dimension_numbers<[1], [1], [0], [0], [0, 0, 1, 0], [], []>} : vector<8x8xbf16>, vector<8x8xbf16>, vector<8x8xf32> -> vector<8x8xf32>
    %cst_2 = arith.constant 0.353553385 : f32
    %10 = vector.broadcast %cst_2 : f32 to vector<8x8xf32>
    %11 = arith.mulf %9, %10 : vector<8x8xf32>
    %cst_3 = arith.constant -1.000000e+30 : f32
    %12 = vector.broadcast %cst_3 : f32 to vector<8x8xf32>
    %13 = arith.select %5, %11, %12 : vector<8x8xi1>, vector<8x8xf32>
    %cst_4 = arith.constant dense<0xFF800000> : vector<8xf32>
    %14 = vector.multi_reduction <maximumf>, %13, %cst_4 [1] : vector<8x8xf32> to vector<8xf32>
    %15 = vector.shape_cast %14 : vector<8xf32> to vector<8x1xf32>
    %16 = vector.broadcast %15 : vector<8x1xf32> to vector<8x8xf32>
    %17 = arith.subf %13, %16 : vector<8x8xf32>
    %18 = math.exp %17 : vector<8x8xf32>
    %cst_5 = arith.constant dense<0.000000e+00> : vector<8xf32>
    %19 = vector.multi_reduction <add>, %18, %cst_5 [1] : vector<8x8xf32> to vector<8xf32>
    %20 = vector.shape_cast %19 : vector<8xf32> to vector<8x1xf32>
    %21 = tpu.reciprocal %20 {approx = true} : vector<8x1xf32> -> vector<8x1xf32>
    %22 = vector.broadcast %21 : vector<8x1xf32> to vector<8x8xf32>
    %23 = arith.mulf %18, %22 : vector<8x8xf32>
    %24 = arith.truncf %23 : vector<8x8xf32> to vector<8x8xbf16>
    %cst_6 = arith.constant dense<0.000000e+00> : vector<8x8xf32>
    %25 = tpu.matmul %24, %8, %cst_6 {dimension_numbers = #tpu.dot_dimension_numbers<[1], [0], [0], [1], [0, 0, 1, 1], [], []>} : vector<8x8xbf16>, vector<8x8xbf16>, vector<8x8xf32> -> vector<8x8xf32>
    %26 = vector.extract_strided_slice %2 {offsets = [0, 8], sizes = [8, 8], strides = [1, 1]} : vector<8x128xbf16> to vector<8x8xbf16>
    %27 = vector.extract_strided_slice %2 {offsets = [0, 40], sizes = [8, 8], strides = [1, 1]} : vector<8x128xbf16> to vector<8x8xbf16>
    %28 = vector.extract_strided_slice %2 {offsets = [0, 72], sizes = [8, 8], strides = [1, 1]} : vector<8x128xbf16> to vector<8x8xbf16>
    %cst_7 = arith.constant dense<0.000000e+00> : vector<8x8xf32>
    %29 = tpu.matmul %26, %27, %cst_7 {dimension_numbers = #tpu.dot_dimension_numbers<[1], [1], [0], [0], [0, 0, 1, 0], [], []>} : vector<8x8xbf16>, vector<8x8xbf16>, vector<8x8xf32> -> vector<8x8xf32>
    %cst_8 = arith.constant 0.353553385 : f32
    %30 = vector.broadcast %cst_8 : f32 to vector<8x8xf32>
    %31 = arith.mulf %29, %30 : vector<8x8xf32>
    %cst_9 = arith.constant -1.000000e+30 : f32
    %32 = vector.broadcast %cst_9 : f32 to vector<8x8xf32>
    %33 = arith.select %5, %31, %32 : vector<8x8xi1>, vector<8x8xf32>
    %cst_10 = arith.constant dense<0xFF800000> : vector<8xf32>
    %34 = vector.multi_reduction <maximumf>, %33, %cst_10 [1] : vector<8x8xf32> to vector<8xf32>
    %35 = vector.shape_cast %34 : vector<8xf32> to vector<8x1xf32>
    %36 = vector.broadcast %35 : vector<8x1xf32> to vector<8x8xf32>
    %37 = arith.subf %33, %36 : vector<8x8xf32>
    %38 = math.exp %37 : vector<8x8xf32>
    %cst_11 = arith.constant dense<0.000000e+00> : vector<8xf32>
    %39 = vector.multi_reduction <add>, %38, %cst_11 [1] : vector<8x8xf32> to vector<8xf32>
    %40 = vector.shape_cast %39 : vector<8xf32> to vector<8x1xf32>
    %41 = tpu.reciprocal %40 {approx = true} : vector<8x1xf32> -> vector<8x1xf32>
    %42 = vector.broadcast %41 : vector<8x1xf32> to vector<8x8xf32>
    %43 = arith.mulf %38, %42 : vector<8x8xf32>
    %44 = arith.truncf %43 : vector<8x8xf32> to vector<8x8xbf16>
    %cst_12 = arith.constant dense<0.000000e+00> : vector<8x8xf32>
    %45 = tpu.matmul %44, %28, %cst_12 {dimension_numbers = #tpu.dot_dimension_numbers<[1], [0], [0], [1], [0, 0, 1, 1], [], []>} : vector<8x8xbf16>, vector<8x8xbf16>, vector<8x8xf32> -> vector<8x8xf32>
    %46 = vector.extract_strided_slice %2 {offsets = [0, 16], sizes = [8, 8], strides = [1, 1]} : vector<8x128xbf16> to vector<8x8xbf16>
    %47 = vector.extract_strided_slice %2 {offsets = [0, 48], sizes = [8, 8], strides = [1, 1]} : vector<8x128xbf16> to vector<8x8xbf16>
    %48 = vector.extract_strided_slice %2 {offsets = [0, 80], sizes = [8, 8], strides = [1, 1]} : vector<8x128xbf16> to vector<8x8xbf16>
    %cst_13 = arith.constant dense<0.000000e+00> : vector<8x8xf32>
    %49 = tpu.matmul %46, %47, %cst_13 {dimension_numbers = #tpu.dot_dimension_numbers<[1], [1], [0], [0], [0, 0, 1, 0], [], []>} : vector<8x8xbf16>, vector<8x8xbf16>, vector<8x8xf32> -> vector<8x8xf32>
    %cst_14 = arith.constant 0.353553385 : f32
    %50 = vector.broadcast %cst_14 : f32 to vector<8x8xf32>
    %51 = arith.mulf %49, %50 : vector<8x8xf32>
    %cst_15 = arith.constant -1.000000e+30 : f32
    %52 = vector.broadcast %cst_15 : f32 to vector<8x8xf32>
    %53 = arith.select %5, %51, %52 : vector<8x8xi1>, vector<8x8xf32>
    %cst_16 = arith.constant dense<0xFF800000> : vector<8xf32>
    %54 = vector.multi_reduction <maximumf>, %53, %cst_16 [1] : vector<8x8xf32> to vector<8xf32>
    %55 = vector.shape_cast %54 : vector<8xf32> to vector<8x1xf32>
    %56 = vector.broadcast %55 : vector<8x1xf32> to vector<8x8xf32>
    %57 = arith.subf %53, %56 : vector<8x8xf32>
    %58 = math.exp %57 : vector<8x8xf32>
    %cst_17 = arith.constant dense<0.000000e+00> : vector<8xf32>
    %59 = vector.multi_reduction <add>, %58, %cst_17 [1] : vector<8x8xf32> to vector<8xf32>
    %60 = vector.shape_cast %59 : vector<8xf32> to vector<8x1xf32>
    %61 = tpu.reciprocal %60 {approx = true} : vector<8x1xf32> -> vector<8x1xf32>
    %62 = vector.broadcast %61 : vector<8x1xf32> to vector<8x8xf32>
    %63 = arith.mulf %58, %62 : vector<8x8xf32>
    %64 = arith.truncf %63 : vector<8x8xf32> to vector<8x8xbf16>
    %cst_18 = arith.constant dense<0.000000e+00> : vector<8x8xf32>
    %65 = tpu.matmul %64, %48, %cst_18 {dimension_numbers = #tpu.dot_dimension_numbers<[1], [0], [0], [1], [0, 0, 1, 1], [], []>} : vector<8x8xbf16>, vector<8x8xbf16>, vector<8x8xf32> -> vector<8x8xf32>
    %66 = vector.extract_strided_slice %2 {offsets = [0, 24], sizes = [8, 8], strides = [1, 1]} : vector<8x128xbf16> to vector<8x8xbf16>
    %67 = vector.extract_strided_slice %2 {offsets = [0, 56], sizes = [8, 8], strides = [1, 1]} : vector<8x128xbf16> to vector<8x8xbf16>
    %68 = vector.extract_strided_slice %2 {offsets = [0, 88], sizes = [8, 8], strides = [1, 1]} : vector<8x128xbf16> to vector<8x8xbf16>
    %cst_19 = arith.constant dense<0.000000e+00> : vector<8x8xf32>
    %69 = tpu.matmul %66, %67, %cst_19 {dimension_numbers = #tpu.dot_dimension_numbers<[1], [1], [0], [0], [0, 0, 1, 0], [], []>} : vector<8x8xbf16>, vector<8x8xbf16>, vector<8x8xf32> -> vector<8x8xf32>
    %cst_20 = arith.constant 0.353553385 : f32
    %70 = vector.broadcast %cst_20 : f32 to vector<8x8xf32>
    %71 = arith.mulf %69, %70 : vector<8x8xf32>
    %cst_21 = arith.constant -1.000000e+30 : f32
    %72 = vector.broadcast %cst_21 : f32 to vector<8x8xf32>
    %73 = arith.select %5, %71, %72 : vector<8x8xi1>, vector<8x8xf32>
    %cst_22 = arith.constant dense<0xFF800000> : vector<8xf32>
    %74 = vector.multi_reduction <maximumf>, %73, %cst_22 [1] : vector<8x8xf32> to vector<8xf32>
    %75 = vector.shape_cast %74 : vector<8xf32> to vector<8x1xf32>
    %76 = vector.broadcast %75 : vector<8x1xf32> to vector<8x8xf32>
    %77 = arith.subf %73, %76 : vector<8x8xf32>
    %78 = math.exp %77 : vector<8x8xf32>
    %cst_23 = arith.constant dense<0.000000e+00> : vector<8xf32>
    %79 = vector.multi_reduction <add>, %78, %cst_23 [1] : vector<8x8xf32> to vector<8xf32>
    %80 = vector.shape_cast %79 : vector<8xf32> to vector<8x1xf32>
    %81 = tpu.reciprocal %80 {approx = true} : vector<8x1xf32> -> vector<8x1xf32>
    %82 = vector.broadcast %81 : vector<8x1xf32> to vector<8x8xf32>
    %83 = arith.mulf %78, %82 : vector<8x8xf32>
    %84 = arith.truncf %83 : vector<8x8xf32> to vector<8x8xbf16>
    %cst_24 = arith.constant dense<0.000000e+00> : vector<8x8xf32>
    %85 = tpu.matmul %84, %68, %cst_24 {dimension_numbers = #tpu.dot_dimension_numbers<[1], [0], [0], [1], [0, 0, 1, 1], [], []>} : vector<8x8xbf16>, vector<8x8xbf16>, vector<8x8xf32> -> vector<8x8xf32>
    %cst_25 = arith.constant 0.000000e+00 : f32
    %86 = vector.broadcast %cst_25 : f32 to vector<8x96xf32>
    %87 = tpu.concatenate %25, %45, %65, %85, %86 in 1 : vector<8x8xf32>, vector<8x8xf32>, vector<8x8xf32>, vector<8x8xf32>, vector<8x96xf32> -> vector<8x128xf32>
    %c0_26 = arith.constant 0 : index
    %c0_27 = arith.constant 0 : index
    %c0_28 = arith.constant 0 : index
    %88 = vector.load %arg2[%c0_26, %c0_27, %c0_28] : memref<1x8x128xf32, #tpu.memory_space<vmem>>, vector<1x8x128xf32>
    %89 = vector.shape_cast %88 : vector<1x8x128xf32> to vector<8x128xf32>
    %90 = vector.shape_cast %87 : vector<8x128xf32> to vector<1x8x128xf32>
    tpu.vector_store %arg2[%c0_26, %c0_27, %c0_28], %90 {strides = array<i32>} : memref<1x8x128xf32, #tpu.memory_space<vmem>>, vector<1x8x128xf32>,
    return
  }
  func.func @transform_0(%arg0: i32) -> (i32, i32, i32) {
    %c0_i32 = arith.constant 0 : i32
    %c0_i32_0 = arith.constant 0 : i32
    %c0_i32_1 = arith.constant 0 : i32
    return %arg0, %c0_i32, %c0_i32_0 : i32, i32, i32
  }
  func.func @transform_1(%arg0: i32) -> (i32, i32, i32) {
    %c0_i32 = arith.constant 0 : i32
    %c0_i32_0 = arith.constant 0 : i32
    %c0_i32_1 = arith.constant 0 : i32
    return %arg0, %c0_i32, %c0_i32_0 : i32, i32, i32
  }
}

module attributes {stable_mosaic.version = 11 : i64} {
  func.func @_linear_add_ln_kernel(%arg0: i32, %arg1: i32, %arg2: memref<16x128xf32, #tpu.memory_space<vmem>>, %arg3: memref<128x128xbf16, #tpu.memory_space<vmem>>, %arg4: memref<1x128xf32, #tpu.memory_space<vmem>>, %arg5: memref<16x128xf32, #tpu.memory_space<vmem>>, %arg6: memref<1x128xf32, #tpu.memory_space<vmem>>, %arg7: memref<1x128xf32, #tpu.memory_space<vmem>>, %arg8: memref<16x128xf32, #tpu.memory_space<vmem>>, %arg9: memref<16x128xf32, #tpu.memory_space<vmem>>) attributes {dimension_semantics = [#tpu.dimension_semantics<parallel>, #tpu.dimension_semantics<arbitrary>], iteration_bounds = array<i64: 1, 1>, scalar_prefetch = 0 : i64, scratch_operands = 1 : i64, tpu.core_type = #tpu.core_type<tc>, window_params = [{transform_indices = @transform_0, window_bounds = array<i64: 16, 128>}, {transform_indices = @transform_1, window_bounds = array<i64: 128, 128>}, {pipeline_mode = #tpu.pipeline_mode<synchronous>, transform_indices = @transform_2, window_bounds = array<i64: 1, 128>}, {transform_indices = @transform_3, window_bounds = array<i64: 16, 128>}, {pipeline_mode = #tpu.pipeline_mode<synchronous>, transform_indices = @transform_4, window_bounds = array<i64: 1, 128>}, {pipeline_mode = #tpu.pipeline_mode<synchronous>, transform_indices = @transform_5, window_bounds = array<i64: 1, 128>}, {transform_indices = @transform_6, window_bounds = array<i64: 16, 128>}]} {
    %c0_i32 = arith.constant 0 : i32
    %0 = arith.cmpi eq, %arg1, %c0_i32 : i32
    %1 = arith.extui %0 : i1 to i32
    %c0_i32_0 = arith.constant 0 : i32
    %2 = arith.cmpi ne, %1, %c0_i32_0 : i32
    scf.if %2 {
      %cst_10 = arith.constant 0.000000e+00 : f32
      %13 = vector.broadcast %cst_10 : f32 to vector<16x128xf32>
      %c0_11 = arith.constant 0 : index
      %c0_12 = arith.constant 0 : index
      %14 = vector.load %arg9[%c0_11, %c0_12] : memref<16x128xf32, #tpu.memory_space<vmem>>, vector<16x128xf32>
      tpu.vector_store %arg9[%c0_11, %c0_12], %13 {strides = array<i32>} : memref<16x128xf32, #tpu.memory_space<vmem>>, vector<16x128xf32>,
    } else {
    }
    %c0 = arith.constant 0 : index
    %c0_1 = arith.constant 0 : index
    %3 = vector.load %arg9[%c0, %c0_1] : memref<16x128xf32, #tpu.memory_space<vmem>>, vector<16x128xf32>
    %c0_2 = arith.constant 0 : index
    %c0_3 = arith.constant 0 : index
    %4 = vector.load %arg2[%c0_2, %c0_3] : memref<16x128xf32, #tpu.memory_space<vmem>>, vector<16x128xf32>
    %5 = arith.truncf %4 : vector<16x128xf32> to vector<16x128xbf16>
    %c0_4 = arith.constant 0 : index
    %c0_5 = arith.constant 0 : index
    %6 = vector.load %arg3[%c0_4, %c0_5] : memref<128x128xbf16, #tpu.memory_space<vmem>>, vector<128x128xbf16>
    %cst = arith.constant dense<0.000000e+00> : vector<16x128xf32>
    %7 = tpu.matmul %5, %6, %cst {dimension_numbers = #tpu.dot_dimension_numbers<[1], [0], [0], [1], [0, 0, 1, 1], [], []>} : vector<16x128xbf16>, vector<128x128xbf16>, vector<16x128xf32> -> vector<16x128xf32>
    %8 = arith.addf %3, %7 : vector<16x128xf32>
    %c0_6 = arith.constant 0 : index
    %c0_7 = arith.constant 0 : index
    %9 = vector.load %arg9[%c0_6, %c0_7] : memref<16x128xf32, #tpu.memory_space<vmem>>, vector<16x128xf32>
    tpu.vector_store %arg9[%c0_6, %c0_7], %8 {strides = array<i32>} : memref<16x128xf32, #tpu.memory_space<vmem>>, vector<16x128xf32>,
    %c0_i32_8 = arith.constant 0 : i32
    %10 = arith.cmpi eq, %arg1, %c0_i32_8 : i32
    %11 = arith.extui %10 : i1 to i32
    %c0_i32_9 = arith.constant 0 : i32
    %12 = arith.cmpi ne, %11, %c0_i32_9 : i32
    scf.if %12 {
      %c0_10 = arith.constant 0 : index
      %c0_11 = arith.constant 0 : index
      %13 = vector.load %arg9[%c0_10, %c0_11] : memref<16x128xf32, #tpu.memory_space<vmem>>, vector<16x128xf32>
      %c0_12 = arith.constant 0 : index
      %c0_13 = arith.constant 0 : index
      %14 = vector.load %arg4[%c0_12, %c0_13] : memref<1x128xf32, #tpu.memory_space<vmem>>, vector<1x128xf32>
      %15 = vector.broadcast %14 : vector<1x128xf32> to vector<16x128xf32>
      %16 = arith.addf %13, %15 : vector<16x128xf32>
      %c0_14 = arith.constant 0 : index
      %c0_15 = arith.constant 0 : index
      %17 = vector.load %arg5[%c0_14, %c0_15] : memref<16x128xf32, #tpu.memory_space<vmem>>, vector<16x128xf32>
      %18 = arith.addf %16, %17 : vector<16x128xf32>
      %c0_16 = arith.constant 0 : index
      %c0_17 = arith.constant 0 : index
      %19 = vector.load %arg6[%c0_16, %c0_17] : memref<1x128xf32, #tpu.memory_space<vmem>>, vector<1x128xf32>
      %c0_18 = arith.constant 0 : index
      %c0_19 = arith.constant 0 : index
      %20 = vector.load %arg7[%c0_18, %c0_19] : memref<1x128xf32, #tpu.memory_space<vmem>>, vector<1x128xf32>
      %21 = tpu.iota {dimensions = array<i32: 1>} : vector<16x128xi32>
      %c32_i32 = arith.constant 32 : i32
      %22 = vector.broadcast %c32_i32 : i32 to vector<16x128xi32>
      %23 = arith.cmpi slt, %21, %22 : vector<16x128xi32>
      %24 = arith.extui %23 : vector<16x128xi1> to vector<16x128xi32>
      %25 = arith.sitofp %24 : vector<16x128xi32> to vector<16x128xf32>
      %26 = arith.mulf %18, %25 : vector<16x128xf32>
      %cst_20 = arith.constant dense<0.000000e+00> : vector<16xf32>
      %27 = vector.multi_reduction <add>, %26, %cst_20 [1] : vector<16x128xf32> to vector<16xf32>
      %28 = vector.shape_cast %27 : vector<16xf32> to vector<16x1xf32>
      %cst_21 = arith.constant 3.125000e-02 : f32
      %29 = vector.broadcast %cst_21 : f32 to vector<16x1xf32>
      %30 = arith.mulf %28, %29 : vector<16x1xf32>
      %31 = vector.broadcast %30 : vector<16x1xf32> to vector<16x128xf32>
      %32 = arith.subf %18, %31 : vector<16x128xf32>
      %33 = arith.mulf %32, %25 : vector<16x128xf32>
      %34 = arith.mulf %33, %33 : vector<16x128xf32>
      %cst_22 = arith.constant dense<0.000000e+00> : vector<16xf32>
      %35 = vector.multi_reduction <add>, %34, %cst_22 [1] : vector<16x128xf32> to vector<16xf32>
      %36 = vector.shape_cast %35 : vector<16xf32> to vector<16x1xf32>
      %cst_23 = arith.constant 3.125000e-02 : f32
      %37 = vector.broadcast %cst_23 : f32 to vector<16x1xf32>
      %38 = arith.mulf %36, %37 : vector<16x1xf32>
      %cst_24 = arith.constant 9.99999974E-6 : f32
      %39 = vector.broadcast %cst_24 : f32 to vector<16x1xf32>
      %40 = arith.addf %38, %39 : vector<16x1xf32>
      %41 = math.rsqrt %40 : vector<16x1xf32>
      %42 = vector.broadcast %41 : vector<16x1xf32> to vector<16x128xf32>
      %43 = arith.mulf %33, %42 : vector<16x128xf32>
      %44 = vector.broadcast %19 : vector<1x128xf32> to vector<16x128xf32>
      %45 = arith.mulf %43, %44 : vector<16x128xf32>
      %46 = vector.broadcast %20 : vector<1x128xf32> to vector<16x128xf32>
      %47 = arith.addf %45, %46 : vector<16x128xf32>
      %c0_25 = arith.constant 0 : index
      %c0_26 = arith.constant 0 : index
      %48 = vector.load %arg8[%c0_25, %c0_26] : memref<16x128xf32, #tpu.memory_space<vmem>>, vector<16x128xf32>
      tpu.vector_store %arg8[%c0_25, %c0_26], %47 {strides = array<i32>} : memref<16x128xf32, #tpu.memory_space<vmem>>, vector<16x128xf32>,
    } else {
    }
    return
  }
  func.func @transform_0(%arg0: i32, %arg1: i32) -> (i32, i32) {
    %c0_i32 = arith.constant 0 : i32
    return %arg0, %arg1 : i32, i32
  }
  func.func @transform_1(%arg0: i32, %arg1: i32) -> (i32, i32) {
    %c0_i32 = arith.constant 0 : i32
    %c0_i32_0 = arith.constant 0 : i32
    return %arg1, %c0_i32 : i32, i32
  }
  func.func @transform_2(%arg0: i32, %arg1: i32) -> (i32, i32) {
    %c0_i32 = arith.constant 0 : i32
    %c0_i32_0 = arith.constant 0 : i32
    %c0_i32_1 = arith.constant 0 : i32
    return %c0_i32, %c0_i32_0 : i32, i32
  }
  func.func @transform_3(%arg0: i32, %arg1: i32) -> (i32, i32) {
    %c0_i32 = arith.constant 0 : i32
    %c0_i32_0 = arith.constant 0 : i32
    return %arg0, %c0_i32 : i32, i32
  }
  func.func @transform_4(%arg0: i32, %arg1: i32) -> (i32, i32) {
    %c0_i32 = arith.constant 0 : i32
    %c0_i32_0 = arith.constant 0 : i32
    %c0_i32_1 = arith.constant 0 : i32
    return %c0_i32, %c0_i32_0 : i32, i32
  }
  func.func @transform_5(%arg0: i32, %arg1: i32) -> (i32, i32) {
    %c0_i32 = arith.constant 0 : i32
    %c0_i32_0 = arith.constant 0 : i32
    %c0_i32_1 = arith.constant 0 : i32
    return %c0_i32, %c0_i32_0 : i32, i32
  }
  func.func @transform_6(%arg0: i32, %arg1: i32) -> (i32, i32) {
    %c0_i32 = arith.constant 0 : i32
    %c0_i32_0 = arith.constant 0 : i32
    return %arg0, %c0_i32 : i32, i32
  }
}

module attributes {stable_mosaic.version = 11 : i64} {
  func.func @_conv3x3_kernel(%arg0: i32, %arg1: i32, %arg2: memref<1x18x18x3xf32, #tpu.memory_space<vmem>>, %arg3: memref<27x16xbf16, #tpu.memory_space<vmem>>, %arg4: memref<1x16xf32, #tpu.memory_space<vmem>>, %arg5: memref<1x8x16x16xf32, #tpu.memory_space<vmem>>) attributes {dimension_semantics = [#tpu.dimension_semantics<parallel>, #tpu.dimension_semantics<arbitrary>], iteration_bounds = array<i64: 2, 2>, scalar_prefetch = 0 : i64, scratch_operands = 0 : i64, tpu.core_type = #tpu.core_type<tc>, window_params = [{transform_indices = @transform_0, window_bounds = array<i64: 1, 18, 18, 3>}, {pipeline_mode = #tpu.pipeline_mode<synchronous>, transform_indices = @transform_1, window_bounds = array<i64: 27, 16>}, {pipeline_mode = #tpu.pipeline_mode<synchronous>, transform_indices = @transform_2, window_bounds = array<i64: 1, 16>}, {transform_indices = @transform_3, window_bounds = array<i64: 1, 8, 16, 16>}]} {
    %c8_i32 = arith.constant 8 : i32
    %0 = arith.muli %arg1, %c8_i32 : i32
    %c0 = arith.constant 0 : index
    %1 = arith.index_cast %0 : i32 to index
    %c0_0 = arith.constant 0 : index
    %c0_1 = arith.constant 0 : index
    %2 = vector.load %arg2[%c0, %1, %c0_0, %c0_1] : memref<1x18x18x3xf32, #tpu.memory_space<vmem>>, vector<1x10x18x3xf32>
    %3 = vector.shape_cast %2 : vector<1x10x18x3xf32> to vector<10x18x3xf32>
    %4 = vector.extract_strided_slice %3 {offsets = [0, 0, 0], sizes = [8, 16, 3], strides = [1, 1, 1]} : vector<10x18x3xf32> to vector<8x16x3xf32>
    %5 = vector.shape_cast %4 : vector<8x16x3xf32> to vector<128x3xf32>
    %6 = vector.extract_strided_slice %3 {offsets = [0, 1, 0], sizes = [8, 16, 3], strides = [1, 1, 1]} : vector<10x18x3xf32> to vector<8x16x3xf32>
    %7 = vector.shape_cast %6 : vector<8x16x3xf32> to vector<128x3xf32>
    %8 = vector.extract_strided_slice %3 {offsets = [0, 2, 0], sizes = [8, 16, 3], strides = [1, 1, 1]} : vector<10x18x3xf32> to vector<8x16x3xf32>
    %9 = vector.shape_cast %8 : vector<8x16x3xf32> to vector<128x3xf32>
    %10 = vector.extract_strided_slice %3 {offsets = [1, 0, 0], sizes = [8, 16, 3], strides = [1, 1, 1]} : vector<10x18x3xf32> to vector<8x16x3xf32>
    %11 = vector.shape_cast %10 : vector<8x16x3xf32> to vector<128x3xf32>
    %12 = vector.extract_strided_slice %3 {offsets = [1, 1, 0], sizes = [8, 16, 3], strides = [1, 1, 1]} : vector<10x18x3xf32> to vector<8x16x3xf32>
    %13 = vector.shape_cast %12 : vector<8x16x3xf32> to vector<128x3xf32>
    %14 = vector.extract_strided_slice %3 {offsets = [1, 2, 0], sizes = [8, 16, 3], strides = [1, 1, 1]} : vector<10x18x3xf32> to vector<8x16x3xf32>
    %15 = vector.shape_cast %14 : vector<8x16x3xf32> to vector<128x3xf32>
    %16 = vector.extract_strided_slice %3 {offsets = [2, 0, 0], sizes = [8, 16, 3], strides = [1, 1, 1]} : vector<10x18x3xf32> to vector<8x16x3xf32>
    %17 = vector.shape_cast %16 : vector<8x16x3xf32> to vector<128x3xf32>
    %18 = vector.extract_strided_slice %3 {offsets = [2, 1, 0], sizes = [8, 16, 3], strides = [1, 1, 1]} : vector<10x18x3xf32> to vector<8x16x3xf32>
    %19 = vector.shape_cast %18 : vector<8x16x3xf32> to vector<128x3xf32>
    %20 = vector.extract_strided_slice %3 {offsets = [2, 2, 0], sizes = [8, 16, 3], strides = [1, 1, 1]} : vector<10x18x3xf32> to vector<8x16x3xf32>
    %21 = vector.shape_cast %20 : vector<8x16x3xf32> to vector<128x3xf32>
    %22 = tpu.concatenate %5, %7, %9, %11, %13, %15, %17, %19, %21 in 1 : vector<128x3xf32>, vector<128x3xf32>, vector<128x3xf32>, vector<128x3xf32>, vector<128x3xf32>, vector<128x3xf32>, vector<128x3xf32>, vector<128x3xf32>, vector<128x3xf32> -> vector<128x27xf32>
    %23 = arith.truncf %22 : vector<128x27xf32> to vector<128x27xbf16>
    %c0_2 = arith.constant 0 : index
    %c0_3 = arith.constant 0 : index
    %24 = vector.load %arg3[%c0_2, %c0_3] : memref<27x16xbf16, #tpu.memory_space<vmem>>, vector<27x16xbf16>
    %cst = arith.constant dense<0.000000e+00> : vector<128x16xf32>
    %25 = tpu.matmul %23, %24, %cst {dimension_numbers = #tpu.dot_dimension_numbers<[1], [0], [0], [1], [0, 0, 1, 1], [], []>} : vector<128x27xbf16>, vector<27x16xbf16>, vector<128x16xf32> -> vector<128x16xf32>
    %c0_4 = arith.constant 0 : index
    %c0_5 = arith.constant 0 : index
    %26 = vector.load %arg4[%c0_4, %c0_5] : memref<1x16xf32, #tpu.memory_space<vmem>>, vector<1x16xf32>
    %27 = vector.broadcast %26 : vector<1x16xf32> to vector<128x16xf32>
    %28 = arith.addf %25, %27 : vector<128x16xf32>
    %cst_6 = arith.constant 0.000000e+00 : f32
    %29 = vector.broadcast %cst_6 : f32 to vector<128x16xf32>
    %30 = arith.maximumf %28, %29 : vector<128x16xf32>
    %31 = vector.shape_cast %30 : vector<128x16xf32> to vector<8x16x16xf32>
    %c0_7 = arith.constant 0 : index
    %c0_8 = arith.constant 0 : index
    %c0_9 = arith.constant 0 : index
    %c0_10 = arith.constant 0 : index
    %32 = vector.load %arg5[%c0_7, %c0_8, %c0_9, %c0_10] : memref<1x8x16x16xf32, #tpu.memory_space<vmem>>, vector<1x8x16x16xf32>
    %33 = vector.shape_cast %32 : vector<1x8x16x16xf32> to vector<8x16x16xf32>
    %34 = vector.shape_cast %31 : vector<8x16x16xf32> to vector<1x8x16x16xf32>
    tpu.vector_store %arg5[%c0_7, %c0_8, %c0_9, %c0_10], %34 {strides = array<i32>} : memref<1x8x16x16xf32, #tpu.memory_space<vmem>>, vector<1x8x16x16xf32>,
    return
  }
  func.func @transform_0(%arg0: i32, %arg1: i32) -> (i32, i32, i32, i32) {
    %c0_i32 = arith.constant 0 : i32
    %c0_i32_0 = arith.constant 0 : i32
    %c0_i32_1 = arith.constant 0 : i32
    %c0_i32_2 = arith.constant 0 : i32
    return %arg0, %c0_i32, %c0_i32_0, %c0_i32_1 : i32, i32, i32, i32
  }
  func.func @transform_1(%arg0: i32, %arg1: i32) -> (i32, i32) {
    %c0_i32 = arith.constant 0 : i32
    %c0_i32_0 = arith.constant 0 : i32
    %c0_i32_1 = arith.constant 0 : i32
    return %c0_i32, %c0_i32_0 : i32, i32
  }
  func.func @transform_2(%arg0: i32, %arg1: i32) -> (i32, i32) {
    %c0_i32 = arith.constant 0 : i32
    %c0_i32_0 = arith.constant 0 : i32
    %c0_i32_1 = arith.constant 0 : i32
    return %c0_i32, %c0_i32_0 : i32, i32
  }
  func.func @transform_3(%arg0: i32, %arg1: i32) -> (i32, i32, i32, i32) {
    %c0_i32 = arith.constant 0 : i32
    %c0_i32_0 = arith.constant 0 : i32
    %c0_i32_1 = arith.constant 0 : i32
    return %arg0, %arg1, %c0_i32, %c0_i32_0 : i32, i32, i32, i32
  }
}

module attributes {stable_mosaic.version = 11 : i64} {
  func.func @_conv3x3_kernel(%arg0: i32, %arg1: i32, %arg2: memref<1x18x18x16xf32, #tpu.memory_space<vmem>>, %arg3: memref<144x16xbf16, #tpu.memory_space<vmem>>, %arg4: memref<1x16xf32, #tpu.memory_space<vmem>>, %arg5: memref<1x8x16x16xf32, #tpu.memory_space<vmem>>) attributes {dimension_semantics = [#tpu.dimension_semantics<parallel>, #tpu.dimension_semantics<arbitrary>], iteration_bounds = array<i64: 2, 2>, scalar_prefetch = 0 : i64, scratch_operands = 0 : i64, tpu.core_type = #tpu.core_type<tc>, window_params = [{transform_indices = @transform_0, window_bounds = array<i64: 1, 18, 18, 16>}, {pipeline_mode = #tpu.pipeline_mode<synchronous>, transform_indices = @transform_1, window_bounds = array<i64: 144, 16>}, {pipeline_mode = #tpu.pipeline_mode<synchronous>, transform_indices = @transform_2, window_bounds = array<i64: 1, 16>}, {transform_indices = @transform_3, window_bounds = array<i64: 1, 8, 16, 16>}]} {
    %c8_i32 = arith.constant 8 : i32
    %0 = arith.muli %arg1, %c8_i32 : i32
    %c0 = arith.constant 0 : index
    %1 = arith.index_cast %0 : i32 to index
    %c0_0 = arith.constant 0 : index
    %c0_1 = arith.constant 0 : index
    %2 = vector.load %arg2[%c0, %1, %c0_0, %c0_1] : memref<1x18x18x16xf32, #tpu.memory_space<vmem>>, vector<1x10x18x16xf32>
    %3 = vector.shape_cast %2 : vector<1x10x18x16xf32> to vector<10x18x16xf32>
    %4 = vector.extract_strided_slice %3 {offsets = [0, 0, 0], sizes = [8, 16, 16], strides = [1, 1, 1]} : vector<10x18x16xf32> to vector<8x16x16xf32>
    %5 = vector.shape_cast %4 : vector<8x16x16xf32> to vector<128x16xf32>
    %6 = vector.extract_strided_slice %3 {offsets = [0, 1, 0], sizes = [8, 16, 16], strides = [1, 1, 1]} : vector<10x18x16xf32> to vector<8x16x16xf32>
    %7 = vector.shape_cast %6 : vector<8x16x16xf32> to vector<128x16xf32>
    %8 = vector.extract_strided_slice %3 {offsets = [0, 2, 0], sizes = [8, 16, 16], strides = [1, 1, 1]} : vector<10x18x16xf32> to vector<8x16x16xf32>
    %9 = vector.shape_cast %8 : vector<8x16x16xf32> to vector<128x16xf32>
    %10 = vector.extract_strided_slice %3 {offsets = [1, 0, 0], sizes = [8, 16, 16], strides = [1, 1, 1]} : vector<10x18x16xf32> to vector<8x16x16xf32>
    %11 = vector.shape_cast %10 : vector<8x16x16xf32> to vector<128x16xf32>
    %12 = vector.extract_strided_slice %3 {offsets = [1, 1, 0], sizes = [8, 16, 16], strides = [1, 1, 1]} : vector<10x18x16xf32> to vector<8x16x16xf32>
    %13 = vector.shape_cast %12 : vector<8x16x16xf32> to vector<128x16xf32>
    %14 = vector.extract_strided_slice %3 {offsets = [1, 2, 0], sizes = [8, 16, 16], strides = [1, 1, 1]} : vector<10x18x16xf32> to vector<8x16x16xf32>
    %15 = vector.shape_cast %14 : vector<8x16x16xf32> to vector<128x16xf32>
    %16 = vector.extract_strided_slice %3 {offsets = [2, 0, 0], sizes = [8, 16, 16], strides = [1, 1, 1]} : vector<10x18x16xf32> to vector<8x16x16xf32>
    %17 = vector.shape_cast %16 : vector<8x16x16xf32> to vector<128x16xf32>
    %18 = vector.extract_strided_slice %3 {offsets = [2, 1, 0], sizes = [8, 16, 16], strides = [1, 1, 1]} : vector<10x18x16xf32> to vector<8x16x16xf32>
    %19 = vector.shape_cast %18 : vector<8x16x16xf32> to vector<128x16xf32>
    %20 = vector.extract_strided_slice %3 {offsets = [2, 2, 0], sizes = [8, 16, 16], strides = [1, 1, 1]} : vector<10x18x16xf32> to vector<8x16x16xf32>
    %21 = vector.shape_cast %20 : vector<8x16x16xf32> to vector<128x16xf32>
    %22 = tpu.concatenate %5, %7, %9, %11, %13, %15, %17, %19, %21 in 1 : vector<128x16xf32>, vector<128x16xf32>, vector<128x16xf32>, vector<128x16xf32>, vector<128x16xf32>, vector<128x16xf32>, vector<128x16xf32>, vector<128x16xf32>, vector<128x16xf32> -> vector<128x144xf32>
    %23 = arith.truncf %22 : vector<128x144xf32> to vector<128x144xbf16>
    %c0_2 = arith.constant 0 : index
    %c0_3 = arith.constant 0 : index
    %24 = vector.load %arg3[%c0_2, %c0_3] : memref<144x16xbf16, #tpu.memory_space<vmem>>, vector<144x16xbf16>
    %cst = arith.constant dense<0.000000e+00> : vector<128x16xf32>
    %25 = tpu.matmul %23, %24, %cst {dimension_numbers = #tpu.dot_dimension_numbers<[1], [0], [0], [1], [0, 0, 1, 1], [], []>} : vector<128x144xbf16>, vector<144x16xbf16>, vector<128x16xf32> -> vector<128x16xf32>
    %c0_4 = arith.constant 0 : index
    %c0_5 = arith.constant 0 : index
    %26 = vector.load %arg4[%c0_4, %c0_5] : memref<1x16xf32, #tpu.memory_space<vmem>>, vector<1x16xf32>
    %27 = vector.broadcast %26 : vector<1x16xf32> to vector<128x16xf32>
    %28 = arith.addf %25, %27 : vector<128x16xf32>
    %cst_6 = arith.constant 0.000000e+00 : f32
    %29 = vector.broadcast %cst_6 : f32 to vector<128x16xf32>
    %30 = arith.maximumf %28, %29 : vector<128x16xf32>
    %31 = vector.shape_cast %30 : vector<128x16xf32> to vector<8x16x16xf32>
    %c0_7 = arith.constant 0 : index
    %c0_8 = arith.constant 0 : index
    %c0_9 = arith.constant 0 : index
    %c0_10 = arith.constant 0 : index
    %32 = vector.load %arg5[%c0_7, %c0_8, %c0_9, %c0_10] : memref<1x8x16x16xf32, #tpu.memory_space<vmem>>, vector<1x8x16x16xf32>
    %33 = vector.shape_cast %32 : vector<1x8x16x16xf32> to vector<8x16x16xf32>
    %34 = vector.shape_cast %31 : vector<8x16x16xf32> to vector<1x8x16x16xf32>
    tpu.vector_store %arg5[%c0_7, %c0_8, %c0_9, %c0_10], %34 {strides = array<i32>} : memref<1x8x16x16xf32, #tpu.memory_space<vmem>>, vector<1x8x16x16xf32>,
    return
  }
  func.func @transform_0(%arg0: i32, %arg1: i32) -> (i32, i32, i32, i32) {
    %c0_i32 = arith.constant 0 : i32
    %c0_i32_0 = arith.constant 0 : i32
    %c0_i32_1 = arith.constant 0 : i32
    %c0_i32_2 = arith.constant 0 : i32
    return %arg0, %c0_i32, %c0_i32_0, %c0_i32_1 : i32, i32, i32, i32
  }
  func.func @transform_1(%arg0: i32, %arg1: i32) -> (i32, i32) {
    %c0_i32 = arith.constant 0 : i32
    %c0_i32_0 = arith.constant 0 : i32
    %c0_i32_1 = arith.constant 0 : i32
    return %c0_i32, %c0_i32_0 : i32, i32
  }
  func.func @transform_2(%arg0: i32, %arg1: i32) -> (i32, i32) {
    %c0_i32 = arith.constant 0 : i32
    %c0_i32_0 = arith.constant 0 : i32
    %c0_i32_1 = arith.constant 0 : i32
    return %c0_i32, %c0_i32_0 : i32, i32
  }
  func.func @transform_3(%arg0: i32, %arg1: i32) -> (i32, i32, i32, i32) {
    %c0_i32 = arith.constant 0 : i32
    %c0_i32_0 = arith.constant 0 : i32
    %c0_i32_1 = arith.constant 0 : i32
    return %arg0, %arg1, %c0_i32, %c0_i32_0 : i32, i32, i32, i32
  }
}

module attributes {stable_mosaic.version = 11 : i64} {
  func.func @_conv3x3_kernel(%arg0: i32, %arg1: i32, %arg2: memref<1x10x10x16xf32, #tpu.memory_space<vmem>>, %arg3: memref<144x32xbf16, #tpu.memory_space<vmem>>, %arg4: memref<1x32xf32, #tpu.memory_space<vmem>>, %arg5: memref<1x8x8x32xf32, #tpu.memory_space<vmem>>) attributes {dimension_semantics = [#tpu.dimension_semantics<parallel>, #tpu.dimension_semantics<arbitrary>], iteration_bounds = array<i64: 2, 1>, scalar_prefetch = 0 : i64, scratch_operands = 0 : i64, tpu.core_type = #tpu.core_type<tc>, window_params = [{transform_indices = @transform_0, window_bounds = array<i64: 1, 10, 10, 16>}, {pipeline_mode = #tpu.pipeline_mode<synchronous>, transform_indices = @transform_1, window_bounds = array<i64: 144, 32>}, {pipeline_mode = #tpu.pipeline_mode<synchronous>, transform_indices = @transform_2, window_bounds = array<i64: 1, 32>}, {transform_indices = @transform_3, window_bounds = array<i64: 1, 8, 8, 32>}]} {
    %c8_i32 = arith.constant 8 : i32
    %0 = arith.muli %arg1, %c8_i32 : i32
    %c0 = arith.constant 0 : index
    %1 = arith.index_cast %0 : i32 to index
    %c0_0 = arith.constant 0 : index
    %c0_1 = arith.constant 0 : index
    %2 = vector.load %arg2[%c0, %1, %c0_0, %c0_1] : memref<1x10x10x16xf32, #tpu.memory_space<vmem>>, vector<1x10x10x16xf32>
    %3 = vector.shape_cast %2 : vector<1x10x10x16xf32> to vector<10x10x16xf32>
    %4 = vector.extract_strided_slice %3 {offsets = [0, 0, 0], sizes = [8, 8, 16], strides = [1, 1, 1]} : vector<10x10x16xf32> to vector<8x8x16xf32>
    %5 = vector.shape_cast %4 : vector<8x8x16xf32> to vector<64x16xf32>
    %6 = vector.extract_strided_slice %3 {offsets = [0, 1, 0], sizes = [8, 8, 16], strides = [1, 1, 1]} : vector<10x10x16xf32> to vector<8x8x16xf32>
    %7 = vector.shape_cast %6 : vector<8x8x16xf32> to vector<64x16xf32>
    %8 = vector.extract_strided_slice %3 {offsets = [0, 2, 0], sizes = [8, 8, 16], strides = [1, 1, 1]} : vector<10x10x16xf32> to vector<8x8x16xf32>
    %9 = vector.shape_cast %8 : vector<8x8x16xf32> to vector<64x16xf32>
    %10 = vector.extract_strided_slice %3 {offsets = [1, 0, 0], sizes = [8, 8, 16], strides = [1, 1, 1]} : vector<10x10x16xf32> to vector<8x8x16xf32>
    %11 = vector.shape_cast %10 : vector<8x8x16xf32> to vector<64x16xf32>
    %12 = vector.extract_strided_slice %3 {offsets = [1, 1, 0], sizes = [8, 8, 16], strides = [1, 1, 1]} : vector<10x10x16xf32> to vector<8x8x16xf32>
    %13 = vector.shape_cast %12 : vector<8x8x16xf32> to vector<64x16xf32>
    %14 = vector.extract_strided_slice %3 {offsets = [1, 2, 0], sizes = [8, 8, 16], strides = [1, 1, 1]} : vector<10x10x16xf32> to vector<8x8x16xf32>
    %15 = vector.shape_cast %14 : vector<8x8x16xf32> to vector<64x16xf32>
    %16 = vector.extract_strided_slice %3 {offsets = [2, 0, 0], sizes = [8, 8, 16], strides = [1, 1, 1]} : vector<10x10x16xf32> to vector<8x8x16xf32>
    %17 = vector.shape_cast %16 : vector<8x8x16xf32> to vector<64x16xf32>
    %18 = vector.extract_strided_slice %3 {offsets = [2, 1, 0], sizes = [8, 8, 16], strides = [1, 1, 1]} : vector<10x10x16xf32> to vector<8x8x16xf32>
    %19 = vector.shape_cast %18 : vector<8x8x16xf32> to vector<64x16xf32>
    %20 = vector.extract_strided_slice %3 {offsets = [2, 2, 0], sizes = [8, 8, 16], strides = [1, 1, 1]} : vector<10x10x16xf32> to vector<8x8x16xf32>
    %21 = vector.shape_cast %20 : vector<8x8x16xf32> to vector<64x16xf32>
    %22 = tpu.concatenate %5, %7, %9, %11, %13, %15, %17, %19, %21 in 1 : vector<64x16xf32>, vector<64x16xf32>, vector<64x16xf32>, vector<64x16xf32>, vector<64x16xf32>, vector<64x16xf32>, vector<64x16xf32>, vector<64x16xf32>, vector<64x16xf32> -> vector<64x144xf32>
    %23 = arith.truncf %22 : vector<64x144xf32> to vector<64x144xbf16>
    %c0_2 = arith.constant 0 : index
    %c0_3 = arith.constant 0 : index
    %24 = vector.load %arg3[%c0_2, %c0_3] : memref<144x32xbf16, #tpu.memory_space<vmem>>, vector<144x32xbf16>
    %cst = arith.constant dense<0.000000e+00> : vector<64x32xf32>
    %25 = tpu.matmul %23, %24, %cst {dimension_numbers = #tpu.dot_dimension_numbers<[1], [0], [0], [1], [0, 0, 1, 1], [], []>} : vector<64x144xbf16>, vector<144x32xbf16>, vector<64x32xf32> -> vector<64x32xf32>
    %c0_4 = arith.constant 0 : index
    %c0_5 = arith.constant 0 : index
    %26 = vector.load %arg4[%c0_4, %c0_5] : memref<1x32xf32, #tpu.memory_space<vmem>>, vector<1x32xf32>
    %27 = vector.broadcast %26 : vector<1x32xf32> to vector<64x32xf32>
    %28 = arith.addf %25, %27 : vector<64x32xf32>
    %cst_6 = arith.constant 0.000000e+00 : f32
    %29 = vector.broadcast %cst_6 : f32 to vector<64x32xf32>
    %30 = arith.maximumf %28, %29 : vector<64x32xf32>
    %31 = vector.shape_cast %30 : vector<64x32xf32> to vector<8x8x32xf32>
    %c0_7 = arith.constant 0 : index
    %c0_8 = arith.constant 0 : index
    %c0_9 = arith.constant 0 : index
    %c0_10 = arith.constant 0 : index
    %32 = vector.load %arg5[%c0_7, %c0_8, %c0_9, %c0_10] : memref<1x8x8x32xf32, #tpu.memory_space<vmem>>, vector<1x8x8x32xf32>
    %33 = vector.shape_cast %32 : vector<1x8x8x32xf32> to vector<8x8x32xf32>
    %34 = vector.shape_cast %31 : vector<8x8x32xf32> to vector<1x8x8x32xf32>
    tpu.vector_store %arg5[%c0_7, %c0_8, %c0_9, %c0_10], %34 {strides = array<i32>} : memref<1x8x8x32xf32, #tpu.memory_space<vmem>>, vector<1x8x8x32xf32>,
    return
  }
  func.func @transform_0(%arg0: i32, %arg1: i32) -> (i32, i32, i32, i32) {
    %c0_i32 = arith.constant 0 : i32
    %c0_i32_0 = arith.constant 0 : i32
    %c0_i32_1 = arith.constant 0 : i32
    %c0_i32_2 = arith.constant 0 : i32
    return %arg0, %c0_i32, %c0_i32_0, %c0_i32_1 : i32, i32, i32, i32
  }
  func.func @transform_1(%arg0: i32, %arg1: i32) -> (i32, i32) {
    %c0_i32 = arith.constant 0 : i32
    %c0_i32_0 = arith.constant 0 : i32
    %c0_i32_1 = arith.constant 0 : i32
    return %c0_i32, %c0_i32_0 : i32, i32
  }
  func.func @transform_2(%arg0: i32, %arg1: i32) -> (i32, i32) {
    %c0_i32 = arith.constant 0 : i32
    %c0_i32_0 = arith.constant 0 : i32
    %c0_i32_1 = arith.constant 0 : i32
    return %c0_i32, %c0_i32_0 : i32, i32
  }
  func.func @transform_3(%arg0: i32, %arg1: i32) -> (i32, i32, i32, i32) {
    %c0_i32 = arith.constant 0 : i32
    %c0_i32_0 = arith.constant 0 : i32
    %c0_i32_1 = arith.constant 0 : i32
    return %arg0, %arg1, %c0_i32, %c0_i32_0 : i32, i32, i32, i32
  }
}

module attributes {stable_mosaic.version = 11 : i64} {
  func.func @_conv3x3_kernel(%arg0: i32, %arg1: i32, %arg2: memref<1x10x10x32xf32, #tpu.memory_space<vmem>>, %arg3: memref<288x32xbf16, #tpu.memory_space<vmem>>, %arg4: memref<1x32xf32, #tpu.memory_space<vmem>>, %arg5: memref<1x8x8x32xf32, #tpu.memory_space<vmem>>) attributes {dimension_semantics = [#tpu.dimension_semantics<parallel>, #tpu.dimension_semantics<arbitrary>], iteration_bounds = array<i64: 2, 1>, scalar_prefetch = 0 : i64, scratch_operands = 0 : i64, tpu.core_type = #tpu.core_type<tc>, window_params = [{transform_indices = @transform_0, window_bounds = array<i64: 1, 10, 10, 32>}, {pipeline_mode = #tpu.pipeline_mode<synchronous>, transform_indices = @transform_1, window_bounds = array<i64: 288, 32>}, {pipeline_mode = #tpu.pipeline_mode<synchronous>, transform_indices = @transform_2, window_bounds = array<i64: 1, 32>}, {transform_indices = @transform_3, window_bounds = array<i64: 1, 8, 8, 32>}]} {
    %c8_i32 = arith.constant 8 : i32
    %0 = arith.muli %arg1, %c8_i32 : i32
    %c0 = arith.constant 0 : index
    %1 = arith.index_cast %0 : i32 to index
    %c0_0 = arith.constant 0 : index
    %c0_1 = arith.constant 0 : index
    %2 = vector.load %arg2[%c0, %1, %c0_0, %c0_1] : memref<1x10x10x32xf32, #tpu.memory_space<vmem>>, vector<1x10x10x32xf32>
    %3 = vector.shape_cast %2 : vector<1x10x10x32xf32> to vector<10x10x32xf32>
    %4 = vector.extract_strided_slice %3 {offsets = [0, 0, 0], sizes = [8, 8, 32], strides = [1, 1, 1]} : vector<10x10x32xf32> to vector<8x8x32xf32>
    %5 = vector.shape_cast %4 : vector<8x8x32xf32> to vector<64x32xf32>
    %6 = vector.extract_strided_slice %3 {offsets = [0, 1, 0], sizes = [8, 8, 32], strides = [1, 1, 1]} : vector<10x10x32xf32> to vector<8x8x32xf32>
    %7 = vector.shape_cast %6 : vector<8x8x32xf32> to vector<64x32xf32>
    %8 = vector.extract_strided_slice %3 {offsets = [0, 2, 0], sizes = [8, 8, 32], strides = [1, 1, 1]} : vector<10x10x32xf32> to vector<8x8x32xf32>
    %9 = vector.shape_cast %8 : vector<8x8x32xf32> to vector<64x32xf32>
    %10 = vector.extract_strided_slice %3 {offsets = [1, 0, 0], sizes = [8, 8, 32], strides = [1, 1, 1]} : vector<10x10x32xf32> to vector<8x8x32xf32>
    %11 = vector.shape_cast %10 : vector<8x8x32xf32> to vector<64x32xf32>
    %12 = vector.extract_strided_slice %3 {offsets = [1, 1, 0], sizes = [8, 8, 32], strides = [1, 1, 1]} : vector<10x10x32xf32> to vector<8x8x32xf32>
    %13 = vector.shape_cast %12 : vector<8x8x32xf32> to vector<64x32xf32>
    %14 = vector.extract_strided_slice %3 {offsets = [1, 2, 0], sizes = [8, 8, 32], strides = [1, 1, 1]} : vector<10x10x32xf32> to vector<8x8x32xf32>
    %15 = vector.shape_cast %14 : vector<8x8x32xf32> to vector<64x32xf32>
    %16 = vector.extract_strided_slice %3 {offsets = [2, 0, 0], sizes = [8, 8, 32], strides = [1, 1, 1]} : vector<10x10x32xf32> to vector<8x8x32xf32>
    %17 = vector.shape_cast %16 : vector<8x8x32xf32> to vector<64x32xf32>
    %18 = vector.extract_strided_slice %3 {offsets = [2, 1, 0], sizes = [8, 8, 32], strides = [1, 1, 1]} : vector<10x10x32xf32> to vector<8x8x32xf32>
    %19 = vector.shape_cast %18 : vector<8x8x32xf32> to vector<64x32xf32>
    %20 = vector.extract_strided_slice %3 {offsets = [2, 2, 0], sizes = [8, 8, 32], strides = [1, 1, 1]} : vector<10x10x32xf32> to vector<8x8x32xf32>
    %21 = vector.shape_cast %20 : vector<8x8x32xf32> to vector<64x32xf32>
    %22 = tpu.concatenate %5, %7, %9, %11, %13, %15, %17, %19, %21 in 1 : vector<64x32xf32>, vector<64x32xf32>, vector<64x32xf32>, vector<64x32xf32>, vector<64x32xf32>, vector<64x32xf32>, vector<64x32xf32>, vector<64x32xf32>, vector<64x32xf32> -> vector<64x288xf32>
    %23 = arith.truncf %22 : vector<64x288xf32> to vector<64x288xbf16>
    %c0_2 = arith.constant 0 : index
    %c0_3 = arith.constant 0 : index
    %24 = vector.load %arg3[%c0_2, %c0_3] : memref<288x32xbf16, #tpu.memory_space<vmem>>, vector<288x32xbf16>
    %cst = arith.constant dense<0.000000e+00> : vector<64x32xf32>
    %25 = tpu.matmul %23, %24, %cst {dimension_numbers = #tpu.dot_dimension_numbers<[1], [0], [0], [1], [0, 0, 1, 1], [], []>} : vector<64x288xbf16>, vector<288x32xbf16>, vector<64x32xf32> -> vector<64x32xf32>
    %c0_4 = arith.constant 0 : index
    %c0_5 = arith.constant 0 : index
    %26 = vector.load %arg4[%c0_4, %c0_5] : memref<1x32xf32, #tpu.memory_space<vmem>>, vector<1x32xf32>
    %27 = vector.broadcast %26 : vector<1x32xf32> to vector<64x32xf32>
    %28 = arith.addf %25, %27 : vector<64x32xf32>
    %cst_6 = arith.constant 0.000000e+00 : f32
    %29 = vector.broadcast %cst_6 : f32 to vector<64x32xf32>
    %30 = arith.maximumf %28, %29 : vector<64x32xf32>
    %31 = vector.shape_cast %30 : vector<64x32xf32> to vector<8x8x32xf32>
    %c0_7 = arith.constant 0 : index
    %c0_8 = arith.constant 0 : index
    %c0_9 = arith.constant 0 : index
    %c0_10 = arith.constant 0 : index
    %32 = vector.load %arg5[%c0_7, %c0_8, %c0_9, %c0_10] : memref<1x8x8x32xf32, #tpu.memory_space<vmem>>, vector<1x8x8x32xf32>
    %33 = vector.shape_cast %32 : vector<1x8x8x32xf32> to vector<8x8x32xf32>
    %34 = vector.shape_cast %31 : vector<8x8x32xf32> to vector<1x8x8x32xf32>
    tpu.vector_store %arg5[%c0_7, %c0_8, %c0_9, %c0_10], %34 {strides = array<i32>} : memref<1x8x8x32xf32, #tpu.memory_space<vmem>>, vector<1x8x8x32xf32>,
    return
  }
  func.func @transform_0(%arg0: i32, %arg1: i32) -> (i32, i32, i32, i32) {
    %c0_i32 = arith.constant 0 : i32
    %c0_i32_0 = arith.constant 0 : i32
    %c0_i32_1 = arith.constant 0 : i32
    %c0_i32_2 = arith.constant 0 : i32
    return %arg0, %c0_i32, %c0_i32_0, %c0_i32_1 : i32, i32, i32, i32
  }
  func.func @transform_1(%arg0: i32, %arg1: i32) -> (i32, i32) {
    %c0_i32 = arith.constant 0 : i32
    %c0_i32_0 = arith.constant 0 : i32
    %c0_i32_1 = arith.constant 0 : i32
    return %c0_i32, %c0_i32_0 : i32, i32
  }
  func.func @transform_2(%arg0: i32, %arg1: i32) -> (i32, i32) {
    %c0_i32 = arith.constant 0 : i32
    %c0_i32_0 = arith.constant 0 : i32
    %c0_i32_1 = arith.constant 0 : i32
    return %c0_i32, %c0_i32_0 : i32, i32
  }
  func.func @transform_3(%arg0: i32, %arg1: i32) -> (i32, i32, i32, i32) {
    %c0_i32 = arith.constant 0 : i32
    %c0_i32_0 = arith.constant 0 : i32
    %c0_i32_1 = arith.constant 0 : i32
    return %arg0, %arg1, %c0_i32, %c0_i32_0 : i32, i32, i32, i32
  }
}

module attributes {stable_mosaic.version = 11 : i64} {
  func.func @_linear_kernel(%arg0: i32, %arg1: i32, %arg2: i32, %arg3: memref<32x32xf32, #tpu.memory_space<vmem>>, %arg4: memref<32x128xbf16, #tpu.memory_space<vmem>>, %arg5: memref<1x128xf32, #tpu.memory_space<vmem>>, %arg6: memref<32x128xf32, #tpu.memory_space<vmem>>, %arg7: memref<32x128xf32, #tpu.memory_space<vmem>>) attributes {dimension_semantics = [#tpu.dimension_semantics<parallel>, #tpu.dimension_semantics<parallel>, #tpu.dimension_semantics<arbitrary>], iteration_bounds = array<i64: 1, 1, 1>, scalar_prefetch = 0 : i64, scratch_operands = 1 : i64, tpu.core_type = #tpu.core_type<tc>, window_params = [{transform_indices = @transform_0, window_bounds = array<i64: 32, 32>}, {transform_indices = @transform_1, window_bounds = array<i64: 32, 128>}, {transform_indices = @transform_2, window_bounds = array<i64: 1, 128>}, {transform_indices = @transform_3, window_bounds = array<i64: 32, 128>}]} {
    %c0_i32 = arith.constant 0 : i32
    %0 = arith.cmpi eq, %arg2, %c0_i32 : i32
    %1 = arith.extui %0 : i1 to i32
    %c0_i32_0 = arith.constant 0 : i32
    %2 = arith.cmpi ne, %1, %c0_i32_0 : i32
    scf.if %2 {
      %cst_10 = arith.constant 0.000000e+00 : f32
      %13 = vector.broadcast %cst_10 : f32 to vector<32x128xf32>
      %c0_11 = arith.constant 0 : index
      %c0_12 = arith.constant 0 : index
      %14 = vector.load %arg7[%c0_11, %c0_12] : memref<32x128xf32, #tpu.memory_space<vmem>>, vector<32x128xf32>
      tpu.vector_store %arg7[%c0_11, %c0_12], %13 {strides = array<i32>} : memref<32x128xf32, #tpu.memory_space<vmem>>, vector<32x128xf32>,
    } else {
    }
    %c0 = arith.constant 0 : index
    %c0_1 = arith.constant 0 : index
    %3 = vector.load %arg7[%c0, %c0_1] : memref<32x128xf32, #tpu.memory_space<vmem>>, vector<32x128xf32>
    %c0_2 = arith.constant 0 : index
    %c0_3 = arith.constant 0 : index
    %4 = vector.load %arg3[%c0_2, %c0_3] : memref<32x32xf32, #tpu.memory_space<vmem>>, vector<32x32xf32>
    %5 = arith.truncf %4 : vector<32x32xf32> to vector<32x32xbf16>
    %c0_4 = arith.constant 0 : index
    %c0_5 = arith.constant 0 : index
    %6 = vector.load %arg4[%c0_4, %c0_5] : memref<32x128xbf16, #tpu.memory_space<vmem>>, vector<32x128xbf16>
    %cst = arith.constant dense<0.000000e+00> : vector<32x128xf32>
    %7 = tpu.matmul %5, %6, %cst {dimension_numbers = #tpu.dot_dimension_numbers<[1], [0], [0], [1], [0, 0, 1, 1], [], []>} : vector<32x32xbf16>, vector<32x128xbf16>, vector<32x128xf32> -> vector<32x128xf32>
    %8 = arith.addf %3, %7 : vector<32x128xf32>
    %c0_6 = arith.constant 0 : index
    %c0_7 = arith.constant 0 : index
    %9 = vector.load %arg7[%c0_6, %c0_7] : memref<32x128xf32, #tpu.memory_space<vmem>>, vector<32x128xf32>
    tpu.vector_store %arg7[%c0_6, %c0_7], %8 {strides = array<i32>} : memref<32x128xf32, #tpu.memory_space<vmem>>, vector<32x128xf32>,
    %c0_i32_8 = arith.constant 0 : i32
    %10 = arith.cmpi eq, %arg2, %c0_i32_8 : i32
    %11 = arith.extui %10 : i1 to i32
    %c0_i32_9 = arith.constant 0 : i32
    %12 = arith.cmpi ne, %11, %c0_i32_9 : i32
    scf.if %12 {
      %c0_10 = arith.constant 0 : index
      %c0_11 = arith.constant 0 : index
      %13 = vector.load %arg7[%c0_10, %c0_11] : memref<32x128xf32, #tpu.memory_space<vmem>>, vector<32x128xf32>
      %c0_12 = arith.constant 0 : index
      %c0_13 = arith.constant 0 : index
      %14 = vector.load %arg5[%c0_12, %c0_13] : memref<1x128xf32, #tpu.memory_space<vmem>>, vector<1x128xf32>
      %15 = vector.broadcast %14 : vector<1x128xf32> to vector<32x128xf32>
      %16 = arith.addf %13, %15 : vector<32x128xf32>
      %c0_14 = arith.constant 0 : index
      %c0_15 = arith.constant 0 : index
      %17 = vector.load %arg6[%c0_14, %c0_15] : memref<32x128xf32, #tpu.memory_space<vmem>>, vector<32x128xf32>
      tpu.vector_store %arg6[%c0_14, %c0_15], %16 {strides = array<i32>} : memref<32x128xf32, #tpu.memory_space<vmem>>, vector<32x128xf32>,
    } else {
    }
    return
  }
  func.func @transform_0(%arg0: i32, %arg1: i32, %arg2: i32) -> (i32, i32) {
    %c0_i32 = arith.constant 0 : i32
    return %arg0, %arg2 : i32, i32
  }
  func.func @transform_1(%arg0: i32, %arg1: i32, %arg2: i32) -> (i32, i32) {
    %c0_i32 = arith.constant 0 : i32
    return %arg2, %arg1 : i32, i32
  }
  func.func @transform_2(%arg0: i32, %arg1: i32, %arg2: i32) -> (i32, i32) {
    %c0_i32 = arith.constant 0 : i32
    %c0_i32_0 = arith.constant 0 : i32
    return %c0_i32, %arg1 : i32, i32
  }
  func.func @transform_3(%arg0: i32, %arg1: i32, %arg2: i32) -> (i32, i32) {
    %c0_i32 = arith.constant 0 : i32
    return %arg0, %arg1 : i32, i32
  }
}

module attributes {stable_mosaic.version = 11 : i64} {
  func.func @_cross_attn_kernel(%arg0: i32, %arg1: memref<1x8x128xf32, #tpu.memory_space<vmem>>, %arg2: memref<1x16x128xf32, #tpu.memory_space<vmem>>, %arg3: memref<1x8x128xf32, #tpu.memory_space<vmem>>) attributes {dimension_semantics = [#tpu.dimension_semantics<parallel>], iteration_bounds = array<i64: 2>, scalar_prefetch = 0 : i64, scratch_operands = 0 : i64, tpu.core_type = #tpu.core_type<tc>, window_params = [{transform_indices = @transform_0, window_bounds = array<i64: 1, 8, 128>}, {transform_indices = @transform_1, window_bounds = array<i64: 1, 16, 128>}, {transform_indices = @transform_2, window_bounds = array<i64: 1, 8, 128>}]} {
    %c0 = arith.constant 0 : index
    %c0_0 = arith.constant 0 : index
    %c0_1 = arith.constant 0 : index
    %0 = vector.load %arg1[%c0, %c0_0, %c0_1] : memref<1x8x128xf32, #tpu.memory_space<vmem>>, vector<1x8x128xf32>
    %1 = vector.shape_cast %0 : vector<1x8x128xf32> to vector<8x128xf32>
    %2 = arith.truncf %1 : vector<8x128xf32> to vector<8x128xbf16>
    %c0_2 = arith.constant 0 : index
    %c0_3 = arith.constant 0 : index
    %c0_4 = arith.constant 0 : index
    %3 = vector.load %arg2[%c0_2, %c0_3, %c0_4] : memref<1x16x128xf32, #tpu.memory_space<vmem>>, vector<1x16x128xf32>
    %4 = vector.shape_cast %3 : vector<1x16x128xf32> to vector<16x128xf32>
    %5 = arith.truncf %4 : vector<16x128xf32> to vector<16x128xbf16>
    %6 = vector.extract_strided_slice %2 {offsets = [0, 0], sizes = [8, 8], strides = [1, 1]} : vector<8x128xbf16> to vector<8x8xbf16>
    %7 = vector.extract_strided_slice %5 {offsets = [0, 0], sizes = [16, 8], strides = [1, 1]} : vector<16x128xbf16> to vector<16x8xbf16>
    %8 = vector.extract_strided_slice %5 {offsets = [0, 32], sizes = [16, 8], strides = [1, 1]} : vector<16x128xbf16> to vector<16x8xbf16>
    %cst = arith.constant dense<0.000000e+00> : vector<8x16xf32>
    %9 = tpu.matmul %6, %7, %cst {dimension_numbers = #tpu.dot_dimension_numbers<[1], [1], [0], [0], [0, 0, 1, 0], [], []>} : vector<8x8xbf16>, vector<16x8xbf16>, vector<8x16xf32> -> vector<8x16xf32>
    %cst_5 = arith.constant 0.353553385 : f32
    %10 = vector.broadcast %cst_5 : f32 to vector<8x16xf32>
    %11 = arith.mulf %9, %10 : vector<8x16xf32>
    %cst_6 = arith.constant dense<0xFF800000> : vector<8xf32>
    %12 = vector.multi_reduction <maximumf>, %11, %cst_6 [1] : vector<8x16xf32> to vector<8xf32>
    %13 = vector.shape_cast %12 : vector<8xf32> to vector<8x1xf32>
    %14 = vector.broadcast %13 : vector<8x1xf32> to vector<8x16xf32>
    %15 = arith.subf %11, %14 : vector<8x16xf32>
    %16 = math.exp %15 : vector<8x16xf32>
    %cst_7 = arith.constant dense<0.000000e+00> : vector<8xf32>
    %17 = vector.multi_reduction <add>, %16, %cst_7 [1] : vector<8x16xf32> to vector<8xf32>
    %18 = vector.shape_cast %17 : vector<8xf32> to vector<8x1xf32>
    %19 = tpu.reciprocal %18 {approx = true} : vector<8x1xf32> -> vector<8x1xf32>
    %20 = vector.broadcast %19 : vector<8x1xf32> to vector<8x16xf32>
    %21 = arith.mulf %16, %20 : vector<8x16xf32>
    %22 = arith.truncf %21 : vector<8x16xf32> to vector<8x16xbf16>
    %cst_8 = arith.constant dense<0.000000e+00> : vector<8x8xf32>
    %23 = tpu.matmul %22, %8, %cst_8 {dimension_numbers = #tpu.dot_dimension_numbers<[1], [0], [0], [1], [0, 0, 1, 1], [], []>} : vector<8x16xbf16>, vector<16x8xbf16>, vector<8x8xf32> -> vector<8x8xf32>
    %24 = vector.extract_strided_slice %2 {offsets = [0, 8], sizes = [8, 8], strides = [1, 1]} : vector<8x128xbf16> to vector<8x8xbf16>
    %25 = vector.extract_strided_slice %5 {offsets = [0, 8], sizes = [16, 8], strides = [1, 1]} : vector<16x128xbf16> to vector<16x8xbf16>
    %26 = vector.extract_strided_slice %5 {offsets = [0, 40], sizes = [16, 8], strides = [1, 1]} : vector<16x128xbf16> to vector<16x8xbf16>
    %cst_9 = arith.constant dense<0.000000e+00> : vector<8x16xf32>
    %27 = tpu.matmul %24, %25, %cst_9 {dimension_numbers = #tpu.dot_dimension_numbers<[1], [1], [0], [0], [0, 0, 1, 0], [], []>} : vector<8x8xbf16>, vector<16x8xbf16>, vector<8x16xf32> -> vector<8x16xf32>
    %cst_10 = arith.constant 0.353553385 : f32
    %28 = vector.broadcast %cst_10 : f32 to vector<8x16xf32>
    %29 = arith.mulf %27, %28 : vector<8x16xf32>
    %cst_11 = arith.constant dense<0xFF800000> : vector<8xf32>
    %30 = vector.multi_reduction <maximumf>, %29, %cst_11 [1] : vector<8x16xf32> to vector<8xf32>
    %31 = vector.shape_cast %30 : vector<8xf32> to vector<8x1xf32>
    %32 = vector.broadcast %31 : vector<8x1xf32> to vector<8x16xf32>
    %33 = arith.subf %29, %32 : vector<8x16xf32>
    %34 = math.exp %33 : vector<8x16xf32>
    %cst_12 = arith.constant dense<0.000000e+00> : vector<8xf32>
    %35 = vector.multi_reduction <add>, %34, %cst_12 [1] : vector<8x16xf32> to vector<8xf32>
    %36 = vector.shape_cast %35 : vector<8xf32> to vector<8x1xf32>
    %37 = tpu.reciprocal %36 {approx = true} : vector<8x1xf32> -> vector<8x1xf32>
    %38 = vector.broadcast %37 : vector<8x1xf32> to vector<8x16xf32>
    %39 = arith.mulf %34, %38 : vector<8x16xf32>
    %40 = arith.truncf %39 : vector<8x16xf32> to vector<8x16xbf16>
    %cst_13 = arith.constant dense<0.000000e+00> : vector<8x8xf32>
    %41 = tpu.matmul %40, %26, %cst_13 {dimension_numbers = #tpu.dot_dimension_numbers<[1], [0], [0], [1], [0, 0, 1, 1], [], []>} : vector<8x16xbf16>, vector<16x8xbf16>, vector<8x8xf32> -> vector<8x8xf32>
    %42 = vector.extract_strided_slice %2 {offsets = [0, 16], sizes = [8, 8], strides = [1, 1]} : vector<8x128xbf16> to vector<8x8xbf16>
    %43 = vector.extract_strided_slice %5 {offsets = [0, 16], sizes = [16, 8], strides = [1, 1]} : vector<16x128xbf16> to vector<16x8xbf16>
    %44 = vector.extract_strided_slice %5 {offsets = [0, 48], sizes = [16, 8], strides = [1, 1]} : vector<16x128xbf16> to vector<16x8xbf16>
    %cst_14 = arith.constant dense<0.000000e+00> : vector<8x16xf32>
    %45 = tpu.matmul %42, %43, %cst_14 {dimension_numbers = #tpu.dot_dimension_numbers<[1], [1], [0], [0], [0, 0, 1, 0], [], []>} : vector<8x8xbf16>, vector<16x8xbf16>, vector<8x16xf32> -> vector<8x16xf32>
    %cst_15 = arith.constant 0.353553385 : f32
    %46 = vector.broadcast %cst_15 : f32 to vector<8x16xf32>
    %47 = arith.mulf %45, %46 : vector<8x16xf32>
    %cst_16 = arith.constant dense<0xFF800000> : vector<8xf32>
    %48 = vector.multi_reduction <maximumf>, %47, %cst_16 [1] : vector<8x16xf32> to vector<8xf32>
    %49 = vector.shape_cast %48 : vector<8xf32> to vector<8x1xf32>
    %50 = vector.broadcast %49 : vector<8x1xf32> to vector<8x16xf32>
    %51 = arith.subf %47, %50 : vector<8x16xf32>
    %52 = math.exp %51 : vector<8x16xf32>
    %cst_17 = arith.constant dense<0.000000e+00> : vector<8xf32>
    %53 = vector.multi_reduction <add>, %52, %cst_17 [1] : vector<8x16xf32> to vector<8xf32>
    %54 = vector.shape_cast %53 : vector<8xf32> to vector<8x1xf32>
    %55 = tpu.reciprocal %54 {approx = true} : vector<8x1xf32> -> vector<8x1xf32>
    %56 = vector.broadcast %55 : vector<8x1xf32> to vector<8x16xf32>
    %57 = arith.mulf %52, %56 : vector<8x16xf32>
    %58 = arith.truncf %57 : vector<8x16xf32> to vector<8x16xbf16>
    %cst_18 = arith.constant dense<0.000000e+00> : vector<8x8xf32>
    %59 = tpu.matmul %58, %44, %cst_18 {dimension_numbers = #tpu.dot_dimension_numbers<[1], [0], [0], [1], [0, 0, 1, 1], [], []>} : vector<8x16xbf16>, vector<16x8xbf16>, vector<8x8xf32> -> vector<8x8xf32>
    %60 = vector.extract_strided_slice %2 {offsets = [0, 24], sizes = [8, 8], strides = [1, 1]} : vector<8x128xbf16> to vector<8x8xbf16>
    %61 = vector.extract_strided_slice %5 {offsets = [0, 24], sizes = [16, 8], strides = [1, 1]} : vector<16x128xbf16> to vector<16x8xbf16>
    %62 = vector.extract_strided_slice %5 {offsets = [0, 56], sizes = [16, 8], strides = [1, 1]} : vector<16x128xbf16> to vector<16x8xbf16>
    %cst_19 = arith.constant dense<0.000000e+00> : vector<8x16xf32>
    %63 = tpu.matmul %60, %61, %cst_19 {dimension_numbers = #tpu.dot_dimension_numbers<[1], [1], [0], [0], [0, 0, 1, 0], [], []>} : vector<8x8xbf16>, vector<16x8xbf16>, vector<8x16xf32> -> vector<8x16xf32>
    %cst_20 = arith.constant 0.353553385 : f32
    %64 = vector.broadcast %cst_20 : f32 to vector<8x16xf32>
    %65 = arith.mulf %63, %64 : vector<8x16xf32>
    %cst_21 = arith.constant dense<0xFF800000> : vector<8xf32>
    %66 = vector.multi_reduction <maximumf>, %65, %cst_21 [1] : vector<8x16xf32> to vector<8xf32>
    %67 = vector.shape_cast %66 : vector<8xf32> to vector<8x1xf32>
    %68 = vector.broadcast %67 : vector<8x1xf32> to vector<8x16xf32>
    %69 = arith.subf %65, %68 : vector<8x16xf32>
    %70 = math.exp %69 : vector<8x16xf32>
    %cst_22 = arith.constant dense<0.000000e+00> : vector<8xf32>
    %71 = vector.multi_reduction <add>, %70, %cst_22 [1] : vector<8x16xf32> to vector<8xf32>
    %72 = vector.shape_cast %71 : vector<8xf32> to vector<8x1xf32>
    %73 = tpu.reciprocal %72 {approx = true} : vector<8x1xf32> -> vector<8x1xf32>
    %74 = vector.broadcast %73 : vector<8x1xf32> to vector<8x16xf32>
    %75 = arith.mulf %70, %74 : vector<8x16xf32>
    %76 = arith.truncf %75 : vector<8x16xf32> to vector<8x16xbf16>
    %cst_23 = arith.constant dense<0.000000e+00> : vector<8x8xf32>
    %77 = tpu.matmul %76, %62, %cst_23 {dimension_numbers = #tpu.dot_dimension_numbers<[1], [0], [0], [1], [0, 0, 1, 1], [], []>} : vector<8x16xbf16>, vector<16x8xbf16>, vector<8x8xf32> -> vector<8x8xf32>
    %cst_24 = arith.constant 0.000000e+00 : f32
    %78 = vector.broadcast %cst_24 : f32 to vector<8x96xf32>
    %79 = tpu.concatenate %23, %41, %59, %77, %78 in 1 : vector<8x8xf32>, vector<8x8xf32>, vector<8x8xf32>, vector<8x8xf32>, vector<8x96xf32> -> vector<8x128xf32>
    %c0_25 = arith.constant 0 : index
    %c0_26 = arith.constant 0 : index
    %c0_27 = arith.constant 0 : index
    %80 = vector.load %arg3[%c0_25, %c0_26, %c0_27] : memref<1x8x128xf32, #tpu.memory_space<vmem>>, vector<1x8x128xf32>
    %81 = vector.shape_cast %80 : vector<1x8x128xf32> to vector<8x128xf32>
    %82 = vector.shape_cast %79 : vector<8x128xf32> to vector<1x8x128xf32>
    tpu.vector_store %arg3[%c0_25, %c0_26, %c0_27], %82 {strides = array<i32>} : memref<1x8x128xf32, #tpu.memory_space<vmem>>, vector<1x8x128xf32>,
    return
  }
  func.func @transform_0(%arg0: i32) -> (i32, i32, i32) {
    %c0_i32 = arith.constant 0 : i32
    %c0_i32_0 = arith.constant 0 : i32
    %c0_i32_1 = arith.constant 0 : i32
    return %arg0, %c0_i32, %c0_i32_0 : i32, i32, i32
  }
  func.func @transform_1(%arg0: i32) -> (i32, i32, i32) {
    %c0_i32 = arith.constant 0 : i32
    %c0_i32_0 = arith.constant 0 : i32
    %c0_i32_1 = arith.constant 0 : i32
    return %arg0, %c0_i32, %c0_i32_0 : i32, i32, i32
  }
  func.func @transform_2(%arg0: i32) -> (i32, i32, i32) {
    %c0_i32 = arith.constant 0 : i32
    %c0_i32_0 = arith.constant 0 : i32
    %c0_i32_1 = arith.constant 0 : i32
    return %arg0, %c0_i32, %c0_i32_0 : i32, i32, i32
  }
}

module attributes {stable_mosaic.version = 11 : i64} {
  func.func @_linear_kernel(%arg0: i32, %arg1: i32, %arg2: i32, %arg3: memref<32x128xf32, #tpu.memory_space<vmem>>, %arg4: memref<128x128xbf16, #tpu.memory_space<vmem>>, %arg5: memref<1x128xf32, #tpu.memory_space<vmem>>, %arg6: memref<32x128xf32, #tpu.memory_space<vmem>>, %arg7: memref<32x128xf32, #tpu.memory_space<vmem>>) attributes {dimension_semantics = [#tpu.dimension_semantics<parallel>, #tpu.dimension_semantics<parallel>, #tpu.dimension_semantics<arbitrary>], iteration_bounds = array<i64: 1, 1, 1>, scalar_prefetch = 0 : i64, scratch_operands = 1 : i64, tpu.core_type = #tpu.core_type<tc>, window_params = [{transform_indices = @transform_0, window_bounds = array<i64: 32, 128>}, {transform_indices = @transform_1, window_bounds = array<i64: 128, 128>}, {transform_indices = @transform_2, window_bounds = array<i64: 1, 128>}, {transform_indices = @transform_3, window_bounds = array<i64: 32, 128>}]} {
    %c0_i32 = arith.constant 0 : i32
    %0 = arith.cmpi eq, %arg2, %c0_i32 : i32
    %1 = arith.extui %0 : i1 to i32
    %c0_i32_0 = arith.constant 0 : i32
    %2 = arith.cmpi ne, %1, %c0_i32_0 : i32
    scf.if %2 {
      %cst_10 = arith.constant 0.000000e+00 : f32
      %13 = vector.broadcast %cst_10 : f32 to vector<32x128xf32>
      %c0_11 = arith.constant 0 : index
      %c0_12 = arith.constant 0 : index
      %14 = vector.load %arg7[%c0_11, %c0_12] : memref<32x128xf32, #tpu.memory_space<vmem>>, vector<32x128xf32>
      tpu.vector_store %arg7[%c0_11, %c0_12], %13 {strides = array<i32>} : memref<32x128xf32, #tpu.memory_space<vmem>>, vector<32x128xf32>,
    } else {
    }
    %c0 = arith.constant 0 : index
    %c0_1 = arith.constant 0 : index
    %3 = vector.load %arg7[%c0, %c0_1] : memref<32x128xf32, #tpu.memory_space<vmem>>, vector<32x128xf32>
    %c0_2 = arith.constant 0 : index
    %c0_3 = arith.constant 0 : index
    %4 = vector.load %arg3[%c0_2, %c0_3] : memref<32x128xf32, #tpu.memory_space<vmem>>, vector<32x128xf32>
    %5 = arith.truncf %4 : vector<32x128xf32> to vector<32x128xbf16>
    %c0_4 = arith.constant 0 : index
    %c0_5 = arith.constant 0 : index
    %6 = vector.load %arg4[%c0_4, %c0_5] : memref<128x128xbf16, #tpu.memory_space<vmem>>, vector<128x128xbf16>
    %cst = arith.constant dense<0.000000e+00> : vector<32x128xf32>
    %7 = tpu.matmul %5, %6, %cst {dimension_numbers = #tpu.dot_dimension_numbers<[1], [0], [0], [1], [0, 0, 1, 1], [], []>} : vector<32x128xbf16>, vector<128x128xbf16>, vector<32x128xf32> -> vector<32x128xf32>
    %8 = arith.addf %3, %7 : vector<32x128xf32>
    %c0_6 = arith.constant 0 : index
    %c0_7 = arith.constant 0 : index
    %9 = vector.load %arg7[%c0_6, %c0_7] : memref<32x128xf32, #tpu.memory_space<vmem>>, vector<32x128xf32>
    tpu.vector_store %arg7[%c0_6, %c0_7], %8 {strides = array<i32>} : memref<32x128xf32, #tpu.memory_space<vmem>>, vector<32x128xf32>,
    %c0_i32_8 = arith.constant 0 : i32
    %10 = arith.cmpi eq, %arg2, %c0_i32_8 : i32
    %11 = arith.extui %10 : i1 to i32
    %c0_i32_9 = arith.constant 0 : i32
    %12 = arith.cmpi ne, %11, %c0_i32_9 : i32
    scf.if %12 {
      %c0_10 = arith.constant 0 : index
      %c0_11 = arith.constant 0 : index
      %13 = vector.load %arg7[%c0_10, %c0_11] : memref<32x128xf32, #tpu.memory_space<vmem>>, vector<32x128xf32>
      %c0_12 = arith.constant 0 : index
      %c0_13 = arith.constant 0 : index
      %14 = vector.load %arg5[%c0_12, %c0_13] : memref<1x128xf32, #tpu.memory_space<vmem>>, vector<1x128xf32>
      %15 = vector.broadcast %14 : vector<1x128xf32> to vector<32x128xf32>
      %16 = arith.addf %13, %15 : vector<32x128xf32>
      %c0_14 = arith.constant 0 : index
      %c0_15 = arith.constant 0 : index
      %17 = vector.load %arg6[%c0_14, %c0_15] : memref<32x128xf32, #tpu.memory_space<vmem>>, vector<32x128xf32>
      tpu.vector_store %arg6[%c0_14, %c0_15], %16 {strides = array<i32>} : memref<32x128xf32, #tpu.memory_space<vmem>>, vector<32x128xf32>,
    } else {
    }
    return
  }
  func.func @transform_0(%arg0: i32, %arg1: i32, %arg2: i32) -> (i32, i32) {
    %c0_i32 = arith.constant 0 : i32
    return %arg0, %arg2 : i32, i32
  }
  func.func @transform_1(%arg0: i32, %arg1: i32, %arg2: i32) -> (i32, i32) {
    %c0_i32 = arith.constant 0 : i32
    return %arg2, %arg1 : i32, i32
  }
  func.func @transform_2(%arg0: i32, %arg1: i32, %arg2: i32) -> (i32, i32) {
    %c0_i32 = arith.constant 0 : i32
    %c0_i32_0 = arith.constant 0 : i32
    return %c0_i32, %arg1 : i32, i32
  }
  func.func @transform_3(%arg0: i32, %arg1: i32, %arg2: i32) -> (i32, i32) {
    %c0_i32 = arith.constant 0 : i32
    return %arg0, %arg1 : i32, i32
  }
}

module attributes {stable_mosaic.version = 11 : i64} {
  func.func @_ffn_add_ln_kernel(%arg0: i32, %arg1: i32, %arg2: memref<16x128xf32, #tpu.memory_space<vmem>>, %arg3: memref<128x128xbf16, #tpu.memory_space<vmem>>, %arg4: memref<1x128xf32, #tpu.memory_space<vmem>>, %arg5: memref<128x128xbf16, #tpu.memory_space<vmem>>, %arg6: memref<1x128xf32, #tpu.memory_space<vmem>>, %arg7: memref<16x128xf32, #tpu.memory_space<vmem>>, %arg8: memref<1x128xf32, #tpu.memory_space<vmem>>, %arg9: memref<1x128xf32, #tpu.memory_space<vmem>>, %arg10: memref<16x128xf32, #tpu.memory_space<vmem>>, %arg11: memref<16x128xf32, #tpu.memory_space<vmem>>) attributes {dimension_semantics = [#tpu.dimension_semantics<parallel>, #tpu.dimension_semantics<arbitrary>], iteration_bounds = array<i64: 1, 1>, scalar_prefetch = 0 : i64, scratch_operands = 1 : i64, tpu.core_type = #tpu.core_type<tc>, window_params = [{transform_indices = @transform_0, window_bounds = array<i64: 16, 128>}, {transform_indices = @transform_1, window_bounds = array<i64: 128, 128>}, {transform_indices = @transform_2, window_bounds = array<i64: 1, 128>}, {transform_indices = @transform_3, window_bounds = array<i64: 128, 128>}, {pipeline_mode = #tpu.pipeline_mode<synchronous>, transform_indices = @transform_4, window_bounds = array<i64: 1, 128>}, {transform_indices = @transform_5, window_bounds = array<i64: 16, 128>}, {pipeline_mode = #tpu.pipeline_mode<synchronous>, transform_indices = @transform_6, window_bounds = array<i64: 1, 128>}, {pipeline_mode = #tpu.pipeline_mode<synchronous>, transform_indices = @transform_7, window_bounds = array<i64: 1, 128>}, {transform_indices = @transform_8, window_bounds = array<i64: 16, 128>}]} {
    %c0_i32 = arith.constant 0 : i32
    %0 = arith.cmpi eq, %arg1, %c0_i32 : i32
    %1 = arith.extui %0 : i1 to i32
    %c0_i32_0 = arith.constant 0 : i32
    %2 = arith.cmpi ne, %1, %c0_i32_0 : i32
    scf.if %2 {
      %cst_16 = arith.constant 0.000000e+00 : f32
      %21 = vector.broadcast %cst_16 : f32 to vector<16x128xf32>
      %c0_17 = arith.constant 0 : index
      %c0_18 = arith.constant 0 : index
      %22 = vector.load %arg11[%c0_17, %c0_18] : memref<16x128xf32, #tpu.memory_space<vmem>>, vector<16x128xf32>
      tpu.vector_store %arg11[%c0_17, %c0_18], %21 {strides = array<i32>} : memref<16x128xf32, #tpu.memory_space<vmem>>, vector<16x128xf32>,
    } else {
    }
    %c0 = arith.constant 0 : index
    %c0_1 = arith.constant 0 : index
    %3 = vector.load %arg2[%c0, %c0_1] : memref<16x128xf32, #tpu.memory_space<vmem>>, vector<16x128xf32>
    %4 = arith.truncf %3 : vector<16x128xf32> to vector<16x128xbf16>
    %c0_2 = arith.constant 0 : index
    %c0_3 = arith.constant 0 : index
    %5 = vector.load %arg3[%c0_2, %c0_3] : memref<128x128xbf16, #tpu.memory_space<vmem>>, vector<128x128xbf16>
    %cst = arith.constant dense<0.000000e+00> : vector<16x128xf32>
    %6 = tpu.matmul %4, %5, %cst {dimension_numbers = #tpu.dot_dimension_numbers<[1], [0], [0], [1], [0, 0, 1, 1], [], []>} : vector<16x128xbf16>, vector<128x128xbf16>, vector<16x128xf32> -> vector<16x128xf32>
    %c0_4 = arith.constant 0 : index
    %c0_5 = arith.constant 0 : index
    %7 = vector.load %arg4[%c0_4, %c0_5] : memref<1x128xf32, #tpu.memory_space<vmem>>, vector<1x128xf32>
    %8 = vector.broadcast %7 : vector<1x128xf32> to vector<16x128xf32>
    %9 = arith.addf %6, %8 : vector<16x128xf32>
    %cst_6 = arith.constant 0.000000e+00 : f32
    %10 = vector.broadcast %cst_6 : f32 to vector<16x128xf32>
    %11 = arith.maximumf %9, %10 : vector<16x128xf32>
    %c0_7 = arith.constant 0 : index
    %c0_8 = arith.constant 0 : index
    %12 = vector.load %arg11[%c0_7, %c0_8] : memref<16x128xf32, #tpu.memory_space<vmem>>, vector<16x128xf32>
    %13 = arith.truncf %11 : vector<16x128xf32> to vector<16x128xbf16>
    %c0_9 = arith.constant 0 : index
    %c0_10 = arith.constant 0 : index
    %14 = vector.load %arg5[%c0_9, %c0_10] : memref<128x128xbf16, #tpu.memory_space<vmem>>, vector<128x128xbf16>
    %cst_11 = arith.constant dense<0.000000e+00> : vector<16x128xf32>
    %15 = tpu.matmul %13, %14, %cst_11 {dimension_numbers = #tpu.dot_dimension_numbers<[1], [0], [0], [1], [0, 0, 1, 1], [], []>} : vector<16x128xbf16>, vector<128x128xbf16>, vector<16x128xf32> -> vector<16x128xf32>
    %16 = arith.addf %12, %15 : vector<16x128xf32>
    %c0_12 = arith.constant 0 : index
    %c0_13 = arith.constant 0 : index
    %17 = vector.load %arg11[%c0_12, %c0_13] : memref<16x128xf32, #tpu.memory_space<vmem>>, vector<16x128xf32>
    tpu.vector_store %arg11[%c0_12, %c0_13], %16 {strides = array<i32>} : memref<16x128xf32, #tpu.memory_space<vmem>>, vector<16x128xf32>,
    %c0_i32_14 = arith.constant 0 : i32
    %18 = arith.cmpi eq, %arg1, %c0_i32_14 : i32
    %19 = arith.extui %18 : i1 to i32
    %c0_i32_15 = arith.constant 0 : i32
    %20 = arith.cmpi ne, %19, %c0_i32_15 : i32
    scf.if %20 {
      %c0_16 = arith.constant 0 : index
      %c0_17 = arith.constant 0 : index
      %21 = vector.load %arg11[%c0_16, %c0_17] : memref<16x128xf32, #tpu.memory_space<vmem>>, vector<16x128xf32>
      %c0_18 = arith.constant 0 : index
      %c0_19 = arith.constant 0 : index
      %22 = vector.load %arg6[%c0_18, %c0_19] : memref<1x128xf32, #tpu.memory_space<vmem>>, vector<1x128xf32>
      %23 = vector.broadcast %22 : vector<1x128xf32> to vector<16x128xf32>
      %24 = arith.addf %21, %23 : vector<16x128xf32>
      %c0_20 = arith.constant 0 : index
      %c0_21 = arith.constant 0 : index
      %25 = vector.load %arg7[%c0_20, %c0_21] : memref<16x128xf32, #tpu.memory_space<vmem>>, vector<16x128xf32>
      %26 = arith.addf %24, %25 : vector<16x128xf32>
      %c0_22 = arith.constant 0 : index
      %c0_23 = arith.constant 0 : index
      %27 = vector.load %arg8[%c0_22, %c0_23] : memref<1x128xf32, #tpu.memory_space<vmem>>, vector<1x128xf32>
      %c0_24 = arith.constant 0 : index
      %c0_25 = arith.constant 0 : index
      %28 = vector.load %arg9[%c0_24, %c0_25] : memref<1x128xf32, #tpu.memory_space<vmem>>, vector<1x128xf32>
      %29 = tpu.iota {dimensions = array<i32: 1>} : vector<16x128xi32>
      %c32_i32 = arith.constant 32 : i32
      %30 = vector.broadcast %c32_i32 : i32 to vector<16x128xi32>
      %31 = arith.cmpi slt, %29, %30 : vector<16x128xi32>
      %32 = arith.extui %31 : vector<16x128xi1> to vector<16x128xi32>
      %33 = arith.sitofp %32 : vector<16x128xi32> to vector<16x128xf32>
      %34 = arith.mulf %26, %33 : vector<16x128xf32>
      %cst_26 = arith.constant dense<0.000000e+00> : vector<16xf32>
      %35 = vector.multi_reduction <add>, %34, %cst_26 [1] : vector<16x128xf32> to vector<16xf32>
      %36 = vector.shape_cast %35 : vector<16xf32> to vector<16x1xf32>
      %cst_27 = arith.constant 3.125000e-02 : f32
      %37 = vector.broadcast %cst_27 : f32 to vector<16x1xf32>
      %38 = arith.mulf %36, %37 : vector<16x1xf32>
      %39 = vector.broadcast %38 : vector<16x1xf32> to vector<16x128xf32>
      %40 = arith.subf %26, %39 : vector<16x128xf32>
      %41 = arith.mulf %40, %33 : vector<16x128xf32>
      %42 = arith.mulf %41, %41 : vector<16x128xf32>
      %cst_28 = arith.constant dense<0.000000e+00> : vector<16xf32>
      %43 = vector.multi_reduction <add>, %42, %cst_28 [1] : vector<16x128xf32> to vector<16xf32>
      %44 = vector.shape_cast %43 : vector<16xf32> to vector<16x1xf32>
      %cst_29 = arith.constant 3.125000e-02 : f32
      %45 = vector.broadcast %cst_29 : f32 to vector<16x1xf32>
      %46 = arith.mulf %44, %45 : vector<16x1xf32>
      %cst_30 = arith.constant 9.99999974E-6 : f32
      %47 = vector.broadcast %cst_30 : f32 to vector<16x1xf32>
      %48 = arith.addf %46, %47 : vector<16x1xf32>
      %49 = math.rsqrt %48 : vector<16x1xf32>
      %50 = vector.broadcast %49 : vector<16x1xf32> to vector<16x128xf32>
      %51 = arith.mulf %41, %50 : vector<16x128xf32>
      %52 = vector.broadcast %27 : vector<1x128xf32> to vector<16x128xf32>
      %53 = arith.mulf %51, %52 : vector<16x128xf32>
      %54 = vector.broadcast %28 : vector<1x128xf32> to vector<16x128xf32>
      %55 = arith.addf %53, %54 : vector<16x128xf32>
      %c0_31 = arith.constant 0 : index
      %c0_32 = arith.constant 0 : index
      %56 = vector.load %arg10[%c0_31, %c0_32] : memref<16x128xf32, #tpu.memory_space<vmem>>, vector<16x128xf32>
      tpu.vector_store %arg10[%c0_31, %c0_32], %55 {strides = array<i32>} : memref<16x128xf32, #tpu.memory_space<vmem>>, vector<16x128xf32>,
    } else {
    }
    return
  }
  func.func @transform_0(%arg0: i32, %arg1: i32) -> (i32, i32) {
    %c0_i32 = arith.constant 0 : i32
    %c0_i32_0 = arith.constant 0 : i32
    return %arg0, %c0_i32 : i32, i32
  }
  func.func @transform_1(%arg0: i32, %arg1: i32) -> (i32, i32) {
    %c0_i32 = arith.constant 0 : i32
    %c0_i32_0 = arith.constant 0 : i32
    return %c0_i32, %arg1 : i32, i32
  }
  func.func @transform_2(%arg0: i32, %arg1: i32) -> (i32, i32) {
    %c0_i32 = arith.constant 0 : i32
    %c0_i32_0 = arith.constant 0 : i32
    return %c0_i32, %arg1 : i32, i32
  }
  func.func @transform_3(%arg0: i32, %arg1: i32) -> (i32, i32) {
    %c0_i32 = arith.constant 0 : i32
    %c0_i32_0 = arith.constant 0 : i32
    return %arg1, %c0_i32 : i32, i32
  }
  func.func @transform_4(%arg0: i32, %arg1: i32) -> (i32, i32) {
    %c0_i32 = arith.constant 0 : i32
    %c0_i32_0 = arith.constant 0 : i32
    %c0_i32_1 = arith.constant 0 : i32
    return %c0_i32, %c0_i32_0 : i32, i32
  }
  func.func @transform_5(%arg0: i32, %arg1: i32) -> (i32, i32) {
    %c0_i32 = arith.constant 0 : i32
    %c0_i32_0 = arith.constant 0 : i32
    return %arg0, %c0_i32 : i32, i32
  }
  func.func @transform_6(%arg0: i32, %arg1: i32) -> (i32, i32) {
    %c0_i32 = arith.constant 0 : i32
    %c0_i32_0 = arith.constant 0 : i32
    %c0_i32_1 = arith.constant 0 : i32
    return %c0_i32, %c0_i32_0 : i32, i32
  }
  func.func @transform_7(%arg0: i32, %arg1: i32) -> (i32, i32) {
    %c0_i32 = arith.constant 0 : i32
    %c0_i32_0 = arith.constant 0 : i32
    %c0_i32_1 = arith.constant 0 : i32
    return %c0_i32, %c0_i32_0 : i32, i32
  }
  func.func @transform_8(%arg0: i32, %arg1: i32) -> (i32, i32) {
    %c0_i32 = arith.constant 0 : i32
    %c0_i32_0 = arith.constant 0 : i32
    return %arg0, %c0_i32 : i32, i32
  }
}

</mosaic_0001>

<bundles_post_ra>
// kernel: image_captioning_forward.27
= control target key start
LH: loop header
LB: loop body
LE: loop exit
PB: predicated region body
PF: predicated region fallthrough
CT: control target
= control target key end

     0   :  { %v203_v0 = vmov 0.0   ;;  %vm204_vm0 = vmmov 0   ;;  %s264_s1 = inlined_call_operand.vmem [shape: bf16[128,128], index: 1, kind: input, shape index: {}]   ;;  %s265_s0 = inlined_call_operand.vmem [shape: f32[16,128], index: 0, kind: input, shape index: {}]   ;;  %s266_s2 = inlined_call_operand.vmem [shape: f32[1,128], index: 2, kind: input, shape index: {}]   ;;  %s267_s3 = inlined_call_operand.vmem [shape: f32[16,128], index: 3, kind: output, shape index: {}]  }
   0x1   :  { %173 = vmatprep.subr.bf16.mxu0 %v203_v0  ;;  %v195_v1 = vld [vmem:[%s264_s1] sm:$0xff]   ;;  %189 = vmatprep.mubr.msk.bf16.mxu0 %vm204_vm0, %v203_v0  ;;  %v196_v2 = vld [vmem:[%s264_s1 + $0x8] sm:$0xff]   ;;  %v197_v3 = vld [vmem:[%s264_s1 + $0x10] sm:$0xff]  }
   0x2   :  { %174 = vmatpush3.bf16.msra.mxu0 %v195_v1  ;;  %v198_v4 = vld [vmem:[%s264_s1 + $0x18] sm:$0xff]   ;;  %v199_v5 = vld [vmem:[%s264_s1 + $0x20] sm:$0xff]   ;;  %v200_v6 = vld [vmem:[%s264_s1 + $0x28] sm:$0xff]  }
   0x3   :  { %175 = vmatprep.subr.bf16.mxu0 %v203_v0  ;;  %v201_v7 = vld [vmem:[%s264_s1 + $0x30] sm:$0xff]   ;;  %v202_v8 = vld [vmem:[%s264_s1 + $0x38] sm:$0xff]   ;;  %v23_v9 = vld [vmem:[%s265_s0] sm:$0xff] }
   0x4   :  { %v24_v10 = vld [vmem:[%s265_s0 + $0x8] sm:$0xff]  ;;  %v163_v12 = vld [vmem:[%s266_s2] ss:$0 sm:$0xff] }
   0x5   :  { %v25_v11 = vpack.c.bf16 %v24_v10, %v23_v9 }
   0x6   :  { %176 = vmatpush3.bf16.msra.mxu0 %v196_v2 }
   0x7   :  { %177 = vmatprep.subr.bf16.mxu0 %v203_v0 }
   0xa   :  { %178 = vmatpush3.bf16.msra.mxu0 %v197_v3 }
   0xb   :  { %179 = vmatprep.subr.bf16.mxu0 %v203_v0 }
   0xe   :  { %180 = vmatpush3.bf16.msra.mxu0 %v198_v4 }
   0xf   :  { %181 = vmatprep.subr.bf16.mxu0 %v203_v0 }
  0x12   :  { %182 = vmatpush3.bf16.msra.mxu0 %v199_v5 }
  0x13   :  { %183 = vmatprep.subr.bf16.mxu0 %v203_v0 }
  0x16   :  { %184 = vmatpush3.bf16.msra.mxu0 %v200_v6 }
  0x17   :  { %185 = vmatprep.subr.bf16.mxu0 %v203_v0 }
  0x1a   :  { %186 = vmatpush3.bf16.msra.mxu0 %v201_v7 }
  0x1b   :  { %187 = vmatprep.subr.bf16.mxu0 %v203_v0 }
  0x1e   :  { %188 = vmatpush3.bf16.msra.mxu0 %v202_v8 }
  0x21   :  { %190 = vmatmul.mubr.bf16.vlgmr.msra.gmra.mrb[0].mxu0 %v25_v11 }
  0xf4   :  { %v124_v13 = vpop.f32.mrb[0].mxu0 }
  0xf5   :  { %v147_v14 = vadd.f32 %v163_v12, %v124_v13  ;;  %v191_v15 = vpop.f32.mrb[1].mxu0 }
  0xf6   :  { %v127_v16 = vpop.f32.mrb[2].mxu0 }
  0xf7   :  { %149 = vst [vmem:[%s267_s3] sm:$0xff] %v147_v14  ;;  %v148_v17 = vadd.f32 %v163_v12, %v127_v16  ;;  %v192_v18 = vpop.f32.mrb[3].mxu0 }
  0xf9   :  { %150 = vst [vmem:[%s267_s3 + $0x8] sm:$0xff] %v148_v17 }

// kernel: image_captioning_forward.29
= control target key start
LH: loop header
LB: loop body
LE: loop exit
PB: predicated region body
PF: predicated region fallthrough
CT: control target
= control target key end

     0   :  { %v272_v0 = vmov 0.0   ;;  %vm273_vm0 = vmmov 0   ;;  %v164_v12 = vlaneseq  ;;  %s360_s1 = inlined_call_operand.vmem [shape: bf16[128,128], index: 1, kind: input, shape index: {}]   ;;  %s361_s0 = inlined_call_operand.vmem [shape: f32[16,128], index: 0, kind: input, shape index: {}]   ;;  %s362_s2 = inlined_call_operand.vmem [shape: f32[1,128], index: 2, kind: input, shape index: {}]   ;;  %s363_s3 = inlined_call_operand.vmem [shape: f32[16,128], index: 3, kind: input, shape index: {}]   ;;  %s364_s4 = inlined_call_operand.vmem [shape: f32[1,128], index: 4, kind: input, shape index: {}]   ;;  %s365_s5 = inlined_call_operand.vmem [shape: f32[1,128], index: 5, kind: input, shape index: {}]   ;;  %s366_s6 = inlined_call_operand.vmem [shape: f32[16,128], index: 6, kind: output, shape index: {}]  }
   0x1   :  { %238 = vmatprep.subr.bf16.mxu0 %v272_v0  ;;  %v260_v1 = vld [vmem:[%s360_s1] sm:$0xff]   ;;  %254 = vmatprep.mubr.msk.bf16.mxu0 %vm273_vm0, %v272_v0  ;;  %v261_v2 = vld [vmem:[%s360_s1 + $0x8] sm:$0xff]   ;;  %v262_v3 = vld [vmem:[%s360_s1 + $0x10] sm:$0xff]  }
   0x2   :  { %239 = vmatpush3.bf16.msra.mxu0 %v260_v1  ;;  %v263_v4 = vld [vmem:[%s360_s1 + $0x18] sm:$0xff]   ;;  %v264_v5 = vld [vmem:[%s360_s1 + $0x20] sm:$0xff]   ;;  %v265_v6 = vld [vmem:[%s360_s1 + $0x28] sm:$0xff]   ;;  %v165_v13 = vand.u32 127, %v164_v12 }
   0x3   :  { %240 = vmatprep.subr.bf16.mxu0 %v272_v0  ;;  %v266_v7 = vld [vmem:[%s360_s1 + $0x30] sm:$0xff]   ;;  %v267_v8 = vld [vmem:[%s360_s1 + $0x38] sm:$0xff]   ;;  %v32_v9 = vld [vmem:[%s361_s0] sm:$0xff] }
   0x4   :  { %v33_v10 = vld [vmem:[%s361_s0 + $0x8] sm:$0xff]  ;;  %v225_v14 = vld [vmem:[%s362_s2] ss:$0 sm:$0xff]  ;;  %vm166_vm1 = vcmp.lt.s32.totalorder %v165_v13, 32 }
   0x5   :  { %v34_v11 = vpack.c.bf16 %v33_v10, %v32_v9  ;;  %v158_v16 = vld [vmem:[%s363_s3] sm:$0xff]  ;;  %v159_v20 = vld [vmem:[%s363_s3 + $0x8] sm:$0xff]  ;;  %v226_v21 = vsel %vm166_vm1, 1.0, %v272_v0 }
   0x6   :  { %241 = vmatpush3.bf16.msra.mxu0 %v261_v2  ;;  %v227_v45 = vld [vmem:[%s364_s4] ss:$0 sm:$0xff] }
   0x7   :  { %242 = vmatprep.subr.bf16.mxu0 %v272_v0  ;;  %v228_v47 = vld [vmem:[%s365_s5] ss:$0 sm:$0xff] }
   0xa   :  { %243 = vmatpush3.bf16.msra.mxu0 %v262_v3 }
   0xb   :  { %244 = vmatprep.subr.bf16.mxu0 %v272_v0 }
   0xe   :  { %245 = vmatpush3.bf16.msra.mxu0 %v263_v4 }
   0xf   :  { %246 = vmatprep.subr.bf16.mxu0 %v272_v0 }
  0x12   :  { %247 = vmatpush3.bf16.msra.mxu0 %v264_v5 }
  0x13   :  { %248 = vmatprep.subr.bf16.mxu0 %v272_v0 }
  0x16   :  { %249 = vmatpush3.bf16.msra.mxu0 %v265_v6 }
  0x17   :  { %250 = vmatprep.subr.bf16.mxu0 %v272_v0 }
  0x1a   :  { %251 = vmatpush3.bf16.msra.mxu0 %v266_v7 }
  0x1b   :  { %252 = vmatprep.subr.bf16.mxu0 %v272_v0 }
  0x1e   :  { %253 = vmatpush3.bf16.msra.mxu0 %v267_v8 }
  0x21   :  { %255 = vmatmul.mubr.bf16.vlgmr.msra.gmra.mrb[0].mxu0 %v34_v11 }
  0xf4   :  { %v133_v15 = vpop.f32.mrb[0].mxu0 }
  0xf5   :  { %v156_v17 = vadd.f32 %v225_v14, %v133_v15  ;;  %v256_v18 = vpop.f32.mrb[1].mxu0 }
  0xf6   :  { %v136_v19 = vpop.f32.mrb[2].mxu0 }
  0xf7   :  { %v157_v22 = vadd.f32 %v225_v14, %v136_v19  ;;  %v257_v23 = vpop.f32.mrb[3].mxu0  ;;  %v160_v24 = vadd.f32 %v158_v16, %v156_v17 }
  0xf9   :  { %v161_v25 = vadd.f32 %v159_v20, %v157_v22  ;;  %v169_v26 = vmul.f32 %v226_v21, %v160_v24 }
  0xfb   :  { %171 = vadd.xlane.f32.xlu0 %v169_v26  ;;  %v170_v27 = vmul.f32 %v226_v21, %v161_v25 }
  0xff   :  { %173 = vadd.xlane.f32.xlu0 %v170_v27 }
 0x188   :  { %v172_v28 = vpop.xlane.xlu0 %171 }
 0x189   :  { %v175_v29 = vmul.f32 0.03125, %v172_v28 }
 0x18b   :  { %v177_v30 = vsub.f32 %v160_v24, %v175_v29 }
 0x18c   :  { %v174_v31 = vpop.xlane.xlu0 %173 }
 0x18d   :  { %v176_v32 = vmul.f32 0.03125, %v174_v31  ;;  %v179_v33 = vmul.f32 %v226_v21, %v177_v30 }
 0x18f   :  { %v178_v34 = vsub.f32 %v161_v25, %v176_v32  ;;  %v181_v35 = vmul.f32 %v179_v33, %v179_v33 }
 0x191   :  { %183 = vadd.xlane.f32.xlu1 %v181_v35  ;;  %v180_v36 = vmul.f32 %v226_v21, %v178_v34 }
 0x193   :  { %v182_v37 = vmul.f32 %v180_v36, %v180_v36 }
 0x195   :  { %185 = vadd.xlane.f32.xlu1 %v182_v37 }
 0x21e   :  { %v184_v38 = vpop.xlane.xlu1 %183 }
 0x21f   :  { %v187_v39 = vmul.f32 0.03125, %v184_v38 }
 0x221   :  { %v189_v40 = vadd.f32 1e-05, %v187_v39 }
 0x222   :  { %v186_v41 = vpop.xlane.xlu1 %185 }
 0x223   :  { %268 = vrsqrt.f32 %v189_v40  ;;  %v188_v42 = vmul.f32 0.03125, %v186_v41 }
 0x225   :  { %v190_v43 = vadd.f32 1e-05, %v188_v42 }
 0x227   :  { %270 = vrsqrt.f32 %v190_v43 }
 0x22d   :  { %v269_v44 = vpop.eup %268 }
 0x22e   :  { %v193_v46 = vmul.f32 %v269_v44, %v179_v33 }
 0x230   :  { %v201_v48 = vmul.f32 %v227_v45, %v193_v46 }
 0x231   :  { %v271_v49 = vpop.eup %270 }
 0x232   :  { %v209_v50 = vadd.f32 %v228_v47, %v201_v48  ;;  %v194_v51 = vmul.f32 %v271_v49, %v180_v36 }
 0x234   :  { %211 = vst [vmem:[%s366_s6] sm:$0xff] %v209_v50  ;;  %v202_v52 = vmul.f32 %v227_v45, %v194_v51 }
 0x236   :  { %v210_v53 = vadd.f32 %v228_v47, %v202_v52 }
 0x238   :  { %212 = vst [vmem:[%s366_s6 + $0x8] sm:$0xff] %v210_v53 }

// kernel: image_captioning_forward.28
= control target key start
LH: loop header
LB: loop body
LE: loop exit
PB: predicated region body
PF: predicated region fallthrough
CT: control target
= control target key end

     0   :  { %s797_s6 = smov 0   ;;  %s905_s0 = inlined_call_operand.vmem [shape: f32[2,8,128], index: 0, kind: input, shape index: {}]   ;;  %s906_s1 = inlined_call_operand.vmem [shape: f32[2,8,128], index: 1, kind: output, shape index: {}]  }
   0x1 LB: > { %s642_s7 = sadd.s32 4294967295, %s769_s6   ;;  %p646_p0 = scmp.ge.s32.totalorder %s769_s6, 1  ;;  %s769_s6 = sphi %s797_s6, %s11_s6  }
   0x2   : > { %p86_p1 = scmp.lt.s32.totalorder %s769_s6, 3 }
   0x4   : > { %p87_p2 = pnand %p646_p0, %p86_p1 }
   0x5   : > { %p104_p3 = scmp.lt.s32.totalorder (!%p87_p2), %s642_s7, 1  ;;  %v771_v0 = vmov (!%p87_p2), 0.0   ;;  %vm772_vm0 = vmmov (!%p87_p2), 0   ;;  %s773_s12 = smov (!%p87_p2), 96   ;;  %vm123_vm1 = vcmask (!%p87_p2), 64512   ;;  %v115_v5 = vlaneseq (!%p87_p2) }
   0x6   : > { %90 = sbr.rel (%p87_p2) target bundleno = 1603 (0x643), region = 24  ;;  %675 = vmatprep.subr.bf16.mxu0 (!%p87_p2), %v771_v0  ;;  %677 = vmatprep.mubr.msk.bf16.mxu0 (!%p87_p2), %vm772_vm0, %v771_v0  ;;  %s774_s13 = smov (!%p87_p2), 64   ;;  %vm189_vm3 = vcmask (!%p87_p2), 1043456   ;;  %vm582_vm4 = vcmask (!%p87_p2), 130048   ;;  %vm584_vm5 = vcmask (!%p87_p2), 195584   ;;  %vm586_vm6 = vcmask (!%p87_p2), 261120  }
   0x7   : > { %681 = vmatprep.subr.bf16.mxu1 (!%p87_p2), %v771_v0  ;;  %683 = vmatprep.mubr.msk.bf16.mxu1 (!%p87_p2), %vm772_vm0, %v771_v0  ;;  %s775_s14 = smov (!%p87_p2), 88   ;;  %v830_v6 = vshrl.u32 (!%p87_p2), %v115_v5, 7  ;;  %v832_v7 = vand.u32 (!%p87_p2), 127, %v115_v5  ;;  %s776_s15 = smov (!%p87_p2), 72  }
   0x8   : > { %s777_s16 = smov (!%p87_p2), 120   ;;  %s778_s17 = smov (!%p87_p2), 80  }
   0x9   : > { %vm119_vm2 = vcmp.le.s32.totalorder (!%p87_p2), %v832_v7, %v830_v6  ;;  %s779_s18 = smov (!%p87_p2), 112   ;;  %s780_s19 = smov (!%p87_p2), 104  }
   0xa   : > { %s781_s20 = smov (!%p87_p2), 56   ;;  %s782_s21 = smov (!%p87_p2), 48  }
   0xb   : > { %s783_s22 = smov (!%p87_p2), 40   ;;  %s784_s23 = smov (!%p87_p2), 8  }
   0xc   : > { %s785_s24 = smov (!%p87_p2), 16   ;;  %s786_s25 = smov (!%p87_p2), 24  }
   0xd   : > { %s908_s7 = smov (!%p104_p3, %s642_s7), 1 }
   0xe   : > { %s647_s8 = sshll.u32 %s908_s7, 3 }
   0xf   : > { %s107_s11 = scalar_lea.vmem %s905_s0, %s647_s8  ;;  %s111_s28 = scalar_lea.vmem %s906_s1, %s647_s8 }
  0x10   : > { %v113_v1 = vld [vmem:[%s107_s11] sm:$0xff] }
  0x11   : > { %v819_v2 = vpack.c.bf16 %v113_v1, %v113_v1 }
  0x13   : > { %121 = vrot.lane.b32.xlu0 %v819_v2, %s773_s12  ;;  %184 = vrot.lane.b32.xlu1 %v819_v2, %s774_s13 }
  0x17   : > { %235 = vrot.lane.b32.xlu1 %v819_v2, %s775_s14 }
  0x85   : > { %v122_v3 = vpop.permute.xlu0 %121  ;;  %v185_v15 = vpop.permute.xlu1 %184 }
  0x86   : > { %v128_v4 = vsel %vm123_vm1, %v122_v3, 0  ;;  %v191_v16 = vsel %vm189_vm3, %v185_v15, 0 }
  0x87   : > { %676 = vmatpush3.bf16.xpose.msra.mxu0 %v128_v4  ;;  %682 = vmatpush3.bf16.msra.mxu1 %v191_v16 }
  0x88   : > { %693 = vmatprep.subr.bf16.mxu0 %v771_v0  ;;  %687 = vmatprep.subr.bf16.mxu1 %v771_v0 }
  0x89   : > { %v236_v22 = vpop.permute.xlu1 %235 }
  0x8a   : > { %v241_v28 = vsel %vm123_vm1, %v236_v22, 0 }
  0x8e   : > { %678 = vmatmul.mubr.msk.bf16.vlgmr.msra.gmra.mrb[0].mxu0 %vm123_vm1, %v819_v2 }
  0x8f   : > { %695 = vmatprep.mubr.msk.bf16.mxu0 %vm772_vm0, %v771_v0 }
 0x161   : > { %v164_v8 = vpop.f32.mrb[0].mxu0 }
 0x162   : > { %v170_v9 = vmul.f32 0.35355338, %v164_v8  ;;  %v679_v10 = vpop.f32.mrb[1].mxu0 }
 0x163   : > { %v167_v11 = vpop.f32.mrb[2].mxu0 }
 0x164   : > { %v680_v12 = vpop.f32.mrb[3].mxu0  ;;  %v171_v13 = vsel %vm119_vm2, %v170_v9, -1e+30 }
 0x165   : > { %v172_v14 = vsel %vm123_vm1, %v171_v13, -inf }
 0x166   : > { %173 = vmax.xlane.f32.xlu0 %v172_v14 }
 0x17c   : > { %459 = vrot.lane.b32.xlu0 %v819_v2, %s776_s15 }
 0x1f3   : > { %v174_v17 = vpop.xlane.xlu0 %173 }
 0x1f4   : > { %v175_v18 = vsub.f32 %v171_v13, %v174_v17 }
 0x1f6   : > { %v176_v19 = vmul.f32 1.442695, %v175_v18 }
 0x1f7   : > { %v460_v31 = vpop.permute.xlu0 %459 }
 0x1f8   : > { %747 = vpow2.f32 %v176_v19  ;;  %v465_v33 = vsel %vm123_vm1, %v460_v31, 0 }
 0x202   : > { %v748_v20 = vpop.eup %747 }
 0x203   : > { %v178_v21 = vsel %vm123_vm1, %v748_v20, 0.0 }
 0x204   : > { %179 = vadd.xlane.f32.xlu1 %v178_v21 }
 0x215   : > { %233 = vrot.lane.b32.xlu1 %v819_v2, %s777_s16 }
 0x219   : > { %347 = vrot.lane.b32.xlu1 %v819_v2, %s778_s17 }
 0x21d   : > { %345 = vrot.lane.b32.xlu1 %v819_v2, %s779_s18 }
 0x221   : > { %457 = vrot.lane.b32.xlu1 %v819_v2, %s780_s19 }
 0x291   : > { %v180_v23 = vpop.xlane.xlu1 %179 }
 0x292   : > { %749 = vrcp.f32 %v180_v23 }
 0x295   : > { %v234_v26 = vpop.permute.xlu1 %233 }
 0x299   : > { %v348_v29 = vpop.permute.xlu1 %347 }
 0x29a   : > { %v353_v30 = vsel %vm123_vm1, %v348_v29, 0 }
 0x29c   : > { %v750_v24 = vpop.eup %749 }
 0x29d   : > { %v182_v25 = vmul.f32 %v750_v24, %v748_v20  ;;  %v346_v32 = vpop.permute.xlu1 %345 }
 0x29f   : > { %v183_v27 = vpack.c.bf16 %v182_v25, %v182_v25 }
 0x2a1   : > { %684 = vmatmul.mubr.msk.bf16.vlgmr.msra.gmra.mrb[0].mxu1 %vm123_vm1, %v183_v27  ;;  %v458_v34 = vpop.permute.xlu1 %457 }
 0x2a2   : > { %688 = vmatpush3.bf16.xpose.msra.mxu1 %v241_v28  ;;  %689 = vmatprep.mubr.msk.bf16.mxu1 %vm772_vm0, %v771_v0 }
 0x2a3   : > { %699 = vmatprep.subr.bf16.mxu1 %v771_v0 }
 0x2a9   : > { %690 = vmatmul.mubr.msk.bf16.vlgmr.msra.gmra.mrb[4].mxu1 %vm123_vm1, %v234_v26 }
 0x2aa   : > { %700 = vmatpush3.bf16.xpose.msra.mxu1 %v353_v30  ;;  %701 = vmatprep.mubr.msk.bf16.mxu1 %vm772_vm0, %v771_v0 }
 0x2ab   : > { %711 = vmatprep.subr.bf16.mxu1 %v771_v0 }
 0x2b1   : > { %702 = vmatmul.mubr.msk.bf16.vlgmr.msra.gmra.mrb[8].mxu1 %vm123_vm1, %v346_v32 }
 0x2b2   : > { %712 = vmatpush3.bf16.xpose.msra.mxu1 %v465_v33  ;;  %713 = vmatprep.mubr.msk.bf16.mxu1 %vm772_vm0, %v771_v0 }
 0x2b9   : > { %714 = vmatmul.mubr.msk.bf16.vlgmr.msra.gmra.mrb[12].mxu1 %vm123_vm1, %v458_v34 }
 0x374   : > { %v863_v35 = vpop.f32.mrb[0].mxu1 }
 0x375   : > { %v685_v36 = vpop.f32.mrb[1].mxu1 }
 0x376   : > { %v230_v37 = vpop.f32.mrb[2].mxu1 }
 0x377   : > { %v686_v38 = vpop.f32.mrb[3].mxu1 }
 0x37c   : > { %v277_v39 = vpop.f32.mrb[4].mxu1 }
 0x37d   : > { %v283_v40 = vmul.f32 0.35355338, %v277_v39  ;;  %v691_v41 = vpop.f32.mrb[5].mxu1 }
 0x37e   : > { %v280_v42 = vpop.f32.mrb[6].mxu1 }
 0x37f   : > { %v692_v43 = vpop.f32.mrb[7].mxu1  ;;  %v284_v44 = vsel %vm119_vm2, %v283_v40, -1e+30 }
 0x380   : > { %v285_v45 = vsel %vm123_vm1, %v284_v44, -inf }
 0x381   : > { %286 = vmax.xlane.f32.xlu1 %v285_v45 }
 0x384   : > { %v389_v46 = vpop.f32.mrb[8].mxu1 }
 0x385   : > { %v395_v47 = vmul.f32 0.35355338, %v389_v46  ;;  %v703_v48 = vpop.f32.mrb[9].mxu1 }
 0x386   : > { %v392_v49 = vpop.f32.mrb[10].mxu1 }
 0x387   : > { %v396_v50 = vsel %vm119_vm2, %v395_v47, -1e+30  ;;  %v704_v51 = vpop.f32.mrb[11].mxu1 }
 0x388   : > { %v397_v52 = vsel %vm123_vm1, %v396_v50, -inf }
 0x389   : > { %398 = vmax.xlane.f32.xlu0 %v397_v52 }
 0x38c   : > { %v501_v53 = vpop.f32.mrb[12].mxu1 }
 0x38d   : > { %v507_v54 = vmul.f32 0.35355338, %v501_v53  ;;  %v715_v55 = vpop.f32.mrb[13].mxu1 }
 0x38e   : > { %v504_v56 = vpop.f32.mrb[14].mxu1 }
 0x38f   : > { %v508_v57 = vsel %vm119_vm2, %v507_v54, -1e+30  ;;  %v716_v58 = vpop.f32.mrb[15].mxu1 }
 0x390   : > { %v509_v59 = vsel %vm123_vm1, %v508_v57, -inf }
 0x391   : > { %510 = vmax.xlane.f32.xlu1 %v509_v59 }
 0x40e   : > { %v287_v60 = vpop.xlane.xlu1 %286 }
 0x40f   : > { %v288_v61 = vsub.f32 %v284_v44, %v287_v60 }
 0x411   : > { %v289_v62 = vmul.f32 1.442695, %v288_v61 }
 0x413   : > { %751 = vpow2.f32 %v289_v62 }
 0x416   : > { %v399_v7 = vpop.xlane.xlu0 %398 }
 0x417   : > { %v400_v9 = vsub.f32 %v396_v50, %v399_v7 }
 0x419   : > { %v401_v10 = vmul.f32 1.442695, %v400_v9 }
 0x41d   : > { %v752_v63 = vpop.eup %751 }
 0x41e   : > { %v511_v1 = vpop.xlane.xlu1 %510  ;;  %v291_v3 = vsel %vm123_vm1, %v752_v63, 0.0 }
 0x41f   : > { %v512_v4 = vsub.f32 %v508_v57, %v511_v1  ;;  %292 = vadd.xlane.f32.xlu1 %v291_v3 }
 0x421   : > { %v513_v5 = vmul.f32 1.442695, %v512_v4 }
 0x423   : > { %753 = vpow2.f32 %v513_v5 }
 0x424   : > { %755 = vpow2.f32 %v401_v10 }
 0x42d   : > { %v754_v8 = vpop.eup %753 }
 0x42e   : > { %v515_v6 = vsel %vm123_vm1, %v754_v8, 0.0  ;;  %v756_v11 = vpop.eup %755 }
 0x42f   : > { %516 = vadd.xlane.f32.xlu0 %v515_v6  ;;  %v403_v12 = vsel %vm123_vm1, %v756_v11, 0.0 }
 0x430   : > { %297 = vrot.lane.b32.xlu1 %v819_v2, %s781_s20 }
 0x445   : > { %409 = vrot.lane.b32.xlu0 %v819_v2, %s782_s21 }
 0x454   : > { %404 = vadd.xlane.f32.xlu1 %v403_v12 }
 0x465   : > { %521 = vrot.lane.b32.xlu1 %v819_v2, %s783_s22 }
 0x4ac   : > { %v293_v13 = vpop.xlane.xlu1 %292 }
 0x4ad   : > { %757 = vrcp.f32 %v293_v13 }
 0x4b0   : > { %v298_v14 = vpop.permute.xlu1 %297 }
 0x4b1   : > { %v303_v15 = vsel %vm189_vm3, %v298_v14, 0 }
 0x4b2   : > { %694 = vmatpush3.bf16.msra.mxu0 %v303_v15 }
 0x4b3   : > { %705 = vmatprep.subr.bf16.mxu0 %v771_v0 }
 0x4b7   : > { %v758_v16 = vpop.eup %757 }
 0x4b8   : > { %v295_v17 = vmul.f32 %v758_v16, %v752_v63 }
 0x4ba   : > { %v296_v18 = vpack.c.bf16 %v295_v17, %v295_v17 }
 0x4bc   : > { %696 = vmatmul.mubr.msk.bf16.vlgmr.msra.gmra.mrb[4].mxu0 %vm123_vm1, %v296_v18  ;;  %v517_v19 = vpop.xlane.xlu0 %516 }
 0x4bd   : > { %707 = vmatprep.mubr.msk.bf16.mxu0 %vm772_vm0, %v771_v0 }
 0x4c0   : > { %v410_v20 = vpop.permute.xlu0 %409 }
 0x4c1   : > { %v415_v2 = vsel %vm189_vm3, %v410_v20, 0 }
 0x4c2   : > { %706 = vmatpush3.bf16.msra.mxu0 %v415_v2 }
 0x4c3   : > { %717 = vmatprep.subr.bf16.mxu0 %v771_v0 }
 0x4e1   : > { %v405_v21 = vpop.xlane.xlu1 %404 }
 0x4e2   : > { %759 = vrcp.f32 %v405_v21 }
 0x4e3   : > { %761 = vrcp.f32 %v517_v19 }
 0x4e5   : > { %v522_v23 = vpop.permute.xlu1 %521 }
 0x4e6   : > { %v527_v25 = vsel %vm189_vm3, %v522_v23, 0 }
 0x4ec   : > { %v760_v22 = vpop.eup %759 }
 0x4ed   : > { %v407_v24 = vmul.f32 %v760_v22, %v756_v11  ;;  %v762_v27 = vpop.eup %761 }
 0x4ee   : > { %v519_v28 = vmul.f32 %v762_v27, %v754_v8 }
 0x4ef   : > { %v408_v26 = vpack.c.bf16 %v407_v24, %v407_v24 }
 0x4f0   : > { %v520_v29 = vpack.c.bf16 %v519_v28, %v519_v28 }
 0x4f1   : > { %708 = vmatmul.mubr.msk.bf16.vlgmr.msra.gmra.mrb[8].mxu0 %vm123_vm1, %v408_v26 }
 0x4f2   : > { %718 = vmatpush3.bf16.msra.mxu0 %v527_v25  ;;  %719 = vmatprep.mubr.msk.bf16.mxu0 %vm772_vm0, %v771_v0 }
 0x4f9   : > { %720 = vmatmul.mubr.msk.bf16.vlgmr.msra.gmra.mrb[12].mxu0 %vm123_vm1, %v520_v29 }
 0x58f   : > { %v339_v30 = vpop.f32.mrb[4].mxu0 }
 0x590   : > { %570 = vrot.lane.b32.xlu1 %v339_v30, %s784_s23  ;;  %v697_v31 = vpop.f32.mrb[5].mxu0 }
 0x591   : > { %v342_v32 = vpop.f32.mrb[6].mxu0 }
 0x592   : > { %v698_v33 = vpop.f32.mrb[7].mxu0 }
 0x5c4   : > { %v451_v34 = vpop.f32.mrb[8].mxu0 }
 0x5c5   : > { %574 = vrot.lane.b32.xlu0 %v451_v34, %s785_s24  ;;  %v709_v36 = vpop.f32.mrb[9].mxu0 }
 0x5c6   : > { %v454_v37 = vpop.f32.mrb[10].mxu0 }
 0x5c7   : > { %v710_v38 = vpop.f32.mrb[11].mxu0 }
 0x5cc   : > { %v563_v39 = vpop.f32.mrb[12].mxu0 }
 0x5cd   : > { %578 = vrot.lane.b32.xlu1 %v563_v39, %s786_s25  ;;  %v721_v0 = vpop.f32.mrb[13].mxu0 }
 0x5ce   : > { %v566_v40 = vpop.f32.mrb[14].mxu0 }
 0x5cf   : > { %v722_v41 = vpop.f32.mrb[15].mxu0 }
 0x602   : > { %v571_v42 = vpop.permute.xlu1 %570 }
 0x603   : > { %v581_v44 = vsel %vm123_vm1, %v863_v35, %v571_v42 }
 0x637   : > { %v575_v43 = vpop.permute.xlu0 %574 }
 0x638   : > { %v583_v45 = vsel %vm582_vm4, %v581_v44, %v575_v43 }
 0x63f   : > { %v579_v46 = vpop.permute.xlu1 %578 }
 0x640   : > { %v585_v47 = vsel %vm584_vm5, %v583_v45, %v579_v46 }
 0x641   : > { %v587_v48 = vsel %vm586_vm6, %v585_v47, 0.0 }
 0x642   : > { %588 = vst [vmem:[%s111_s28] sm:$0xff] %v587_v48 }
 0x643 PF: > { %s11_s6 = sadd.s32 1, %s769_s6  }
 0x644   : > { %p8_p4 = scmp.ge.s32.totalorder %s11_s6, 4  }
 0x646   :  { %10 = sbr.rel (!%p8_p4) target bundleno = 1 (0x1), region = 54 }

// kernel: image_captioning_forward.22
= control target key start
LH: loop header
LB: loop body
LE: loop exit
PB: predicated region body
PF: predicated region fallthrough
CT: control target
= control target key end

     0   :  { %s1665_s12 = smov 0   ;;  %s1667_s13 = smov 0   ;;  %s2372_s0 = inlined_call_operand.vmem [shape: f32[2,18,18,3], index: 0, kind: input, shape index: {}]   ;;  %s2373_s1 = inlined_call_operand.vmem [shape: bf16[27,16], index: 1, kind: input, shape index: {}]   ;;  %s2374_s2 = inlined_call_operand.vmem [shape: f32[1,16], index: 2, kind: input, shape index: {}]   ;;  %s2375_s3 = inlined_call_operand.vmem [shape: f32[2,16,16,16], index: 3, kind: output, shape index: {}]  }
   0x1   :  { %s1669_s14 = smov 0   ;;  %s1671_s15 = smov 0  }
   0x2   :  { %s1673_s16 = smov 0  }
   0x3 LB: > { %s22_s17 = sadd.s32 1, %s1626_s14  ;;  %s25_s18 = sadd.s32 1, %s1630_s15  ;;  %s1634_s16 = sphi %s1673_s16, %s13_s16   ;;  %s1630_s15 = sphi %s1671_s15, %s2379_s15   ;;  %s1626_s14 = sphi %s1669_s14, %s2378_s14   ;;  %s1622_s13 = sphi %s1667_s13, %s2377_s13   ;;  %s1618_s12 = sphi %s1665_s12, %s2376_s12  }
   0x4   : > { %p23_p0 = scmp.ge.s32.totalorder %s22_s17, 2  ;;  %p1169_p1 = scmp.ge.s32.totalorder %s1634_s16, 1 }
   0x5   : > { %p151_p2 = scmp.lt.s32.totalorder %s1634_s16, 5 }
   0x6   : > { %s2381_s17 = smov (%p23_p0, %s22_s17), 0  ;;  %s2383_s18 = smov (!%p23_p0, %s25_s18), %s1630_s15 }
   0x7   : > { %p152_p3 = pnand %p1169_p1, %p151_p2  ;;  %p27_p4 = scmp.ge.s32.totalorder %s2383_s18, 2 }
   0x8   : > { %p180_p5 = scmp.lt.s32.totalorder (!%p152_p3), %s1622_s13, 1  ;;  %s1176_s19 = smul.u32 (!%p152_p3), 192, %s1618_s12  ;;  %vm254_vm0 = vcmask (!%p152_p3), 1046528   ;;  %vm295_vm1 = vcmask (!%p152_p3), 1045504   ;;  %vm937_vm2 = vcmask (!%p152_p3), 1044480   ;;  %vm746_vm3 = vcmask (!%p152_p3), 23552  }
   0x9   : > { %s2385_s18 = smov (%p27_p4, %s2383_s18), 0  ;;  %155 = sbr.rel (%p152_p3) target bundleno = 493 (0x1ed), region = 32 }
   0xa   : > { %s1636_s25 = smov (!%p152_p3), 3   ;;  %s1637_s26 = smov (!%p152_p3), 6   ;;  %vm763_vm4 = vcmask (!%p152_p3), 48128   ;;  %vm780_vm5 = vcmask (!%p152_p3), 72704   ;;  %vm797_vm6 = vcmask (!%p152_p3), 97280   ;;  %vm814_vm7 = vcmask (!%p152_p3), 121856  }
   0xb   : > { %s1638_s27 = smov (!%p152_p3), 9   ;;  %s1639_s28 = smov (!%p152_p3), 12   ;;  %vm831_vm8 = vcmask (!%p152_p3), 146432   ;;  %vm848_vm9 = vcmask (!%p152_p3), 171008   ;;  %vm865_vm10 = vcmask (!%p152_p3), 195584   ;;  %vm912_vm11 = vcmask (!%p152_p3), 220160  }
   0xc   : > { %s1640_s29 = smov (!%p152_p3), 15   ;;  %s1641_s30 = smov (!%p152_p3), 18   ;;  %vm1056_vm12 = vcmask (!%p152_p3), 130048  }
   0xd   : > { %s1642_s4 = smov (!%p152_p3), 21   ;;  %s1644_s9 = smov (!%p152_p3), 24  }
   0xe   : > { %s1171_s10 = sshll.u32 (!%p152_p3), %s1618_s12, 3 }
   0xf   : > { %p188_p6 = scmp.lt.s32.totalorder (!%p152_p3), %s1171_s10, 15 }
  0x10   : > { %s2387_s13 = smov (!%p180_p5, %s1622_s13), 1 }
  0x11   : > { %s1224_s20 = smul.u32 432, %s2387_s13  ;;  %s2389_s10 = smov (!%p188_p6, %s1171_s10), 15 }
  0x12   : > { %s1172_s11 = sshll.u32 %s2389_s10, 1 }
  0x13   : > { %s184_s23 = scalar_lea.vmem %s2372_s0, %s1224_s20 }
  0x14   : > { %s1704_s24 = scalar_lea.vmem %s184_s23, %s1176_s19  ;;  %s1173_s19 = sshll.u32 %s2387_s13, 5 }
  0x15   : > { %v1707_v0 = vld [vmem:[%s1704_s24 + $0x18] sm:$0xff]  ;;  %v1710_v1 = vld [vmem:[%s1704_s24 + $0x20] sm:$0xff]  ;;  %v1713_v2 = vld [vmem:[%s1704_s24 + $0x28] sm:$0x3]  ;;  %s192_s20 = sadd.s32 %s1173_s19, %s1172_s11 }
  0x16   : > { %v260_v3 = vrot.slane %v1707_v0, 1  ;;  %v261_v4 = vrot.slane %v1710_v1, 1  ;;  %v263_v5 = vrot.slane %v1713_v2, 1  ;;  %v1719_v6 = vld [vmem:[%s1704_s24] sm:$0xff]  ;;  %v1722_v7 = vld [vmem:[%s1704_s24 + $0x8] sm:$0xff]  ;;  %v1728_v11 = vld [vmem:[%s1704_s24 + $0x78] sm:$0xff]  ;;  %v1309_v63 = vpack.i.bf16 %v1710_v1, %v1707_v0 }
  0x17   : > { %v202_v8 = vld [vmem:[%s1704_s24 + $0x10] sm:$0x3]  ;;  %v255_v9 = vrot.slane %v1719_v6, 1  ;;  %v256_v10 = vrot.slane %v1722_v7, 1  ;;  %v1731_v12 = vld [vmem:[%s1704_s24 + $0x80] sm:$0xff]  ;;  %v304_v15 = vrot.slane %v1713_v2, 2 }
  0x18   : > { %v262_v13 = vsel %vm254_vm0, %v260_v3, %v261_v4  ;;  %v264_v14 = vsel %vm254_vm0, %v261_v4, %v263_v5  ;;  %v258_v16 = vrot.slane %v202_v8, 1  ;;  %v217_v17 = vld [vmem:[%s1704_s24 + $0x88] sm:$0x3]  ;;  %v1738_v18 = vld [vmem:[%s1704_s24 + $0x60] sm:$0xff]  ;;  %v299_v22 = vrot.slane %v202_v8, 2  ;;  %v1799_v61 = vld [vmem:[%s1704_s24 + $0x90] sm:$0xff] }
  0x19   : > { %v1741_v19 = vld [vmem:[%s1704_s24 + $0x68] sm:$0xff]  ;;  %v1743_v20 = vpack.i.bf16 %v264_v14, %v262_v13  ;;  %v257_v21 = vsel %vm254_vm0, %v255_v9, %v256_v10  ;;  %v280_v23 = vrot.slane %v1728_v11, 1  ;;  %v214_v24 = vld [vmem:[%s1704_s24 + $0x70] sm:$0x3]  ;;  %v281_v26 = vrot.slane %v1731_v12, 1  ;;  %v1802_v62 = vld [vmem:[%s1704_s24 + $0x98] sm:$0xff] }
  0x1a   : > { %v259_v25 = vsel %vm254_vm0, %v256_v10, %v258_v16  ;;  %v283_v27 = vrot.slane %v217_v17, 1  ;;  %v275_v28 = vrot.slane %v1738_v18, 1  ;;  %v276_v30 = vrot.slane %v1741_v19, 1  ;;  %v220_v2 = vld [vmem:[%s1704_s24 + $0xa0] sm:$0x3]  ;;  %v1810_v3 = vld [vmem:[%s1704_s24 + $0x30] sm:$0xff] }
  0x1b   : > { %1285 = vrot.lane.b32.xlu1 %v1743_v20, %s1636_s25  ;;  %v1274_v29 = vpack.i.bf16 %v259_v25, %v257_v21  ;;  %v278_v31 = vrot.slane %v214_v24, 1  ;;  %v316_v32 = vrot.slane %v1738_v18, 2  ;;  %v282_v33 = vsel %vm254_vm0, %v280_v23, %v281_v26  ;;  %v1813_v4 = vld [vmem:[%s1704_s24 + $0x38] sm:$0xff]  ;;  %v208_v8 = vld [vmem:[%s1704_s24 + $0x40] sm:$0x3]  ;;  %s1174_s23 = sshll.u32 %s192_s20, 3 }
  0x1c   : > { %v284_v34 = vsel %vm254_vm0, %v281_v26, %v283_v27  ;;  %v317_v35 = vrot.slane %v1741_v19, 2  ;;  %v319_v36 = vrot.slane %v214_v24, 2  ;;  %v277_v38 = vsel %vm254_vm0, %v275_v28, %v276_v30  ;;  %v226_v28 = vld [vmem:[%s1704_s24 + $0xd0] sm:$0x3] }
  0x1d   : > { %1275 = vrot.lane.b32.xlu0 %v1274_v29, %s1636_s25  ;;  %v1759_v37 = vpack.i.bf16 %v284_v34, %v282_v33  ;;  %v279_v39 = vsel %vm254_vm0, %v276_v30, %v278_v31  ;;  %v296_v40 = vrot.slane %v1719_v6, 2  ;;  %v297_v44 = vrot.slane %v1722_v7, 2  ;;  %v1847_v30 = vld [vmem:[%s1704_s24 + $0xc0] sm:$0xff]  ;;  %v1856_v34 = vld [vmem:[%s1704_s24 + $0xc8] sm:$0xff] }
  0x1e   : > { %v1764_v41 = vpack.i.bf16 %v279_v39, %v277_v38  ;;  %v318_v42 = vsel %vm295_vm1, %v316_v32, %v317_v35  ;;  %v320_v43 = vsel %vm295_vm1, %v317_v35, %v319_v36  ;;  %v321_v46 = vrot.slane %v1728_v11, 2 }
  0x1f   : > { %1290 = vrot.lane.b32.xlu1 %v1759_v37, %s1636_s25  ;;  %v1771_v45 = vpack.i.bf16 %v320_v43, %v318_v42  ;;  %v322_v47 = vrot.slane %v1731_v12, 2  ;;  %v324_v48 = vrot.slane %v217_v17, 2  ;;  %v298_v49 = vsel %vm295_vm1, %v296_v40, %v297_v44 }
  0x20   : > { %v300_v50 = vsel %vm295_vm1, %v297_v44, %v299_v22  ;;  %v301_v51 = vrot.slane %v1707_v0, 2  ;;  %v302_v52 = vrot.slane %v1710_v1, 2  ;;  %v1796_v60 = vpack.i.bf16 %v1731_v12, %v1728_v11 }
  0x21   : > { %1280 = vrot.lane.b32.xlu0 %v1764_v41, %s1636_s25  ;;  %v1294_v53 = vpack.i.bf16 %v300_v50, %v298_v49  ;;  %v323_v54 = vsel %vm295_vm1, %v321_v46, %v322_v47  ;;  %v325_v55 = vsel %vm295_vm1, %v322_v47, %v324_v48  ;;  %v1819_v5 = vpack.i.bf16 %v1802_v62, %v1799_v61 }
  0x22   : > { %v303_v56 = vsel %vm295_vm1, %v301_v51, %v302_v52  ;;  %v305_v57 = vsel %vm295_vm1, %v302_v52, %v304_v15  ;;  %v1787_v58 = vpack.i.bf16 %v325_v55, %v323_v54  ;;  %v285_v9 = vrot.slane %v1799_v61, 1  ;;  %v1876_v52 = vld [vmem:[%s1704_s24 + $0xe0] sm:$0xff] }
  0x23   : > { %1300 = vrot.lane.b32.xlu1 %v1771_v45, %s1637_s26  ;;  %v1790_v59 = vpack.i.bf16 %v305_v57, %v303_v56  ;;  %v286_v10 = vrot.slane %v1802_v62, 1  ;;  %v288_v13 = vrot.slane %v220_v2, 1  ;;  %v1827_v14 = vpack.i.bf16 %v1813_v4, %v1810_v3  ;;  %v1883_v56 = vld [vmem:[%s1704_s24 + $0xd8] sm:$0xff] }
  0x24   : > { %v265_v15 = vrot.slane %v1810_v3, 1  ;;  %v266_v16 = vrot.slane %v1813_v4, 1  ;;  %v268_v17 = vrot.slane %v208_v8, 1  ;;  %v326_v26 = vrot.slane %v1799_v61, 2 }
  0x25   : > { %1295 = vrot.lane.b32.xlu0 %v1294_v53, %s1637_s26  ;;  %v287_v21 = vsel %vm254_vm0, %v285_v9, %v286_v10  ;;  %v289_v22 = vsel %vm254_vm0, %v286_v10, %v288_v13  ;;  %v327_v27 = vrot.slane %v1802_v62, 2  ;;  %v329_v29 = vrot.slane %v220_v2, 2  ;;  %v229_v53 = vld [vmem:[%s1704_s24 + $0xe8] sm:$0x3] }
  0x26   : > { %v267_v23 = vsel %vm254_vm0, %v265_v15, %v266_v16  ;;  %v269_v24 = vsel %vm254_vm0, %v266_v16, %v268_v17  ;;  %v1841_v25 = vpack.i.bf16 %v289_v22, %v287_v21  ;;  %v306_v32 = vrot.slane %v1810_v3, 2 }
  0x27   : > { %1315 = vrot.lane.b32.xlu1 %v1787_v58, %s1637_s26  ;;  %v1851_v31 = vpack.i.bf16 %v269_v24, %v267_v23  ;;  %v307_v33 = vrot.slane %v1813_v4, 2  ;;  %v339_v35 = vrot.slane %v1847_v30, 1  ;;  %v309_v36 = vrot.slane %v208_v8, 2  ;;  %v1914_v23 = vld [vmem:[%s1704_s24 + $0xb0] sm:$0xff] }
  0x28   : > { %v340_v38 = vrot.slane %v1856_v34, 1  ;;  %v342_v39 = vrot.slane %v226_v28, 1  ;;  %v344_v40 = vrot.slane %v1847_v30, 2  ;;  %v345_v42 = vrot.slane %v1856_v34, 2 }
  0x29   : > { %1305 = vrot.lane.b32.xlu0 %v1790_v59, %s1637_s26  ;;  %v347_v43 = vrot.slane %v226_v28, 2  ;;  %v330_v44 = vsel %vm295_vm1, %v327_v27, %v329_v29  ;;  %v308_v48 = vsel %vm295_vm1, %v306_v32, %v307_v33  ;;  %v310_v54 = vsel %vm295_vm1, %v307_v33, %v309_v36  ;;  %v1925_v28 = vld [vmem:[%s1704_s24 + $0x48] sm:$0xff]  ;;  %v1928_v29 = vld [vmem:[%s1704_s24 + $0x50] sm:$0xff]  ;;  %v211_v33 = vld [vmem:[%s1704_s24 + $0x58] sm:$0x3] }
  0x2a   : > { %v341_v46 = vsel %vm254_vm0, %v339_v35, %v340_v38  ;;  %v343_v47 = vsel %vm254_vm0, %v340_v38, %v342_v39  ;;  %v346_v50 = vsel %vm295_vm1, %v344_v40, %v345_v42  ;;  %v353_v57 = vrot.slane %v1876_v52, 1 }
  0x2b   : > { %1320 = vrot.lane.b32.xlu1 %v1796_v60, %s1638_s27  ;;  %v1871_v49 = vpack.i.bf16 %v343_v47, %v341_v46  ;;  %v348_v51 = vsel %vm295_vm1, %v345_v42, %v347_v43  ;;  %v352_v8 = vrot.slane %v1883_v56, 1  ;;  %v357_v9 = vrot.slane %v1883_v56, 2  ;;  %v1594_v47 = vld [vmem:[%s2373_s1] sm:$0xff]  }
  0x2c   : > { %v1880_v55 = vpack.i.bf16 %v348_v51, %v346_v50  ;;  %v355_v10 = vrot.slane %v229_v53, 1  ;;  %v1895_v13 = vpack.i.bf16 %v310_v54, %v308_v48  ;;  %v360_v21 = vrot.slane %v229_v53, 2  ;;  %1200 = vmatprep.subr.bf16.mxu0 %v1594_v47  ;;  %v1595_v50 = vld [vmem:[%s2373_s1 + $0x8] sm:$0x3f]   ;;  %1220 = vmatprep.subr.bf16.mxu1 %v1594_v47 }
  0x2d   : > { %1310 = vrot.lane.b32.xlu0 %v1309_v63, %s1638_s27  ;;  %v358_v63 = vrot.slane %v1876_v52, 2  ;;  %v1898_v15 = vsel %vm254_vm0, %v352_v8, %v353_v57  ;;  %v291_v36 = vrot.slane %v1914_v23, 1  ;;  %v1384_v39 = vpack.i.bf16 %v1928_v29, %v1925_v28  ;;  %1201 = vmatpush3.bf16.msra.mxu0 %v1594_v47 }
  0x2e   : > { %v1904_v17 = vsel %vm254_vm0, %v353_v57, %v355_v10  ;;  %v271_v40 = vrot.slane %v1928_v29, 1  ;;  %v1643_v51 = vmov 65535   ;;  %1222 = vmatpush3.bf16.msra.mxu1 %v1594_v47  ;;  %v332_v8 = vrot.slane %v1914_v23, 2 }
  0x2f   : > { %1330 = vrot.lane.b32.xlu1 %v1819_v5, %s1638_s27  ;;  %v1901_v16 = vsel %vm295_vm1, %v357_v9, %v358_v63  ;;  %v1569_v22 = vpack.i.bf16 %v1904_v17, %v1898_v15  ;;  %v1917_v24 = vsel %vm295_vm1, %v358_v63, %v360_v21  ;;  %v938_v53 = vsel %vm937_vm2, 4294967295, %v1643_v51 }
  0x30   : > { %v939_v54 = vsel %vm295_vm1, %v938_v53, 0  ;;  %v311_v10 = vrot.slane %v1925_v28, 2  ;;  %v312_v21 = vrot.slane %v1928_v29, 2 }
  0x31   : > { %1325 = vrot.lane.b32.xlu0 %v1827_v14, %s1638_s27  ;;  %v941_v57 = vand.u32 %v1595_v50, %v939_v54 }
  0x33   : > { %1340 = vrot.lane.b32.xlu1 %v1759_v37, %s1639_s28  ;;  %1202 = vmatprep.subr.bf16.mxu0 %v941_v57 }
  0x34   : > { %1221 = vmatprep.subr.bf16.mxu1 %v941_v57  ;;  %1203 = vmatpush3.bf16.msra.mxu0 %v941_v57 }
  0x35   : > { %1335 = vrot.lane.b32.xlu0 %v1743_v20, %s1639_s28  ;;  %v328_v20 = vsel %vm295_vm1, %v326_v26, %v327_v27  ;;  %v223_v26 = vld [vmem:[%s1704_s24 + $0xb8] sm:$0x3]  ;;  %v1589_v27 = vpack.i.bf16 %v1917_v24, %v1901_v16  ;;  %1223 = vmatpush3.bf16.msra.mxu1 %v941_v57 }
  0x36   : > { %v1889_v2 = vpack.i.bf16 %v330_v44, %v328_v20  ;;  %v293_v38 = vrot.slane %v223_v26, 1  ;;  %v270_v20 = vrot.slane %v1925_v28, 1  ;;  %v334_v9 = vrot.slane %v223_v26, 2 }
  0x37   : > { %1350 = vrot.lane.b32.xlu1 %v1841_v25, %s1639_s28  ;;  %v313_v26 = vsel %vm295_vm1, %v311_v10, %v312_v21 }
  0x38   : > { %v294_v43 = vsel %vm254_vm0, %v291_v36, %v293_v38  ;;  %v272_v44 = vsel %vm254_vm0, %v270_v20, %v271_v40  ;;  %v335_v38 = vsel %vm295_vm1, %v332_v8, %v334_v9 }
  0x39   : > { %1345 = vrot.lane.b32.xlu0 %v1851_v31, %s1639_s28 }
  0x3b   : > { %1360 = vrot.lane.b32.xlu1 %v1787_v58, %s1640_s29 }
  0x3d   : > { %1355 = vrot.lane.b32.xlu0 %v1790_v59, %s1640_s29  ;;  %v1911_v59 = vld [vmem:[%s1704_s24 + $0xa8] sm:$0xff] }
  0x3e   : > { %v1389_v32 = vpack.i.bf16 %v1914_v23, %v1911_v59  ;;  %v290_v35 = vrot.slane %v1911_v59, 1  ;;  %v331_v63 = vrot.slane %v1911_v59, 2 }
  0x3f   : > { %1370 = vrot.lane.b32.xlu1 %v1889_v2, %s1640_s29 }
  0x40   : > { %v292_v42 = vsel %vm254_vm0, %v290_v35, %v291_v36  ;;  %v314_v35 = vrot.slane %v211_v33, 2  ;;  %v333_v36 = vsel %vm295_vm1, %v331_v63, %v332_v8 }
  0x41   : > { %1365 = vrot.lane.b32.xlu0 %v1895_v13, %s1640_s29  ;;  %v1409_v46 = vpack.i.bf16 %v294_v43, %v292_v42 }
  0x42   : > { %v315_v20 = vsel %vm295_vm1, %v312_v21, %v314_v35 }
  0x43   : > { %1380 = vrot.lane.b32.xlu1 %v1819_v5, %s1641_s30  ;;  %v273_v5 = vrot.slane %v211_v33, 1  ;;  %v1439_v33 = vpack.i.bf16 %v335_v38, %v333_v36 }
  0x45   : > { %1375 = vrot.lane.b32.xlu0 %v1827_v14, %s1641_s30  ;;  %v274_v14 = vsel %vm254_vm0, %v271_v40, %v273_v5  ;;  %v1434_v40 = vpack.i.bf16 %v315_v20, %v313_v26 }
  0x46   : > { %v1404_v48 = vpack.i.bf16 %v274_v14, %v272_v44 }
  0x47   : > { %1390 = vrot.lane.b32.xlu1 %v1389_v32, %s1641_s30 }
  0x49   : > { %1385 = vrot.lane.b32.xlu0 %v1384_v39, %s1641_s30 }
  0x4b   : > { %1400 = vrot.lane.b32.xlu1 %v1841_v25, %s1642_s4 }
  0x4d   : > { %1395 = vrot.lane.b32.xlu0 %v1851_v31, %s1642_s4 }
  0x4f   : > { %1410 = vrot.lane.b32.xlu1 %v1409_v46, %s1642_s4 }
  0x51   : > { %1405 = vrot.lane.b32.xlu0 %v1404_v48, %s1642_s4 }
  0x53   : > { %1420 = vrot.lane.b32.xlu1 %v1889_v2, %s1644_s9 }
  0x55   : > { %1415 = vrot.lane.b32.xlu0 %v1895_v13, %s1644_s9 }
  0x57   : > { %1430 = vrot.lane.b32.xlu1 %v1841_v25, %s1636_s25  ;;  %v1489_v25 = vpack.i.bf16 %v1856_v34, %v1847_v30  ;;  %v1549_v30 = vpack.i.bf16 %v1876_v52, %v1883_v56 }
  0x59   : > { %1425 = vrot.lane.b32.xlu0 %v1851_v31, %s1636_s25  ;;  %v1484_v31 = vpack.i.bf16 %v1741_v19, %v1738_v18 }
  0x5b   : > { %1440 = vrot.lane.b32.xlu1 %v1439_v33, %s1644_s9 }
  0x5d   : > { %1435 = vrot.lane.b32.xlu0 %v1434_v40, %s1644_s9 }
  0x5f   : > { %1450 = vrot.lane.b32.xlu1 %v1409_v46, %s1636_s25 }
  0x61   : > { %1445 = vrot.lane.b32.xlu0 %v1404_v48, %s1636_s25 }
  0x63   : > { %1460 = vrot.lane.b32.xlu1 %v1889_v2, %s1637_s26 }
  0x65   : > { %1455 = vrot.lane.b32.xlu0 %v1895_v13, %s1637_s26 }
  0x67   : > { %1470 = vrot.lane.b32.xlu1 %v1439_v33, %s1637_s26 }
  0x69   : > { %1465 = vrot.lane.b32.xlu0 %v1434_v40, %s1637_s26  ;;  %s2323_s26 = scalar_lea.vmem %s2375_s3, %s1174_s23 }
  0x6b   : > { %1480 = vrot.lane.b32.xlu1 %v1389_v32, %s1638_s27 }
  0x6d   : > { %1475 = vrot.lane.b32.xlu0 %v1384_v39, %s1638_s27 }
  0x6f   : > { %1490 = vrot.lane.b32.xlu1 %v1489_v25, %s1638_s27 }
  0x71   : > { %1485 = vrot.lane.b32.xlu0 %v1484_v31, %s1638_s27 }
  0x73   : > { %1500 = vrot.lane.b32.xlu1 %v1409_v46, %s1639_s28 }
  0x75   : > { %1495 = vrot.lane.b32.xlu0 %v1404_v48, %s1639_s28 }
  0x77   : > { %1510 = vrot.lane.b32.xlu1 %v1871_v49, %s1639_s28 }
  0x79   : > { %1505 = vrot.lane.b32.xlu0 %v1764_v41, %s1639_s28 }
  0x7b   : > { %1520 = vrot.lane.b32.xlu1 %v1439_v33, %s1640_s29 }
  0x7d   : > { %1515 = vrot.lane.b32.xlu0 %v1434_v40, %s1640_s29 }
  0x7f   : > { %1530 = vrot.lane.b32.xlu1 %v1880_v55, %s1640_s29 }
  0x81   : > { %1525 = vrot.lane.b32.xlu0 %v1771_v45, %s1640_s29 }
  0x83   : > { %1540 = vrot.lane.b32.xlu1 %v1489_v25, %s1641_s30 }
  0x85   : > { %1535 = vrot.lane.b32.xlu0 %v1484_v31, %s1641_s30 }
  0x87   : > { %1550 = vrot.lane.b32.xlu1 %v1549_v30, %s1641_s30 }
  0x89   : > { %1545 = vrot.lane.b32.xlu0 %v1796_v60, %s1641_s30 }
  0x8b   : > { %1560 = vrot.lane.b32.xlu1 %v1871_v49, %s1642_s4 }
  0x8d   : > { %1555 = vrot.lane.b32.xlu0 %v1764_v41, %s1642_s4  ;;  %v1286_v34 = vpop.permute.xlu1 %1285 }
  0x8e   : > { %v1287_v39 = vunpack.i.l.bf16 %v1286_v34 }
  0x8f   : > { %v1276_v2 = vpop.permute.xlu0 %1275  ;;  %1570 = vrot.lane.b32.xlu1 %v1569_v22, %s1642_s4 }
  0x90   : > { %v1278_v5 = vunpack.i.h.bf16 %v1276_v2  ;;  %v1277_v42 = vunpack.i.l.bf16 %v1276_v2  ;;  %v749_v54 = vsel %vm746_vm3, %v1707_v0, %v1287_v39 }
  0x91   : > { %1565 = vrot.lane.b32.xlu0 %v1759_v37, %s1642_s4  ;;  %v1291_v52 = vpop.permute.xlu1 %1290 }
  0x92   : > { %v1293_v46 = vunpack.i.h.bf16 %v1291_v52  ;;  %v1292_v47 = vunpack.i.l.bf16 %v1291_v52  ;;  %v748_v8 = vsel %vm746_vm3, %v1722_v7, %v1278_v5  ;;  %v747_v9 = vsel %vm746_vm3, %v1719_v6, %v1277_v42 }
  0x93   : > { %v1281_v56 = vpop.permute.xlu0 %1280  ;;  %1580 = vrot.lane.b32.xlu1 %v1880_v55, %s1644_s9 }
  0x94   : > { %v1283_v44 = vunpack.i.h.bf16 %v1281_v56  ;;  %v1282_v14 = vunpack.i.l.bf16 %v1281_v56  ;;  %v758_v26 = vsel %vm746_vm3, %v1731_v12, %v1293_v46  ;;  %v757_v7 = vsel %vm746_vm3, %v1728_v11, %v1292_v47 }
  0x95   : > { %1575 = vrot.lane.b32.xlu0 %v1771_v45, %s1644_s9  ;;  %v1301_v60 = vpop.permute.xlu1 %1300 }
  0x96   : > { %v1303_v48 = vunpack.i.h.bf16 %v1301_v60  ;;  %v1302_v50 = vunpack.i.l.bf16 %v1301_v60  ;;  %v756_v36 = vsel %vm746_vm3, %v1741_v19, %v1283_v44 }
  0x97   : > { %v1296_v41 = vpop.permute.xlu0 %1295  ;;  %1590 = vrot.lane.b32.xlu1 %v1589_v27, %s1644_s9  ;;  %v1288_v27 = vunpack.i.h.bf16 %v1286_v34 }
  0x98   : > { %v1298_v57 = vunpack.i.h.bf16 %v1296_v41  ;;  %v1297_v63 = vunpack.i.l.bf16 %v1296_v41  ;;  %v773_v20 = vsel %vm763_vm4, %v756_v36, %v1303_v48 }
  0x99   : > { %1585 = vrot.lane.b32.xlu0 %v1787_v58, %s1644_s9  ;;  %v1316_v49 = vpop.permute.xlu1 %1315  ;;  %v750_v53 = vsel %vm746_vm3, %v1710_v1, %v1288_v27  ;;  %v755_v1 = vsel %vm746_vm3, %v1738_v18, %v1282_v14 }
  0x9a   : > { %v1318_v10 = vunpack.i.h.bf16 %v1316_v49  ;;  %v1317_v21 = vunpack.i.l.bf16 %v1316_v49  ;;  %v772_v6 = vsel %vm763_vm4, %v755_v1, %v1302_v50  ;;  %v764_v19 = vsel %vm763_vm4, %v747_v9, %v1297_v63 }
  0x9b   : > { %v1306_v37 = vpop.permute.xlu0 %1305  ;;  %v765_v40 = vsel %vm763_vm4, %v748_v8, %v1298_v57 }
  0x9c   : > { %v1308_v0 = vunpack.i.h.bf16 %v1306_v37  ;;  %v1307_v38 = vunpack.i.l.bf16 %v1306_v37  ;;  %v774_v12 = vsel %vm763_vm4, %v757_v7, %v1317_v21  ;;  %v775_v31 = vsel %vm763_vm4, %v758_v26, %v1318_v10 }
  0x9d   : > { %v2035_v13 = vpop.permute.xlu1 %1320 }
  0x9e   : > { %v1323_v18 = vunpack.i.h.bf16 %v2035_v13  ;;  %v1322_v25 = vunpack.i.l.bf16 %v2035_v13  ;;  %v767_v2 = vsel %vm763_vm4, %v750_v53, %v1308_v0  ;;  %v766_v52 = vsel %vm763_vm4, %v749_v54, %v1307_v38 }
  0x9f   : > { %v2037_v15 = vpop.permute.xlu0 %1310 }
  0xa0   : > { %v1313_v11 = vunpack.i.h.bf16 %v2037_v15  ;;  %v1312_v30 = vunpack.i.l.bf16 %v2037_v15  ;;  %v789_v27 = vsel %vm780_vm5, %v772_v6, %v1322_v25  ;;  %v790_v39 = vsel %vm780_vm5, %v773_v20, %v1323_v18 }
  0xa1   : > { %v2039_v55 = vpop.permute.xlu1 %1330 }
  0xa2   : > { %v1333_v56 = vunpack.i.h.bf16 %v2039_v55  ;;  %v1332_v60 = vunpack.i.l.bf16 %v2039_v55  ;;  %v781_v55 = vsel %vm780_vm5, %v764_v19, %v1312_v30 }
  0xa3   : > { %v2041_v17 = vpop.permute.xlu0 %1325 }
  0xa4   : > { %v1328_v41 = vunpack.i.h.bf16 %v2041_v17  ;;  %v1327_v49 = vunpack.i.l.bf16 %v2041_v17  ;;  %v782_v17 = vsel %vm780_vm5, %v765_v40, %v1313_v11  ;;  %v791_v46 = vsel %vm780_vm5, %v774_v12, %v1332_v60 }
  0xa5   : > { %v2043_v45 = vpop.permute.xlu1 %1340  ;;  %v792_v47 = vsel %vm780_vm5, %v775_v31, %v1333_v56 }
  0xa6   : > { %v1343_v37 = vunpack.i.h.bf16 %v2043_v45  ;;  %v1342_v13 = vunpack.i.l.bf16 %v2043_v45  ;;  %v784_v53 = vsel %vm780_vm5, %v767_v2, %v1328_v41 }
  0xa7   : > { %v2045_v22 = vpop.permute.xlu0 %1335 }
  0xa8   : > { %v1338_v5 = vunpack.i.h.bf16 %v2045_v22  ;;  %v1337_v42 = vunpack.i.l.bf16 %v2045_v22  ;;  %v783_v22 = vsel %vm780_vm5, %v766_v52, %v1327_v49  ;;  %v806_v54 = vsel %vm797_vm6, %v789_v27, %v1342_v13 }
  0xa9   : > { %v2047_v32 = vpop.permute.xlu1 %1350  ;;  %v807_v57 = vsel %vm797_vm6, %v790_v39, %v1343_v37 }
  0xaa   : > { %v1353_v44 = vunpack.i.h.bf16 %v2047_v32  ;;  %v1352_v45 = vunpack.i.l.bf16 %v2047_v32  ;;  %v798_v32 = vsel %vm797_vm6, %v781_v55, %v1337_v42  ;;  %v799_v8 = vsel %vm797_vm6, %v782_v17, %v1338_v5 }
  0xab   : > { %v2049_v16 = vpop.permute.xlu0 %1345 }
  0xac   : > { %v809_v21 = vsel %vm797_vm6, %v792_v47, %v1353_v44  ;;  %v1348_v36 = vunpack.i.h.bf16 %v2049_v16  ;;  %v1347_v1 = vunpack.i.l.bf16 %v2049_v16 }
  0xad   : > { %v2051_v24 = vpop.permute.xlu1 %1360 }
  0xae   : > { %v1363_v48 = vunpack.i.h.bf16 %v2051_v24  ;;  %v1362_v50 = vunpack.i.l.bf16 %v2051_v24  ;;  %v808_v24 = vsel %vm797_vm6, %v791_v46, %v1352_v45 }
  0xaf   : > { %v2053_v58 = vpop.permute.xlu0 %1355 }
  0xb0   : > { %v1358_v9 = vunpack.i.h.bf16 %v2053_v58  ;;  %v1357_v10 = vunpack.i.l.bf16 %v2053_v58  ;;  %v823_v38 = vsel %vm814_vm7, %v806_v54, %v1362_v50  ;;  %v824_v26 = vsel %vm814_vm7, %v807_v57, %v1363_v48 }
  0xb1   : > { %v2055_v43 = vpop.permute.xlu1 %1370 }
  0xb2   : > { %v815_v16 = vsel %vm814_vm7, %v798_v32, %v1357_v10  ;;  %v816_v25 = vsel %vm814_vm7, %v799_v8, %v1358_v9  ;;  %v1373_v12 = vunpack.i.h.bf16 %v2055_v43  ;;  %v1372_v31 = vunpack.i.l.bf16 %v2055_v43 }
  0xb3   : > { %v2057_v51 = vpop.permute.xlu0 %1365  ;;  %v800_v9 = vsel %vm797_vm6, %v783_v22, %v1347_v1 }
  0xb4   : > { %v1368_v11 = vunpack.i.h.bf16 %v2057_v51  ;;  %v825_v10 = vsel %vm814_vm7, %v808_v24, %v1372_v31 }
  0xb5   : > { %v2067_v35 = vpop.permute.xlu1 %1380 }
  0xb6   : > { %v1383_v7 = vunpack.i.h.bf16 %v2067_v35  ;;  %v1382_v6 = vunpack.i.l.bf16 %v2067_v35  ;;  %v1367_v35 = vunpack.i.l.bf16 %v2057_v51 }
  0xb7   : > { %v2079_v33 = vpop.permute.xlu0 %1375 }
  0xb8   : > { %v1378_v58 = vunpack.i.h.bf16 %v2079_v33  ;;  %v1377_v20 = vunpack.i.l.bf16 %v2079_v33  ;;  %v840_v33 = vsel %vm831_vm8, %v823_v38, %v1382_v6  ;;  %v841_v56 = vsel %vm831_vm8, %v824_v26, %v1383_v7 }
  0xb9   : > { %v2089_v34 = vpop.permute.xlu1 %1390  ;;  %v826_v38 = vsel %vm814_vm7, %v809_v21, %v1373_v12  ;;  %v817_v26 = vsel %vm814_vm7, %v800_v9, %v1367_v35 }
  0xba   : > { %v832_v49 = vsel %vm831_vm8, %v815_v16, %v1377_v20  ;;  %v833_v37 = vsel %vm831_vm8, %v816_v25, %v1378_v58  ;;  %v1393_v55 = vunpack.i.h.bf16 %v2089_v34  ;;  %v1392_v46 = vunpack.i.l.bf16 %v2089_v34 }
  0xbb   : > { %v2099_v15 = vpop.permute.xlu0 %1385  ;;  %v801_v34 = vsel %vm797_vm6, %v784_v53, %v1348_v36 }
  0xbc   : > { %v1388_v47 = vunpack.i.h.bf16 %v2099_v15  ;;  %v1387_v54 = vunpack.i.l.bf16 %v2099_v15  ;;  %v818_v15 = vsel %vm814_vm7, %v801_v34, %v1368_v11  ;;  %v842_v58 = vsel %vm831_vm8, %v825_v10, %v1392_v46 }
  0xbd   : > { %v1401_v14 = vpop.permute.xlu1 %1400  ;;  %v843_v22 = vsel %vm831_vm8, %v826_v38, %v1393_v55 }
  0xbe   : > { %v1403_v19 = vunpack.i.h.bf16 %v1401_v14  ;;  %v1402_v40 = vunpack.i.l.bf16 %v1401_v14  ;;  %v834_v24 = vsel %vm831_vm8, %v817_v26, %v1387_v54  ;;  %v835_v21 = vsel %vm831_vm8, %v818_v15, %v1388_v47 }
  0xbf   : > { %v1396_v63 = vpop.permute.xlu0 %1395 }
  0xc0   : > { %v1398_v30 = vunpack.i.h.bf16 %v1396_v63  ;;  %v1397_v2 = vunpack.i.l.bf16 %v1396_v63  ;;  %v857_v43 = vsel %vm848_vm9, %v840_v33, %v1402_v40  ;;  %v858_v27 = vsel %vm848_vm9, %v841_v56, %v1403_v19 }
  0xc1   : > { %v2125_v0 = vpop.permute.xlu1 %1410 }
  0xc2   : > { %v849_v44 = vsel %vm848_vm9, %v832_v49, %v1397_v2  ;;  %v850_v45 = vsel %vm848_vm9, %v833_v37, %v1398_v30  ;;  %v1413_v57 = vunpack.i.h.bf16 %v2125_v0  ;;  %v1412_v63 = vunpack.i.l.bf16 %v2125_v0 }
  0xc3   : > { %v2133_v18 = vpop.permute.xlu0 %1405 }
  0xc4   : > { %v1408_v7 = vunpack.i.h.bf16 %v2133_v18  ;;  %v1407_v0 = vunpack.i.l.bf16 %v2133_v18  ;;  %v859_v1 = vsel %vm848_vm9, %v842_v58, %v1412_v63  ;;  %v860_v20 = vsel %vm848_vm9, %v843_v22, %v1413_v57 }
  0xc5   : > { %v1421_v52 = vpop.permute.xlu1 %1420 }
  0xc6   : > { %v1423_v60 = vunpack.i.h.bf16 %v1421_v52  ;;  %v1422_v41 = vunpack.i.l.bf16 %v1421_v52  ;;  %v851_v12 = vsel %vm848_vm9, %v834_v24, %v1407_v0  ;;  %v852_v31 = vsel %vm848_vm9, %v835_v21, %v1408_v7 }
  0xc7   : > { %v1416_v13 = vpop.permute.xlu0 %1415 }
  0xc8   : > { %v1418_v39 = vunpack.i.h.bf16 %v1416_v13  ;;  %v1417_v51 = vunpack.i.l.bf16 %v1416_v13  ;;  %v874_v5 = vsel %vm865_vm10, %v857_v43, %v1422_v41  ;;  %v875_v42 = vsel %vm865_vm10, %v858_v27, %v1423_v60 }
  0xc9   : > { %v2150_v17 = vpop.permute.xlu1 %1430  ;;  %v886_v14 = vpack.c.bf16 %v875_v42, %v874_v5 }
  0xca   : > { %v866_v48 = vsel %vm865_vm10, %v849_v44, %v1417_v51  ;;  %v867_v50 = vsel %vm865_vm10, %v850_v45, %v1418_v39  ;;  %v1433_v42 = vunpack.i.h.bf16 %v2150_v17  ;;  %v1432_v55 = vunpack.i.l.bf16 %v2150_v17 }
  0xcb   : > { %v2161_v32 = vpop.permute.xlu0 %1425  ;;  %v882_v8 = vpack.c.bf16 %v867_v50, %v866_v48  ;;  %1212 = vmatprep.mubr.msk.bf16.mxu1 %vm912_vm11, %v886_v14 }
  0xcc   : > { %v1428_v45 = vunpack.i.h.bf16 %v2161_v32  ;;  %v1427_v14 = vunpack.i.l.bf16 %v2161_v32  ;;  %v760_v50 = vsel %vm746_vm3, %v1802_v62, %v1433_v42  ;;  %v759_v54 = vsel %vm746_vm3, %v1799_v61, %v1432_v55 }
  0xcd   : > { %1204 = vmatprep.mubr.msk.bf16.mxu0 %vm912_vm11, %v882_v8  ;;  %v1441_v6 = vpop.permute.xlu1 %1440 }
  0xce   : > { %v1443_v53 = vunpack.i.h.bf16 %v1441_v6  ;;  %v1442_v36 = vunpack.i.l.bf16 %v1441_v6  ;;  %v752_v32 = vsel %vm746_vm3, %v1813_v4, %v1428_v45  ;;  %v751_v38 = vsel %vm746_vm3, %v1810_v3, %v1427_v14 }
  0xcf   : > { %v1436_v19 = vpop.permute.xlu0 %1435 }
  0xd0   : > { %v876_v40 = vsel %vm865_vm10, %v859_v1, %v1442_v36  ;;  %v877_v18 = vsel %vm865_vm10, %v860_v20, %v1443_v53  ;;  %v1438_v16 = vunpack.i.h.bf16 %v1436_v19  ;;  %v1437_v25 = vunpack.i.l.bf16 %v1436_v19 }
  0xd1   : > { %v887_v11 = vpack.c.bf16 %v877_v18, %v876_v40  ;;  %v1451_v35 = vpop.permute.xlu1 %1450 }
  0xd2   : > { %v868_v30 = vsel %vm865_vm10, %v851_v12, %v1437_v25  ;;  %v869_v2 = vsel %vm865_vm10, %v852_v31, %v1438_v16  ;;  %v1453_v47 = vunpack.i.h.bf16 %v1451_v35  ;;  %v1452_v48 = vunpack.i.l.bf16 %v1451_v35 }
  0xd3   : > { %v883_v52 = vpack.c.bf16 %v869_v2, %v868_v30  ;;  %v1446_v33 = vpop.permute.xlu0 %1445  ;;  %1213 = vmatmul.mubr.msk.bf16.vlgmr.msra.gmra.mrb[0].mxu1 %vm912_vm11, %v887_v11 }
  0xd4   : > { %v1448_v57 = vunpack.i.h.bf16 %v1446_v33  ;;  %v1447_v63 = vunpack.i.l.bf16 %v1446_v33  ;;  %v762_v61 = vsel %vm746_vm3, %v1914_v23, %v1453_v47  ;;  %v761_v7 = vsel %vm746_vm3, %v1911_v59, %v1452_v48 }
  0xd5   : > { %1205 = vmatmul.mubr.msk.bf16.vlgmr.msra.gmra.mrb[0].mxu0 %vm912_vm11, %v883_v52  ;;  %v1461_v56 = vpop.permute.xlu1 %1460 }
  0xd6   : > { %v1463_v17 = vunpack.i.h.bf16 %v1461_v56  ;;  %v1462_v9 = vunpack.i.l.bf16 %v1461_v56  ;;  %v754_v58 = vsel %vm746_vm3, %v1928_v29, %v1448_v57  ;;  %v753_v4 = vsel %vm746_vm3, %v1925_v28, %v1447_v63 }
  0xd7   : > { %v1456_v60 = vpop.permute.xlu0 %1455 }
  0xd8   : > { %v1458_v34 = vunpack.i.h.bf16 %v1456_v60  ;;  %v1457_v10 = vunpack.i.l.bf16 %v1456_v60  ;;  %v776_v36 = vsel %vm763_vm4, %v759_v54, %v1462_v9  ;;  %v777_v24 = vsel %vm763_vm4, %v760_v50, %v1463_v17 }
  0xd9   : > { %v1471_v41 = vpop.permute.xlu1 %1470 }
  0xda   : > { %v1473_v26 = vunpack.i.h.bf16 %v1471_v41  ;;  %v1472_v15 = vunpack.i.l.bf16 %v1471_v41  ;;  %v768_v23 = vsel %vm763_vm4, %v751_v38, %v1457_v10  ;;  %v769_v59 = vsel %vm763_vm4, %v752_v32, %v1458_v34 }
  0xdb   : > { %v1466_v49 = vpop.permute.xlu0 %1465 }
  0xdc   : > { %v1468_v0 = vunpack.i.h.bf16 %v1466_v49  ;;  %v1467_v6 = vunpack.i.l.bf16 %v1466_v49  ;;  %v778_v21 = vsel %vm763_vm4, %v761_v7, %v1472_v15  ;;  %v779_v1 = vsel %vm763_vm4, %v762_v61, %v1473_v26 }
  0xdd   : > { %v1481_v37 = vpop.permute.xlu1 %1480 }
  0xde   : > { %v1483_v22 = vunpack.i.h.bf16 %v1481_v37  ;;  %v1482_v3 = vunpack.i.l.bf16 %v1481_v37  ;;  %v770_v28 = vsel %vm763_vm4, %v753_v4, %v1467_v6  ;;  %v771_v40 = vsel %vm763_vm4, %v754_v58, %v1468_v0 }
  0xdf   : > { %v1476_v13 = vpop.permute.xlu0 %1475 }
  0xe0   : > { %v1478_v29 = vunpack.i.h.bf16 %v1476_v13  ;;  %v1477_v20 = vunpack.i.l.bf16 %v1476_v13  ;;  %v793_v25 = vsel %vm780_vm5, %v776_v36, %v1482_v3  ;;  %v794_v12 = vsel %vm780_vm5, %v777_v24, %v1483_v22 }
  0xe1   : > { %v2187_v43 = vpop.permute.xlu1 %1490 }
  0xe2   : > { %v1493_v18 = vunpack.i.h.bf16 %v2187_v43  ;;  %v1492_v16 = vunpack.i.l.bf16 %v2187_v43  ;;  %v785_v56 = vsel %vm780_vm5, %v768_v23, %v1477_v20  ;;  %v786_v60 = vsel %vm780_vm5, %v769_v59, %v1478_v29 }
  0xe3   : > { %v2189_v27 = vpop.permute.xlu0 %1485 }
  0xe4   : > { %v1488_v31 = vunpack.i.h.bf16 %v2189_v27  ;;  %v1487_v11 = vunpack.i.l.bf16 %v2189_v27  ;;  %v795_v13 = vsel %vm780_vm5, %v778_v21, %v1492_v16  ;;  %v796_v43 = vsel %vm780_vm5, %v779_v1, %v1493_v18 }
  0xe5   : > { %v2191_v39 = vpop.permute.xlu1 %1500 }
  0xe6   : > { %v1503_v30 = vunpack.i.h.bf16 %v2191_v39  ;;  %v1502_v2 = vunpack.i.l.bf16 %v2191_v39  ;;  %v787_v42 = vsel %vm780_vm5, %v770_v28, %v1487_v11 }
  0xe7   : > { %v2193_v51 = vpop.permute.xlu0 %1495 }
  0xe8   : > { %v1498_v52 = vunpack.i.h.bf16 %v2193_v51  ;;  %v1497_v33 = vunpack.i.l.bf16 %v2193_v51  ;;  %v788_v51 = vsel %vm780_vm5, %v771_v40, %v1488_v31  ;;  %v811_v47 = vsel %vm797_vm6, %v794_v12, %v1503_v30 }
  0xe9   : > { %v2195_v5 = vpop.permute.xlu1 %1510 }
  0xea   : > { %v1513_v41 = vunpack.i.h.bf16 %v2195_v5  ;;  %v1512_v49 = vunpack.i.l.bf16 %v2195_v5  ;;  %v810_v5 = vsel %vm797_vm6, %v793_v25, %v1502_v2  ;;  %v802_v48 = vsel %vm797_vm6, %v785_v56, %v1497_v33 }
  0xeb   : > { %v2199_v44 = vpop.permute.xlu0 %1505  ;;  %v803_v50 = vsel %vm797_vm6, %v786_v60, %v1498_v52 }
  0xec   : > { %v1508_v27 = vunpack.i.h.bf16 %v2199_v44  ;;  %v1507_v39 = vunpack.i.l.bf16 %v2199_v44  ;;  %v812_v44 = vsel %vm797_vm6, %v795_v13, %v1512_v49  ;;  %v813_v54 = vsel %vm797_vm6, %v796_v43, %v1513_v41 }
  0xed   : > { %v2203_v46 = vpop.permute.xlu1 %1520 }
  0xee   : > { %v1523_v55 = vunpack.i.h.bf16 %v2203_v46  ;;  %v1522_v45 = vunpack.i.l.bf16 %v2203_v46  ;;  %v804_v46 = vsel %vm797_vm6, %v787_v42, %v1507_v39  ;;  %v805_v9 = vsel %vm797_vm6, %v788_v51, %v1508_v27 }
  0xef   : > { %v2209_v8 = vpop.permute.xlu0 %1515 }
  0xf0   : > { %v1518_v57 = vunpack.i.h.bf16 %v2209_v8  ;;  %v1517_v63 = vunpack.i.l.bf16 %v2209_v8  ;;  %v827_v32 = vsel %vm814_vm7, %v810_v5, %v1522_v45  ;;  %v828_v38 = vsel %vm814_vm7, %v811_v47, %v1523_v55 }
  0xf1   : > { %v2215_v62 = vpop.permute.xlu1 %1530 }
  0xf2   : > { %v1533_v34 = vunpack.i.h.bf16 %v2215_v62  ;;  %v1532_v10 = vunpack.i.l.bf16 %v2215_v62  ;;  %v819_v58 = vsel %vm814_vm7, %v802_v48, %v1517_v63  ;;  %v820_v4 = vsel %vm814_vm7, %v803_v50, %v1518_v57 }
  0xf3   : > { %v2225_v53 = vpop.permute.xlu0 %1525 }
  0xf4   : > { %v1528_v26 = vunpack.i.h.bf16 %v2225_v53  ;;  %v1527_v15 = vunpack.i.l.bf16 %v2225_v53  ;;  %v829_v36 = vsel %vm814_vm7, %v812_v44, %v1532_v10  ;;  %v830_v24 = vsel %vm814_vm7, %v813_v54, %v1533_v34 }
  0xf5   : > { %v2233_v19 = vpop.permute.xlu1 %1540 }
  0xf6   : > { %v1543_v8 = vunpack.i.h.bf16 %v2233_v19  ;;  %v1542_v7 = vunpack.i.l.bf16 %v2233_v19  ;;  %v821_v59 = vsel %vm814_vm7, %v804_v46, %v1527_v15  ;;  %v822_v21 = vsel %vm814_vm7, %v805_v9, %v1528_v26 }
  0xf7   : > { %v1536_v35 = vpop.permute.xlu0 %1535 }
  0xf8   : > { %v1538_v0 = vunpack.i.h.bf16 %v1536_v35  ;;  %v1537_v6 = vunpack.i.l.bf16 %v1536_v35  ;;  %v844_v19 = vsel %vm831_vm8, %v827_v32, %v1542_v7  ;;  %v845_v28 = vsel %vm831_vm8, %v828_v38, %v1543_v8  ;;  %v1177_v8 = vld [vmem:[%s2374_s2] ss:$0 sm:$0xff] }
  0xf9   : > { %v1551_v37 = vpop.permute.xlu1 %1550 }
  0xfa   : > { %v1553_v62 = vunpack.i.h.bf16 %v1551_v37  ;;  %v1552_v22 = vunpack.i.l.bf16 %v1551_v37  ;;  %v836_v40 = vsel %vm831_vm8, %v819_v58, %v1537_v6  ;;  %v837_v18 = vsel %vm831_vm8, %v820_v4, %v1538_v0 }
  0xfb   : > { %v2259_v14 = vpop.permute.xlu0 %1545 }
  0xfc   : > { %v1547_v53 = vunpack.i.l.bf16 %v2259_v14  ;;  %v846_v16 = vsel %vm831_vm8, %v829_v36, %v1552_v22  ;;  %v847_v25 = vsel %vm831_vm8, %v830_v24, %v1553_v62  ;;  %v1548_v12 = vunpack.i.h.bf16 %v2259_v14 }
  0xfd   : > { %v1561_v17 = vpop.permute.xlu1 %1560 }
  0xfe   : > { %v1562_v23 = vunpack.i.l.bf16 %v1561_v17  ;;  %v1563_v1 = vunpack.i.h.bf16 %v1561_v17  ;;  %v838_v35 = vsel %vm831_vm8, %v821_v59, %v1547_v53  ;;  %v839_v50 = vsel %vm831_vm8, %v822_v21, %v1548_v12 }
  0xff   : > { %v1556_v61 = vpop.permute.xlu0 %1555 }
 0x100   : > { %v1557_v29 = vunpack.i.l.bf16 %v1556_v61  ;;  %v1558_v31 = vunpack.i.h.bf16 %v1556_v61  ;;  %v861_v30 = vsel %vm848_vm9, %v844_v19, %v1562_v23  ;;  %v862_v33 = vsel %vm848_vm9, %v845_v28, %v1563_v1 }
 0x101   : > { %v1571_v3 = vpop.permute.xlu1 %1570 }
 0x102   : > { %v853_v56 = vsel %vm848_vm9, %v836_v40, %v1557_v29  ;;  %v1573_v60 = vunpack.i.h.bf16 %v1571_v3  ;;  %v1572_v41 = vunpack.i.l.bf16 %v1571_v3  ;;  %v854_v39 = vsel %vm848_vm9, %v837_v18, %v1558_v31 }
 0x103   : > { %v1566_v20 = vpop.permute.xlu0 %1565 }
 0x104   : > { %v1568_v42 = vunpack.i.h.bf16 %v1566_v20  ;;  %v1567_v51 = vunpack.i.l.bf16 %v1566_v20  ;;  %v863_v44 = vsel %vm848_vm9, %v846_v16, %v1572_v41  ;;  %v864_v54 = vsel %vm848_vm9, %v847_v25, %v1573_v60 }
 0x105   : > { %v1581_v11 = vpop.permute.xlu1 %1580 }
 0x106   : > { %v1583_v2 = vunpack.i.h.bf16 %v1581_v11  ;;  %v1582_v52 = vunpack.i.l.bf16 %v1581_v11  ;;  %v855_v10 = vsel %vm848_vm9, %v838_v35, %v1567_v51  ;;  %v856_v32 = vsel %vm848_vm9, %v839_v50, %v1568_v42 }
 0x107   : > { %v1576_v49 = vpop.permute.xlu0 %1575 }
 0x108   : > { %v878_v37 = vsel %vm865_vm10, %v861_v30, %v1582_v52  ;;  %v879_v13 = vsel %vm865_vm10, %v862_v33, %v1583_v2  ;;  %v1578_v43 = vunpack.i.h.bf16 %v1576_v49  ;;  %v1577_v27 = vunpack.i.l.bf16 %v1576_v49 }
 0x109   : > { %v888_v55 = vpack.c.bf16 %v879_v13, %v878_v37  ;;  %v1591_v45 = vpop.permute.xlu1 %1590 }
 0x10a   : > { %v870_v14 = vsel %vm865_vm10, %v853_v56, %v1577_v27  ;;  %v871_v5 = vsel %vm865_vm10, %v854_v39, %v1578_v43  ;;  %v1593_v47 = vunpack.i.h.bf16 %v1591_v45  ;;  %v1592_v48 = vunpack.i.l.bf16 %v1591_v45 }
 0x10b   : > { %v884_v57 = vpack.c.bf16 %v871_v5, %v870_v14  ;;  %v1586_v63 = vpop.permute.xlu0 %1585  ;;  %1216 = vmatprep.mubr.msk.bf16.mxu1 %vm912_vm11, %v888_v55 }
 0x10c   : > { %v880_v17 = vsel %vm865_vm10, %v863_v44, %v1592_v48  ;;  %v881_v46 = vsel %vm865_vm10, %v864_v54, %v1593_v47  ;;  %v1588_v9 = vunpack.i.h.bf16 %v1586_v63  ;;  %v1587_v34 = vunpack.i.l.bf16 %v1586_v63 }
 0x10d   : > { %v889_v38 = vpack.c.bf16 %v881_v46, %v880_v17  ;;  %1208 = vmatprep.mubr.msk.bf16.mxu0 %vm912_vm11, %v884_v57 }
 0x10e   : > { %v872_v26 = vsel %vm865_vm10, %v855_v10, %v1587_v34  ;;  %v873_v15 = vsel %vm865_vm10, %v856_v32, %v1588_v9 }
 0x10f   : > { %v885_v61 = vpack.c.bf16 %v873_v15, %v872_v26  ;;  %1217 = vmatmul.mubr.msk.bf16.gmra.mrb[4].mxu1 %vm912_vm11, %v889_v38 }
 0x111   : > { %1209 = vmatmul.mubr.msk.bf16.gmra.mrb[4].mxu0 %vm912_vm11, %v885_v61 }
 0x1a6   : > { %v1214_v7 = vpop.f32.mrb[0].mxu1 }
 0x1a7   : > { %v1018_v0 = vadd.f32 %v1214_v7, %v1177_v8  ;;  %v1009_v6 = vpop.f32.mrb[1].mxu1 }
 0x1a8   : > { %v1206_v58 = vpop.f32.mrb[0].mxu0  ;;  %v1010_v4 = vadd.f32 %v1177_v8, %v1009_v6  ;;  %v1215_v62 = vpop.f32.mrb[2].mxu1 }
 0x1a9   : > { %v986_v22 = vadd.f32 %v1206_v58, %v1177_v8  ;;  %v1050_v3 = vmax.f32 %v1018_v0, 0.0  ;;  %v977_v36 = vpop.f32.mrb[1].mxu0  ;;  %v1021_v24 = vadd.f32 %v1215_v62, %v1177_v8  ;;  %v1012_v53 = vpop.f32.mrb[3].mxu1 }
 0x1aa   : > { %v978_v23 = vadd.f32 %v1177_v8, %v977_v36  ;;  %v1048_v59 = vmax.f32 %v1010_v4, 0.0  ;;  %v1207_v21 = vpop.f32.mrb[2].mxu0  ;;  %v1013_v1 = vadd.f32 %v1177_v8, %v1012_v53 }
 0x1ab   : > { %v1042_v29 = vmax.f32 %v986_v22, 0.0  ;;  %1067 = vst.msk [vmem:[%s2323_s26 + $0x50] sm:$0xff] %vm1056_vm12, %v1050_v3  ;;  %v989_v20 = vadd.f32 %v1207_v21, %v1177_v8  ;;  %v1051_v19 = vmax.f32 %v1021_v24, 0.0  ;;  %v980_v28 = vpop.f32.mrb[3].mxu0 }
 0x1ac   : > { %v1040_v40 = vmax.f32 %v978_v23, 0.0  ;;  %1065 = vst.msk [vmem:[%s2323_s26 + $0x40] sm:$0xff] %vm1056_vm12, %v1048_v59  ;;  %v981_v18 = vadd.f32 %v1177_v8, %v980_v28  ;;  %v1049_v16 = vmax.f32 %v1013_v1, 0.0 }
 0x1ad   : > { %1059 = vst.msk [vmem:[%s2323_s26 + $0x10] sm:$0xff] %vm1056_vm12, %v1042_v29  ;;  %v1043_v25 = vmax.f32 %v989_v20, 0.0  ;;  %1068 = vst.msk [vmem:[%s2323_s26 + $0x58] sm:$0xff] %vm1056_vm12, %v1051_v19 }
 0x1ae   : > { %1057 = vst.msk [vmem:[%s2323_s26] sm:$0xff] %vm1056_vm12, %v1040_v40  ;;  %v1041_v12 = vmax.f32 %v981_v18, 0.0  ;;  %1066 = vst.msk [vmem:[%s2323_s26 + $0x48] sm:$0xff] %vm1056_vm12, %v1049_v16 }
 0x1af   : > { %1060 = vst.msk [vmem:[%s2323_s26 + $0x18] sm:$0xff] %vm1056_vm12, %v1043_v25 }
 0x1b0   : > { %1058 = vst.msk [vmem:[%s2323_s26 + $0x8] sm:$0xff] %vm1056_vm12, %v1041_v12 }
 0x1e2   : > { %v1218_v31 = vpop.f32.mrb[4].mxu1 }
 0x1e3   : > { %v1034_v11 = vadd.f32 %v1218_v31, %v1177_v8  ;;  %v1025_v35 = vpop.f32.mrb[5].mxu1 }
 0x1e4   : > { %v1210_v30 = vpop.f32.mrb[4].mxu0  ;;  %v1026_v2 = vadd.f32 %v1177_v8, %v1025_v35  ;;  %v1219_v52 = vpop.f32.mrb[6].mxu1 }
 0x1e5   : > { %v1002_v33 = vadd.f32 %v1210_v30, %v1177_v8  ;;  %v1054_v56 = vmax.f32 %v1034_v11, 0.0  ;;  %v993_v60 = vpop.f32.mrb[5].mxu0  ;;  %v1037_v41 = vadd.f32 %v1219_v52, %v1177_v8  ;;  %v1028_v49 = vpop.f32.mrb[7].mxu1 }
 0x1e6   : > { %v994_v37 = vadd.f32 %v1177_v8, %v993_v60  ;;  %v1052_v13 = vmax.f32 %v1026_v2, 0.0  ;;  %v1211_v43 = vpop.f32.mrb[6].mxu0  ;;  %v1029_v27 = vadd.f32 %v1177_v8, %v1028_v49 }
 0x1e7   : > { %v1046_v39 = vmax.f32 %v1002_v33, 0.0  ;;  %1071 = vst.msk [vmem:[%s2323_s26 + $0x70] sm:$0xff] %vm1056_vm12, %v1054_v56  ;;  %v1005_v42 = vadd.f32 %v1211_v43, %v1177_v8  ;;  %v1055_v51 = vmax.f32 %v1037_v41, 0.0  ;;  %v996_v55 = vpop.f32.mrb[7].mxu0 }
 0x1e8   : > { %v1044_v45 = vmax.f32 %v994_v37, 0.0  ;;  %1069 = vst.msk [vmem:[%s2323_s26 + $0x60] sm:$0xff] %vm1056_vm12, %v1052_v13  ;;  %v997_v14 = vadd.f32 %v1177_v8, %v996_v55  ;;  %v1053_v5 = vmax.f32 %v1029_v27, 0.0 }
 0x1e9   : > { %1063 = vst.msk [vmem:[%s2323_s26 + $0x30] sm:$0xff] %vm1056_vm12, %v1046_v39  ;;  %v1047_v47 = vmax.f32 %v1005_v42, 0.0  ;;  %1072 = vst.msk [vmem:[%s2323_s26 + $0x78] sm:$0xff] %vm1056_vm12, %v1055_v51 }
 0x1ea   : > { %1061 = vst.msk [vmem:[%s2323_s26 + $0x20] sm:$0xff] %vm1056_vm12, %v1044_v45  ;;  %v1045_v48 = vmax.f32 %v997_v14, 0.0  ;;  %1070 = vst.msk [vmem:[%s2323_s26 + $0x68] sm:$0xff] %vm1056_vm12, %v1053_v5 }
 0x1eb   : > { %1064 = vst.msk [vmem:[%s2323_s26 + $0x38] sm:$0xff] %vm1056_vm12, %v1047_v47 }
 0x1ec   : > { %1062 = vst.msk [vmem:[%s2323_s26 + $0x28] sm:$0xff] %vm1056_vm12, %v1045_v48 }
 0x1ed PF: > { %s13_s16 = sadd.s32 1, %s1634_s16   ;;  %s2376_s12 = smov %s1626_s14 }
 0x1ee   : > { %p10_p7 = scmp.ge.s32.totalorder %s13_s16, 6   ;;  %s2377_s13 = smov %s1630_s15 }
 0x1ef   : > { %s2378_s14 = smov %s2381_s17  ;;  %s2379_s15 = smov %s2385_s18 }
 0x1f0   :  { %12 = sbr.rel (!%p10_p7) target bundleno = 3 (0x3), region = 63 }

// kernel: image_captioning_forward.23
= control target key start
LH: loop header
LB: loop body
LE: loop exit
PB: predicated region body
PF: predicated region fallthrough
CT: control target
= control target key end

     0   :  { %s1629_s12 = smov 0   ;;  %s1631_s13 = smov 0   ;;  %s2273_s0 = inlined_call_operand.vmem [shape: f32[2,18,18,16], index: 0, kind: input, shape index: {}]   ;;  %s2274_s1 = inlined_call_operand.vmem [shape: bf16[144,16], index: 1, kind: input, shape index: {}]   ;;  %s2275_s2 = inlined_call_operand.vmem [shape: f32[1,16], index: 2, kind: input, shape index: {}]   ;;  %s2276_s3 = inlined_call_operand.vmem [shape: f32[2,16,16,16], index: 3, kind: output, shape index: {}]  }
   0x1   :  { %s1633_s14 = smov 0   ;;  %s1635_s15 = smov 0  }
   0x2   :  { %s1637_s16 = smov 0  }
   0x3 LB: > { %s22_s17 = sadd.s32 1, %s1591_s14  ;;  %s25_s18 = sadd.s32 1, %s1595_s15  ;;  %s1599_s16 = sphi %s1637_s16, %s13_s16   ;;  %s1595_s15 = sphi %s1635_s15, %s2280_s15   ;;  %s1591_s14 = sphi %s1633_s14, %s2279_s14   ;;  %s1587_s13 = sphi %s1631_s13, %s2278_s13   ;;  %s1583_s12 = sphi %s1629_s12, %s2277_s12  }
   0x4   : > { %p23_p0 = scmp.ge.s32.totalorder %s22_s17, 2  ;;  %p1177_p1 = scmp.ge.s32.totalorder %s1599_s16, 1 }
   0x5   : > { %p151_p2 = scmp.lt.s32.totalorder %s1599_s16, 5 }
   0x6   : > { %s2282_s17 = smov (%p23_p0, %s22_s17), 0  ;;  %s2284_s18 = smov (!%p23_p0, %s25_s18), %s1595_s15 }
   0x7   : > { %p152_p3 = pnand %p1177_p1, %p151_p2  ;;  %p27_p4 = scmp.ge.s32.totalorder %s2284_s18, 2 }
   0x8   : > { %p180_p5 = scmp.lt.s32.totalorder (!%p152_p3), %s1587_s13, 1  ;;  %v1552_v0 = vld [vmem:[%s2274_s1] sm:$0xff] (!%p152_p3)   ;;  %v1601_v1 = vmov (!%p152_p3), 0   ;;  %v1553_v2 = vld [vmem:[%s2274_s1 + $0x8] sm:$0xff] (!%p152_p3)   ;;  %s1184_s23 = smul.u32 (!%p152_p3), 192, %s1583_s12  ;;  %v1554_v3 = vld [vmem:[%s2274_s1 + $0x10] sm:$0xff] (!%p152_p3)  }
   0x9   : > { %s2286_s18 = smov (%p27_p4, %s2284_s18), 0  ;;  %155 = sbr.rel (%p152_p3) target bundleno = 472 (0x1d8), region = 32 }
   0xa   : > { %952 = vmatprep.subr.bf16.mxu0 (!%p152_p3), %v1601_v1  ;;  %1205 = vmatprep.subr.bf16.mxu1 (!%p152_p3), %v1601_v1  ;;  %vm295_vm0 = vcmask (!%p152_p3), 1045504   ;;  %vm254_vm1 = vcmask (!%p152_p3), 1046528   ;;  %v1555_v7 = vld [vmem:[%s2274_s1 + $0x18] sm:$0xff] (!%p152_p3)   ;;  %s1602_s6 = smov (!%p152_p3), 48   ;;  %v1556_v41 = vld [vmem:[%s2274_s1 + $0x20] sm:$0xff] (!%p152_p3)   ;;  %s1603_s9 = smov (!%p152_p3), 32  }
   0xb   : > { %953 = vmatpush1.bf16.msra.mxu0 (!%p152_p3), %v1552_v0  ;;  %1214 = vmatpush1.bf16.msra.mxu1 (!%p152_p3), %v1552_v0  ;;  %s1604_s10 = smov (!%p152_p3), 16   ;;  %v1557_v60 = vld [vmem:[%s2274_s1 + $0x28] sm:$0xff] (!%p152_p3)   ;;  %s1605_s22 = smov (!%p152_p3), 64   ;;  %vm714_vm2 = vcmask (!%p152_p3), 130048   ;;  %vm731_vm3 = vcmask (!%p152_p3), 261120   ;;  %vm748_vm4 = vcmask (!%p152_p3), 392192  }
   0xc   : > { %954 = vmatprep.subr.bf16.mxu0 (!%p152_p3), %v1601_v1  ;;  %1206 = vmatprep.subr.bf16.mxu1 (!%p152_p3), %v1601_v1  ;;  %s1606_s25 = smov (!%p152_p3), 80   ;;  %s1607_s28 = smov (!%p152_p3), 96   ;;  %vm765_vm5 = vcmask (!%p152_p3), 523264   ;;  %vm782_vm6 = vcmask (!%p152_p3), 654336   ;;  %vm799_vm7 = vcmask (!%p152_p3), 785408   ;;  %vm816_vm8 = vcmask (!%p152_p3), 916480  }
   0xd   : > { %s1608_s29 = smov (!%p152_p3), 112  }
   0xf   : > { %955 = vmatpush1.bf16.msra.mxu0 (!%p152_p3), %v1553_v2  ;;  %1215 = vmatpush1.bf16.msra.mxu1 (!%p152_p3), %v1553_v2 }
  0x10   : > { %s2288_s13 = smov (!%p180_p5, %s1587_s13), 1  ;;  %956 = vmatprep.subr.bf16.mxu0 %v1601_v1  ;;  %1207 = vmatprep.subr.bf16.mxu1 %v1601_v1 }
  0x11   : > { %s1223_s24 = smul.u32 432, %s2288_s13  ;;  %s1181_s5 = sshll.u32 %s2288_s13, 5 }
  0x13   : > { %s184_s27 = scalar_lea.vmem %s2273_s0, %s1223_s24  ;;  %957 = vmatpush1.bf16.msra.mxu0 %v1554_v3  ;;  %1216 = vmatpush1.bf16.msra.mxu1 %v1554_v3 }
  0x14   : > { %s1681_s30 = scalar_lea.vmem %s184_s27, %s1184_s23  ;;  %958 = vmatprep.subr.bf16.mxu0 %v1601_v1  ;;  %1208 = vmatprep.subr.bf16.mxu1 %v1601_v1 }
  0x15   : > { %v1686_v4 = vld [vmem:[%s1681_s30 + $0x78] sm:$0xff]  ;;  %v1689_v5 = vld [vmem:[%s1681_s30 + $0x80] sm:$0xff]  ;;  %v1708_v11 = vld [vmem:[%s1681_s30 + $0x8] sm:$0xff] }
  0x16   : > { %v1692_v6 = vld [vmem:[%s1681_s30 + $0x18] sm:$0xff]  ;;  %v1699_v8 = vpack.i.bf16 %v1689_v5, %v1686_v4  ;;  %v1702_v9 = vld [vmem:[%s1681_s30 + $0x20] sm:$0xff]  ;;  %v280_v12 = vrot.slane %v1686_v4, 1  ;;  %v281_v13 = vrot.slane %v1689_v5, 1  ;;  %v202_v16 = vld [vmem:[%s1681_s30 + $0x10] sm:$0x3] }
  0x17   : > { %v1705_v10 = vld [vmem:[%s1681_s30] sm:$0xff]  ;;  %v260_v14 = vrot.slane %v1692_v6, 1  ;;  %v1272_v15 = vpack.i.bf16 %v1702_v9, %v1692_v6  ;;  %v297_v18 = vrot.slane %v1708_v11, 2  ;;  %v299_v21 = vrot.slane %v202_v16, 2  ;;  %v1726_v24 = vld [vmem:[%s1681_s30 + $0x68] sm:$0xff]  ;;  %959 = vmatpush1.bf16.msra.mxu0 %v1555_v7  ;;  %1217 = vmatpush1.bf16.msra.mxu1 %v1555_v7  ;;  %v1772_v58 = vld [vmem:[%s1681_s30 + $0x90] sm:$0xff] }
  0x18   : > { %v296_v17 = vrot.slane %v1705_v10, 2  ;;  %v255_v19 = vrot.slane %v1705_v10, 1  ;;  %v1720_v20 = vld [vmem:[%s1681_s30 + $0x60] sm:$0xff]  ;;  %1278 = vrot.lane.b32.xlu1 %v1699_v8, %s1602_s6  ;;  %v256_v22 = vrot.slane %v1708_v11, 1  ;;  %v258_v23 = vrot.slane %v202_v16, 1  ;;  %960 = vmatprep.subr.bf16.mxu0 %v1601_v1  ;;  %v1775_v59 = vld [vmem:[%s1681_s30 + $0x98] sm:$0xff] }
  0x19   : > { %v214_v25 = vld [vmem:[%s1681_s30 + $0x70] sm:$0x3]  ;;  %v282_v26 = vsel %vm254_vm1, %v280_v12, %v281_v13  ;;  %1273 = vrot.lane.b32.xlu0 %v1272_v15, %s1602_s6  ;;  %v316_v28 = vrot.slane %v1720_v20, 2  ;;  %v317_v29 = vrot.slane %v1726_v24, 2  ;;  %v217_v31 = vld [vmem:[%s1681_s30 + $0x88] sm:$0x3]  ;;  %v300_v32 = vsel %vm295_vm0, %v297_v18, %v299_v21  ;;  %1209 = vmatprep.subr.bf16.mxu1 %v1601_v1 }
  0x1a   : > { %v298_v27 = vsel %vm295_vm0, %v296_v17, %v297_v18  ;;  %v319_v30 = vrot.slane %v214_v25, 2  ;;  %v257_v33 = vsel %vm254_vm1, %v255_v19, %v256_v22  ;;  %v259_v34 = vsel %vm254_vm1, %v256_v22, %v258_v23  ;;  %v205_v36 = vld [vmem:[%s1681_s30 + $0x28] sm:$0x3]  ;;  %v1791_v2 = vld [vmem:[%s1681_s30 + $0x30] sm:$0xff]  ;;  %v1794_v3 = vld [vmem:[%s1681_s30 + $0x38] sm:$0xff] }
  0x1b   : > { %v275_v35 = vrot.slane %v1720_v20, 1  ;;  %v1292_v37 = vpack.i.bf16 %v300_v32, %v298_v27  ;;  %v1282_v38 = vpack.i.bf16 %v259_v34, %v257_v33  ;;  %v1743_v39 = vsel %vm295_vm0, %v316_v28, %v317_v29  ;;  %961 = vmatpush1.bf16.msra.mxu0 %v1556_v41  ;;  %1218 = vmatpush1.bf16.msra.mxu1 %v1556_v41  ;;  %v1558_v17 = vld [vmem:[%s2274_s1 + $0x30] sm:$0xff]   ;;  %v1559_v28 = vld [vmem:[%s2274_s1 + $0x38] sm:$0xff]   ;;  %v1864_v41 = vld [vmem:[%s1681_s30 + $0xc8] sm:$0xff] }
  0x1c   : > { %v1746_v40 = vsel %vm295_vm0, %v317_v29, %v319_v30  ;;  %v276_v43 = vrot.slane %v1726_v24, 1  ;;  %v278_v44 = vrot.slane %v214_v25, 1  ;;  %v283_v45 = vrot.slane %v217_v31, 1  ;;  %962 = vmatprep.subr.bf16.mxu0 %v1601_v1  ;;  %1210 = vmatprep.subr.bf16.mxu1 %v1601_v1 }
  0x1d   : > { %v1753_v42 = vpack.i.bf16 %v1746_v40, %v1743_v39  ;;  %1293 = vrot.lane.b32.xlu1 %v1292_v37, %s1603_s9  ;;  %1283 = vrot.lane.b32.xlu0 %v1282_v38, %s1604_s10  ;;  %v261_v46 = vrot.slane %v1702_v9, 1  ;;  %v263_v47 = vrot.slane %v205_v36, 1  ;;  %v321_v48 = vrot.slane %v1686_v4, 2  ;;  %v1861_v38 = vld [vmem:[%s1681_s30 + $0xc0] sm:$0xff] }
  0x1e   : > { %v322_v49 = vrot.slane %v1689_v5, 2  ;;  %v277_v50 = vsel %vm254_vm1, %v275_v35, %v276_v43  ;;  %v279_v51 = vsel %vm254_vm1, %v276_v43, %v278_v44  ;;  %v284_v52 = vsel %vm254_vm1, %v281_v13, %v283_v45  ;;  %v1803_v13 = vld [vmem:[%s1681_s30 + $0xa0] sm:$0x3]  ;;  %v226_v43 = vld [vmem:[%s1681_s30 + $0xd0] sm:$0x3] }
  0x1f   : > { %v324_v53 = vrot.slane %v217_v31, 2  ;;  %v1766_v54 = vpack.i.bf16 %v279_v51, %v277_v50  ;;  %v262_v55 = vsel %vm254_vm1, %v260_v14, %v261_v46  ;;  %v264_v56 = vsel %vm254_vm1, %v261_v46, %v263_v47  ;;  %v1806_v14 = vld [vmem:[%s1681_s30 + $0x40] sm:$0x3]  ;;  %963 = vmatpush1.bf16.msra.mxu0 %v1557_v60  ;;  %1219 = vmatpush1.bf16.msra.mxu1 %v1557_v60  ;;  %v1894_v60 = vld [vmem:[%s1681_s30 + $0xe8] sm:$0x3] }
  0x20   : > { %v301_v57 = vrot.slane %v1692_v6, 2  ;;  %v1785_v61 = vpack.i.bf16 %v284_v52, %v282_v26  ;;  %v1787_v62 = vpack.i.bf16 %v264_v56, %v262_v55  ;;  %v302_v63 = vrot.slane %v1702_v9, 2  ;;  %964 = vmatprep.subr.bf16.mxu0 %v1601_v1  ;;  %1211 = vmatprep.subr.bf16.mxu1 %v1601_v1  ;;  %v1560_v35 = vld [vmem:[%s2274_s1 + $0x40] sm:$0xff]   ;;  %v1888_v55 = vld [vmem:[%s1681_s30 + $0xd8] sm:$0xff] }
  0x21   : > { %1298 = vrot.lane.b32.xlu1 %v1753_v42, %s1603_s9  ;;  %1288 = vrot.lane.b32.xlu0 %v1766_v54, %s1604_s10  ;;  %v304_v0 = vrot.slane %v205_v36, 2  ;;  %v1797_v7 = vsel %vm295_vm0, %v321_v48, %v322_v49  ;;  %v1800_v12 = vsel %vm295_vm0, %v322_v49, %v324_v53  ;;  %v285_v21 = vrot.slane %v1772_v58, 1  ;;  %v1881_v49 = vld [vmem:[%s1681_s30 + $0xe0] sm:$0xff] }
  0x22   : > { %v303_v15 = vsel %vm295_vm0, %v301_v57, %v302_v63  ;;  %v1317_v18 = vpack.i.bf16 %v1800_v12, %v1797_v7  ;;  %v286_v22 = vrot.slane %v1775_v59, 1  ;;  %v288_v23 = vrot.slane %v1803_v13, 1 }
  0x23   : > { %v305_v16 = vsel %vm295_vm0, %v302_v63, %v304_v0  ;;  %v265_v25 = vrot.slane %v1791_v2, 1  ;;  %v266_v26 = vrot.slane %v1794_v3, 1  ;;  %v268_v27 = vrot.slane %v1806_v14, 1  ;;  %965 = vmatpush1.bf16.msra.mxu0 %v1558_v17  ;;  %1220 = vmatpush1.bf16.msra.mxu1 %v1558_v17 }
  0x24   : > { %v1312_v19 = vpack.i.bf16 %v305_v16, %v303_v15  ;;  %966 = vmatprep.subr.bf16.mxu0 %v1601_v1  ;;  %v1836_v29 = vpack.i.bf16 %v1775_v59, %v1772_v58  ;;  %v1840_v30 = vpack.i.bf16 %v1794_v3, %v1791_v2  ;;  %v287_v31 = vsel %vm254_vm1, %v285_v21, %v286_v22 }
  0x25   : > { %1308 = vrot.lane.b32.xlu1 %v1785_v61, %s1605_s22  ;;  %1303 = vrot.lane.b32.xlu0 %v1787_v62, %s1605_s22  ;;  %v289_v32 = vsel %vm254_vm1, %v286_v22, %v288_v23  ;;  %v267_v33 = vsel %vm254_vm1, %v265_v25, %v266_v26  ;;  %v269_v34 = vsel %vm254_vm1, %v266_v26, %v268_v27  ;;  %v339_v44 = vrot.slane %v1861_v38, 1  ;;  %v1913_v23 = vld [vmem:[%s1681_s30 + $0xa8] sm:$0xff]  ;;  %v1922_v27 = vld [vmem:[%s1681_s30 + $0xb0] sm:$0xff] }
  0x26   : > { %1212 = vmatprep.subr.bf16.mxu1 %v1601_v1  ;;  %v1855_v36 = vpack.i.bf16 %v289_v32, %v287_v31  ;;  %v1857_v37 = vpack.i.bf16 %v269_v34, %v267_v33  ;;  %v326_v45 = vrot.slane %v1772_v58, 2  ;;  %v342_v46 = vrot.slane %v226_v43, 1  ;;  %v1928_v31 = vld [vmem:[%s1681_s30 + $0x50] sm:$0xff]  ;;  %v223_v34 = vld [vmem:[%s1681_s30 + $0xb8] sm:$0x3] }
  0x27   : > { %967 = vmatpush1.bf16.msra.mxu0 %v1559_v28  ;;  %1221 = vmatpush1.bf16.msra.mxu1 %v1559_v28  ;;  %v327_v47 = vrot.slane %v1775_v59, 2  ;;  %v329_v50 = vrot.slane %v1803_v13, 2  ;;  %v306_v51 = vrot.slane %v1791_v2, 2  ;;  %v344_v53 = vrot.slane %v1861_v38, 2  ;;  %v1925_v28 = vld [vmem:[%s1681_s30 + $0x48] sm:$0xff] }
  0x28   : > { %968 = vmatprep.subr.bf16.mxu0 %v1601_v1  ;;  %1213 = vmatprep.subr.bf16.mxu1 %v1601_v1  ;;  %v340_v1 = vrot.slane %v1864_v41, 1  ;;  %v307_v56 = vrot.slane %v1794_v3, 2  ;;  %v345_v63 = vrot.slane %v1864_v41, 2  ;;  %v347_v0 = vrot.slane %v226_v43, 2 }
  0x29   : > { %1318 = vrot.lane.b32.xlu1 %v1317_v18, %s1606_s25  ;;  %1313 = vrot.lane.b32.xlu0 %v1312_v19, %s1606_s25  ;;  %v353_v13 = vrot.slane %v1881_v49, 1  ;;  %v352_v15 = vrot.slane %v1888_v55, 1  ;;  %v328_v16 = vsel %vm295_vm0, %v326_v45, %v327_v47  ;;  %v355_v21 = vrot.slane %v1894_v60, 1 }
  0x2a   : > { %v341_v48 = vsel %vm254_vm1, %v339_v44, %v340_v1  ;;  %v343_v52 = vsel %vm254_vm1, %v340_v1, %v342_v46  ;;  %v1904_v17 = vsel %vm295_vm0, %v344_v53, %v345_v63  ;;  %v330_v22 = vsel %vm295_vm0, %v327_v47, %v329_v50 }
  0x2b   : > { %969 = vmatpush1.bf16.msra.mxu0 %v1560_v35  ;;  %1222 = vmatpush1.bf16.msra.mxu1 %v1560_v35  ;;  %v1891_v57 = vpack.i.bf16 %v343_v52, %v341_v48  ;;  %v1918_v25 = vsel %vm254_vm1, %v352_v15, %v353_v13  ;;  %v331_v32 = vrot.slane %v1913_v23, 2  ;;  %v1932_v33 = vsel %vm254_vm1, %v353_v13, %v355_v21  ;;  %v211_v35 = vld [vmem:[%s1681_s30 + $0x58] sm:$0x3]  ;;  %s1179_s30 = sshll.u32 %s1583_s12, 3 }
  0x2c   : > { %v332_v43 = vrot.slane %v1922_v27, 2  ;;  %v1547_v44 = vpack.i.bf16 %v1932_v33, %v1918_v25  ;;  %v842_v45 = vpack.c.bf16 %v330_v22, %v328_v16  ;;  %v334_v46 = vrot.slane %v223_v34, 2  ;;  %p188_p6 = scmp.lt.s32.totalorder %s1179_s30, 15 }
  0x2d   : > { %1328 = vrot.lane.b32.xlu1 %v1836_v29, %s1607_s28  ;;  %1323 = vrot.lane.b32.xlu0 %v1840_v30, %s1607_s28  ;;  %v311_v47 = vrot.slane %v1925_v28, 2  ;;  %v312_v48 = vrot.slane %v1928_v31, 2  ;;  %v314_v50 = vrot.slane %v211_v35, 2  ;;  %v293_v52 = vrot.slane %v223_v34, 1 }
  0x2e   : > { %1199 = vmatprep.mubr.msk.bf16.mxu1 %vm714_vm2, %v842_v45  ;;  %v1959_v13 = vsel %vm295_vm0, %v332_v43, %v334_v46  ;;  %s2290_s30 = smov (!%p188_p6, %s1179_s30), 15 }
  0x2f   : > { %v1962_v15 = vsel %vm295_vm0, %v311_v47, %v312_v48  ;;  %v1462_v47 = vpack.i.bf16 %v1726_v24, %v1720_v20  ;;  %s1180_s4 = sshll.u32 %s2290_s30, 1 }
  0x31   : > { %1338 = vrot.lane.b32.xlu1 %v1855_v36, %s1608_s29  ;;  %1333 = vrot.lane.b32.xlu0 %v1857_v37, %s1608_s29 }
  0x35   : > { %1348 = vrot.lane.b32.xlu1 %v1785_v61, %s1604_s10  ;;  %1343 = vrot.lane.b32.xlu0 %v1787_v62, %s1604_s10  ;;  %v309_v62 = vrot.slane %v1806_v14, 2  ;;  %v1907_v14 = vsel %vm295_vm0, %v345_v63, %v347_v0  ;;  %v273_v63 = vrot.slane %v211_v35, 1  ;;  %v1956_v0 = vsel %vm295_vm0, %v331_v32, %v332_v43 }
  0x36   : > { %v1457_v46 = vpack.i.bf16 %v1959_v13, %v1956_v0 }
  0x37   : > { %v310_v26 = vsel %vm295_vm0, %v307_v56, %v309_v62  ;;  %v271_v62 = vrot.slane %v1928_v31, 1 }
  0x39   : > { %1358 = vrot.lane.b32.xlu1 %v1317_v18, %s1603_s9  ;;  %1353 = vrot.lane.b32.xlu0 %v1312_v19, %s1603_s9  ;;  %v308_v18 = vsel %vm295_vm0, %v306_v51, %v307_v56  ;;  %v846_v19 = vpack.c.bf16 %v1907_v14, %v1904_v17  ;;  %v291_v51 = vrot.slane %v1922_v27, 1  ;;  %v270_v56 = vrot.slane %v1925_v28, 1 }
  0x3a   : > { %v834_v1 = vpack.c.bf16 %v310_v26, %v308_v18  ;;  %v1382_v53 = vpack.i.bf16 %v310_v26, %v308_v18  ;;  %v1397_v18 = vpack.i.bf16 %v1922_v27, %v1913_v23  ;;  %v1392_v26 = vpack.i.bf16 %v1928_v31, %v1925_v28 }
  0x3b   : > { %v294_v34 = vsel %vm254_vm1, %v291_v51, %v293_v52  ;;  %v272_v35 = vsel %vm254_vm1, %v270_v56, %v271_v62  ;;  %v274_v43 = vsel %vm254_vm1, %v271_v62, %v273_v63 }
  0x3c   : > { %1195 = vmatprep.mubr.msk.bf16.mxu0 %vm714_vm2, %v834_v1  ;;  %v1402_v45 = vpack.i.bf16 %v274_v43, %v272_v35 }
  0x3d   : > { %1368 = vrot.lane.b32.xlu1 %v1836_v29, %s1602_s6  ;;  %1363 = vrot.lane.b32.xlu0 %v1840_v30, %s1602_s6  ;;  %v1387_v29 = vpack.i.bf16 %v330_v22, %v328_v16  ;;  %v290_v30 = vrot.slane %v1913_v23, 1  ;;  %v1965_v16 = vsel %vm295_vm0, %v312_v48, %v314_v50  ;;  %v844_v22 = vpack.c.bf16 %v1959_v13, %v1956_v0 }
  0x3e   : > { %v836_v21 = vpack.c.bf16 %v1965_v16, %v1962_v15  ;;  %v360_v48 = vrot.slane %v1894_v60, 2 }
  0x3f   : > { %v292_v32 = vsel %vm254_vm1, %v290_v30, %v291_v51  ;;  %v1527_v30 = vpack.i.bf16 %v1907_v14, %v1904_v17  ;;  %v1537_v51 = vpack.i.bf16 %v1881_v49, %v1888_v55 }
  0x40   : > { %v1407_v1 = vpack.i.bf16 %v294_v34, %v292_v32 }
  0x41   : > { %1378 = vrot.lane.b32.xlu1 %v1855_v36, %s1605_s22  ;;  %1373 = vrot.lane.b32.xlu0 %v1857_v37, %s1605_s22 }
  0x45   : > { %1388 = vrot.lane.b32.xlu1 %v1387_v29, %s1606_s25  ;;  %1383 = vrot.lane.b32.xlu0 %v1382_v53, %s1606_s25 }
  0x49   : > { %1398 = vrot.lane.b32.xlu1 %v1397_v18, %s1607_s28  ;;  %1393 = vrot.lane.b32.xlu0 %v1392_v26, %s1607_s28 }
  0x4d   : > { %1408 = vrot.lane.b32.xlu1 %v1407_v1, %s1608_s29  ;;  %1403 = vrot.lane.b32.xlu0 %v1402_v45, %s1608_s29 }
  0x51   : > { %1418 = vrot.lane.b32.xlu1 %v1855_v36, %s1604_s10  ;;  %1413 = vrot.lane.b32.xlu0 %v1857_v37, %s1604_s10  ;;  %v1452_v36 = vpack.i.bf16 %v1965_v16, %v1962_v15  ;;  %v1467_v37 = vpack.i.bf16 %v1864_v41, %v1861_v38  ;;  %v358_v38 = vrot.slane %v1881_v49, 2  ;;  %v357_v41 = vrot.slane %v1888_v55, 2 }
  0x53   : > { %v2021_v50 = vsel %vm295_vm0, %v357_v41, %v358_v38 }
  0x55   : > { %1428 = vrot.lane.b32.xlu1 %v1387_v29, %s1603_s9  ;;  %1423 = vrot.lane.b32.xlu0 %v1382_v53, %s1603_s9  ;;  %v2024_v29 = vsel %vm295_vm0, %v358_v38, %v360_v48 }
  0x56   : > { %v848_v60 = vpack.c.bf16 %v2024_v29, %v2021_v50 }
  0x59   : > { %1438 = vrot.lane.b32.xlu1 %v1397_v18, %s1602_s6  ;;  %1433 = vrot.lane.b32.xlu0 %v1392_v26, %s1602_s6 }
  0x5d   : > { %1448 = vrot.lane.b32.xlu1 %v1407_v1, %s1605_s22  ;;  %1443 = vrot.lane.b32.xlu0 %v1402_v45, %s1605_s22 }
  0x61   : > { %1458 = vrot.lane.b32.xlu1 %v1457_v46, %s1606_s25  ;;  %1453 = vrot.lane.b32.xlu0 %v1452_v36, %s1606_s25 }
  0x65   : > { %1468 = vrot.lane.b32.xlu1 %v1467_v37, %s1607_s28  ;;  %1463 = vrot.lane.b32.xlu0 %v1462_v47, %s1607_s28 }
  0x69   : > { %1478 = vrot.lane.b32.xlu1 %v1891_v57, %s1608_s29  ;;  %1473 = vrot.lane.b32.xlu0 %v1766_v54, %s1608_s29 }
  0x6d   : > { %1488 = vrot.lane.b32.xlu1 %v1407_v1, %s1604_s10  ;;  %1483 = vrot.lane.b32.xlu0 %v1402_v45, %s1604_s10 }
  0x71   : > { %1498 = vrot.lane.b32.xlu1 %v1457_v46, %s1603_s9  ;;  %1493 = vrot.lane.b32.xlu0 %v1452_v36, %s1603_s9 }
  0x75   : > { %1508 = vrot.lane.b32.xlu1 %v1467_v37, %s1602_s6  ;;  %1503 = vrot.lane.b32.xlu0 %v1462_v47, %s1602_s6  ;;  %s192_s6 = sadd.s32 %s1181_s5, %s1180_s4 }
  0x76   : > { %s1182_s9 = sshll.u32 %s192_s6, 3 }
  0x77   : > { %s2210_s11 = scalar_lea.vmem %s2276_s3, %s1182_s9 }
  0x79   : > { %1518 = vrot.lane.b32.xlu1 %v1891_v57, %s1605_s22  ;;  %1513 = vrot.lane.b32.xlu0 %v1766_v54, %s1605_s22 }
  0x7d   : > { %1528 = vrot.lane.b32.xlu1 %v1527_v30, %s1606_s25  ;;  %1523 = vrot.lane.b32.xlu0 %v1753_v42, %s1606_s25 }
  0x81   : > { %1538 = vrot.lane.b32.xlu1 %v1537_v51, %s1607_s28  ;;  %1533 = vrot.lane.b32.xlu0 %v1699_v8, %s1607_s28 }
  0x85   : > { %1548 = vrot.lane.b32.xlu1 %v1547_v44, %s1608_s29  ;;  %1543 = vrot.lane.b32.xlu0 %v1785_v61, %s1608_s29 }
  0x8a   : > { %v1279_v54 = vpop.permute.xlu1 %1278 }
  0x8b   : > { %v1274_v57 = vpop.permute.xlu0 %1273  ;;  %v1281_v46 = vunpack.i.h.bf16 %v1279_v54 }
  0x8c   : > { %v1276_v36 = vunpack.i.h.bf16 %v1274_v57  ;;  %v1275_v37 = vunpack.i.l.bf16 %v1274_v57 }
  0x8f   : > { %v1294_v52 = vpop.permute.xlu1 %1293  ;;  %v1284_v42 = vpop.permute.xlu0 %1283 }
  0x90   : > { %v1286_v62 = vunpack.i.h.bf16 %v1284_v42  ;;  %v1285_v63 = vunpack.i.l.bf16 %v1284_v42  ;;  %v1296_v33 = vunpack.i.h.bf16 %v1294_v52  ;;  %v1295_v44 = vunpack.i.l.bf16 %v1294_v52 }
  0x92   : > { %v716_v34 = vsel %vm714_vm2, %v1708_v11, %v1286_v62  ;;  %v715_v35 = vsel %vm714_vm2, %v1705_v10, %v1285_v63 }
  0x93   : > { %v1299_v53 = vpop.permute.xlu1 %1298  ;;  %v1289_v56 = vpop.permute.xlu0 %1288  ;;  %v733_v47 = vsel %vm731_vm3, %v716_v34, %v1296_v33  ;;  %v732_v11 = vsel %vm731_vm3, %v715_v35, %v1295_v44 }
  0x94   : > { %v1291_v49 = vunpack.i.h.bf16 %v1289_v56  ;;  %v1290_v55 = vunpack.i.l.bf16 %v1289_v56  ;;  %v1301_v18 = vunpack.i.h.bf16 %v1299_v53  ;;  %v1300_v8 = vunpack.i.l.bf16 %v1299_v53 }
  0x95   : > { %v749_v57 = vsel %vm748_vm4, %v732_v11, %v1275_v37 }
  0x96   : > { %v724_v25 = vsel %vm714_vm2, %v1726_v24, %v1291_v49  ;;  %v723_v61 = vsel %vm714_vm2, %v1720_v20, %v1290_v55  ;;  %v1280_v20 = vunpack.i.l.bf16 %v1279_v54  ;;  %v750_v55 = vsel %vm748_vm4, %v733_v47, %v1276_v36 }
  0x97   : > { %v1309_v26 = vpop.permute.xlu1 %1308  ;;  %v1304_v32 = vpop.permute.xlu0 %1303  ;;  %v741_v43 = vsel %vm731_vm3, %v724_v25, %v1301_v18  ;;  %v740_v1 = vsel %vm731_vm3, %v723_v61, %v1300_v8 }
  0x98   : > { %v1311_v38 = vunpack.i.h.bf16 %v1309_v26  ;;  %v1310_v41 = vunpack.i.l.bf16 %v1309_v26  ;;  %v757_v10 = vsel %vm748_vm4, %v740_v1, %v1280_v20  ;;  %v758_v48 = vsel %vm748_vm4, %v741_v43, %v1281_v46 }
  0x99   : > { %v1306_v30 = vunpack.i.h.bf16 %v1304_v32  ;;  %v1305_v51 = vunpack.i.l.bf16 %v1304_v32 }
  0x9a   : > { %v774_v26 = vsel %vm765_vm5, %v757_v10, %v1310_v41  ;;  %v775_v32 = vsel %vm765_vm5, %v758_v48, %v1311_v38 }
  0x9b   : > { %v1319_v24 = vpop.permute.xlu1 %1318  ;;  %v1314_v45 = vpop.permute.xlu0 %1313  ;;  %v766_v25 = vsel %vm765_vm5, %v749_v57, %v1305_v51  ;;  %v767_v61 = vsel %vm765_vm5, %v750_v55, %v1306_v30 }
  0x9c   : > { %v1321_v52 = vunpack.i.h.bf16 %v1319_v24  ;;  %v1320_v42 = vunpack.i.l.bf16 %v1319_v24  ;;  %v1316_v53 = vunpack.i.h.bf16 %v1314_v45  ;;  %v1315_v56 = vunpack.i.l.bf16 %v1314_v45 }
  0x9e   : > { %v791_v33 = vsel %vm782_vm6, %v774_v26, %v1320_v42  ;;  %v792_v44 = vsel %vm782_vm6, %v775_v32, %v1321_v52  ;;  %v783_v34 = vsel %vm782_vm6, %v766_v25, %v1315_v56  ;;  %v784_v35 = vsel %vm782_vm6, %v767_v61, %v1316_v53 }
  0x9f   : > { %v1329_v49 = vpop.permute.xlu1 %1328  ;;  %v1324_v54 = vpop.permute.xlu0 %1323 }
  0xa0   : > { %v1331_v62 = vunpack.i.h.bf16 %v1329_v49  ;;  %v1330_v63 = vunpack.i.l.bf16 %v1329_v49  ;;  %v1326_v18 = vunpack.i.h.bf16 %v1324_v54  ;;  %v1325_v8 = vunpack.i.l.bf16 %v1324_v54 }
  0xa2   : > { %v808_v36 = vsel %vm799_vm7, %v791_v33, %v1330_v63  ;;  %v809_v37 = vsel %vm799_vm7, %v792_v44, %v1331_v62  ;;  %v800_v47 = vsel %vm799_vm7, %v783_v34, %v1325_v8  ;;  %v801_v11 = vsel %vm799_vm7, %v784_v35, %v1326_v18 }
  0xa3   : > { %v1339_v43 = vpop.permute.xlu1 %1338  ;;  %v1334_v1 = vpop.permute.xlu0 %1333 }
  0xa4   : > { %v1341_v24 = vunpack.i.h.bf16 %v1339_v43  ;;  %v1340_v45 = vunpack.i.l.bf16 %v1339_v43  ;;  %v1336_v46 = vunpack.i.h.bf16 %v1334_v1  ;;  %v1335_v20 = vunpack.i.l.bf16 %v1334_v1 }
  0xa6   : > { %v817_v38 = vsel %vm816_vm8, %v800_v47, %v1335_v20  ;;  %v818_v41 = vsel %vm816_vm8, %v801_v11, %v1336_v46  ;;  %v825_v10 = vsel %vm816_vm8, %v808_v36, %v1340_v45  ;;  %v826_v48 = vsel %vm816_vm8, %v809_v37, %v1341_v24 }
  0xa7   : > { %v1349_v30 = vpop.permute.xlu1 %1348  ;;  %v1344_v51 = vpop.permute.xlu0 %1343  ;;  %v833_v52 = vpack.c.bf16 %v818_v41, %v817_v38  ;;  %v841_v42 = vpack.c.bf16 %v826_v48, %v825_v10 }
  0xa8   : > { %v1351_v57 = vunpack.i.h.bf16 %v1349_v30  ;;  %v1350_v55 = vunpack.i.l.bf16 %v1349_v30  ;;  %v1346_v62 = vunpack.i.h.bf16 %v1344_v51  ;;  %v1345_v63 = vunpack.i.l.bf16 %v1344_v51 }
  0xa9   : > { %985 = vmatmul.mubr.bf16.vlgmr.msra.gmra.mrb[0].mxu0 %v833_v52  ;;  %1017 = vmatmul.mubr.bf16.vlgmr.msra.gmra.mrb[0].mxu1 %v841_v42 }
  0xaa   : > { %1196 = vmatprep.mubr.msk.bf16.mxu0 %vm714_vm2, %v836_v21  ;;  %1200 = vmatprep.mubr.msk.bf16.mxu1 %vm714_vm2, %v844_v22  ;;  %v838_v21 = vpack.c.bf16 %v1746_v40, %v1743_v39  ;;  %v726_v0 = vsel %vm714_vm2, %v1689_v5, %v1351_v57  ;;  %v725_v13 = vsel %vm714_vm2, %v1686_v4, %v1350_v55 }
  0xab   : > { %v1359_v53 = vpop.permute.xlu1 %1358  ;;  %v1354_v56 = vpop.permute.xlu0 %1353  ;;  %v718_v22 = vsel %vm714_vm2, %v1702_v9, %v1346_v62  ;;  %v717_v25 = vsel %vm714_vm2, %v1692_v6, %v1345_v63 }
  0xac   : > { %v1361_v26 = vunpack.i.h.bf16 %v1359_v53  ;;  %v1360_v32 = vunpack.i.l.bf16 %v1359_v53  ;;  %v1356_v15 = vunpack.i.h.bf16 %v1354_v56  ;;  %v1355_v16 = vunpack.i.l.bf16 %v1354_v56 }
  0xae   : > { %v742_v39 = vsel %vm731_vm3, %v725_v13, %v1360_v32  ;;  %v743_v40 = vsel %vm731_vm3, %v726_v0, %v1361_v26  ;;  %v734_v5 = vsel %vm731_vm3, %v717_v25, %v1355_v16  ;;  %v735_v4 = vsel %vm731_vm3, %v718_v22, %v1356_v15 }
  0xaf   : > { %v1369_v49 = vpop.permute.xlu1 %1368  ;;  %v1364_v54 = vpop.permute.xlu0 %1363 }
  0xb0   : > { %v1371_v44 = vunpack.i.h.bf16 %v1369_v49  ;;  %v1370_v34 = vunpack.i.l.bf16 %v1369_v49  ;;  %v1366_v35 = vunpack.i.h.bf16 %v1364_v54  ;;  %v1365_v43 = vunpack.i.l.bf16 %v1364_v54 }
  0xb2   : > { %v759_v11 = vsel %vm748_vm4, %v742_v39, %v1370_v34  ;;  %v760_v38 = vsel %vm748_vm4, %v743_v40, %v1371_v44  ;;  %v751_v41 = vsel %vm748_vm4, %v734_v5, %v1365_v43  ;;  %v752_v10 = vsel %vm748_vm4, %v735_v4, %v1366_v35 }
  0xb3   : > { %v1379_v18 = vpop.permute.xlu1 %1378  ;;  %v1374_v8 = vpop.permute.xlu0 %1373 }
  0xb4   : > { %v1381_v1 = vunpack.i.h.bf16 %v1379_v18  ;;  %v1380_v24 = vunpack.i.l.bf16 %v1379_v18  ;;  %v1376_v9 = vunpack.i.h.bf16 %v1374_v8  ;;  %v1375_v45 = vunpack.i.l.bf16 %v1374_v8 }
  0xb6   : > { %v776_v42 = vsel %vm765_vm5, %v759_v11, %v1380_v24  ;;  %v777_v53 = vsel %vm765_vm5, %v760_v38, %v1381_v1  ;;  %v768_v56 = vsel %vm765_vm5, %v751_v41, %v1375_v45  ;;  %v769_v49 = vsel %vm765_vm5, %v752_v10, %v1376_v9 }
  0xb7   : > { %v1389_v61 = vpop.permute.xlu1 %1388  ;;  %v1384_v33 = vpop.permute.xlu0 %1383 }
  0xb8   : > { %v1391_v46 = vunpack.i.h.bf16 %v1389_v61  ;;  %v1390_v6 = vunpack.i.l.bf16 %v1389_v61  ;;  %v1386_v20 = vunpack.i.h.bf16 %v1384_v33  ;;  %v1385_v36 = vunpack.i.l.bf16 %v1384_v33 }
  0xba   : > { %v793_v54 = vsel %vm782_vm6, %v776_v42, %v1390_v6  ;;  %v794_v57 = vsel %vm782_vm6, %v777_v53, %v1391_v46  ;;  %v785_v55 = vsel %vm782_vm6, %v768_v56, %v1385_v36  ;;  %v786_v62 = vsel %vm782_vm6, %v769_v49, %v1386_v20 }
  0xbb   : > { %v1399_v37 = vpop.permute.xlu1 %1398  ;;  %v1394_v47 = vpop.permute.xlu0 %1393 }
  0xbc   : > { %v1401_v48 = vunpack.i.h.bf16 %v1399_v37  ;;  %v1400_v30 = vunpack.i.l.bf16 %v1399_v37  ;;  %v1396_v51 = vunpack.i.h.bf16 %v1394_v47  ;;  %v1395_v52 = vunpack.i.l.bf16 %v1394_v47 }
  0xbe   : > { %v810_v16 = vsel %vm799_vm7, %v793_v54, %v1400_v30  ;;  %v811_v0 = vsel %vm799_vm7, %v794_v57, %v1401_v48  ;;  %v802_v13 = vsel %vm799_vm7, %v785_v55, %v1395_v52  ;;  %v803_v22 = vsel %vm799_vm7, %v786_v62, %v1396_v51 }
  0xbf   : > { %v1409_v63 = vpop.permute.xlu1 %1408  ;;  %v1404_v18 = vpop.permute.xlu0 %1403 }
  0xc0   : > { %v1411_v8 = vunpack.i.h.bf16 %v1409_v63  ;;  %v1410_v26 = vunpack.i.l.bf16 %v1409_v63  ;;  %v1406_v32 = vunpack.i.h.bf16 %v1404_v18  ;;  %v1405_v15 = vunpack.i.l.bf16 %v1404_v18 }
  0xc2   : > { %v819_v25 = vsel %vm816_vm8, %v802_v13, %v1405_v15  ;;  %v820_v61 = vsel %vm816_vm8, %v803_v22, %v1406_v32  ;;  %v827_v33 = vsel %vm816_vm8, %v810_v16, %v1410_v26  ;;  %v828_v44 = vsel %vm816_vm8, %v811_v0, %v1411_v8 }
  0xc3   : > { %v1419_v34 = vpop.permute.xlu1 %1418  ;;  %v1414_v35 = vpop.permute.xlu0 %1413  ;;  %v835_v43 = vpack.c.bf16 %v820_v61, %v819_v25  ;;  %v843_v39 = vpack.c.bf16 %v828_v44, %v827_v33 }
  0xc4   : > { %v1421_v24 = vunpack.i.h.bf16 %v1419_v34  ;;  %v1420_v9 = vunpack.i.l.bf16 %v1419_v34  ;;  %v1416_v45 = vunpack.i.h.bf16 %v1414_v35  ;;  %v1415_v46 = vunpack.i.l.bf16 %v1414_v35 }
  0xc5   : > { %993 = vmatmul.mubr.bf16.gmra.mrb[4].mxu0 %v835_v43  ;;  %1025 = vmatmul.mubr.bf16.gmra.mrb[4].mxu1 %v843_v39 }
  0xc6   : > { %1197 = vmatprep.mubr.msk.bf16.mxu0 %vm714_vm2, %v838_v21  ;;  %1201 = vmatprep.mubr.msk.bf16.mxu1 %vm714_vm2, %v846_v19  ;;  %v840_v21 = vpack.c.bf16 %v1800_v12, %v1797_v7  ;;  %v728_v17 = vsel %vm714_vm2, %v1775_v59, %v1421_v24  ;;  %v727_v14 = vsel %vm714_vm2, %v1772_v58, %v1420_v9 }
  0xc7   : > { %v1429_v40 = vpop.permute.xlu1 %1428  ;;  %v1424_v5 = vpop.permute.xlu0 %1423  ;;  %v720_v19 = vsel %vm714_vm2, %v1794_v3, %v1416_v45  ;;  %v719_v38 = vsel %vm714_vm2, %v1791_v2, %v1415_v46 }
  0xc8   : > { %v1431_v36 = vunpack.i.h.bf16 %v1429_v40  ;;  %v1430_v37 = vunpack.i.l.bf16 %v1429_v40  ;;  %v1426_v47 = vunpack.i.h.bf16 %v1424_v5  ;;  %v1425_v11 = vunpack.i.l.bf16 %v1424_v5 }
  0xca   : > { %v744_v7 = vsel %vm731_vm3, %v727_v14, %v1430_v37  ;;  %v745_v12 = vsel %vm731_vm3, %v728_v17, %v1431_v36  ;;  %v736_v59 = vsel %vm731_vm3, %v719_v38, %v1425_v11  ;;  %v737_v58 = vsel %vm731_vm3, %v720_v19, %v1426_v47 }
  0xcb   : > { %v1439_v4 = vpop.permute.xlu1 %1438  ;;  %v1434_v1 = vpop.permute.xlu0 %1433 }
  0xcc   : > { %v1441_v48 = vunpack.i.h.bf16 %v1439_v4  ;;  %v1440_v30 = vunpack.i.l.bf16 %v1439_v4  ;;  %v1436_v51 = vunpack.i.h.bf16 %v1434_v1  ;;  %v1435_v52 = vunpack.i.l.bf16 %v1434_v1 }
  0xce   : > { %v761_v63 = vsel %vm748_vm4, %v744_v7, %v1440_v30  ;;  %v762_v18 = vsel %vm748_vm4, %v745_v12, %v1441_v48  ;;  %v753_v8 = vsel %vm748_vm4, %v736_v59, %v1435_v52  ;;  %v754_v26 = vsel %vm748_vm4, %v737_v58, %v1436_v51 }
  0xcf   : > { %v1449_v6 = vpop.permute.xlu1 %1448  ;;  %v1444_v20 = vpop.permute.xlu0 %1443 }
  0xd0   : > { %v1451_v42 = vunpack.i.h.bf16 %v1449_v6  ;;  %v1450_v53 = vunpack.i.l.bf16 %v1449_v6  ;;  %v1446_v3 = vunpack.i.h.bf16 %v1444_v20  ;;  %v1445_v56 = vunpack.i.l.bf16 %v1444_v20 }
  0xd2   : > { %v778_v13 = vsel %vm765_vm5, %v761_v63, %v1450_v53  ;;  %v779_v22 = vsel %vm765_vm5, %v762_v18, %v1451_v42  ;;  %v770_v25 = vsel %vm765_vm5, %v753_v8, %v1445_v56  ;;  %v771_v61 = vsel %vm765_vm5, %v754_v26, %v1446_v3 }
  0xd3   : > { %v1459_v41 = vpop.permute.xlu1 %1458  ;;  %v1454_v10 = vpop.permute.xlu0 %1453 }
  0xd4   : > { %v1461_v49 = vunpack.i.h.bf16 %v1459_v41  ;;  %v1460_v2 = vunpack.i.l.bf16 %v1459_v41  ;;  %v1456_v54 = vunpack.i.h.bf16 %v1454_v10  ;;  %v1455_v57 = vunpack.i.l.bf16 %v1454_v10 }
  0xd6   : > { %v795_v33 = vsel %vm782_vm6, %v778_v13, %v1460_v2  ;;  %v796_v44 = vsel %vm782_vm6, %v779_v22, %v1461_v49  ;;  %v787_v34 = vsel %vm782_vm6, %v770_v25, %v1455_v57  ;;  %v788_v35 = vsel %vm782_vm6, %v771_v61, %v1456_v54 }
  0xd7   : > { %v1469_v55 = vpop.permute.xlu1 %1468  ;;  %v1464_v62 = vpop.permute.xlu0 %1463 }
  0xd8   : > { %v1471_v32 = vunpack.i.h.bf16 %v1469_v55  ;;  %v1470_v15 = vunpack.i.l.bf16 %v1469_v55  ;;  %v1466_v16 = vunpack.i.h.bf16 %v1464_v62  ;;  %v1465_v0 = vunpack.i.l.bf16 %v1464_v62 }
  0xda   : > { %v812_v24 = vsel %vm799_vm7, %v795_v33, %v1470_v15  ;;  %v813_v9 = vsel %vm799_vm7, %v796_v44, %v1471_v32  ;;  %v804_v45 = vsel %vm799_vm7, %v787_v34, %v1465_v0  ;;  %v805_v46 = vsel %vm799_vm7, %v788_v35, %v1466_v16 }
  0xdb   : > { %v1479_v43 = vpop.permute.xlu1 %1478  ;;  %v1474_v39 = vpop.permute.xlu0 %1473 }
  0xdc   : > { %v1481_v40 = vunpack.i.h.bf16 %v1479_v43  ;;  %v1480_v5 = vunpack.i.l.bf16 %v1479_v43  ;;  %v1476_v4 = vunpack.i.h.bf16 %v1474_v39  ;;  %v1475_v1 = vunpack.i.l.bf16 %v1474_v39 }
  0xde   : > { %v821_v6 = vsel %vm816_vm8, %v804_v45, %v1475_v1  ;;  %v822_v20 = vsel %vm816_vm8, %v805_v46, %v1476_v4  ;;  %v829_v36 = vsel %vm816_vm8, %v812_v24, %v1480_v5  ;;  %v830_v37 = vsel %vm816_vm8, %v813_v9, %v1481_v40 }
  0xdf   : > { %v1489_v47 = vpop.permute.xlu1 %1488  ;;  %v1484_v11 = vpop.permute.xlu0 %1483  ;;  %v837_v17 = vpack.c.bf16 %v822_v20, %v821_v6  ;;  %v845_v14 = vpack.c.bf16 %v830_v37, %v829_v36 }
  0xe0   : > { %v1491_v48 = vunpack.i.h.bf16 %v1489_v47  ;;  %v1490_v30 = vunpack.i.l.bf16 %v1489_v47  ;;  %v1486_v51 = vunpack.i.h.bf16 %v1484_v11  ;;  %v1485_v52 = vunpack.i.l.bf16 %v1484_v11 }
  0xe1   : > { %1001 = vmatmul.mubr.bf16.gmra.mrb[8].mxu0 %v837_v17  ;;  %1033 = vmatmul.mubr.bf16.gmra.mrb[8].mxu1 %v845_v14 }
  0xe2   : > { %1198 = vmatprep.mubr.msk.bf16.mxu0 %vm714_vm2, %v840_v21  ;;  %1202 = vmatprep.mubr.msk.bf16.mxu1 %vm714_vm2, %v848_v60  ;;  %v730_v21 = vsel %vm714_vm2, %v1922_v27, %v1491_v48  ;;  %v729_v50 = vsel %vm714_vm2, %v1913_v23, %v1490_v30  ;;  %v722_v29 = vsel %vm714_vm2, %v1928_v31, %v1486_v51  ;;  %v2203_v51 = vld [vmem:[%s2275_s2] ss:$0 sm:$0xff] }
  0xe3   : > { %v1499_v19 = vpop.permute.xlu1 %1498  ;;  %v1494_v38 = vpop.permute.xlu0 %1493  ;;  %v721_v60 = vsel %vm714_vm2, %v1925_v28, %v1485_v52 }
  0xe4   : > { %v1501_v59 = vunpack.i.h.bf16 %v1499_v19  ;;  %v1500_v58 = vunpack.i.l.bf16 %v1499_v19  ;;  %v1496_v42 = vunpack.i.h.bf16 %v1494_v38  ;;  %v1495_v53 = vunpack.i.l.bf16 %v1494_v38 }
  0xe6   : > { %v746_v55 = vsel %vm731_vm3, %v729_v50, %v1500_v58  ;;  %v747_v62 = vsel %vm731_vm3, %v730_v21, %v1501_v59  ;;  %v738_v27 = vsel %vm731_vm3, %v721_v60, %v1495_v53  ;;  %v739_v23 = vsel %vm731_vm3, %v722_v29, %v1496_v42 }
  0xe7   : > { %v1509_v41 = vpop.permute.xlu1 %1508  ;;  %v1504_v10 = vpop.permute.xlu0 %1503 }
  0xe8   : > { %v1511_v49 = vunpack.i.h.bf16 %v1509_v41  ;;  %v1510_v2 = vunpack.i.l.bf16 %v1509_v41  ;;  %v1506_v54 = vunpack.i.h.bf16 %v1504_v10  ;;  %v1505_v57 = vunpack.i.l.bf16 %v1504_v10 }
  0xea   : > { %v763_v13 = vsel %vm748_vm4, %v746_v55, %v1510_v2  ;;  %v764_v22 = vsel %vm748_vm4, %v747_v62, %v1511_v49  ;;  %v755_v25 = vsel %vm748_vm4, %v738_v27, %v1505_v57  ;;  %v756_v61 = vsel %vm748_vm4, %v739_v23, %v1506_v54 }
  0xeb   : > { %v1519_v7 = vpop.permute.xlu1 %1518  ;;  %v1514_v12 = vpop.permute.xlu0 %1513 }
  0xec   : > { %v1521_v63 = vunpack.i.h.bf16 %v1519_v7  ;;  %v1520_v18 = vunpack.i.l.bf16 %v1519_v7  ;;  %v1516_v31 = vunpack.i.h.bf16 %v1514_v12  ;;  %v1515_v8 = vunpack.i.l.bf16 %v1514_v12 }
  0xee   : > { %v780_v43 = vsel %vm765_vm5, %v763_v13, %v1520_v18  ;;  %v781_v39 = vsel %vm765_vm5, %v764_v22, %v1521_v63  ;;  %v772_v40 = vsel %vm765_vm5, %v755_v25, %v1515_v8  ;;  %v773_v5 = vsel %vm765_vm5, %v756_v61, %v1516_v31 }
  0xef   : > { %v1529_v3 = vpop.permute.xlu1 %1528  ;;  %v1524_v56 = vpop.permute.xlu0 %1523 }
  0xf0   : > { %v1531_v26 = vunpack.i.h.bf16 %v1529_v3  ;;  %v1530_v28 = vunpack.i.l.bf16 %v1529_v3  ;;  %v1526_v32 = vunpack.i.h.bf16 %v1524_v56  ;;  %v1525_v15 = vunpack.i.l.bf16 %v1524_v56 }
  0xf2   : > { %v797_v4 = vsel %vm782_vm6, %v780_v43, %v1530_v28  ;;  %v798_v1 = vsel %vm782_vm6, %v781_v39, %v1531_v26  ;;  %v789_v24 = vsel %vm782_vm6, %v772_v40, %v1525_v15  ;;  %v790_v9 = vsel %vm782_vm6, %v773_v5, %v1526_v32 }
  0xf3   : > { %v1539_v16 = vpop.permute.xlu1 %1538  ;;  %v1534_v0 = vpop.permute.xlu0 %1533 }
  0xf4   : > { %v1541_v33 = vunpack.i.h.bf16 %v1539_v16  ;;  %v1540_v44 = vunpack.i.l.bf16 %v1539_v16  ;;  %v1536_v34 = vunpack.i.h.bf16 %v1534_v0  ;;  %v1535_v35 = vunpack.i.l.bf16 %v1534_v0 }
  0xf6   : > { %v814_v47 = vsel %vm799_vm7, %v797_v4, %v1540_v44  ;;  %v815_v11 = vsel %vm799_vm7, %v798_v1, %v1541_v33  ;;  %v806_v17 = vsel %vm799_vm7, %v789_v24, %v1535_v35  ;;  %v807_v14 = vsel %vm799_vm7, %v790_v9, %v1536_v34 }
  0xf7   : > { %v1549_v45 = vpop.permute.xlu1 %1548  ;;  %v1544_v46 = vpop.permute.xlu0 %1543 }
  0xf8   : > { %v1551_v6 = vunpack.i.h.bf16 %v1549_v45  ;;  %v1550_v20 = vunpack.i.l.bf16 %v1549_v45  ;;  %v1546_v36 = vunpack.i.h.bf16 %v1544_v46  ;;  %v1545_v37 = vunpack.i.l.bf16 %v1544_v46 }
  0xfa   : > { %v823_v19 = vsel %vm816_vm8, %v806_v17, %v1545_v37  ;;  %v824_v38 = vsel %vm816_vm8, %v807_v14, %v1546_v36  ;;  %v831_v41 = vsel %vm816_vm8, %v814_v47, %v1550_v20  ;;  %v832_v10 = vsel %vm816_vm8, %v815_v11, %v1551_v6 }
  0xfb   : > { %v839_v48 = vpack.c.bf16 %v824_v38, %v823_v19  ;;  %v847_v30 = vpack.c.bf16 %v832_v10, %v831_v41 }
  0xfd   : > { %1009 = vmatmul.mubr.bf16.gmra.mrb[12].mxu0 %v839_v48  ;;  %1041 = vmatmul.mubr.bf16.gmra.mrb[12].mxu1 %v847_v30 }
 0x17c   : > { %v986_v52 = vpop.f32.mrb[0].mxu0  ;;  %v1018_v7 = vpop.f32.mrb[0].mxu1 }
 0x17d   : > { %v987_v12 = vadd.f32 %v2203_v51, %v986_v52  ;;  %v1019_v59 = vadd.f32 %v2203_v51, %v1018_v7  ;;  %v988_v58 = vpop.f32.mrb[1].mxu0  ;;  %v1020_v42 = vpop.f32.mrb[1].mxu1 }
 0x17e   : > { %v989_v53 = vpop.f32.mrb[2].mxu0  ;;  %v1021_v21 = vpop.f32.mrb[2].mxu1 }
 0x17f   : > { %v1049_v50 = vmax.f32 %v987_v12, 0.0  ;;  %v1057_v29 = vmax.f32 %v1019_v59, 0.0  ;;  %v990_v60 = vadd.f32 %v2203_v51, %v989_v53  ;;  %v1022_v3 = vadd.f32 %v2203_v51, %v1021_v21  ;;  %v991_v56 = vpop.f32.mrb[3].mxu0  ;;  %v1023_v49 = vpop.f32.mrb[3].mxu1 }
 0x181   : > { %1065 = vst.msk [vmem:[%s2210_s11] sm:$0xff] %vm714_vm2, %v1049_v50  ;;  %1073 = vst.msk [vmem:[%s2210_s11 + $0x40] sm:$0xff] %vm714_vm2, %v1057_v29  ;;  %v1050_v2 = vmax.f32 %v990_v60, 0.0  ;;  %v1058_v54 = vmax.f32 %v1022_v3, 0.0 }
 0x183   : > { %1066 = vst.msk [vmem:[%s2210_s11 + $0x8] sm:$0xff] %vm714_vm2, %v1050_v2  ;;  %1074 = vst.msk [vmem:[%s2210_s11 + $0x48] sm:$0xff] %vm714_vm2, %v1058_v54 }
 0x198   : > { %v994_v57 = vpop.f32.mrb[4].mxu0  ;;  %v1026_v55 = vpop.f32.mrb[4].mxu1 }
 0x199   : > { %v995_v62 = vadd.f32 %v2203_v51, %v994_v57  ;;  %v1027_v27 = vadd.f32 %v2203_v51, %v1026_v55  ;;  %v996_v23 = vpop.f32.mrb[5].mxu0  ;;  %v1028_v63 = vpop.f32.mrb[5].mxu1 }
 0x19a   : > { %v997_v18 = vpop.f32.mrb[6].mxu0  ;;  %v1029_v31 = vpop.f32.mrb[6].mxu1 }
 0x19b   : > { %v1051_v8 = vmax.f32 %v995_v62, 0.0  ;;  %v1059_v26 = vmax.f32 %v1027_v27, 0.0  ;;  %v998_v28 = vadd.f32 %v2203_v51, %v997_v18  ;;  %v1030_v32 = vadd.f32 %v2203_v51, %v1029_v31  ;;  %v999_v15 = vpop.f32.mrb[7].mxu0  ;;  %v1031_v16 = vpop.f32.mrb[7].mxu1 }
 0x19d   : > { %1067 = vst.msk [vmem:[%s2210_s11 + $0x10] sm:$0xff] %vm714_vm2, %v1051_v8  ;;  %1075 = vst.msk [vmem:[%s2210_s11 + $0x50] sm:$0xff] %vm714_vm2, %v1059_v26  ;;  %v1052_v0 = vmax.f32 %v998_v28, 0.0  ;;  %v1060_v13 = vmax.f32 %v1030_v32, 0.0 }
 0x19f   : > { %1068 = vst.msk [vmem:[%s2210_s11 + $0x18] sm:$0xff] %vm714_vm2, %v1052_v0  ;;  %1076 = vst.msk [vmem:[%s2210_s11 + $0x58] sm:$0xff] %vm714_vm2, %v1060_v13 }
 0x1b4   : > { %v1002_v22 = vpop.f32.mrb[8].mxu0  ;;  %v1034_v25 = vpop.f32.mrb[8].mxu1 }
 0x1b5   : > { %v1003_v61 = vadd.f32 %v2203_v51, %v1002_v22  ;;  %v1035_v33 = vadd.f32 %v2203_v51, %v1034_v25  ;;  %v1004_v44 = vpop.f32.mrb[9].mxu0  ;;  %v1036_v34 = vpop.f32.mrb[9].mxu1 }
 0x1b6   : > { %v1005_v35 = vpop.f32.mrb[10].mxu0  ;;  %v1037_v43 = vpop.f32.mrb[10].mxu1 }
 0x1b7   : > { %v1053_v39 = vmax.f32 %v1003_v61, 0.0  ;;  %v1061_v40 = vmax.f32 %v1035_v33, 0.0  ;;  %v1006_v5 = vadd.f32 %v2203_v51, %v1005_v35  ;;  %v1038_v4 = vadd.f32 %v2203_v51, %v1037_v43  ;;  %v1007_v1 = vpop.f32.mrb[11].mxu0  ;;  %v1039_v24 = vpop.f32.mrb[11].mxu1 }
 0x1b9   : > { %1069 = vst.msk [vmem:[%s2210_s11 + $0x20] sm:$0xff] %vm714_vm2, %v1053_v39  ;;  %1077 = vst.msk [vmem:[%s2210_s11 + $0x60] sm:$0xff] %vm714_vm2, %v1061_v40  ;;  %v1054_v9 = vmax.f32 %v1006_v5, 0.0  ;;  %v1062_v45 = vmax.f32 %v1038_v4, 0.0 }
 0x1bb   : > { %1070 = vst.msk [vmem:[%s2210_s11 + $0x28] sm:$0xff] %vm714_vm2, %v1054_v9  ;;  %1078 = vst.msk [vmem:[%s2210_s11 + $0x68] sm:$0xff] %vm714_vm2, %v1062_v45 }
 0x1d0   : > { %v1010_v46 = vpop.f32.mrb[12].mxu0  ;;  %v1042_v6 = vpop.f32.mrb[12].mxu1 }
 0x1d1   : > { %v1011_v20 = vadd.f32 %v2203_v51, %v1010_v46  ;;  %v1043_v36 = vadd.f32 %v2203_v51, %v1042_v6  ;;  %v1012_v37 = vpop.f32.mrb[13].mxu0  ;;  %v1044_v47 = vpop.f32.mrb[13].mxu1 }
 0x1d2   : > { %v1013_v11 = vpop.f32.mrb[14].mxu0  ;;  %v1045_v17 = vpop.f32.mrb[14].mxu1 }
 0x1d3   : > { %v1055_v14 = vmax.f32 %v1011_v20, 0.0  ;;  %v1063_v19 = vmax.f32 %v1043_v36, 0.0  ;;  %v1014_v38 = vadd.f32 %v2203_v51, %v1013_v11  ;;  %v1046_v41 = vadd.f32 %v2203_v51, %v1045_v17  ;;  %v1015_v10 = vpop.f32.mrb[15].mxu0  ;;  %v1047_v48 = vpop.f32.mrb[15].mxu1 }
 0x1d5   : > { %1071 = vst.msk [vmem:[%s2210_s11 + $0x30] sm:$0xff] %vm714_vm2, %v1055_v14  ;;  %1079 = vst.msk [vmem:[%s2210_s11 + $0x70] sm:$0xff] %vm714_vm2, %v1063_v19  ;;  %v1056_v30 = vmax.f32 %v1014_v38, 0.0  ;;  %v1064_v52 = vmax.f32 %v1046_v41, 0.0 }
 0x1d7   : > { %1072 = vst.msk [vmem:[%s2210_s11 + $0x38] sm:$0xff] %vm714_vm2, %v1056_v30  ;;  %1080 = vst.msk [vmem:[%s2210_s11 + $0x78] sm:$0xff] %vm714_vm2, %v1064_v52 }
 0x1d8 PF: > { %s13_s16 = sadd.s32 1, %s1599_s16   ;;  %s2277_s12 = smov %s1591_s14 }
 0x1d9   : > { %p10_p7 = scmp.ge.s32.totalorder %s13_s16, 6   ;;  %s2278_s13 = smov %s1595_s15 }
 0x1da   : > { %s2279_s14 = smov %s2282_s17  ;;  %s2280_s15 = smov %s2286_s18 }
 0x1db   :  { %12 = sbr.rel (!%p10_p7) target bundleno = 3 (0x3), region = 63 }

// kernel: image_captioning_forward.24
= control target key start
LH: loop header
LB: loop body
LE: loop exit
PB: predicated region body
PF: predicated region fallthrough
CT: control target
= control target key end

     0   :  { %s1079_s12 = smov 0   ;;  %s1081_s13 = smov 0   ;;  %s1437_s0 = inlined_call_operand.vmem [shape: f32[2,10,10,16], index: 0, kind: input, shape index: {}]   ;;  %s1438_s1 = inlined_call_operand.vmem [shape: bf16[144,32], index: 1, kind: input, shape index: {}]   ;;  %s1439_s2 = inlined_call_operand.vmem [shape: f32[1,32], index: 2, kind: input, shape index: {}]   ;;  %s1440_s3 = inlined_call_operand.vmem [shape: f32[2,8,8,32], index: 3, kind: output, shape index: {}]  }
   0x1   :  { %s1083_s14 = smov 0  }
   0x2 LB: > { %s25_s15 = sadd.s32 1, %s1045_s13  ;;  %p806_p0 = scmp.ge.s32.totalorder %s1049_s14, 1  ;;  %s1049_s14 = sphi %s1083_s14, %s13_s14   ;;  %s1045_s13 = sphi %s1081_s13, %s1442_s13   ;;  %s1041_s12 = sphi %s1079_s12, %s1441_s12  }
   0x3   : > { %p27_p1 = scmp.ge.s32.totalorder %s25_s15, 2  ;;  %p151_p2 = scmp.lt.s32.totalorder %s1049_s14, 3 }
   0x5   : > { %s1444_s15 = smov (%p27_p1, %s25_s15), 0  ;;  %p152_p3 = pnand %p806_p0, %p151_p2 }
   0x6   : > { %p179_p4 = scmp.lt.s32.totalorder (!%p152_p3), %s1041_s12, 1  ;;  %v1018_v0 = vld [vmem:[%s1438_s1] sm:$0xff] (!%p152_p3)   ;;  %v1051_v1 = vmov (!%p152_p3), 0   ;;  %v1019_v2 = vld [vmem:[%s1438_s1 + $0x8] sm:$0xff] (!%p152_p3)   ;;  %v1020_v3 = vld [vmem:[%s1438_s1 + $0x10] sm:$0xff] (!%p152_p3)   ;;  %vm259_vm0 = vcmask (!%p152_p3), 1045504  }
   0x7   : > { %155 = sbr.rel (%p152_p3) target bundleno = 413 (0x19d), region = 32  ;;  %638 = vmatprep.subr.bf16.mxu0 (!%p152_p3), %v1051_v1  ;;  %827 = vmatprep.subr.bf16.mxu1 (!%p152_p3), %v1051_v1  ;;  %vm234_vm1 = vcmask (!%p152_p3), 1046528   ;;  %v1021_v13 = vld [vmem:[%s1438_s1 + $0x18] sm:$0xff] (!%p152_p3)   ;;  %s1052_s28 = smov (!%p152_p3), 48   ;;  %v1022_v44 = vld [vmem:[%s1438_s1 + $0x20] sm:$0xff] (!%p152_p3)   ;;  %v1023_v58 = vld [vmem:[%s1438_s1 + $0x28] sm:$0xff] (!%p152_p3)  }
   0x8   : > { %639 = vmatpush1.bf16.msra.mxu0 (!%p152_p3), %v1018_v0  ;;  %836 = vmatpush1.bf16.msra.mxu1 (!%p152_p3), %v1018_v0  ;;  %s1053_s4 = smov (!%p152_p3), 32   ;;  %s1054_s5 = smov (!%p152_p3), 16   ;;  %vm476_vm2 = vcmask (!%p152_p3), 130048   ;;  %vm485_vm3 = vcmask (!%p152_p3), 261120   ;;  %vm494_vm4 = vcmask (!%p152_p3), 392192   ;;  %vm503_vm5 = vcmask (!%p152_p3), 523264  }
   0x9   : > { %640 = vmatprep.subr.bf16.mxu0 (!%p152_p3), %v1051_v1  ;;  %828 = vmatprep.subr.bf16.mxu1 (!%p152_p3), %v1051_v1  ;;  %s1055_s10 = smov (!%p152_p3), 64   ;;  %s1056_s17 = smov (!%p152_p3), 80   ;;  %vm512_vm6 = vcmask (!%p152_p3), 654336   ;;  %vm521_vm7 = vcmask (!%p152_p3), 785408   ;;  %vm530_vm8 = vcmask (!%p152_p3), 916480  }
   0xa   : > { %s1058_s21 = smov (!%p152_p3), 112  }
   0xc   : > { %641 = vmatpush1.bf16.msra.mxu0 (!%p152_p3), %v1019_v2  ;;  %837 = vmatpush1.bf16.msra.mxu1 (!%p152_p3), %v1019_v2 }
   0xd   : > { %642 = vmatprep.subr.bf16.mxu0 (!%p152_p3), %v1051_v1  ;;  %829 = vmatprep.subr.bf16.mxu1 (!%p152_p3), %v1051_v1 }
   0xe   : > { %s1446_s12 = smov (!%p179_p4, %s1041_s12), 1 }
   0xf   : > { %s845_s20 = smul.u32 160, %s1446_s12  ;;  %s826_s24 = sshll.u32 %s1446_s12, 6 }
  0x10   : > { %643 = vmatpush1.bf16.msra.mxu0 %v1020_v3  ;;  %838 = vmatpush1.bf16.msra.mxu1 %v1020_v3  ;;  %s1410_s27 = scalar_lea.vmem %s1440_s3, %s826_s24 }
  0x11   : > { %s1113_s23 = scalar_lea.vmem %s1437_s0, %s845_s20  ;;  %644 = vmatprep.subr.bf16.mxu0 %v1051_v1  ;;  %830 = vmatprep.subr.bf16.mxu1 %v1051_v1  ;;  %s1057_s20 = smov 96  }
  0x12   : > { %v1119_v4 = vld [vmem:[%s1113_s23 + $0x50] sm:$0xff]  ;;  %v1122_v5 = vld [vmem:[%s1113_s23 + $0x60] sm:$0xff]  ;;  %v199_v10 = vld [vmem:[%s1113_s23 + $0x8] sm:$0x3] }
  0x13   : > { %v1125_v6 = vld [vmem:[%s1113_s23 + $0x10] sm:$0xff]  ;;  %v883_v7 = vpack.i.bf16 %v1122_v5, %v1119_v4  ;;  %v1132_v8 = vld [vmem:[%s1113_s23 + $0x20] sm:$0xff]  ;;  %v201_v15 = vld [vmem:[%s1113_s23 + $0x18] sm:$0x3]  ;;  %v261_v17 = vrot.slane %v199_v10, 2  ;;  %v236_v21 = vrot.slane %v199_v10, 1 }
  0x14   : > { %v1135_v9 = vld [vmem:[%s1113_s23] sm:$0xff]  ;;  %v263_v11 = vrot.slane %v1125_v6, 2  ;;  %v238_v12 = vrot.slane %v1125_v6, 1  ;;  %v878_v14 = vpack.i.bf16 %v1132_v8, %v1125_v6  ;;  %v264_v20 = vrot.slane %v201_v15, 2  ;;  %v207_v23 = vld [vmem:[%s1113_s23 + $0x48] sm:$0x3]  ;;  %645 = vmatpush1.bf16.msra.mxu0 %v1021_v13  ;;  %839 = vmatpush1.bf16.msra.mxu1 %v1021_v13 }
  0x15   : > { %v260_v16 = vrot.slane %v1135_v9, 2  ;;  %v235_v18 = vrot.slane %v1135_v9, 1  ;;  %v1149_v19 = vld [vmem:[%s1113_s23 + $0x40] sm:$0xff]  ;;  %884 = vrot.lane.b32.xlu1 %v883_v7, %s1052_s28  ;;  %v239_v22 = vrot.slane %v201_v15, 1  ;;  %v209_v26 = vld [vmem:[%s1113_s23 + $0x58] sm:$0x3]  ;;  %646 = vmatprep.subr.bf16.mxu0 %v1051_v1 }
  0x16   : > { %v272_v24 = vrot.slane %v1149_v19, 2  ;;  %879 = vrot.lane.b32.xlu0 %v878_v14, %s1052_s28  ;;  %v273_v27 = vrot.slane %v207_v23, 2  ;;  %v275_v28 = vrot.slane %v1119_v4, 2  ;;  %v247_v29 = vrot.slane %v1149_v19, 1  ;;  %v211_v34 = vld [vmem:[%s1113_s23 + $0x68] sm:$0x3]  ;;  %831 = vmatprep.subr.bf16.mxu1 %v1051_v1 }
  0x17   : > { %v262_v25 = vsel %vm259_vm0, %v260_v16, %v261_v17  ;;  %v1160_v30 = vsel %vm259_vm0, %v263_v11, %v264_v20  ;;  %v237_v31 = vsel %vm234_vm1, %v235_v18, %v236_v21  ;;  %v240_v32 = vsel %vm234_vm1, %v238_v12, %v239_v22  ;;  %v203_v39 = vld [vmem:[%s1113_s23 + $0x28] sm:$0x3]  ;;  %v1217_v63 = vld [vmem:[%s1113_s23 + $0x70] sm:$0xff]  ;;  %v213_v2 = vld [vmem:[%s1113_s23 + $0x78] sm:$0x3] }
  0x18   : > { %v276_v33 = vrot.slane %v209_v26, 2  ;;  %v898_v35 = vpack.i.bf16 %v1160_v30, %v262_v25  ;;  %v888_v36 = vpack.i.bf16 %v240_v32, %v237_v31  ;;  %v1169_v37 = vsel %vm259_vm0, %v272_v24, %v273_v27  ;;  %647 = vmatpush1.bf16.msra.mxu0 %v1022_v44  ;;  %840 = vmatpush1.bf16.msra.mxu1 %v1022_v44  ;;  %v1221_v0 = vld [vmem:[%s1113_s23 + $0x30] sm:$0xff]  ;;  %v205_v3 = vld [vmem:[%s1113_s23 + $0x38] sm:$0x3]  ;;  %v1236_v12 = vld [vmem:[%s1113_s23 + $0x88] sm:$0x3] }
  0x19   : > { %v248_v38 = vrot.slane %v207_v23, 1  ;;  %v250_v41 = vrot.slane %v1119_v4, 1  ;;  %v251_v42 = vrot.slane %v209_v26, 1  ;;  %v253_v43 = vrot.slane %v1122_v5, 1  ;;  %648 = vmatprep.subr.bf16.mxu0 %v1051_v1  ;;  %832 = vmatprep.subr.bf16.mxu1 %v1051_v1  ;;  %v1024_v7 = vld [vmem:[%s1438_s1 + $0x30] sm:$0xff]   ;;  %v1241_v17 = vld [vmem:[%s1113_s23 + $0x80] sm:$0xff] }
  0x1a   : > { %v1173_v40 = vsel %vm259_vm0, %v275_v28, %v276_v33  ;;  %899 = vrot.lane.b32.xlu1 %v898_v35, %s1053_s4  ;;  %889 = vrot.lane.b32.xlu0 %v888_v36, %s1054_s5  ;;  %v254_v47 = vrot.slane %v211_v34, 1  ;;  %v241_v48 = vrot.slane %v1132_v8, 1  ;;  %v242_v50 = vrot.slane %v203_v39, 1  ;;  %v1244_v18 = vld [vmem:[%s1113_s23 + $0x90] sm:$0xff]  ;;  %v1249_v24 = vld [vmem:[%s1113_s23 + $0x98] sm:$0x3] }
  0x1b   : > { %v903_v45 = vpack.i.bf16 %v1173_v40, %v1169_v37  ;;  %v1185_v46 = vsel %vm234_vm1, %v247_v29, %v248_v38  ;;  %v252_v49 = vsel %vm234_vm1, %v250_v41, %v251_v42  ;;  %v278_v51 = vrot.slane %v1122_v5, 2  ;;  %v1025_v29 = vld [vmem:[%s1438_s1 + $0x38] sm:$0xff]   ;;  %v1026_v41 = vld [vmem:[%s1438_s1 + $0x40] sm:$0xff]  }
  0x1c   : > { %v279_v52 = vrot.slane %v211_v34, 2  ;;  %v1192_v53 = vpack.i.bf16 %v252_v49, %v1185_v46  ;;  %v1195_v54 = vsel %vm234_vm1, %v253_v43, %v254_v47  ;;  %v266_v55 = vrot.slane %v1132_v8, 2  ;;  %649 = vmatpush1.bf16.msra.mxu0 %v1023_v58  ;;  %841 = vmatpush1.bf16.msra.mxu1 %v1023_v58 }
  0x1d   : > { %v267_v56 = vrot.slane %v203_v39, 2  ;;  %v1200_v57 = vsel %vm234_vm1, %v241_v48, %v242_v50  ;;  %v913_v59 = vpack.i.bf16 %v1195_v54, %v252_v49  ;;  %v256_v13 = vrot.slane %v1217_v63, 1  ;;  %650 = vmatprep.subr.bf16.mxu0 %v1051_v1  ;;  %833 = vmatprep.subr.bf16.mxu1 %v1051_v1 }
  0x1e   : > { %904 = vrot.lane.b32.xlu1 %v903_v45, %s1053_s4  ;;  %894 = vrot.lane.b32.xlu0 %v1192_v53, %s1054_s5  ;;  %v908_v60 = vpack.i.bf16 %v1200_v57, %v240_v32  ;;  %v1211_v61 = vsel %vm259_vm0, %v278_v51, %v279_v52  ;;  %v257_v14 = vrot.slane %v213_v2, 1  ;;  %v244_v15 = vrot.slane %v1221_v0, 1 }
  0x1f   : > { %v1214_v62 = vsel %vm259_vm0, %v266_v55, %v267_v56  ;;  %v923_v10 = vpack.i.bf16 %v1211_v61, %v1173_v40  ;;  %v245_v16 = vrot.slane %v205_v3, 1  ;;  %v281_v20 = vrot.slane %v1217_v63, 2 }
  0x20   : > { %v918_v11 = vpack.i.bf16 %v1214_v62, %v1160_v30  ;;  %v282_v21 = vrot.slane %v213_v2, 2  ;;  %v269_v22 = vrot.slane %v1221_v0, 2  ;;  %v270_v23 = vrot.slane %v205_v3, 2  ;;  %651 = vmatpush1.bf16.msra.mxu0 %v1024_v7  ;;  %842 = vmatpush1.bf16.msra.mxu1 %v1024_v7 }
  0x21   : > { %v289_v25 = vrot.slane %v1241_v17, 2  ;;  %v290_v26 = vrot.slane %v1236_v12, 2  ;;  %v297_v27 = vrot.slane %v1244_v18, 2  ;;  %v298_v28 = vrot.slane %v1249_v24, 2  ;;  %652 = vmatprep.subr.bf16.mxu0 %v1051_v1  ;;  %834 = vmatprep.subr.bf16.mxu1 %v1051_v1 }
  0x22   : > { %914 = vrot.lane.b32.xlu1 %v913_v59, %s1055_s10  ;;  %909 = vrot.lane.b32.xlu0 %v908_v60, %s1055_s10  ;;  %v933_v30 = vpack.i.bf16 %v1217_v63, %v1122_v5  ;;  %v928_v31 = vpack.i.bf16 %v1221_v0, %v1132_v8  ;;  %v258_v32 = vsel %vm234_vm1, %v256_v13, %v257_v14  ;;  %v287_v49 = vrot.slane %v1236_v12, 1 }
  0x23   : > { %v246_v33 = vsel %vm234_vm1, %v244_v15, %v245_v16  ;;  %v1269_v34 = vsel %vm259_vm0, %v289_v25, %v290_v26  ;;  %v1272_v35 = vsel %vm259_vm0, %v297_v27, %v298_v28  ;;  %v271_v36 = vsel %vm259_vm0, %v269_v22, %v270_v23 }
  0x24   : > { %v546_v38 = vpack.c.bf16 %v1272_v35, %v1269_v34  ;;  %v283_v39 = vsel %vm259_vm0, %v281_v20, %v282_v21  ;;  %653 = vmatpush1.bf16.msra.mxu0 %v1025_v29  ;;  %v540_v42 = vpack.c.bf16 %v271_v36, %v1214_v62  ;;  %v943_v43 = vpack.i.bf16 %v258_v32, %v1195_v54 }
  0x25   : > { %v938_v44 = vpack.i.bf16 %v246_v33, %v1200_v57  ;;  %v544_v45 = vpack.c.bf16 %v283_v39, %v1211_v61  ;;  %843 = vmatpush1.bf16.msra.mxu1 %v1025_v29  ;;  %654 = vmatprep.subr.bf16.mxu0 %v1051_v1  ;;  %v963_v47 = vpack.i.bf16 %v283_v39, %v1211_v61  ;;  %v294_v59 = vrot.slane %v1244_v18, 1 }
  0x26   : > { %924 = vrot.lane.b32.xlu1 %v923_v10, %s1056_s17  ;;  %919 = vrot.lane.b32.xlu0 %v918_v11, %s1056_s17  ;;  %v958_v48 = vpack.i.bf16 %v271_v36, %v1214_v62  ;;  %v973_v50 = vpack.i.bf16 %v1241_v17, %v1217_v63  ;;  %v968_v51 = vpack.i.bf16 %v1149_v19, %v1221_v0  ;;  %v295_v60 = vrot.slane %v1249_v24, 1 }
  0x27   : > { %835 = vmatprep.subr.bf16.mxu1 %v1051_v1  ;;  %820 = vmatprep.mubr.msk.bf16.mxu0 %vm476_vm2, %v540_v42  ;;  %v286_v1 = vrot.slane %v1241_v17, 1  ;;  %v978_v55 = vpack.i.bf16 %v1185_v46, %v246_v33  ;;  %v542_v56 = vpack.c.bf16 %v1173_v40, %v1169_v37  ;;  %v993_v57 = vpack.i.bf16 %v1269_v34, %v283_v39 }
  0x28   : > { %655 = vmatpush1.bf16.msra.mxu0 %v1026_v41  ;;  %822 = vmatprep.mubr.msk.bf16.mxu1 %vm476_vm2, %v544_v45  ;;  %v988_v58 = vpack.i.bf16 %v1169_v37, %v271_v36  ;;  %v1003_v46 = vpack.i.bf16 %v1244_v18, %v1241_v17  ;;  %v998_v61 = vpack.i.bf16 %v1119_v4, %v1149_v19 }
  0x29   : > { %844 = vmatpush1.bf16.msra.mxu1 %v1026_v41  ;;  %v288_v52 = vsel %vm234_vm1, %v286_v1, %v287_v49  ;;  %v296_v62 = vsel %vm234_vm1, %v294_v59, %v295_v60 }
  0x2a   : > { %934 = vrot.lane.b32.xlu1 %v933_v30, %s1057_s20  ;;  %929 = vrot.lane.b32.xlu0 %v928_v31, %s1057_s20  ;;  %v983_v54 = vpack.i.bf16 %v288_v52, %v258_v32  ;;  %v1013_v2 = vpack.i.bf16 %v296_v62, %v288_v52 }
  0x2e   : > { %944 = vrot.lane.b32.xlu1 %v943_v43, %s1058_s21  ;;  %939 = vrot.lane.b32.xlu0 %v938_v44, %s1058_s21 }
  0x32   : > { %954 = vrot.lane.b32.xlu1 %v943_v43, %s1054_s5  ;;  %949 = vrot.lane.b32.xlu0 %v938_v44, %s1054_s5 }
  0x36   : > { %964 = vrot.lane.b32.xlu1 %v963_v47, %s1053_s4  ;;  %959 = vrot.lane.b32.xlu0 %v958_v48, %s1053_s4 }
  0x3a   : > { %974 = vrot.lane.b32.xlu1 %v973_v50, %s1052_s28  ;;  %969 = vrot.lane.b32.xlu0 %v968_v51, %s1052_s28 }
  0x3e   : > { %984 = vrot.lane.b32.xlu1 %v983_v54, %s1055_s10  ;;  %979 = vrot.lane.b32.xlu0 %v978_v55, %s1055_s10 }
  0x42   : > { %994 = vrot.lane.b32.xlu1 %v993_v57, %s1056_s17  ;;  %989 = vrot.lane.b32.xlu0 %v988_v58, %s1056_s17 }
  0x46   : > { %1004 = vrot.lane.b32.xlu1 %v1003_v46, %s1057_s20  ;;  %999 = vrot.lane.b32.xlu0 %v998_v61, %s1057_s20 }
  0x4a   : > { %1014 = vrot.lane.b32.xlu1 %v1013_v2, %s1058_s21  ;;  %1009 = vrot.lane.b32.xlu0 %v1192_v53, %s1058_s21 }
  0x87   : > { %v885_v3 = vpop.permute.xlu1 %884 }
  0x88   : > { %v880_v7 = vpop.permute.xlu0 %879  ;;  %v887_v31 = vunpack.i.h.bf16 %v885_v3 }
  0x89   : > { %v882_v32 = vunpack.i.h.bf16 %v880_v7  ;;  %v881_v33 = vunpack.i.l.bf16 %v880_v7 }
  0x8c   : > { %v900_v10 = vpop.permute.xlu1 %899  ;;  %v890_v11 = vpop.permute.xlu0 %889 }
  0x8d   : > { %v892_v16 = vunpack.i.h.bf16 %v890_v11  ;;  %v891_v17 = vunpack.i.l.bf16 %v890_v11  ;;  %v902_v24 = vunpack.i.h.bf16 %v900_v10  ;;  %v901_v25 = vunpack.i.l.bf16 %v900_v10 }
  0x8f   : > { %v478_v26 = vsel %vm476_vm2, %v1125_v6, %v892_v16  ;;  %v477_v27 = vsel %vm476_vm2, %v1135_v9, %v891_v17 }
  0x90   : > { %v905_v12 = vpop.permute.xlu1 %904  ;;  %v895_v13 = vpop.permute.xlu0 %894  ;;  %v487_v36 = vsel %vm485_vm3, %v478_v26, %v902_v24  ;;  %v486_v6 = vsel %vm485_vm3, %v477_v27, %v901_v25 }
  0x91   : > { %v897_v14 = vunpack.i.h.bf16 %v895_v13  ;;  %v896_v15 = vunpack.i.l.bf16 %v895_v13  ;;  %v907_v18 = vunpack.i.h.bf16 %v905_v12  ;;  %v906_v20 = vunpack.i.l.bf16 %v905_v12 }
  0x92   : > { %v495_v51 = vsel %vm494_vm4, %v486_v6, %v881_v33  ;;  %v496_v52 = vsel %vm494_vm4, %v487_v36, %v882_v32 }
  0x93   : > { %v482_v23 = vsel %vm476_vm2, %v1119_v4, %v897_v14  ;;  %v481_v53 = vsel %vm476_vm2, %v1149_v19, %v896_v15  ;;  %v886_v19 = vunpack.i.l.bf16 %v885_v3 }
  0x94   : > { %v915_v21 = vpop.permute.xlu1 %914  ;;  %v910_v22 = vpop.permute.xlu0 %909  ;;  %v491_v28 = vsel %vm485_vm3, %v482_v23, %v907_v18  ;;  %v490_v29 = vsel %vm485_vm3, %v481_v53, %v906_v20 }
  0x95   : > { %v917_v39 = vunpack.i.h.bf16 %v915_v21  ;;  %v916_v41 = vunpack.i.l.bf16 %v915_v21  ;;  %v499_v9 = vsel %vm494_vm4, %v490_v29, %v886_v19  ;;  %v500_v42 = vsel %vm494_vm4, %v491_v28, %v887_v31 }
  0x96   : > { %v912_v43 = vunpack.i.h.bf16 %v910_v22  ;;  %v911_v44 = vunpack.i.l.bf16 %v910_v22 }
  0x97   : > { %v508_v59 = vsel %vm503_vm5, %v499_v9, %v916_v41  ;;  %v509_v60 = vsel %vm503_vm5, %v500_v42, %v917_v39 }
  0x98   : > { %v925_v4 = vpop.permute.xlu1 %924  ;;  %v920_v30 = vpop.permute.xlu0 %919  ;;  %v504_v46 = vsel %vm503_vm5, %v495_v51, %v911_v44  ;;  %v505_v61 = vsel %vm503_vm5, %v496_v52, %v912_v43 }
  0x99   : > { %v927_v45 = vunpack.i.h.bf16 %v925_v4  ;;  %v926_v47 = vunpack.i.l.bf16 %v925_v4  ;;  %v922_v48 = vunpack.i.h.bf16 %v920_v30  ;;  %v921_v1 = vunpack.i.l.bf16 %v920_v30 }
  0x9b   : > { %v517_v62 = vsel %vm512_vm6, %v508_v59, %v926_v47  ;;  %v518_v2 = vsel %vm512_vm6, %v509_v60, %v927_v45  ;;  %v513_v3 = vsel %vm512_vm6, %v504_v46, %v921_v1  ;;  %v514_v7 = vsel %vm512_vm6, %v505_v61, %v922_v48 }
  0x9c   : > { %v935_v49 = vpop.permute.xlu1 %934  ;;  %v930_v50 = vpop.permute.xlu0 %929 }
  0x9d   : > { %v937_v54 = vunpack.i.h.bf16 %v935_v49  ;;  %v936_v55 = vunpack.i.l.bf16 %v935_v49  ;;  %v932_v57 = vunpack.i.h.bf16 %v930_v50  ;;  %v931_v58 = vunpack.i.l.bf16 %v930_v50 }
  0x9f   : > { %v526_v16 = vsel %vm521_vm7, %v517_v62, %v936_v55  ;;  %v527_v17 = vsel %vm521_vm7, %v518_v2, %v937_v54  ;;  %v522_v18 = vsel %vm521_vm7, %v513_v3, %v931_v58  ;;  %v523_v20 = vsel %vm521_vm7, %v514_v7, %v932_v57 }
  0xa0   : > { %v945_v10 = vpop.permute.xlu1 %944  ;;  %v940_v11 = vpop.permute.xlu0 %939 }
  0xa1   : > { %v947_v12 = vunpack.i.h.bf16 %v945_v10  ;;  %v946_v13 = vunpack.i.l.bf16 %v945_v10  ;;  %v942_v14 = vunpack.i.h.bf16 %v940_v11  ;;  %v941_v15 = vunpack.i.l.bf16 %v940_v11 }
  0xa3   : > { %v531_v21 = vsel %vm530_vm8, %v522_v18, %v941_v15  ;;  %v532_v22 = vsel %vm530_vm8, %v523_v20, %v942_v14  ;;  %v535_v23 = vsel %vm530_vm8, %v526_v16, %v946_v13  ;;  %v536_v53 = vsel %vm530_vm8, %v527_v17, %v947_v12 }
  0xa4   : > { %v955_v24 = vpop.permute.xlu1 %954  ;;  %v950_v25 = vpop.permute.xlu0 %949  ;;  %v539_v26 = vpack.c.bf16 %v532_v22, %v531_v21  ;;  %v543_v27 = vpack.c.bf16 %v536_v53, %v535_v23 }
  0xa5   : > { %v957_v31 = vunpack.i.h.bf16 %v955_v24  ;;  %v956_v19 = vunpack.i.l.bf16 %v955_v24  ;;  %v952_v32 = vunpack.i.h.bf16 %v950_v25  ;;  %v951_v33 = vunpack.i.l.bf16 %v950_v25 }
  0xa6   : > { %671 = vmatmul.mubr.bf16.vlgmr.msra.gmra.mrb[0].mxu0 %v539_v26  ;;  %687 = vmatmul.mubr.bf16.vlgmr.msra.gmra.mrb[0].mxu1 %v543_v27 }
  0xa7   : > { %821 = vmatprep.mubr.msk.bf16.mxu0 %vm476_vm2, %v542_v56  ;;  %823 = vmatprep.mubr.msk.bf16.mxu1 %vm476_vm2, %v546_v38  ;;  %v484_v56 = vsel %vm476_vm2, %v1217_v63, %v957_v31  ;;  %v483_v34 = vsel %vm476_vm2, %v1122_v5, %v956_v19  ;;  %v480_v35 = vsel %vm476_vm2, %v1221_v0, %v952_v32  ;;  %v810_v32 = vld [vmem:[%s1439_s2] ss:$0 sm:$0xff] }
  0xa8   : > { %v965_v28 = vpop.permute.xlu1 %964  ;;  %v960_v29 = vpop.permute.xlu0 %959  ;;  %v479_v38 = vsel %vm476_vm2, %v1132_v8, %v951_v33 }
  0xa9   : > { %v967_v39 = vunpack.i.h.bf16 %v965_v28  ;;  %v966_v41 = vunpack.i.l.bf16 %v965_v28  ;;  %v962_v37 = vunpack.i.h.bf16 %v960_v29  ;;  %v961_v40 = vunpack.i.l.bf16 %v960_v29 }
  0xab   : > { %v492_v48 = vsel %vm485_vm3, %v483_v34, %v966_v41  ;;  %v493_v1 = vsel %vm485_vm3, %v484_v56, %v967_v39  ;;  %v488_v63 = vsel %vm485_vm3, %v479_v38, %v961_v40  ;;  %v489_v5 = vsel %vm485_vm3, %v480_v35, %v962_v37 }
  0xac   : > { %v975_v4 = vpop.permute.xlu1 %974  ;;  %v970_v30 = vpop.permute.xlu0 %969 }
  0xad   : > { %v977_v43 = vunpack.i.h.bf16 %v975_v4  ;;  %v976_v44 = vunpack.i.l.bf16 %v975_v4  ;;  %v972_v45 = vunpack.i.h.bf16 %v970_v30  ;;  %v971_v47 = vunpack.i.l.bf16 %v970_v30 }
  0xaf   : > { %v501_v59 = vsel %vm494_vm4, %v492_v48, %v976_v44  ;;  %v502_v60 = vsel %vm494_vm4, %v493_v1, %v977_v43  ;;  %v497_v46 = vsel %vm494_vm4, %v488_v63, %v971_v47  ;;  %v498_v61 = vsel %vm494_vm4, %v489_v5, %v972_v45 }
  0xb0   : > { %v985_v36 = vpop.permute.xlu1 %984  ;;  %v980_v6 = vpop.permute.xlu0 %979 }
  0xb1   : > { %v987_v49 = vunpack.i.h.bf16 %v985_v36  ;;  %v986_v50 = vunpack.i.l.bf16 %v985_v36  ;;  %v982_v0 = vunpack.i.h.bf16 %v980_v6  ;;  %v981_v51 = vunpack.i.l.bf16 %v980_v6 }
  0xb3   : > { %v510_v10 = vsel %vm503_vm5, %v501_v59, %v986_v50  ;;  %v511_v11 = vsel %vm503_vm5, %v502_v60, %v987_v49  ;;  %v506_v12 = vsel %vm503_vm5, %v497_v46, %v981_v51  ;;  %v507_v13 = vsel %vm503_vm5, %v498_v61, %v982_v0 }
  0xb4   : > { %v995_v9 = vpop.permute.xlu1 %994  ;;  %v990_v42 = vpop.permute.xlu0 %989 }
  0xb5   : > { %v997_v52 = vunpack.i.h.bf16 %v995_v9  ;;  %v996_v8 = vunpack.i.l.bf16 %v995_v9  ;;  %v992_v54 = vunpack.i.h.bf16 %v990_v42  ;;  %v991_v55 = vunpack.i.l.bf16 %v990_v42 }
  0xb7   : > { %v519_v14 = vsel %vm512_vm6, %v510_v10, %v996_v8  ;;  %v520_v15 = vsel %vm512_vm6, %v511_v11, %v997_v52  ;;  %v515_v16 = vsel %vm512_vm6, %v506_v12, %v991_v55  ;;  %v516_v17 = vsel %vm512_vm6, %v507_v13, %v992_v54 }
  0xb8   : > { %v1005_v57 = vpop.permute.xlu1 %1004  ;;  %v1000_v58 = vpop.permute.xlu0 %999 }
  0xb9   : > { %v1007_v62 = vunpack.i.h.bf16 %v1005_v57  ;;  %v1006_v2 = vunpack.i.l.bf16 %v1005_v57  ;;  %v1002_v3 = vunpack.i.h.bf16 %v1000_v58  ;;  %v1001_v7 = vunpack.i.l.bf16 %v1000_v58 }
  0xbb   : > { %v528_v24 = vsel %vm521_vm7, %v519_v14, %v1006_v2  ;;  %v529_v25 = vsel %vm521_vm7, %v520_v15, %v1007_v62  ;;  %v524_v26 = vsel %vm521_vm7, %v515_v16, %v1001_v7  ;;  %v525_v27 = vsel %vm521_vm7, %v516_v17, %v1002_v3 }
  0xbc   : > { %v1015_v18 = vpop.permute.xlu1 %1014  ;;  %v1010_v20 = vpop.permute.xlu0 %1009 }
  0xbd   : > { %v1017_v21 = vunpack.i.h.bf16 %v1015_v18  ;;  %v1016_v22 = vunpack.i.l.bf16 %v1015_v18  ;;  %v1012_v23 = vunpack.i.h.bf16 %v1010_v20  ;;  %v1011_v53 = vunpack.i.l.bf16 %v1010_v20 }
  0xbf   : > { %v533_v28 = vsel %vm530_vm8, %v524_v26, %v1011_v53  ;;  %v534_v29 = vsel %vm530_vm8, %v525_v27, %v1012_v23  ;;  %v537_v4 = vsel %vm530_vm8, %v528_v24, %v1016_v22  ;;  %v538_v30 = vsel %vm530_vm8, %v529_v25, %v1017_v21 }
  0xc0   : > { %v541_v31 = vpack.c.bf16 %v534_v29, %v533_v28  ;;  %v545_v19 = vpack.c.bf16 %v538_v30, %v537_v4 }
  0xc2   : > { %679 = vmatmul.mubr.bf16.gmra.mrb[4].mxu0 %v541_v31  ;;  %695 = vmatmul.mubr.bf16.gmra.mrb[4].mxu1 %v545_v19 }
 0x179   : > { %v672_v33 = vpop.f32.mrb[0].mxu0  ;;  %v688_v36 = vpop.f32.mrb[0].mxu1 }
 0x17a   : > { %v673_v6 = vadd.f32 %v810_v32, %v672_v33  ;;  %v689_v39 = vadd.f32 %v810_v32, %v688_v36  ;;  %v674_v41 = vpop.f32.mrb[1].mxu0  ;;  %v690_v37 = vpop.f32.mrb[1].mxu1 }
 0x17b   : > { %v675_v40 = vpop.f32.mrb[2].mxu0  ;;  %v691_v56 = vpop.f32.mrb[2].mxu1 }
 0x17c   : > { %v703_v34 = vmax.f32 %v673_v6, 0.0  ;;  %v707_v35 = vmax.f32 %v689_v39, 0.0  ;;  %v676_v38 = vadd.f32 %v810_v32, %v675_v40  ;;  %v692_v9 = vadd.f32 %v810_v32, %v691_v56  ;;  %v677_v42 = vpop.f32.mrb[3].mxu0  ;;  %v693_v43 = vpop.f32.mrb[3].mxu1 }
 0x17e   : > { %711 = vst.msk [vmem:[%s1410_s27] sm:$0xff] %vm485_vm3, %v703_v34  ;;  %715 = vst.msk [vmem:[%s1410_s27 + $0x20] sm:$0xff] %vm485_vm3, %v707_v35  ;;  %v704_v44 = vmax.f32 %v676_v38, 0.0  ;;  %v708_v45 = vmax.f32 %v692_v9, 0.0 }
 0x180   : > { %712 = vst.msk [vmem:[%s1410_s27 + $0x8] sm:$0xff] %vm485_vm3, %v704_v44  ;;  %716 = vst.msk [vmem:[%s1410_s27 + $0x28] sm:$0xff] %vm485_vm3, %v708_v45 }
 0x195   : > { %v680_v47 = vpop.f32.mrb[4].mxu0  ;;  %v696_v48 = vpop.f32.mrb[4].mxu1 }
 0x196   : > { %v681_v1 = vadd.f32 %v810_v32, %v680_v47  ;;  %v697_v63 = vadd.f32 %v810_v32, %v696_v48  ;;  %v682_v5 = vpop.f32.mrb[5].mxu0  ;;  %v698_v49 = vpop.f32.mrb[5].mxu1 }
 0x197   : > { %v683_v50 = vpop.f32.mrb[6].mxu0  ;;  %v699_v0 = vpop.f32.mrb[6].mxu1 }
 0x198   : > { %v705_v51 = vmax.f32 %v681_v1, 0.0  ;;  %v709_v52 = vmax.f32 %v697_v63, 0.0  ;;  %v684_v8 = vadd.f32 %v810_v32, %v683_v50  ;;  %v700_v54 = vadd.f32 %v810_v32, %v699_v0  ;;  %v685_v55 = vpop.f32.mrb[7].mxu0  ;;  %v701_v57 = vpop.f32.mrb[7].mxu1 }
 0x19a   : > { %713 = vst.msk [vmem:[%s1410_s27 + $0x10] sm:$0xff] %vm485_vm3, %v705_v51  ;;  %717 = vst.msk [vmem:[%s1410_s27 + $0x30] sm:$0xff] %vm485_vm3, %v709_v52  ;;  %v706_v58 = vmax.f32 %v684_v8, 0.0  ;;  %v710_v59 = vmax.f32 %v700_v54, 0.0 }
 0x19c   : > { %714 = vst.msk [vmem:[%s1410_s27 + $0x18] sm:$0xff] %vm485_vm3, %v706_v58  ;;  %718 = vst.msk [vmem:[%s1410_s27 + $0x38] sm:$0xff] %vm485_vm3, %v710_v59 }
 0x19d PF: > { %s13_s14 = sadd.s32 1, %s1049_s14   ;;  %s1441_s12 = smov %s1045_s13 }
 0x19e   : > { %p10_p5 = scmp.ge.s32.totalorder %s13_s14, 4   ;;  %s1442_s13 = smov %s1444_s15 }
 0x1a0   :  { %12 = sbr.rel (!%p10_p5) target bundleno = 2 (0x2), region = 63 }

// kernel: image_captioning_forward.26
= control target key start
LH: loop header
LB: loop body
LE: loop exit
PB: predicated region body
PF: predicated region fallthrough
CT: control target
= control target key end

     0   :  { %vm49_vm0 = vcmask 261120   ;;  %s211_s1 = inlined_call_operand.vmem [shape: bf16[32,128], index: 1, kind: input, shape index: {}]   ;;  %s212_s0 = inlined_call_operand.vmem [shape: f32[32,32], index: 0, kind: input, shape index: {}]   ;;  %s213_s2 = inlined_call_operand.vmem [shape: f32[1,128], index: 2, kind: input, shape index: {}]   ;;  %s214_s3 = inlined_call_operand.vmem [shape: f32[32,128], index: 3, kind: output, shape index: {}]  }
   0x1   :  { %v156_v0 = vld [vmem:[%s211_s1] sm:$0xff]   ;;  %v157_v1 = vld [vmem:[%s211_s1 + $0x8] sm:$0xff]   ;;  %v29_v5 = vld [vmem:[%s212_s0 + $0x10] sm:$0xff] }
   0x2   :  { %148 = vmatprep.subr.bf16.mxu0 %v156_v0  ;;  %v27_v2 = vld [vmem:[%s212_s0] sm:$0xff]  ;;  %v28_v3 = vld [vmem:[%s212_s0 + $0x8] sm:$0xff]  ;;  %v30_v6 = vld [vmem:[%s212_s0 + $0x18] sm:$0xff] }
   0x3   :  { %149 = vmatpush3.bf16.msra.mxu0 %v156_v0  ;;  %v31_v4 = vpack.c.bf16 %v28_v3, %v27_v2  ;;  %v32_v7 = vpack.c.bf16 %v30_v6, %v29_v5  ;;  %v143_v8 = vld [vmem:[%s213_s2] ss:$0 sm:$0xff] }
   0x4   :  { %150 = vmatprep.subr.bf16.mxu0 %v157_v1 }
   0x5   :  { %152 = vmatprep.mubr.msk.bf16.mxu0 %vm49_vm0, %v31_v4 }
   0x7   :  { %151 = vmatpush3.bf16.msra.mxu0 %v157_v1 }
   0xa   :  { %153 = vmatmul.mubr.msk.bf16.vlgmr.msra.gmra.mrb[0].mxu0 %vm49_vm0, %v32_v7 }
  0xdd   :  { %v154_v9 = vpop.f32.mrb[0].mxu0 }
  0xde   :  { %v129_v10 = vadd.f32 %v154_v9, %v143_v8  ;;  %v90_v11 = vpop.f32.mrb[1].mxu0 }
  0xdf   :  { %v127_v12 = vadd.f32 %v143_v8, %v90_v11  ;;  %v155_v13 = vpop.f32.mrb[2].mxu0 }
  0xe0   :  { %133 = vst [vmem:[%s214_s3 + $0x10] sm:$0xff] %v129_v10  ;;  %v130_v14 = vadd.f32 %v155_v13, %v143_v8  ;;  %v93_v15 = vpop.f32.mrb[3].mxu0 }
  0xe1   :  { %131 = vst [vmem:[%s214_s3] sm:$0xff] %v127_v12  ;;  %v128_v16 = vadd.f32 %v143_v8, %v93_v15 }
  0xe2   :  { %134 = vst [vmem:[%s214_s3 + $0x18] sm:$0xff] %v130_v14 }
  0xe3   :  { %132 = vst [vmem:[%s214_s3 + $0x8] sm:$0xff] %v128_v16 }

// kernel: image_captioning_forward.25
= control target key start
LH: loop header
LB: loop body
LE: loop exit
PB: predicated region body
PF: predicated region fallthrough
CT: control target
= control target key end

     0   :  { %s1236_s12 = smov 0   ;;  %s1238_s13 = smov 0   ;;  %s1627_s0 = inlined_call_operand.vmem [shape: f32[2,10,10,32], index: 0, kind: input, shape index: {}]   ;;  %s1628_s1 = inlined_call_operand.vmem [shape: bf16[288,32], index: 1, kind: input, shape index: {}]   ;;  %s1629_s2 = inlined_call_operand.vmem [shape: f32[1,32], index: 2, kind: input, shape index: {}]   ;;  %s1630_s3 = inlined_call_operand.vmem [shape: f32[2,8,8,32], index: 3, kind: output, shape index: {}]  }
   0x1   :  { %s1240_s14 = smov 0  }
   0x2 LB: > { %s25_s15 = sadd.s32 1, %s1207_s13  ;;  %p919_p0 = scmp.ge.s32.totalorder %s1211_s14, 1  ;;  %s1211_s14 = sphi %s1240_s14, %s13_s14   ;;  %s1207_s13 = sphi %s1238_s13, %s1632_s13   ;;  %s1203_s12 = sphi %s1236_s12, %s1631_s12  }
   0x3   : > { %p27_p1 = scmp.ge.s32.totalorder %s25_s15, 2  ;;  %p151_p2 = scmp.lt.s32.totalorder %s1211_s14, 3 }
   0x5   : > { %s1634_s15 = smov (%p27_p1, %s25_s15), 0  ;;  %p152_p3 = pnand %p919_p0, %p151_p2 }
   0x6   : > { %p179_p4 = scmp.lt.s32.totalorder (!%p152_p3), %s1203_s12, 1  ;;  %v1171_v0 = vld [vmem:[%s1628_s1 + $0x40] sm:$0xff] (!%p152_p3)   ;;  %v1173_v2 = vld [vmem:[%s1628_s1 + $0x48] sm:$0xff] (!%p152_p3)   ;;  %v1175_v4 = vld [vmem:[%s1628_s1 + $0x50] sm:$0xff] (!%p152_p3)   ;;  %vm259_vm0 = vcmask (!%p152_p3), 1045504   ;;  %vm234_vm1 = vcmask (!%p152_p3), 1046528  }
   0x7   : > { %155 = sbr.rel (%p152_p3) target bundleno = 415 (0x19f), region = 32  ;;  %v1172_v1 = vld [vmem:[%s1628_s1] sm:$0xff] (!%p152_p3)   ;;  %949 = vmatprep.subr.bf16.mxu0 (!%p152_p3), %v1171_v0  ;;  %1007 = vmatprep.subr.bf16.mxu1 (!%p152_p3), %v1171_v0  ;;  %v1174_v3 = vld [vmem:[%s1628_s1 + $0x8] sm:$0xff] (!%p152_p3)   ;;  %v1176_v5 = vld [vmem:[%s1628_s1 + $0x10] sm:$0xff] (!%p152_p3)   ;;  %s1213_s5 = smov (!%p152_p3), 64   ;;  %vm460_vm2 = vcmask (!%p152_p3), 261120  }
   0x8   : > { %950 = vmatpush3.bf16.msra.mxu0 (!%p152_p3), %v1172_v1  ;;  %1015 = vmatpush3.bf16.msra.mxu1 (!%p152_p3), %v1172_v1  ;;  %s1214_s6 = smov (!%p152_p3), 96   ;;  %s1215_s7 = smov (!%p152_p3), 32   ;;  %v1177_v51 = vld [vmem:[%s1628_s1 + $0x58] sm:$0xff] (!%p152_p3)   ;;  %v1179_v62 = vld [vmem:[%s1628_s1 + $0x60] sm:$0xff] (!%p152_p3)   ;;  %vm469_vm3 = vcmask (!%p152_p3), 523264   ;;  %vm478_vm4 = vcmask (!%p152_p3), 785408  }
   0x9   : > { %951 = vmatprep.subr.bf16.mxu0 (!%p152_p3), %v1173_v2  ;;  %1008 = vmatprep.subr.bf16.mxu1 (!%p152_p3), %v1173_v2  ;;  %v1178_v52 = vld [vmem:[%s1628_s1 + $0x18] sm:$0xff] (!%p152_p3)   ;;  %v1180_v2 = vld [vmem:[%s1628_s1 + $0x20] sm:$0xff] (!%p152_p3)  }
   0xc   : > { %952 = vmatpush3.bf16.msra.mxu0 (!%p152_p3), %v1174_v3  ;;  %1016 = vmatpush3.bf16.msra.mxu1 (!%p152_p3), %v1174_v3 }
   0xd   : > { %953 = vmatprep.subr.bf16.mxu0 (!%p152_p3), %v1175_v4  ;;  %1009 = vmatprep.subr.bf16.mxu1 (!%p152_p3), %v1175_v4 }
   0xe   : > { %s1636_s12 = smov (!%p179_p4, %s1203_s12), 1 }
   0xf   : > { %s1023_s22 = smul.u32 160, %s1636_s12  ;;  %s948_s11 = sshll.u32 %s1636_s12, 6 }
  0x10   : > { %954 = vmatpush3.bf16.msra.mxu0 %v1176_v5  ;;  %1017 = vmatpush3.bf16.msra.mxu1 %v1176_v5  ;;  %s1600_s18 = scalar_lea.vmem %s1630_s3, %s948_s11 }
  0x11   : > { %s1275_s29 = scalar_lea.vmem %s1627_s0, %s1023_s22  ;;  %955 = vmatprep.subr.bf16.mxu0 %v1177_v51  ;;  %1010 = vmatprep.subr.bf16.mxu1 %v1177_v51 }
  0x12   : > { %v1281_v6 = vld [vmem:[%s1275_s29 + $0x20] sm:$0xff]  ;;  %v1284_v7 = vld [vmem:[%s1275_s29 + $0x30] sm:$0xff]  ;;  %v201_v10 = vld [vmem:[%s1275_s29 + $0x18] sm:$0x3] }
  0x13   : > { %v1287_v8 = vld [vmem:[%s1275_s29 + $0x10] sm:$0xff]  ;;  %v1051_v9 = vpack.i.bf16 %v1284_v7, %v1281_v6  ;;  %v203_v11 = vld [vmem:[%s1275_s29 + $0x28] sm:$0x3]  ;;  %v205_v12 = vld [vmem:[%s1275_s29 + $0x38] sm:$0x3]  ;;  %v239_v14 = vrot.slane %v201_v10, 1 }
  0x14   : > { %v1056_v13 = vpack.i.bf16 %v1281_v6, %v1287_v8  ;;  %v242_v15 = vrot.slane %v203_v11, 1  ;;  %v263_v16 = vrot.slane %v1287_v8, 2  ;;  %v264_v17 = vrot.slane %v201_v10, 2  ;;  %v1298_v18 = vld [vmem:[%s1275_s29] sm:$0xff]  ;;  %v199_v23 = vld [vmem:[%s1275_s29 + $0x8] sm:$0x3]  ;;  %956 = vmatpush3.bf16.msra.mxu0 %v1178_v52  ;;  %1018 = vmatpush3.bf16.msra.mxu1 %v1178_v52 }
  0x15   : > { %1052 = vrot.lane.b32.xlu1 %v1051_v9, %s1213_s5  ;;  %v266_v19 = vrot.slane %v1281_v6, 2  ;;  %v267_v20 = vrot.slane %v203_v11, 2  ;;  %v269_v21 = vrot.slane %v1284_v7, 2  ;;  %v270_v22 = vrot.slane %v205_v12, 2  ;;  %v1315_v32 = vld [vmem:[%s1275_s29 + $0x60] sm:$0xff]  ;;  %v1324_v38 = vld [vmem:[%s1275_s29 + $0x70] sm:$0xff]  ;;  %957 = vmatprep.subr.bf16.mxu0 %v1179_v62 }
  0x16   : > { %v265_v24 = vsel %vm259_vm0, %v263_v16, %v264_v17  ;;  %v260_v25 = vrot.slane %v1298_v18, 2  ;;  %v261_v26 = vrot.slane %v199_v23, 2  ;;  %v235_v27 = vrot.slane %v1298_v18, 1  ;;  %v211_v37 = vld [vmem:[%s1275_s29 + $0x68] sm:$0x3]  ;;  %v1334_v44 = vld [vmem:[%s1275_s29 + $0x80] sm:$0xff]  ;;  %1011 = vmatprep.subr.bf16.mxu1 %v1179_v62 }
  0x17   : > { %v1308_v28 = vsel %vm259_vm0, %v266_v19, %v267_v20  ;;  %v1311_v29 = vsel %vm259_vm0, %v269_v21, %v270_v22  ;;  %v236_v30 = vrot.slane %v199_v23, 1  ;;  %v238_v31 = vrot.slane %v1287_v8, 1  ;;  %v213_v39 = vld [vmem:[%s1275_s29 + $0x78] sm:$0x3]  ;;  %v1337_v45 = vld [vmem:[%s1275_s29 + $0x88] sm:$0x3] }
  0x18   : > { %v513_v33 = vpack.c.bf16 %v1311_v29, %v1308_v28  ;;  %v1061_v34 = vpack.i.bf16 %v1308_v28, %v265_v24  ;;  %v262_v35 = vsel %vm259_vm0, %v260_v25, %v261_v26  ;;  %v241_v36 = vrot.slane %v1281_v6, 1  ;;  %v1346_v50 = vld [vmem:[%s1275_s29 + $0x90] sm:$0xff]  ;;  %v1356_v56 = vld [vmem:[%s1275_s29 + $0x98] sm:$0x3]  ;;  %v1181_v9 = vld [vmem:[%s1628_s1 + $0x68] sm:$0xff]   ;;  %958 = vmatpush3.bf16.msra.mxu0 %v1180_v2  ;;  %1019 = vmatpush3.bf16.msra.mxu1 %v1180_v2 }
  0x19   : > { %v1071_v40 = vpack.i.bf16 %v265_v24, %v262_v35  ;;  %1057 = vrot.lane.b32.xlu1 %v1056_v13, %s1214_s6  ;;  %v237_v41 = vsel %vm234_vm1, %v235_v27, %v236_v30  ;;  %v1330_v42 = vsel %vm234_vm1, %v238_v31, %v239_v14  ;;  %v244_v43 = vrot.slane %v1284_v7, 1  ;;  %v207_v20 = vld [vmem:[%s1275_s29 + $0x48] sm:$0x3]  ;;  %v1421_v25 = vld [vmem:[%s1275_s29 + $0x50] sm:$0xff]  ;;  %959 = vmatprep.subr.bf16.mxu0 %v1181_v9  ;;  %v1464_v52 = vld [vmem:[%s1628_s1 + $0x80] sm:$0xff]  }
  0x1a   : > { %1062 = vrot.lane.b32.xlu0 %v1061_v34, %s1215_s7  ;;  %v1066_v46 = vpack.i.bf16 %v1330_v42, %v237_v41  ;;  %v1342_v47 = vsel %vm234_vm1, %v241_v36, %v242_v15  ;;  %v245_v48 = vrot.slane %v205_v12, 1  ;;  %v253_v49 = vrot.slane %v1315_v32, 1  ;;  %v1400_v15 = vld [vmem:[%s1275_s29 + $0x40] sm:$0xff]  ;;  %v1182_v21 = vld [vmem:[%s1628_s1 + $0x28] sm:$0xff]   ;;  %v1183_v26 = vld [vmem:[%s1628_s1 + $0x70] sm:$0xff]   ;;  %1012 = vmatprep.subr.bf16.mxu1 %v1181_v9 }
  0x1b   : > { %v254_v53 = vrot.slane %v211_v37, 1  ;;  %v256_v54 = vrot.slane %v1324_v38, 1  ;;  %v257_v55 = vrot.slane %v213_v39, 1  ;;  %v281_v57 = vrot.slane %v1324_v38, 2  ;;  %v209_v36 = vld [vmem:[%s1275_s29 + $0x58] sm:$0x3] }
  0x1c   : > { %v1360_v58 = vsel %vm234_vm1, %v244_v43, %v245_v48  ;;  %v282_v59 = vrot.slane %v213_v39, 2  ;;  %v297_v60 = vrot.slane %v1334_v44, 2  ;;  %v298_v61 = vrot.slane %v1337_v45, 2  ;;  %960 = vmatpush3.bf16.msra.mxu0 %v1182_v21  ;;  %v1184_v39 = vld [vmem:[%s1628_s1 + $0x30] sm:$0xff]   ;;  %v1185_v43 = vld [vmem:[%s1628_s1 + $0x78] sm:$0xff]   ;;  %1020 = vmatpush3.bf16.msra.mxu1 %v1182_v21 }
  0x1d   : > { %1072 = vrot.lane.b32.xlu1 %v1071_v40, %s1213_s5  ;;  %v1369_v63 = vsel %vm234_vm1, %v253_v49, %v254_v53  ;;  %v1372_v0 = vsel %vm234_vm1, %v256_v54, %v257_v55  ;;  %v305_v1 = vrot.slane %v1346_v50, 2  ;;  %v1076_v3 = vpack.i.bf16 %v1360_v58, %v1342_v47  ;;  %961 = vmatprep.subr.bf16.mxu0 %v1183_v26 }
  0x1e   : > { %1067 = vrot.lane.b32.xlu0 %v1066_v46, %s1215_s7  ;;  %v1383_v4 = vpack.i.bf16 %v1372_v0, %v1369_v63  ;;  %v306_v5 = vrot.slane %v1356_v56, 2  ;;  %v1390_v10 = vsel %vm259_vm0, %v281_v57, %v282_v59  ;;  %v1393_v11 = vsel %vm259_vm0, %v297_v60, %v298_v61  ;;  %1013 = vmatprep.subr.bf16.mxu1 %v1183_v26 }
  0x1f   : > { %v278_v12 = vrot.slane %v1315_v32, 2  ;;  %v279_v13 = vrot.slane %v211_v37, 2  ;;  %v286_v19 = vrot.slane %v1334_v44, 1  ;;  %v1081_v22 = vpack.i.bf16 %v1393_v11, %v1390_v10 }
  0x20   : > { %v1397_v14 = vsel %vm259_vm0, %v305_v1, %v306_v5  ;;  %v287_v24 = vrot.slane %v1337_v45, 1  ;;  %v302_v27 = vrot.slane %v1346_v50, 1  ;;  %v303_v30 = vrot.slane %v1356_v56, 1  ;;  %962 = vmatpush3.bf16.msra.mxu0 %v1184_v39  ;;  %1021 = vmatpush3.bf16.msra.mxu1 %v1184_v39 }
  0x21   : > { %1087 = vrot.lane.b32.xlu1 %v1383_v4, %s1215_s7  ;;  %v522_v16 = vpack.c.bf16 %v1397_v14, %v1393_v11  ;;  %v1407_v17 = vsel %vm259_vm0, %v278_v12, %v279_v13  ;;  %v272_v31 = vrot.slane %v1400_v15, 2  ;;  %v273_v34 = vrot.slane %v207_v20, 2  ;;  %963 = vmatprep.subr.bf16.mxu0 %v1185_v43 }
  0x22   : > { %1077 = vrot.lane.b32.xlu0 %v1076_v3, %s1214_s6  ;;  %v1096_v23 = vpack.i.bf16 %v1390_v10, %v1407_v17  ;;  %v1106_v35 = vpack.i.bf16 %v1334_v44, %v1324_v38  ;;  %v275_v37 = vrot.slane %v1421_v25, 2  ;;  %v1091_v40 = vpack.i.bf16 %v1346_v50, %v1334_v44  ;;  %v1186_v50 = vld [vmem:[%s1628_s1 + $0x38] sm:$0xff]   ;;  %1014 = vmatprep.subr.bf16.mxu1 %v1185_v43 }
  0x23   : > { %v276_v41 = vrot.slane %v209_v36, 2  ;;  %v1444_v45 = vsel %vm234_vm1, %v286_v19, %v287_v24  ;;  %v304_v46 = vsel %vm234_vm1, %v302_v27, %v303_v30  ;;  %v1448_v48 = vsel %vm259_vm0, %v272_v31, %v273_v34 }
  0x24   : > { %v1101_v51 = vpack.i.bf16 %v304_v46, %v1444_v45  ;;  %v1126_v53 = vpack.i.bf16 %v1311_v29, %v1308_v28  ;;  %v247_v54 = vrot.slane %v1400_v15, 1  ;;  %964 = vmatpush3.bf16.msra.mxu0 %v1186_v50  ;;  %v1111_v55 = vpack.i.bf16 %v1448_v48, %v1311_v29  ;;  %1022 = vmatpush3.bf16.msra.mxu1 %v1186_v50 }
  0x25   : > { %1097 = vrot.lane.b32.xlu1 %v1096_v23, %s1213_s5  ;;  %v1451_v49 = vsel %vm259_vm0, %v275_v37, %v276_v41  ;;  %v248_v56 = vrot.slane %v207_v20, 1  ;;  %v250_v57 = vrot.slane %v1421_v25, 1  ;;  %v251_v59 = vrot.slane %v209_v36, 1  ;;  %995 = vmatprep.subr.bf16.mxu1 %v1464_v52 }
  0x26   : > { %1082 = vrot.lane.b32.xlu0 %v1081_v22, %s1215_s7  ;;  %v516_v44 = vpack.c.bf16 %v1451_v49, %v1448_v48  ;;  %v1136_v60 = vpack.i.bf16 %v1400_v15, %v1284_v7  ;;  %v1121_v61 = vpack.i.bf16 %v1421_v25, %v1400_v15  ;;  %v519_v2 = vpack.c.bf16 %v1390_v10, %v1407_v17 }
  0x27   : > { %v1482_v62 = vsel %vm234_vm1, %v247_v54, %v248_v56  ;;  %v1485_v1 = vsel %vm234_vm1, %v250_v57, %v251_v59  ;;  %v1156_v5 = vpack.i.bf16 %v1451_v49, %v1448_v48  ;;  %v1141_v9 = vpack.i.bf16 %v1407_v17, %v1451_v49 }
  0x28   : > { %v1166_v12 = vpack.i.bf16 %v1315_v32, %v1421_v25  ;;  %v1151_v13 = vpack.i.bf16 %v1324_v38, %v1315_v32 }
  0x29   : > { %1107 = vrot.lane.b32.xlu1 %v1106_v35, %s1214_s6 }
  0x2a   : > { %1092 = vrot.lane.b32.xlu0 %v1091_v40, %s1213_s5 }
  0x2d   : > { %1117 = vrot.lane.b32.xlu1 %v1076_v3, %s1215_s7  ;;  %v1146_v3 = vpack.i.bf16 %v1485_v1, %v1482_v62 }
  0x2e   : > { %1102 = vrot.lane.b32.xlu0 %v1101_v51, %s1214_s6 }
  0x31   : > { %1127 = vrot.lane.b32.xlu1 %v1126_v53, %s1213_s5 }
  0x32   : > { %1112 = vrot.lane.b32.xlu0 %v1111_v55, %s1215_s7 }
  0x35   : > { %1137 = vrot.lane.b32.xlu1 %v1136_v60, %s1214_s6 }
  0x36   : > { %1122 = vrot.lane.b32.xlu0 %v1121_v61, %s1213_s5 }
  0x39   : > { %1147 = vrot.lane.b32.xlu1 %v1146_v3, %s1215_s7 }
  0x3a   : > { %1132 = vrot.lane.b32.xlu0 %v1146_v3, %s1214_s6 }
  0x3d   : > { %1157 = vrot.lane.b32.xlu1 %v1156_v5, %s1213_s5 }
  0x3e   : > { %1142 = vrot.lane.b32.xlu0 %v1141_v9, %s1215_s7 }
  0x41   : > { %1167 = vrot.lane.b32.xlu1 %v1166_v12, %s1214_s6 }
  0x42   : > { %1152 = vrot.lane.b32.xlu0 %v1151_v13, %s1213_s5 }
  0x46   : > { %1162 = vrot.lane.b32.xlu0 %v1383_v4, %s1214_s6 }
  0x87   : > { %v1053_v19 = vpop.permute.xlu1 %1052 }
  0x88   : > { %v1055_v35 = vunpack.i.h.bf16 %v1053_v19  ;;  %v1054_v36 = vunpack.i.l.bf16 %v1053_v19 }
  0x8b   : > { %v1058_v20 = vpop.permute.xlu1 %1057 }
  0x8c   : > { %v1063_v21 = vpop.permute.xlu0 %1062  ;;  %v1060_v37 = vunpack.i.h.bf16 %v1058_v20  ;;  %v1059_v39 = vunpack.i.l.bf16 %v1058_v20 }
  0x8d   : > { %v1065_v22 = vunpack.i.h.bf16 %v1063_v21  ;;  %v1064_v23 = vunpack.i.l.bf16 %v1063_v21 }
  0x8f   : > { %v1073_v24 = vpop.permute.xlu1 %1072  ;;  %v487_v43 = vsel %vm460_vm2, %v1330_v42, %v1064_v23  ;;  %v488_v46 = vsel %vm460_vm2, %v1342_v47, %v1065_v22 }
  0x90   : > { %v1068_v26 = vpop.permute.xlu0 %1067  ;;  %v1075_v27 = vunpack.i.h.bf16 %v1073_v24  ;;  %v1074_v30 = vunpack.i.l.bf16 %v1073_v24  ;;  %v495_v56 = vsel %vm469_vm3, %v487_v43, %v1054_v36 }
  0x91   : > { %v1070_v31 = vunpack.i.h.bf16 %v1068_v26  ;;  %v1069_v34 = vunpack.i.l.bf16 %v1068_v26 }
  0x93   : > { %v462_v4 = vsel %vm460_vm2, %v1287_v8, %v1070_v31  ;;  %v461_v40 = vsel %vm460_vm2, %v1298_v18, %v1069_v34  ;;  %v1088_v41 = vpop.permute.xlu1 %1087  ;;  %v496_v8 = vsel %vm469_vm3, %v488_v46, %v1055_v35 }
  0x94   : > { %v470_v50 = vsel %vm469_vm3, %v461_v40, %v1074_v30  ;;  %v471_v51 = vsel %vm469_vm3, %v462_v4, %v1075_v27  ;;  %v1078_v53 = vpop.permute.xlu0 %1077  ;;  %v1090_v3 = vunpack.i.h.bf16 %v1088_v41  ;;  %v1089_v5 = vunpack.i.l.bf16 %v1088_v41 }
  0x95   : > { %v1080_v54 = vunpack.i.h.bf16 %v1078_v53  ;;  %v1079_v55 = vunpack.i.l.bf16 %v1078_v53  ;;  %v479_v18 = vsel %vm478_vm4, %v470_v50, %v1059_v39  ;;  %v480_v57 = vsel %vm478_vm4, %v471_v51, %v1060_v37 }
  0x96   : > { %v511_v9 = vpack.c.bf16 %v480_v57, %v479_v18  ;;  %v468_v21 = vsel %vm460_vm2, %v1324_v38, %v1090_v3  ;;  %v467_v22 = vsel %vm460_vm2, %v1315_v32, %v1089_v5 }
  0x97   : > { %v1098_v59 = vpop.permute.xlu1 %1097  ;;  %v503_v42 = vsel %vm478_vm4, %v495_v56, %v1079_v55  ;;  %v504_v47 = vsel %vm478_vm4, %v496_v8, %v1080_v54 }
  0x98   : > { %v1083_v60 = vpop.permute.xlu0 %1082  ;;  %v512_v61 = vpack.c.bf16 %v504_v47, %v503_v42  ;;  %v1100_v13 = vunpack.i.h.bf16 %v1098_v59  ;;  %v1099_v19 = vunpack.i.l.bf16 %v1098_v59 }
  0x99   : > { %v1085_v23 = vunpack.i.h.bf16 %v1083_v60  ;;  %v1084_v24 = vunpack.i.l.bf16 %v1083_v60 }
  0x9a   : > { %718 = vmatprep.mubr.bf16.mxu0 %v512_v61  ;;  %v476_v35 = vsel %vm469_vm3, %v467_v22, %v1099_v19  ;;  %v477_v36 = vsel %vm469_vm3, %v468_v21, %v1100_v13 }
  0x9b   : > { %719 = vmatmul.mubr.bf16.vlgmr.msra.gmra.mrb[0].mxu0 %v511_v9  ;;  %v1108_v12 = vpop.permute.xlu1 %1107  ;;  %v493_v38 = vsel %vm460_vm2, %v1372_v0, %v1084_v24  ;;  %v494_v32 = vsel %vm460_vm2, %v1444_v45, %v1085_v23  ;;  %v1188_v45 = vld [vmem:[%s1628_s1 + $0x88] sm:$0xff]  }
  0x9c   : > { %v1093_v20 = vpop.permute.xlu0 %1092  ;;  %v1110_v30 = vunpack.i.h.bf16 %v1108_v12  ;;  %v1109_v31 = vunpack.i.l.bf16 %v1108_v12 }
  0x9d   : > { %v1095_v26 = vunpack.i.h.bf16 %v1093_v20  ;;  %v1094_v27 = vunpack.i.l.bf16 %v1093_v20 }
  0x9e   : > { %v485_v43 = vsel %vm478_vm4, %v476_v35, %v1109_v31  ;;  %v486_v46 = vsel %vm478_vm4, %v477_v36, %v1110_v30 }
  0x9f   : > { %v1118_v34 = vpop.permute.xlu1 %1117  ;;  %v501_v40 = vsel %vm469_vm3, %v493_v38, %v1094_v27  ;;  %v502_v41 = vsel %vm469_vm3, %v494_v32, %v1095_v26  ;;  %v520_v8 = vpack.c.bf16 %v486_v46, %v485_v43 }
  0xa0   : > { %v1103_v37 = vpop.permute.xlu0 %1102  ;;  %v1120_v56 = vunpack.i.h.bf16 %v1118_v34  ;;  %v1119_v0 = vunpack.i.l.bf16 %v1118_v34 }
  0xa1   : > { %v1105_v39 = vunpack.i.h.bf16 %v1103_v37  ;;  %v1104_v4 = vunpack.i.l.bf16 %v1103_v37 }
  0xa2   : > { %v464_v47 = vsel %vm460_vm2, %v1284_v7, %v1120_v56  ;;  %v463_v60 = vsel %vm460_vm2, %v1281_v6, %v1119_v0 }
  0xa3   : > { %v1128_v50 = vpop.permute.xlu1 %1127  ;;  %v509_v51 = vsel %vm478_vm4, %v501_v40, %v1104_v4  ;;  %v510_v53 = vsel %vm478_vm4, %v502_v41, %v1105_v39 }
  0xa4   : > { %v1113_v54 = vpop.permute.xlu0 %1112  ;;  %v521_v55 = vpack.c.bf16 %v510_v53, %v509_v51  ;;  %v1130_v57 = vunpack.i.h.bf16 %v1128_v50  ;;  %v1129_v59 = vunpack.i.l.bf16 %v1128_v50 }
  0xa5   : > { %v1115_v61 = vunpack.i.h.bf16 %v1113_v54  ;;  %v1114_v3 = vunpack.i.l.bf16 %v1113_v54 }
  0xa6   : > { %742 = vmatprep.mubr.bf16.mxu1 %v521_v55  ;;  %v473_v28 = vsel %vm469_vm3, %v464_v47, %v1130_v57 }
  0xa7   : > { %743 = vmatmul.mubr.bf16.vlgmr.msra.gmra.mrb[0].mxu1 %v520_v8  ;;  %v1138_v18 = vpop.permute.xlu1 %1137  ;;  %v490_v7 = vsel %vm460_vm2, %v1482_v62, %v1115_v61  ;;  %v489_v6 = vsel %vm460_vm2, %v1360_v58, %v1114_v3  ;;  %v923_v3 = vld [vmem:[%s1629_s2] ss:$0 sm:$0xff] }
  0xa8   : > { %v1123_v42 = vpop.permute.xlu0 %1122  ;;  %996 = vmatpush3.bf16.msra.mxu1 %v1464_v52  ;;  %999 = vmatprep.mubr.msk.bf16.mxu1 %vm460_vm2, %v513_v33  ;;  %v1140_v12 = vunpack.i.h.bf16 %v1138_v18  ;;  %v1139_v13 = vunpack.i.l.bf16 %v1138_v18  ;;  %v472_v52 = vsel %vm469_vm3, %v463_v60, %v1129_v59 }
  0xa9   : > { %997 = vmatprep.subr.bf16.mxu1 %v1188_v45  ;;  %v1125_v5 = vunpack.i.h.bf16 %v1123_v42  ;;  %v1124_v9 = vunpack.i.l.bf16 %v1123_v42 }
  0xaa   : > { %v481_v23 = vsel %vm478_vm4, %v472_v52, %v1139_v13  ;;  %v482_v24 = vsel %vm478_vm4, %v473_v28, %v1140_v12 }
  0xab   : > { %v1148_v19 = vpop.permute.xlu1 %1147  ;;  %v497_v21 = vsel %vm469_vm3, %v489_v6, %v1124_v9  ;;  %v498_v22 = vsel %vm469_vm3, %v490_v7, %v1125_v5  ;;  %v514_v35 = vpack.c.bf16 %v482_v24, %v481_v23 }
  0xac   : > { %v1133_v29 = vpop.permute.xlu0 %1132  ;;  %998 = vmatpush3.bf16.msra.mxu1 %v1188_v45  ;;  %v1150_v31 = vunpack.i.h.bf16 %v1148_v19  ;;  %v1149_v34 = vunpack.i.l.bf16 %v1148_v19 }
  0xad   : > { %v1135_v33 = vunpack.i.h.bf16 %v1133_v29  ;;  %v1134_v20 = vunpack.i.l.bf16 %v1133_v29 }
  0xae   : > { %v466_v37 = vsel %vm460_vm2, %v1421_v25, %v1150_v31  ;;  %v465_v39 = vsel %vm460_vm2, %v1400_v15, %v1149_v34 }
  0xaf   : > { %1000 = vmatmul.mubr.msk.bf16.vlgmr.msra.gmra.mrb[4].mxu1 %vm460_vm2, %v516_v44  ;;  %v1158_v26 = vpop.permute.xlu1 %1157  ;;  %v505_v62 = vsel %vm478_vm4, %v497_v21, %v1134_v20  ;;  %v506_v58 = vsel %vm478_vm4, %v498_v22, %v1135_v33 }
  0xb0   : > { %v1143_v27 = vpop.permute.xlu0 %1142  ;;  %v515_v30 = vpack.c.bf16 %v506_v58, %v505_v62  ;;  %1003 = vmatprep.mubr.msk.bf16.mxu1 %vm460_vm2, %v519_v2  ;;  %v1160_v49 = vunpack.i.h.bf16 %v1158_v26  ;;  %v1159_v44 = vunpack.i.l.bf16 %v1158_v26 }
  0xb1   : > { %v1145_v4 = vunpack.i.h.bf16 %v1143_v27  ;;  %v1144_v38 = vunpack.i.l.bf16 %v1143_v27 }
  0xb2   : > { %726 = vmatprep.mubr.bf16.mxu0 %v515_v30  ;;  %v474_v40 = vsel %vm469_vm3, %v465_v39, %v1159_v44  ;;  %v475_v41 = vsel %vm469_vm3, %v466_v37, %v1160_v49 }
  0xb3   : > { %727 = vmatmul.mubr.bf16.gmra.mrb[4].mxu0 %v514_v35  ;;  %v1168_v48 = vpop.permute.xlu1 %1167  ;;  %v492_v25 = vsel %vm460_vm2, %v1369_v63, %v1145_v4  ;;  %v491_v15 = vsel %vm460_vm2, %v1485_v1, %v1144_v38 }
  0xb4   : > { %v1153_v36 = vpop.permute.xlu0 %1152  ;;  %v1170_v2 = vunpack.i.h.bf16 %v1168_v48  ;;  %v1169_v32 = vunpack.i.l.bf16 %v1168_v48 }
  0xb5   : > { %v1155_v10 = vunpack.i.h.bf16 %v1153_v36  ;;  %v1154_v17 = vunpack.i.l.bf16 %v1153_v36 }
  0xb6   : > { %v483_v11 = vsel %vm478_vm4, %v474_v40, %v1169_v32  ;;  %v484_v14 = vsel %vm478_vm4, %v475_v41, %v1170_v2 }
  0xb7   : > { %1004 = vmatmul.mubr.msk.bf16.gmra.mrb[8].mxu1 %vm460_vm2, %v522_v16  ;;  %v499_v51 = vsel %vm469_vm3, %v491_v15, %v1154_v17  ;;  %v500_v53 = vsel %vm469_vm3, %v492_v25, %v1155_v10  ;;  %v517_v56 = vpack.c.bf16 %v484_v14, %v483_v11 }
  0xb8   : > { %v1163_v43 = vpop.permute.xlu0 %1162 }
  0xb9   : > { %v1165_v46 = vunpack.i.h.bf16 %v1163_v43  ;;  %v1164_v50 = vunpack.i.l.bf16 %v1163_v43 }
  0xbb   : > { %v507_v16 = vsel %vm478_vm4, %v499_v51, %v1164_v50  ;;  %v508_v54 = vsel %vm478_vm4, %v500_v53, %v1165_v46 }
  0xbc   : > { %v518_v55 = vpack.c.bf16 %v508_v54, %v507_v16 }
  0xbe   : > { %734 = vmatprep.mubr.bf16.mxu0 %v518_v55 }
  0xbf   : > { %735 = vmatmul.mubr.bf16.gmra.mrb[8].mxu0 %v517_v56 }
 0x16e   : > { %v965_v63 = vpop.f32.mrb[0].mxu0 }
 0x16f   : > { %v966_v1 = vpop.f32.mrb[1].mxu0 }
 0x170   : > { %v967_v0 = vadd.f32 %v966_v1, %v965_v63  ;;  %v968_v8 = vpop.f32.mrb[2].mxu0 }
 0x171   : > { %v969_v45 = vpop.f32.mrb[3].mxu0 }
 0x172   : > { %v970_v18 = vadd.f32 %v969_v45, %v968_v8  ;;  %v721_v9 = vadd.f32 %v967_v0, %v923_v3 }
 0x174   : > { %v724_v52 = vadd.f32 %v970_v18, %v923_v3 }
 0x17a   : > { %v983_v57 = vpop.f32.mrb[0].mxu1 }
 0x17b   : > { %v984_v59 = vpop.f32.mrb[1].mxu1 }
 0x17c   : > { %v985_v42 = vadd.f32 %v984_v59, %v983_v57  ;;  %v986_v47 = vpop.f32.mrb[2].mxu1 }
 0x17d   : > { %v987_v60 = vpop.f32.mrb[3].mxu1 }
 0x17e   : > { %v988_v61 = vadd.f32 %v987_v60, %v986_v47  ;;  %v745_v24 = vadd.f32 %v985_v42, %v923_v3 }
 0x180   : > { %v748_v31 = vadd.f32 %v988_v61, %v923_v3 }
 0x182   : > { %v1001_v5 = vpop.f32.mrb[4].mxu1 }
 0x183   : > { %v785_v12 = vpop.f32.mrb[5].mxu1 }
 0x184   : > { %v786_v13 = vadd.f32 %v785_v12, %v721_v9  ;;  %v1002_v19 = vpop.f32.mrb[6].mxu1 }
 0x185   : > { %v788_v28 = vpop.f32.mrb[7].mxu1 }
 0x186   : > { %v816_v29 = vmax.f32 %v786_v13, 0.0  ;;  %v789_v7 = vadd.f32 %v788_v28, %v724_v52  ;;  %v971_v6 = vpop.f32.mrb[4].mxu0 }
 0x187   : > { %v972_v33 = vpop.f32.mrb[5].mxu0 }
 0x188   : > { %824 = vst.msk [vmem:[%s1600_s18] sm:$0xff] %vm460_vm2, %v816_v29  ;;  %v817_v20 = vmax.f32 %v789_v7, 0.0  ;;  %v973_v21 = vadd.f32 %v972_v33, %v971_v6  ;;  %v974_v22 = vpop.f32.mrb[6].mxu0 }
 0x189   : > { %v975_v23 = vpop.f32.mrb[7].mxu0 }
 0x18a   : > { %825 = vst.msk [vmem:[%s1600_s18 + $0x8] sm:$0xff] %vm460_vm2, %v817_v20  ;;  %v729_v26 = vadd.f32 %v973_v21, %v923_v3  ;;  %v976_v62 = vadd.f32 %v975_v23, %v974_v22  ;;  %v1005_v58 = vpop.f32.mrb[8].mxu1 }
 0x18b   : > { %v810_v27 = vadd.f32 %v1005_v58, %v745_v24  ;;  %v801_v30 = vpop.f32.mrb[9].mxu1 }
 0x18c   : > { %v794_v34 = vadd.f32 %v1001_v5, %v729_v26  ;;  %v732_v35 = vadd.f32 %v976_v62, %v923_v3  ;;  %v1006_v48 = vpop.f32.mrb[10].mxu1 }
 0x18d   : > { %v822_v49 = vmax.f32 %v810_v27, 0.0  ;;  %v813_v44 = vadd.f32 %v1006_v48, %v748_v31  ;;  %v804_v36 = vpop.f32.mrb[11].mxu1 }
 0x18e   : > { %v818_v37 = vmax.f32 %v794_v34, 0.0  ;;  %v797_v39 = vadd.f32 %v1002_v19, %v732_v35 }
 0x18f   : > { %830 = vst.msk [vmem:[%s1600_s18 + $0x30] sm:$0xff] %vm460_vm2, %v822_v49  ;;  %v823_v4 = vmax.f32 %v813_v44, 0.0 }
 0x190   : > { %826 = vst.msk [vmem:[%s1600_s18 + $0x10] sm:$0xff] %vm460_vm2, %v818_v37  ;;  %v819_v38 = vmax.f32 %v797_v39, 0.0 }
 0x191   : > { %831 = vst.msk [vmem:[%s1600_s18 + $0x38] sm:$0xff] %vm460_vm2, %v823_v4 }
 0x192   : > { %827 = vst.msk [vmem:[%s1600_s18 + $0x18] sm:$0xff] %vm460_vm2, %v819_v38  ;;  %v977_v10 = vpop.f32.mrb[8].mxu0 }
 0x193   : > { %v978_v17 = vpop.f32.mrb[9].mxu0 }
 0x194   : > { %v979_v2 = vadd.f32 %v978_v17, %v977_v10  ;;  %v980_v32 = vpop.f32.mrb[10].mxu0 }
 0x195   : > { %v981_v40 = vpop.f32.mrb[11].mxu0 }
 0x196   : > { %v737_v41 = vadd.f32 %v979_v2, %v923_v3  ;;  %v982_v43 = vadd.f32 %v981_v40, %v980_v32 }
 0x198   : > { %v802_v25 = vadd.f32 %v801_v30, %v737_v41  ;;  %v740_v15 = vadd.f32 %v982_v43, %v923_v3 }
 0x19a   : > { %v820_v46 = vmax.f32 %v802_v25, 0.0  ;;  %v805_v50 = vadd.f32 %v804_v36, %v740_v15 }
 0x19c   : > { %828 = vst.msk [vmem:[%s1600_s18 + $0x20] sm:$0xff] %vm460_vm2, %v820_v46  ;;  %v821_v51 = vmax.f32 %v805_v50, 0.0 }
 0x19e   : > { %829 = vst.msk [vmem:[%s1600_s18 + $0x28] sm:$0xff] %vm460_vm2, %v821_v51 }
 0x19f PF: > { %s13_s14 = sadd.s32 1, %s1211_s14   ;;  %s1631_s12 = smov %s1207_s13 }
 0x1a0   : > { %p10_p5 = scmp.ge.s32.totalorder %s13_s14, 4   ;;  %s1632_s13 = smov %s1634_s15 }
 0x1a2   :  { %12 = sbr.rel (!%p10_p5) target bundleno = 2 (0x2), region = 63 }

// kernel: image_captioning_forward.31
= control target key start
LH: loop header
LB: loop body
LE: loop exit
PB: predicated region body
PF: predicated region fallthrough
CT: control target
= control target key end

     0   :  { %s298_s1 = inlined_call_operand.vmem [shape: bf16[128,128], index: 1, kind: input, shape index: {}]   ;;  %s299_s0 = inlined_call_operand.vmem [shape: f32[32,128], index: 0, kind: input, shape index: {}]   ;;  %s300_s2 = inlined_call_operand.vmem [shape: f32[1,128], index: 2, kind: input, shape index: {}]   ;;  %s301_s3 = inlined_call_operand.vmem [shape: f32[32,128], index: 3, kind: output, shape index: {}]  }
   0x1   :  { %v219_v0 = vld [vmem:[%s298_s1] sm:$0xff]   ;;  %v220_v1 = vld [vmem:[%s298_s1 + $0x8] sm:$0xff]   ;;  %v221_v2 = vld [vmem:[%s298_s1 + $0x10] sm:$0xff]  }
   0x2   :  { %199 = vmatprep.subr.bf16.mxu0 %v219_v0  ;;  %v222_v3 = vld [vmem:[%s298_s1 + $0x18] sm:$0xff]   ;;  %v27_v4 = vld [vmem:[%s299_s0] sm:$0xff]  ;;  %v28_v5 = vld [vmem:[%s299_s0 + $0x8] sm:$0xff] }
   0x3   :  { %200 = vmatpush3.bf16.msra.mxu0 %v219_v0  ;;  %v31_v6 = vpack.c.bf16 %v28_v5, %v27_v4  ;;  %v223_v7 = vld [vmem:[%s298_s1 + $0x20] sm:$0xff]   ;;  %v224_v8 = vld [vmem:[%s298_s1 + $0x28] sm:$0xff]   ;;  %v225_v9 = vld [vmem:[%s298_s1 + $0x30] sm:$0xff]  }
   0x4   :  { %201 = vmatprep.subr.bf16.mxu0 %v220_v1  ;;  %v226_v10 = vld [vmem:[%s298_s1 + $0x38] sm:$0xff]   ;;  %v29_v11 = vld [vmem:[%s299_s0 + $0x10] sm:$0xff]  ;;  %v188_v14 = vld [vmem:[%s300_s2] ss:$0 sm:$0xff] }
   0x5   :  { %215 = vmatprep.mubr.bf16.mxu0 %v31_v6  ;;  %v30_v12 = vld [vmem:[%s299_s0 + $0x18] sm:$0xff] }
   0x6   :  { %v32_v13 = vpack.c.bf16 %v30_v12, %v29_v11 }
   0x7   :  { %202 = vmatpush3.bf16.msra.mxu0 %v220_v1 }
   0x8   :  { %203 = vmatprep.subr.bf16.mxu0 %v221_v2 }
   0xb   :  { %204 = vmatpush3.bf16.msra.mxu0 %v221_v2 }
   0xc   :  { %205 = vmatprep.subr.bf16.mxu0 %v222_v3 }
   0xf   :  { %206 = vmatpush3.bf16.msra.mxu0 %v222_v3 }
  0x10   :  { %207 = vmatprep.subr.bf16.mxu0 %v223_v7 }
  0x13   :  { %208 = vmatpush3.bf16.msra.mxu0 %v223_v7 }
  0x14   :  { %209 = vmatprep.subr.bf16.mxu0 %v224_v8 }
  0x17   :  { %210 = vmatpush3.bf16.msra.mxu0 %v224_v8 }
  0x18   :  { %211 = vmatprep.subr.bf16.mxu0 %v225_v9 }
  0x1b   :  { %212 = vmatpush3.bf16.msra.mxu0 %v225_v9 }
  0x1c   :  { %213 = vmatprep.subr.bf16.mxu0 %v226_v10 }
  0x1f   :  { %214 = vmatpush3.bf16.msra.mxu0 %v226_v10 }
  0x22   :  { %216 = vmatmul.mubr.bf16.vlgmr.msra.gmra.mrb[0].mxu0 %v32_v13 }
  0xf5   :  { %v217_v15 = vpop.f32.mrb[0].mxu0 }
  0xf6   :  { %v170_v16 = vadd.f32 %v217_v15, %v188_v14  ;;  %v131_v17 = vpop.f32.mrb[1].mxu0 }
  0xf7   :  { %v168_v18 = vadd.f32 %v188_v14, %v131_v17  ;;  %v218_v19 = vpop.f32.mrb[2].mxu0 }
  0xf8   :  { %174 = vst [vmem:[%s301_s3 + $0x10] sm:$0xff] %v170_v16  ;;  %v171_v20 = vadd.f32 %v218_v19, %v188_v14  ;;  %v134_v21 = vpop.f32.mrb[3].mxu0 }
  0xf9   :  { %172 = vst [vmem:[%s301_s3] sm:$0xff] %v168_v18  ;;  %v169_v22 = vadd.f32 %v188_v14, %v134_v21 }
  0xfa   :  { %175 = vst [vmem:[%s301_s3 + $0x18] sm:$0xff] %v171_v20 }
  0xfb   :  { %173 = vst [vmem:[%s301_s3 + $0x8] sm:$0xff] %v169_v22 }

// kernel: image_captioning_forward.32
= control target key start
LH: loop header
LB: loop body
LE: loop exit
PB: predicated region body
PF: predicated region fallthrough
CT: control target
= control target key end

     0   :  { %s840_s9 = smov 0   ;;  %s927_s0 = inlined_call_operand.vmem [shape: f32[2,8,128], index: 0, kind: input, shape index: {}]   ;;  %s928_s1 = inlined_call_operand.vmem [shape: f32[2,16,128], index: 1, kind: input, shape index: {}]   ;;  %s929_s2 = inlined_call_operand.vmem [shape: f32[2,8,128], index: 2, kind: output, shape index: {}]  }
   0x1 LB: > { %s685_s10 = sadd.s32 4294967295, %s811_s9   ;;  %p689_p0 = scmp.ge.s32.totalorder %s811_s9, 1  ;;  %s811_s9 = sphi %s840_s9, %s12_s9  }
   0x2   : > { %p121_p1 = scmp.lt.s32.totalorder %s811_s9, 3 }
   0x4   : > { %p122_p2 = pnand %p689_p0, %p121_p1 }
   0x5   : > { %p146_p3 = scmp.lt.s32.totalorder (!%p122_p2), %s685_s10, 1  ;;  %v813_v0 = vmov (!%p122_p2), 0.0   ;;  %vm814_vm0 = vmmov (!%p122_p2), 0   ;;  %vm165_vm1 = vcmask (!%p122_p2), 64512   ;;  %vm213_vm2 = vcmask (!%p122_p2), 130048   ;;  %s815_s19 = smov (!%p122_p2), 96  }
   0x6   : > { %125 = sbr.rel (%p122_p2) target bundleno = 1441 (0x5a1), region = 28  ;;  %721 = vmatprep.subr.bf16.mxu0 (!%p122_p2), %v813_v0  ;;  %723 = vmatprep.mubr.msk.bf16.mxu0 (!%p122_p2), %vm814_vm0, %v813_v0  ;;  %s816_s20 = smov (!%p122_p2), 120   ;;  %vm615_vm3 = vcmask (!%p122_p2), 195584   ;;  %vm617_vm4 = vcmask (!%p122_p2), 261120  }
   0x7   : > { %727 = vmatprep.subr.bf16.mxu1 (!%p122_p2), %v813_v0  ;;  %729 = vmatprep.mubr.msk.bf16.mxu1 (!%p122_p2), %vm814_vm0, %v813_v0  ;;  %s817_s21 = smov (!%p122_p2), 112   ;;  %s818_s22 = smov (!%p122_p2), 104  }
   0x8   : > { %s819_s23 = smov (!%p122_p2), 88   ;;  %s820_s24 = smov (!%p122_p2), 72  }
   0x9   : > { %s821_s25 = smov (!%p122_p2), 80   ;;  %s822_s26 = smov (!%p122_p2), 8  }
   0xa   : > { %s823_s27 = smov (!%p122_p2), 16   ;;  %s824_s28 = smov (!%p122_p2), 24  }
   0xd   : > { %s931_s10 = smov (!%p146_p3, %s685_s10), 1 }
   0xe   : > { %s704_s11 = sshll.u32 %s931_s10, 4  ;;  %s690_s12 = sshll.u32 %s931_s10, 3 }
   0xf   : > { %s154_s15 = scalar_lea.vmem %s928_s1, %s704_s11  ;;  %s149_s18 = scalar_lea.vmem %s927_s0, %s690_s12 }
  0x10   : > { %v162_v1 = vld [vmem:[%s154_s15] sm:$0xff]  ;;  %v163_v2 = vld [vmem:[%s154_s15 + $0x8] sm:$0xff]  ;;  %s158_s3 = scalar_lea.vmem %s929_s2, %s690_s12 }
  0x11   : > { %v861_v3 = vpack.c.bf16 %v163_v2, %v162_v1  ;;  %v160_v5 = vld [vmem:[%s149_s18] sm:$0xff] }
  0x12   : > { %v161_v6 = vpack.c.bf16 %v160_v5, %v160_v5 }
  0x13   : > { %v170_v4 = vsel %vm165_vm1, %v861_v3, 0  ;;  %227 = vrot.lane.b32.xlu1 %v861_v3, %s815_s19 }
  0x14   : > { %722 = vmatpush3.bf16.xpose.msra.mxu0 %v170_v4 }
  0x15   : > { %739 = vmatprep.subr.bf16.mxu0 %v813_v0 }
  0x17   : > { %276 = vrot.lane.b32.xlu1 %v861_v3, %s816_s20 }
  0x1b   : > { %724 = vmatmul.mubr.msk.bf16.vlgmr.msra.gmra.mrb[0].mxu0 %vm165_vm1, %v161_v6  ;;  %385 = vrot.lane.b32.xlu1 %v861_v3, %s817_s21 }
  0x1c   : > { %741 = vmatprep.mubr.msk.bf16.mxu0 %vm814_vm0, %v813_v0 }
  0x1f   : > { %383 = vrot.lane.b32.xlu1 %v161_v6, %s817_s21 }
  0x23   : > { %494 = vrot.lane.b32.xlu1 %v861_v3, %s818_s22 }
  0x27   : > { %492 = vrot.lane.b32.xlu1 %v161_v6, %s818_s22 }
  0x85   : > { %v228_v18 = vpop.permute.xlu1 %227 }
  0x86   : > { %728 = vmatpush3.bf16.msra.mxu1 %v228_v18 }
  0x87   : > { %733 = vmatprep.subr.bf16.mxu1 %v813_v0 }
  0x89   : > { %v277_v21 = vpop.permute.xlu1 %276 }
  0x8a   : > { %v282_v23 = vsel %vm165_vm1, %v277_v21, 0 }
  0x8d   : > { %v386_v25 = vpop.permute.xlu1 %385 }
  0x8e   : > { %v391_v28 = vsel %vm165_vm1, %v386_v25, 0 }
  0x91   : > { %v384_v27 = vpop.permute.xlu1 %383 }
  0x95   : > { %v495_v29 = vpop.permute.xlu1 %494 }
  0x96   : > { %v500_v30 = vsel %vm165_vm1, %v495_v29, 0 }
  0x99   : > { %v493_v31 = vpop.permute.xlu1 %492 }
  0xee   : > { %v206_v7 = vpop.f32.mrb[0].mxu0 }
  0xef   : > { %v212_v8 = vmul.f32 0.35355338, %v206_v7  ;;  %v725_v9 = vpop.f32.mrb[1].mxu0 }
  0xf0   : > { %v209_v10 = vpop.f32.mrb[2].mxu0 }
  0xf1   : > { %v726_v11 = vpop.f32.mrb[3].mxu0  ;;  %v214_v12 = vsel %vm213_vm2, %v212_v8, -inf }
  0xf2   : > { %215 = vmax.xlane.f32.xlu0 %v214_v12 }
 0x17f   : > { %v216_v13 = vpop.xlane.xlu0 %215 }
 0x180   : > { %v217_v14 = vsub.f32 %v212_v8, %v216_v13 }
 0x182   : > { %v218_v15 = vmul.f32 1.442695, %v217_v14 }
 0x184   : > { %789 = vpow2.f32 %v218_v15 }
 0x18e   : > { %v790_v16 = vpop.eup %789 }
 0x18f   : > { %v220_v17 = vsel %vm213_vm2, %v790_v16, 0.0 }
 0x190   : > { %221 = vadd.xlane.f32.xlu0 %v220_v17 }
 0x1a6   : > { %274 = vrot.lane.b32.xlu0 %v161_v6, %s816_s20 }
 0x21d   : > { %v222_v19 = vpop.xlane.xlu0 %221 }
 0x21e   : > { %791 = vrcp.f32 %v222_v19 }
 0x221   : > { %v275_v26 = vpop.permute.xlu0 %274 }
 0x228   : > { %v792_v20 = vpop.eup %791 }
 0x229   : > { %v224_v22 = vmul.f32 %v792_v20, %v790_v16 }
 0x22b   : > { %v225_v24 = vpack.c.bf16 %v224_v22, %v224_v22 }
 0x22d   : > { %730 = vmatmul.mubr.msk.bf16.vlgmr.msra.gmra.mrb[0].mxu1 %vm213_vm2, %v225_v24 }
 0x22e   : > { %734 = vmatpush3.bf16.xpose.msra.mxu1 %v282_v23  ;;  %735 = vmatprep.mubr.msk.bf16.mxu1 %vm814_vm0, %v813_v0 }
 0x22f   : > { %745 = vmatprep.subr.bf16.mxu1 %v813_v0 }
 0x235   : > { %736 = vmatmul.mubr.msk.bf16.vlgmr.msra.gmra.mrb[4].mxu1 %vm165_vm1, %v275_v26 }
 0x236   : > { %746 = vmatpush3.bf16.xpose.msra.mxu1 %v391_v28  ;;  %747 = vmatprep.mubr.msk.bf16.mxu1 %vm814_vm0, %v813_v0 }
 0x237   : > { %757 = vmatprep.subr.bf16.mxu1 %v813_v0 }
 0x23d   : > { %748 = vmatmul.mubr.msk.bf16.vlgmr.msra.gmra.mrb[8].mxu1 %vm165_vm1, %v384_v27 }
 0x23e   : > { %758 = vmatpush3.bf16.xpose.msra.mxu1 %v500_v30  ;;  %759 = vmatprep.mubr.msk.bf16.mxu1 %vm814_vm0, %v813_v0 }
 0x245   : > { %760 = vmatmul.mubr.msk.bf16.vlgmr.msra.gmra.mrb[12].mxu1 %vm165_vm1, %v493_v31 }
 0x300   : > { %v896_v32 = vpop.f32.mrb[0].mxu1 }
 0x301   : > { %v731_v33 = vpop.f32.mrb[1].mxu1 }
 0x302   : > { %v270_v34 = vpop.f32.mrb[2].mxu1 }
 0x303   : > { %v732_v35 = vpop.f32.mrb[3].mxu1 }
 0x308   : > { %v318_v36 = vpop.f32.mrb[4].mxu1 }
 0x309   : > { %v324_v37 = vmul.f32 0.35355338, %v318_v36  ;;  %v737_v38 = vpop.f32.mrb[5].mxu1 }
 0x30a   : > { %v321_v39 = vpop.f32.mrb[6].mxu1 }
 0x30b   : > { %v738_v40 = vpop.f32.mrb[7].mxu1  ;;  %v325_v41 = vsel %vm213_vm2, %v324_v37, -inf }
 0x30c   : > { %326 = vmax.xlane.f32.xlu1 %v325_v41 }
 0x310   : > { %v427_v42 = vpop.f32.mrb[8].mxu1 }
 0x311   : > { %v433_v43 = vmul.f32 0.35355338, %v427_v42  ;;  %v749_v44 = vpop.f32.mrb[9].mxu1 }
 0x312   : > { %v430_v45 = vpop.f32.mrb[10].mxu1 }
 0x313   : > { %v750_v46 = vpop.f32.mrb[11].mxu1  ;;  %v434_v47 = vsel %vm213_vm2, %v433_v43, -inf }
 0x314   : > { %435 = vmax.xlane.f32.xlu0 %v434_v47 }
 0x318   : > { %v536_v48 = vpop.f32.mrb[12].mxu1 }
 0x319   : > { %v542_v49 = vmul.f32 0.35355338, %v536_v48  ;;  %v761_v50 = vpop.f32.mrb[13].mxu1 }
 0x31a   : > { %v539_v51 = vpop.f32.mrb[14].mxu1 }
 0x31b   : > { %v762_v52 = vpop.f32.mrb[15].mxu1  ;;  %v543_v53 = vsel %vm213_vm2, %v542_v49, -inf }
 0x31c   : > { %544 = vmax.xlane.f32.xlu1 %v543_v53 }
 0x32d   : > { %337 = vrot.lane.b32.xlu1 %v861_v3, %s819_s23 }
 0x399   : > { %v327_v54 = vpop.xlane.xlu1 %326 }
 0x39a   : > { %v328_v55 = vsub.f32 %v324_v37, %v327_v54 }
 0x39c   : > { %v329_v56 = vmul.f32 1.442695, %v328_v55 }
 0x39e   : > { %793 = vpow2.f32 %v329_v56 }
 0x3a1   : > { %v436_v57 = vpop.xlane.xlu0 %435 }
 0x3a2   : > { %v437_v58 = vsub.f32 %v433_v43, %v436_v57 }
 0x3a4   : > { %v438_v59 = vmul.f32 1.442695, %v437_v58 }
 0x3a6   : > { %795 = vpow2.f32 %v438_v59 }
 0x3a8   : > { %v794_v60 = vpop.eup %793 }
 0x3a9   : > { %v545_v61 = vpop.xlane.xlu1 %544  ;;  %v331_v62 = vsel %vm213_vm2, %v794_v60, 0.0 }
 0x3aa   : > { %v546_v63 = vsub.f32 %v542_v49, %v545_v61  ;;  %332 = vadd.xlane.f32.xlu0 %v331_v62 }
 0x3ac   : > { %v547_v1 = vmul.f32 1.442695, %v546_v63 }
 0x3ad   : > { %v338_v2 = vpop.permute.xlu1 %337 }
 0x3ae   : > { %797 = vpow2.f32 %v547_v1  ;;  %740 = vmatpush3.bf16.msra.mxu0 %v338_v2 }
 0x3af   : > { %751 = vmatprep.subr.bf16.mxu0 %v813_v0 }
 0x3b0   : > { %v796_v4 = vpop.eup %795 }
 0x3b1   : > { %v440_v5 = vsel %vm213_vm2, %v796_v4, 0.0 }
 0x3b2   : > { %441 = vadd.xlane.f32.xlu1 %v440_v5 }
 0x3b8   : > { %v798_v6 = vpop.eup %797 }
 0x3b9   : > { %v549_v7 = vsel %vm213_vm2, %v798_v6, 0.0 }
 0x3ba   : > { %550 = vadd.xlane.f32.xlu0 %v549_v7 }
 0x3c3   : > { %555 = vrot.lane.b32.xlu1 %v861_v3, %s820_s24 }
 0x3d0   : > { %446 = vrot.lane.b32.xlu0 %v861_v3, %s821_s25 }
 0x437   : > { %v333_v8 = vpop.xlane.xlu0 %332 }
 0x438   : > { %799 = vrcp.f32 %v333_v8 }
 0x43f   : > { %v442_v9 = vpop.xlane.xlu1 %441 }
 0x440   : > { %801 = vrcp.f32 %v442_v9 }
 0x442   : > { %v800_v10 = vpop.eup %799 }
 0x443   : > { %v335_v11 = vmul.f32 %v800_v10, %v794_v60  ;;  %v556_v3 = vpop.permute.xlu1 %555 }
 0x445   : > { %v336_v12 = vpack.c.bf16 %v335_v11, %v335_v11 }
 0x447   : > { %v551_v13 = vpop.xlane.xlu0 %550  ;;  %742 = vmatmul.mubr.msk.bf16.vlgmr.msra.gmra.mrb[4].mxu0 %vm213_vm2, %v336_v12 }
 0x448   : > { %803 = vrcp.f32 %v551_v13  ;;  %753 = vmatprep.mubr.msk.bf16.mxu0 %vm814_vm0, %v813_v0 }
 0x44a   : > { %v802_v14 = vpop.eup %801 }
 0x44b   : > { %v444_v15 = vmul.f32 %v802_v14, %v796_v4  ;;  %v447_v16 = vpop.permute.xlu0 %446 }
 0x44c   : > { %752 = vmatpush3.bf16.msra.mxu0 %v447_v16 }
 0x44d   : > { %v445_v17 = vpack.c.bf16 %v444_v15, %v444_v15  ;;  %763 = vmatprep.subr.bf16.mxu0 %v813_v0 }
 0x44f   : > { %754 = vmatmul.mubr.msk.bf16.vlgmr.msra.gmra.mrb[8].mxu0 %vm213_vm2, %v445_v17 }
 0x450   : > { %764 = vmatpush3.bf16.msra.mxu0 %v556_v3  ;;  %765 = vmatprep.mubr.msk.bf16.mxu0 %vm814_vm0, %v813_v0 }
 0x452   : > { %v804_v18 = vpop.eup %803 }
 0x453   : > { %v553_v19 = vmul.f32 %v804_v18, %v798_v6 }
 0x455   : > { %v554_v20 = vpack.c.bf16 %v553_v19, %v553_v19 }
 0x457   : > { %766 = vmatmul.mubr.msk.bf16.vlgmr.msra.gmra.mrb[12].mxu0 %vm213_vm2, %v554_v20 }
 0x51a   : > { %v377_v21 = vpop.f32.mrb[4].mxu0 }
 0x51b   : > { %602 = vrot.lane.b32.xlu1 %v377_v21, %s822_s26  ;;  %v743_v22 = vpop.f32.mrb[5].mxu0 }
 0x51c   : > { %v380_v23 = vpop.f32.mrb[6].mxu0 }
 0x51d   : > { %v744_v24 = vpop.f32.mrb[7].mxu0 }
 0x522   : > { %v486_v25 = vpop.f32.mrb[8].mxu0 }
 0x523   : > { %606 = vrot.lane.b32.xlu0 %v486_v25, %s823_s27  ;;  %v755_v26 = vpop.f32.mrb[9].mxu0 }
 0x524   : > { %v489_v27 = vpop.f32.mrb[10].mxu0 }
 0x525   : > { %v756_v28 = vpop.f32.mrb[11].mxu0 }
 0x52a   : > { %v595_v29 = vpop.f32.mrb[12].mxu0 }
 0x52b   : > { %610 = vrot.lane.b32.xlu1 %v595_v29, %s824_s28  ;;  %v767_v0 = vpop.f32.mrb[13].mxu0 }
 0x52c   : > { %v598_v30 = vpop.f32.mrb[14].mxu0 }
 0x52d   : > { %v768_v31 = vpop.f32.mrb[15].mxu0 }
 0x58d   : > { %v603_v33 = vpop.permute.xlu1 %602 }
 0x58e   : > { %v613_v35 = vsel %vm165_vm1, %v896_v32, %v603_v33 }
 0x595   : > { %v607_v34 = vpop.permute.xlu0 %606 }
 0x596   : > { %v614_v36 = vsel %vm213_vm2, %v613_v35, %v607_v34 }
 0x59d   : > { %v611_v37 = vpop.permute.xlu1 %610 }
 0x59e   : > { %v616_v38 = vsel %vm615_vm3, %v614_v36, %v611_v37 }
 0x59f   : > { %v618_v39 = vsel %vm617_vm4, %v616_v38, 0.0 }
 0x5a0   : > { %619 = vst [vmem:[%s158_s3] sm:$0xff] %v618_v39 }
 0x5a1 PF: > { %s12_s9 = sadd.s32 1, %s811_s9  }
 0x5a2   : > { %p9_p4 = scmp.ge.s32.totalorder %s12_s9, 4  }
 0x5a4   :  { %11 = sbr.rel (!%p9_p4) target bundleno = 1 (0x1), region = 61 }

// kernel: image_captioning_forward.34
= control target key start
LH: loop header
LB: loop body
LE: loop exit
PB: predicated region body
PF: predicated region fallthrough
CT: control target
= control target key end

     0   :  { %v439_v0 = vmov 0.0   ;;  %vm440_vm0 = vmmov 0   ;;  %v285_v30 = vlaneseq  ;;  %s583_s1 = inlined_call_operand.vmem [shape: bf16[128,128], index: 1, kind: input, shape index: {}]   ;;  %s584_s3 = inlined_call_operand.vmem [shape: bf16[128,128], index: 3, kind: input, shape index: {}]   ;;  %s585_s0 = inlined_call_operand.vmem [shape: f32[16,128], index: 0, kind: input, shape index: {}, may-alias: {0,5}]   ;;  %s586_s2 = inlined_call_operand.vmem [shape: f32[1,128], index: 2, kind: input, shape index: {}]   ;;  %s587_s4 = inlined_call_operand.vmem [shape: f32[1,128], index: 4, kind: input, shape index: {}]   ;;  %s588_s5 = inlined_call_operand.vmem [shape: f32[16,128], index: 5, kind: input, shape index: {}, may-alias: {0,5}]   ;;  %s589_s6 = inlined_call_operand.vmem [shape: f32[1,128], index: 6, kind: input, shape index: {}]   ;;  %s590_s7 = inlined_call_operand.vmem [shape: f32[1,128], index: 7, kind: input, shape index: {}]   ;;  %s591_s8 = inlined_call_operand.vmem [shape: f32[16,128], index: 8, kind: output, shape index: {}]  }
   0x1   :  { %377 = vmatprep.subr.bf16.mxu0 %v439_v0  ;;  %v419_v1 = vld [vmem:[%s583_s1] sm:$0xff]   ;;  %393 = vmatprep.mubr.msk.bf16.mxu0 %vm440_vm0, %v439_v0  ;;  %v420_v2 = vld [vmem:[%s583_s1 + $0x8] sm:$0xff]   ;;  %v421_v3 = vld [vmem:[%s583_s1 + $0x10] sm:$0xff]  }
   0x2   :  { %397 = vmatprep.subr.bf16.mxu1 %v439_v0  ;;  %413 = vmatprep.mubr.msk.bf16.mxu1 %vm440_vm0, %v439_v0  ;;  %v427_v4 = vld [vmem:[%s584_s3] sm:$0xff]   ;;  %v422_v5 = vld [vmem:[%s583_s1 + $0x18] sm:$0xff]   ;;  %v428_v6 = vld [vmem:[%s584_s3 + $0x8] sm:$0xff]   ;;  %v286_v31 = vand.u32 127, %v285_v30 }
   0x3   :  { %378 = vmatpush3.bf16.msra.mxu0 %v419_v1  ;;  %398 = vmatpush3.bf16.msra.mxu1 %v427_v4  ;;  %v423_v7 = vld [vmem:[%s583_s1 + $0x20] sm:$0xff]   ;;  %v429_v8 = vld [vmem:[%s584_s3 + $0x10] sm:$0xff]   ;;  %v424_v9 = vld [vmem:[%s583_s1 + $0x28] sm:$0xff]  }
   0x4   :  { %379 = vmatprep.subr.bf16.mxu0 %v439_v0  ;;  %399 = vmatprep.subr.bf16.mxu1 %v439_v0  ;;  %v430_v10 = vld [vmem:[%s584_s3 + $0x18] sm:$0xff]   ;;  %v425_v11 = vld [vmem:[%s583_s1 + $0x30] sm:$0xff]   ;;  %v431_v12 = vld [vmem:[%s584_s3 + $0x20] sm:$0xff]   ;;  %vm287_vm1 = vcmp.lt.s32.totalorder %v286_v31, 32 }
   0x5   :  { %v426_v13 = vld [vmem:[%s583_s1 + $0x38] sm:$0xff]   ;;  %v36_v14 = vld [vmem:[%s585_s0] sm:$0xff]  ;;  %v37_v15 = vld [vmem:[%s585_s0 + $0x8] sm:$0xff]  ;;  %v356_v39 = vsel %vm287_vm1, 1.0, %v439_v0 }
   0x6   :  { %v432_v16 = vld [vmem:[%s584_s3 + $0x28] sm:$0xff]   ;;  %v38_v17 = vpack.c.bf16 %v37_v15, %v36_v14  ;;  %v433_v18 = vld [vmem:[%s584_s3 + $0x30] sm:$0xff]   ;;  %v434_v19 = vld [vmem:[%s584_s3 + $0x38] sm:$0xff]  }
   0x7   :  { %380 = vmatpush3.bf16.msra.mxu0 %v420_v2  ;;  %400 = vmatpush3.bf16.msra.mxu1 %v428_v6  ;;  %v338_v20 = vld [vmem:[%s586_s2] ss:$0 sm:$0xff]  ;;  %v280_v38 = vld [vmem:[%s588_s5 + $0x8] sm:$0xff] }
   0x8   :  { %381 = vmatprep.subr.bf16.mxu0 %v439_v0  ;;  %401 = vmatprep.subr.bf16.mxu1 %v439_v0  ;;  %v355_v32 = vld [vmem:[%s587_s4] ss:$0 sm:$0xff] }
   0x9   :  { %v279_v34 = vld [vmem:[%s588_s5] sm:$0xff] }
   0xa   :  { %v357_v63 = vld [vmem:[%s589_s6] ss:$0 sm:$0xff] }
   0xb   :  { %382 = vmatpush3.bf16.msra.mxu0 %v421_v3  ;;  %402 = vmatpush3.bf16.msra.mxu1 %v429_v8  ;;  %v358_v1 = vld [vmem:[%s590_s7] ss:$0 sm:$0xff] }
   0xc   :  { %383 = vmatprep.subr.bf16.mxu0 %v439_v0  ;;  %403 = vmatprep.subr.bf16.mxu1 %v439_v0 }
   0xf   :  { %384 = vmatpush3.bf16.msra.mxu0 %v422_v5  ;;  %404 = vmatpush3.bf16.msra.mxu1 %v430_v10 }
  0x10   :  { %385 = vmatprep.subr.bf16.mxu0 %v439_v0  ;;  %405 = vmatprep.subr.bf16.mxu1 %v439_v0 }
  0x13   :  { %386 = vmatpush3.bf16.msra.mxu0 %v423_v7  ;;  %406 = vmatpush3.bf16.msra.mxu1 %v431_v12 }
  0x14   :  { %387 = vmatprep.subr.bf16.mxu0 %v439_v0  ;;  %407 = vmatprep.subr.bf16.mxu1 %v439_v0 }
  0x17   :  { %388 = vmatpush3.bf16.msra.mxu0 %v424_v9  ;;  %408 = vmatpush3.bf16.msra.mxu1 %v432_v16 }
  0x18   :  { %389 = vmatprep.subr.bf16.mxu0 %v439_v0  ;;  %409 = vmatprep.subr.bf16.mxu1 %v439_v0 }
  0x1b   :  { %390 = vmatpush3.bf16.msra.mxu0 %v425_v11  ;;  %410 = vmatpush3.bf16.msra.mxu1 %v433_v18 }
  0x1c   :  { %391 = vmatprep.subr.bf16.mxu0 %v439_v0  ;;  %411 = vmatprep.subr.bf16.mxu1 %v439_v0 }
  0x1f   :  { %392 = vmatpush3.bf16.msra.mxu0 %v426_v13  ;;  %412 = vmatpush3.bf16.msra.mxu1 %v434_v19 }
  0x22   :  { %394 = vmatmul.mubr.bf16.vlgmr.msra.gmra.mrb[0].mxu0 %v38_v17 }
  0xf5   :  { %v144_v21 = vpop.f32.mrb[0].mxu0 }
  0xf6   :  { %v145_v22 = vadd.f32 %v338_v20, %v144_v21  ;;  %v395_v23 = vpop.f32.mrb[1].mxu0 }
  0xf7   :  { %v147_v24 = vpop.f32.mrb[2].mxu0 }
  0xf8   :  { %v148_v25 = vadd.f32 %v338_v20, %v147_v24  ;;  %v396_v26 = vpop.f32.mrb[3].mxu0  ;;  %v151_v27 = vmax.f32 %v145_v22, 0.0 }
  0xfa   :  { %v152_v28 = vmax.f32 %v148_v25, 0.0 }
  0xfc   :  { %v155_v29 = vpack.c.bf16 %v152_v28, %v151_v27 }
  0xfe   :  { %414 = vmatmul.mubr.bf16.vlgmr.msra.gmra.mrb[0].mxu1 %v155_v29 }
 0x1d1   :  { %v254_v33 = vpop.f32.mrb[0].mxu1 }
 0x1d2   :  { %v277_v35 = vadd.f32 %v355_v32, %v254_v33  ;;  %v415_v36 = vpop.f32.mrb[1].mxu1 }
 0x1d3   :  { %v257_v37 = vpop.f32.mrb[2].mxu1 }
 0x1d4   :  { %v278_v40 = vadd.f32 %v355_v32, %v257_v37  ;;  %v416_v41 = vpop.f32.mrb[3].mxu1  ;;  %v281_v42 = vadd.f32 %v279_v34, %v277_v35 }
 0x1d6   :  { %v282_v43 = vadd.f32 %v280_v38, %v278_v40  ;;  %v290_v44 = vmul.f32 %v356_v39, %v281_v42 }
 0x1d8   :  { %292 = vadd.xlane.f32.xlu0 %v290_v44  ;;  %v291_v45 = vmul.f32 %v356_v39, %v282_v43 }
 0x1dc   :  { %294 = vadd.xlane.f32.xlu0 %v291_v45 }
 0x265   :  { %v293_v46 = vpop.xlane.xlu0 %292 }
 0x266   :  { %v296_v47 = vmul.f32 0.03125, %v293_v46 }
 0x268   :  { %v298_v48 = vsub.f32 %v281_v42, %v296_v47 }
 0x269   :  { %v295_v49 = vpop.xlane.xlu0 %294 }
 0x26a   :  { %v297_v50 = vmul.f32 0.03125, %v295_v49  ;;  %v300_v51 = vmul.f32 %v356_v39, %v298_v48 }
 0x26c   :  { %v299_v52 = vsub.f32 %v282_v43, %v297_v50  ;;  %v302_v53 = vmul.f32 %v300_v51, %v300_v51 }
 0x26e   :  { %304 = vadd.xlane.f32.xlu1 %v302_v53  ;;  %v301_v54 = vmul.f32 %v356_v39, %v299_v52 }
 0x270   :  { %v303_v55 = vmul.f32 %v301_v54, %v301_v54 }
 0x272   :  { %306 = vadd.xlane.f32.xlu1 %v303_v55 }
 0x2fb   :  { %v305_v56 = vpop.xlane.xlu1 %304 }
 0x2fc   :  { %v308_v57 = vmul.f32 0.03125, %v305_v56 }
 0x2fe   :  { %v310_v58 = vadd.f32 1e-05, %v308_v57 }
 0x2ff   :  { %v307_v59 = vpop.xlane.xlu1 %306 }
 0x300   :  { %435 = vrsqrt.f32 %v310_v58  ;;  %v309_v60 = vmul.f32 0.03125, %v307_v59 }
 0x302   :  { %v311_v61 = vadd.f32 1e-05, %v309_v60 }
 0x304   :  { %437 = vrsqrt.f32 %v311_v61 }
 0x30a   :  { %v436_v62 = vpop.eup %435 }
 0x30b   :  { %v314_v0 = vmul.f32 %v436_v62, %v300_v51 }
 0x30d   :  { %v322_v2 = vmul.f32 %v357_v63, %v314_v0 }
 0x30e   :  { %v438_v3 = vpop.eup %437 }
 0x30f   :  { %v330_v4 = vadd.f32 %v358_v1, %v322_v2  ;;  %v315_v5 = vmul.f32 %v438_v3, %v301_v54 }
 0x311   :  { %332 = vst [vmem:[%s591_s8] sm:$0xff] %v330_v4  ;;  %v323_v6 = vmul.f32 %v357_v63, %v315_v5 }
 0x313   :  { %v331_v7 = vadd.f32 %v358_v1, %v323_v6 }
 0x315   :  { %333 = vst [vmem:[%s591_s8 + $0x8] sm:$0xff] %v331_v7 }

</bundles_post_ra>
